<compile_context>
chip_gen: v5e
topology: v5e:2x2
jax: 0.10.0
libtpu: 0.0.40
codegen_flags: <defaults>
</compile_context>

<pallas_src>
import jax
import jax.numpy as jnp
from jax import lax
from jax.experimental import pallas as pl
from jax.experimental.pallas import tpu as pltpu

D = 128         # inner_dim of SimLoss / GatedFusionNew
NUM_ATTN = 4    # num_attn of GatedFusionNew (SummaryAttn heads)

# Unpacked (reference) parameter names, (in, out) layout so y = x @ W (+ b).
WEIGHT_NAMES = [
    "w_img_key", "w_txt_key", "w_img_query", "w_txt_query",
    "w_wimg_key", "w_wtxt_key", "w_wimg_query", "w_wtxt_query",
    "w_fc1", "w_fc2",
    "w_r1a", "b_r1a", "w_r1b", "b_r1b",
    "w_r2a", "b_r2a", "w_r2b", "b_r2b",
]

# Packed parameter names consumed by the kernel.
PACKED_NAMES = [
    "w_img_kq", "w_txt_kq", "w_wimg_kq", "w_wtxt_kq",
    "w_fc1", "w_fc2",
    "w_r1a", "b_r1a", "w_r1b", "b_r1b",
    "w_r2a", "b_r2a", "w_r2b", "b_r2b",
]


def _softmax_last(x):
    """Softmax over the last (lane) axis; EUP reciprocal for the denominator."""
    m = jnp.max(x, axis=-1, keepdims=True)
    e = jnp.exp(x - m)
    return e * pl.reciprocal(jnp.sum(e, axis=-1, keepdims=True), approx=True)


def _l2norm(x):
    """x / ||x|| over the last axis using rsqrt (EUP) instead of sqrt+divide."""
    ss = jnp.sum(x * x, axis=-1, keepdims=True)
    return x * lax.rsqrt(ss + jnp.float32(1e-12))


def _gated_fusion_kernel(
    v1_ref, v2_ref,
    w_img_kq, w_txt_kq, w_wimg_kq, w_wtxt_kq,
    w_fc1, w_fc2,
    w_r1a, b_r1a, w_r1b, b_r1b,
    w_r2a, b_r2a, w_r2b, b_r2b,
    o1_ref, o2_ref,
):
    f32 = jnp.float32
    bf16 = jnp.bfloat16

    v1 = v1_ref[...]   # (TB, L1, D) f32
    v2 = v2_ref[...]   # (TB, L2, D) f32

    def proj_kq(x, w_ref):
        """x:(TB,L,D) -> (key, query/sqrt(D)), each (TB,L,D) f32.

        One (TB*L,128)@(128,256) bf16 dot; the 1/sqrt(D) scale is already
        folded into the query half of the packed weights.
        """
        tb_, l, _ = x.shape
        x2 = x.reshape(-1, D).astype(bf16)                       # free reshape, then pack
        y = jnp.dot(x2, w_ref[...], preferred_element_type=f32)  # (TB*L, 2D)
        k = y[:, :D].reshape(tb_, l, D)                          # static lane slice
        q = y[:, D:].reshape(tb_, l, D)
        return k, q

    def attend(q, k, vv):
        """Batched attention; q is pre-scaled, no operand transposes."""
        s = jnp.einsum("bqd,bkd->bqk", q.astype(bf16), k.astype(bf16),
                       preferred_element_type=f32)
        p = _softmax_last(s)
        return jnp.einsum("bqk,bkd->bqd", p.astype(bf16), vv.astype(bf16),
                          preferred_element_type=f32)

    # --- key / query projections (bias-free linears) -------------------------
    k1, q1 = proj_kq(v1, w_img_kq)
    k2, q2 = proj_kq(v2, w_txt_kq)

    # --- cross attention ------------------------------------------------------
    weighted_v1 = attend(q2, k1, v1)   # (TB, L2, D)
    weighted_v2 = attend(q1, k2, v2)   # (TB, L1, D)

    # --- self attention on the weighted features -----------------------------
    wv2_k, wv2_q = proj_kq(weighted_v2, w_wtxt_kq)
    wv1_k, wv1_q = proj_kq(weighted_v1, w_wimg_kq)

    fused_v1 = _l2norm(attend(wv2_q, wv2_k, weighted_v2))  # (TB, L1, D)
    fused_v2 = _l2norm(attend(wv1_q, wv1_k, weighted_v1))  # (TB, L2, D)

    # --- gating ---------------------------------------------------------------
    gate_v1 = jax.nn.sigmoid(jnp.sum(v1 * fused_v1, axis=-1, keepdims=True))  # (TB,L1,1)
    gate_v2 = jax.nn.sigmoid(jnp.sum(v2 * fused_v2, axis=-1, keepdims=True))  # (TB,L2,1)

    # --- concat fusion:  relu(gate * (cat(v, fused) @ W_fc)) + v --------------
    def fused_fc(v, fused, gate, w_ref):
        tb_, l, _ = v.shape
        cat = jnp.concatenate([v.reshape(-1, D), fused.reshape(-1, D)],
                              axis=-1).astype(bf16)               # (TB*L, 2D), lane-aligned
        y = jnp.dot(cat, w_ref[...],
                    preferred_element_type=f32).reshape(tb_, l, D)
        return jax.nn.relu(gate * y) + v

    co_v1 = fused_fc(v1, fused_v1, gate_v1, w_fc1)   # (TB, L1, D)
    co_v2 = fused_fc(v2, fused_v2, gate_v2, w_fc2)   # (TB, L2, D)

    # --- SummaryAttn reduction (reduce_func='self_attn', is_cat=False) --------
    # Transpose-free: softmax over the L axis of the (TB, L, h) scores and
    # commute the head-mean into the probabilities:
    #   mean_h(sum_l p[l,h] x[l,:]) == sum_l mean_h(p[l,h]) x[l,:]
    def summary_attn(x, wa_ref, ba_ref, wb_ref, bb_ref):
        tb_, l, _ = x.shape
        x2 = x.reshape(-1, D).astype(bf16)
        h = jax.nn.relu(jnp.dot(x2, wa_ref[...], preferred_element_type=f32)
                        + ba_ref[...])                                        # (TB*L, D)
        s = (jnp.dot(h.astype(bf16), wb_ref[...], preferred_element_type=f32)
             + bb_ref[...])                                                   # (TB*L, h)
        s = s.reshape(tb_, l, NUM_ATTN)
        m = jnp.max(s, axis=1, keepdims=True)
        e = jnp.exp(s - m)
        p = e * pl.reciprocal(jnp.sum(e, axis=1, keepdims=True), approx=True)  # (TB,L,h)
        pbar = jnp.mean(p, axis=-1, keepdims=True)                             # (TB,L,1)
        return jnp.sum(pbar * x, axis=1)                                       # (TB,D)

    o1_ref[...] = _l2norm(summary_attn(co_v1, w_r1a, b_r1a, w_r1b, b_r1b))
    o2_ref[...] = _l2norm(summary_attn(co_v2, w_r2a, b_r2a, w_r2b, b_r2b))


def pack_params(p, matmul_dtype=jnp.bfloat16):
    """One-time weight packing outside the kernel.

    * pairs [key | query] into a single (D, 2D) matrix per input stream,
    * folds the 1/sqrt(D) attention scale into the query half,
    * casts matmul weights to bf16 (f32 accumulation inside the kernel),
    * keeps biases in f32 (added to f32 accumulator outputs).
    """
    inv_sqrt_d = 1.0 / (D ** 0.5)

    def kq(wk, wq):
        return jnp.concatenate([wk, wq * inv_sqrt_d], axis=1).astype(matmul_dtype)

    return {
        "w_img_kq": kq(p["w_img_key"], p["w_img_query"]),
        "w_txt_kq": kq(p["w_txt_key"], p["w_txt_query"]),
        "w_wimg_kq": kq(p["w_wimg_key"], p["w_wimg_query"]),
        "w_wtxt_kq": kq(p["w_wtxt_key"], p["w_wtxt_query"]),
        "w_fc1": p["w_fc1"].astype(matmul_dtype),
        "w_fc2": p["w_fc2"].astype(matmul_dtype),
        "w_r1a": p["w_r1a"].astype(matmul_dtype),
        "b_r1a": p["b_r1a"].astype(jnp.float32),
        "w_r1b": p["w_r1b"].astype(matmul_dtype),
        "b_r1b": p["b_r1b"].astype(jnp.float32),
        "w_r2a": p["w_r2a"].astype(matmul_dtype),
        "b_r2a": p["b_r2a"].astype(jnp.float32),
        "w_r2b": p["w_r2b"].astype(matmul_dtype),
        "b_r2b": p["b_r2b"].astype(jnp.float32),
    }


def _pick_tb(batch):
    """Largest batch block that still leaves >=2 grid steps (v7x: 2 TCs)."""
    for tb in (8, 4, 2, 1):
        if batch % tb == 0 and (batch // tb >= 2 or batch == tb == 1):
            return tb
    return 1


def sim_loss_forward(v1, v2, packed, tb=None):
    """SimLoss.forward(im, s) -> (co_v1, co_v2) of shape (B, D) each."""
    B, L1, d1 = v1.shape
    B2, L2, d2 = v2.shape
    assert d1 == D and d2 == D and B2 == B
    if tb is None:
        tb = _pick_tb(B)
    assert B % tb == 0

    def full_spec(a):
        nd = a.ndim
        return pl.BlockSpec(a.shape, lambda b, _nd=nd: (0,) * _nd)

    in_specs = [
        pl.BlockSpec((tb, L1, D), lambda b: (b, 0, 0)),
        pl.BlockSpec((tb, L2, D), lambda b: (b, 0, 0)),
    ] + [full_spec(packed[n]) for n in PACKED_NAMES]

    out_specs = [
        pl.BlockSpec((tb, D), lambda b: (b, 0)),
        pl.BlockSpec((tb, D), lambda b: (b, 0)),
    ]
    out_shape = [
        jax.ShapeDtypeStruct((B, D), jnp.float32),
        jax.ShapeDtypeStruct((B, D), jnp.float32),
    ]

    return pl.pallas_call(
        _gated_fusion_kernel,
        out_shape=out_shape,
        grid_spec=pltpu.PrefetchScalarGridSpec(
            num_scalar_prefetch=0,
            grid=(B // tb,),
            in_specs=in_specs,
            out_specs=out_specs,
        ),
        compiler_params=pltpu.CompilerParams(
            dimension_semantics=("parallel",)),
    )(v1, v2, *[packed[n] for n in PACKED_NAMES])


def reference_forward(v1, v2, p):
    """Pure-JAX reference (mirrors the PyTorch forward) for validation."""
    hp = lax.Precision.HIGHEST

    def lin(x, w):
        return jnp.dot(x, w, precision=hp)

    def qkv(q, k, v):
        scores = jnp.einsum("bld,bmd->blm", q, k, precision=hp) / jnp.sqrt(jnp.float32(D))
        a = jax.nn.softmax(scores, axis=-1)
        return jnp.einsum("blm,bmd->bld", a, v, precision=hp)

    def l2n(x):
        return x / (jnp.sqrt(jnp.sum(x * x, -1, keepdims=True)) + 1e-8)

    k1 = lin(v1, p["w_img_key"]); k2 = lin(v2, p["w_txt_key"])
    q1 = lin(v1, p["w_img_query"]); q2 = lin(v2, p["w_txt_query"])
    wv1 = qkv(q2, k1, v1)
    wv2 = qkv(q1, k2, v2)
    fused_v1 = l2n(qkv(lin(wv2, p["w_wtxt_query"]), lin(wv2, p["w_wtxt_key"]), wv2))
    fused_v2 = l2n(qkv(lin(wv1, p["w_wimg_query"]), lin(wv1, p["w_wimg_key"]), wv1))
    g1 = jax.nn.sigmoid(jnp.sum(v1 * fused_v1, -1, keepdims=True))
    g2 = jax.nn.sigmoid(jnp.sum(v2 * fused_v2, -1, keepdims=True))
    co1 = jnp.concatenate([v1, fused_v1], -1) * g1
    co2 = jnp.concatenate([v2, fused_v2], -1) * g2
    co1 = jax.nn.relu(lin(co1, p["w_fc1"])) + v1
    co2 = jax.nn.relu(lin(co2, p["w_fc2"])) + v2

    def summ(x, wa, ba, wb, bb):
        h = jax.nn.relu(lin(x, wa) + ba)
        s = lin(h, wb) + bb                                    # (B, L, h)
        pa = jax.nn.softmax(jnp.swapaxes(s, -1, -2), axis=-1)  # (B, h, L)
        w = jnp.einsum("bhl,bld->bhd", pa, x, precision=hp)    # (B, h, D)
        return jnp.mean(w, axis=-2)                            # (B, D)

    o1 = l2n(summ(co1, p["w_r1a"], p["b_r1a"], p["w_r1b"], p["b_r1b"]))
    o2 = l2n(summ(co2, p["w_r2a"], p["b_r2a"], p["w_r2b"], p["b_r2b"]))
    return o1, o2


def init_params(key):
    """Deterministic synthetic parameters (shapes per GatedFusionNew.__init__)."""
    shapes = {
        "w_img_key": (D, D), "w_txt_key": (D, D),
        "w_img_query": (D, D), "w_txt_query": (D, D),
        "w_wimg_key": (D, D), "w_wtxt_key": (D, D),
        "w_wimg_query": (D, D), "w_wtxt_query": (D, D),
        "w_fc1": (2 * D, D), "w_fc2": (2 * D, D),
        "w_r1a": (D, D), "b_r1a": (1, D), "w_r1b": (D, NUM_ATTN), "b_r1b": (1, NUM_ATTN),
        "w_r2a": (D, D), "b_r2a": (1, D), "w_r2b": (D, NUM_ATTN), "b_r2b": (1, NUM_ATTN),
    }
    params = {}
    keys = jax.random.split(key, len(shapes))
    r = (6.0 ** 0.5) / ((D + D) ** 0.5)   # xavier-style range, as in init_weights
    for k, (name, shp) in zip(keys, sorted(shapes.items())):
        params[name] = jax.random.uniform(k, shp, jnp.float32, minval=-r, maxval=r)
    return params


if __name__ == "__main__":
    # batch=16 (two grid steps of 8 -> dense (8,128) output slabs, both v7x
    # cores busy), image regions=16, words=8, hidden=D=128.
    B, L1, L2 = 16, 16, 8

    key = jax.random.PRNGKey(0)
    k_im, k_s, k_p = jax.random.split(key, 3)
    im = jax.random.normal(k_im, (B, L1, D), jnp.float32)
    s = jax.random.normal(k_s, (B, L2, D), jnp.float32)
    params = init_params(k_p)
    packed = pack_params(params)

    o1, o2 = sim_loss_forward(im, s, packed)
    o1 = jax.block_until_ready(o1)
    o2 = jax.block_until_ready(o2)

    r1, r2 = reference_forward(im, s, params)
    assert o1.shape == (B, D) and o2.shape == (B, D)
    assert jnp.allclose(o1, r1, atol=2e-2, rtol=2e-2), float(jnp.max(jnp.abs(o1 - r1)))
    assert jnp.allclose(o2, r2, atol=2e-2, rtol=2e-2), float(jnp.max(jnp.abs(o2 - r2)))

    print("KERNEL_OK")
</pallas_src>

<mosaic_0001>
module attributes {stable_mosaic.version = 11 : i64} {
  func.func @_gated_fusion_kernel(%arg0: i32, %arg1: memref<8x16x128xf32, #tpu.memory_space<vmem>>, %arg2: memref<8x8x128xf32, #tpu.memory_space<vmem>>, %arg3: memref<128x256xbf16, #tpu.memory_space<vmem>>, %arg4: memref<128x256xbf16, #tpu.memory_space<vmem>>, %arg5: memref<128x256xbf16, #tpu.memory_space<vmem>>, %arg6: memref<128x256xbf16, #tpu.memory_space<vmem>>, %arg7: memref<256x128xbf16, #tpu.memory_space<vmem>>, %arg8: memref<256x128xbf16, #tpu.memory_space<vmem>>, %arg9: memref<128x128xbf16, #tpu.memory_space<vmem>>, %arg10: memref<1x128xf32, #tpu.memory_space<vmem>>, %arg11: memref<128x4xbf16, #tpu.memory_space<vmem>>, %arg12: memref<1x4xf32, #tpu.memory_space<vmem>>, %arg13: memref<128x128xbf16, #tpu.memory_space<vmem>>, %arg14: memref<1x128xf32, #tpu.memory_space<vmem>>, %arg15: memref<128x4xbf16, #tpu.memory_space<vmem>>, %arg16: memref<1x4xf32, #tpu.memory_space<vmem>>, %arg17: memref<8x128xf32, #tpu.memory_space<vmem>>, %arg18: memref<8x128xf32, #tpu.memory_space<vmem>>) attributes {dimension_semantics = [#tpu.dimension_semantics<parallel>], iteration_bounds = array<i64: 2>, scalar_prefetch = 0 : i64, scratch_operands = 0 : i64, tpu.core_type = #tpu.core_type<tc>, window_params = [{transform_indices = @transform_0, window_bounds = array<i64: 8, 16, 128>}, {transform_indices = @transform_1, window_bounds = array<i64: 8, 8, 128>}, {pipeline_mode = #tpu.pipeline_mode<synchronous>, transform_indices = @transform_2, window_bounds = array<i64: 128, 256>}, {pipeline_mode = #tpu.pipeline_mode<synchronous>, transform_indices = @transform_3, window_bounds = array<i64: 128, 256>}, {pipeline_mode = #tpu.pipeline_mode<synchronous>, transform_indices = @transform_4, window_bounds = array<i64: 128, 256>}, {pipeline_mode = #tpu.pipeline_mode<synchronous>, transform_indices = @transform_5, window_bounds = array<i64: 128, 256>}, {pipeline_mode = #tpu.pipeline_mode<synchronous>, transform_indices = @transform_6, window_bounds = array<i64: 256, 128>}, {pipeline_mode = #tpu.pipeline_mode<synchronous>, transform_indices = @transform_7, window_bounds = array<i64: 256, 128>}, {pipeline_mode = #tpu.pipeline_mode<synchronous>, transform_indices = @transform_8, window_bounds = array<i64: 128, 128>}, {pipeline_mode = #tpu.pipeline_mode<synchronous>, transform_indices = @transform_9, window_bounds = array<i64: 1, 128>}, {pipeline_mode = #tpu.pipeline_mode<synchronous>, transform_indices = @transform_10, window_bounds = array<i64: 128, 4>}, {pipeline_mode = #tpu.pipeline_mode<synchronous>, transform_indices = @transform_11, window_bounds = array<i64: 1, 4>}, {pipeline_mode = #tpu.pipeline_mode<synchronous>, transform_indices = @transform_12, window_bounds = array<i64: 128, 128>}, {pipeline_mode = #tpu.pipeline_mode<synchronous>, transform_indices = @transform_13, window_bounds = array<i64: 1, 128>}, {pipeline_mode = #tpu.pipeline_mode<synchronous>, transform_indices = @transform_14, window_bounds = array<i64: 128, 4>}, {pipeline_mode = #tpu.pipeline_mode<synchronous>, transform_indices = @transform_15, window_bounds = array<i64: 1, 4>}, {transform_indices = @transform_16, window_bounds = array<i64: 8, 128>}, {transform_indices = @transform_17, window_bounds = array<i64: 8, 128>}]} {
    %c0 = arith.constant 0 : index
    %c0_0 = arith.constant 0 : index
    %c0_1 = arith.constant 0 : index
    %0 = vector.load %arg1[%c0, %c0_0, %c0_1] : memref<8x16x128xf32, #tpu.memory_space<vmem>>, vector<8x16x128xf32>
    %c0_2 = arith.constant 0 : index
    %c0_3 = arith.constant 0 : index
    %c0_4 = arith.constant 0 : index
    %1 = vector.load %arg2[%c0_2, %c0_3, %c0_4] : memref<8x8x128xf32, #tpu.memory_space<vmem>>, vector<8x8x128xf32>
    %2 = vector.shape_cast %0 : vector<8x16x128xf32> to vector<128x128xf32>
    %3 = arith.truncf %2 : vector<128x128xf32> to vector<128x128xbf16>
    %c0_5 = arith.constant 0 : index
    %c0_6 = arith.constant 0 : index
    %4 = vector.load %arg3[%c0_5, %c0_6] : memref<128x256xbf16, #tpu.memory_space<vmem>>, vector<128x256xbf16>
    %cst = arith.constant dense<0.000000e+00> : vector<128x256xf32>
    %5 = tpu.matmul %3, %4, %cst {dimension_numbers = #tpu.dot_dimension_numbers<[1], [0], [0], [1], [0, 0, 1, 1], [], []>} : vector<128x128xbf16>, vector<128x256xbf16>, vector<128x256xf32> -> vector<128x256xf32>
    %6 = vector.extract_strided_slice %5 {offsets = [0, 0], sizes = [128, 128], strides = [1, 1]} : vector<128x256xf32> to vector<128x128xf32>
    %7 = vector.shape_cast %6 : vector<128x128xf32> to vector<8x16x128xf32>
    %8 = vector.extract_strided_slice %5 {offsets = [0, 128], sizes = [128, 128], strides = [1, 1]} : vector<128x256xf32> to vector<128x128xf32>
    %9 = vector.shape_cast %8 : vector<128x128xf32> to vector<8x16x128xf32>
    %10 = vector.shape_cast %1 : vector<8x8x128xf32> to vector<64x128xf32>
    %11 = arith.truncf %10 : vector<64x128xf32> to vector<64x128xbf16>
    %c0_7 = arith.constant 0 : index
    %c0_8 = arith.constant 0 : index
    %12 = vector.load %arg4[%c0_7, %c0_8] : memref<128x256xbf16, #tpu.memory_space<vmem>>, vector<128x256xbf16>
    %cst_9 = arith.constant dense<0.000000e+00> : vector<64x256xf32>
    %13 = tpu.matmul %11, %12, %cst_9 {dimension_numbers = #tpu.dot_dimension_numbers<[1], [0], [0], [1], [0, 0, 1, 1], [], []>} : vector<64x128xbf16>, vector<128x256xbf16>, vector<64x256xf32> -> vector<64x256xf32>
    %14 = vector.extract_strided_slice %13 {offsets = [0, 0], sizes = [64, 128], strides = [1, 1]} : vector<64x256xf32> to vector<64x128xf32>
    %15 = vector.shape_cast %14 : vector<64x128xf32> to vector<8x8x128xf32>
    %16 = vector.extract_strided_slice %13 {offsets = [0, 128], sizes = [64, 128], strides = [1, 1]} : vector<64x256xf32> to vector<64x128xf32>
    %17 = vector.shape_cast %16 : vector<64x128xf32> to vector<8x8x128xf32>
    %18 = arith.truncf %17 : vector<8x8x128xf32> to vector<8x8x128xbf16>
    %19 = arith.truncf %7 : vector<8x16x128xf32> to vector<8x16x128xbf16>
    "tpu.trace_start"() <{level = 10 : i32, message = "bqd,bkd->bqk"}> : () -> ()
    %cst_10 = arith.constant dense<0.000000e+00> : vector<8x8x16xf32>
    %20 = tpu.matmul %18, %19, %cst_10 {dimension_numbers = #tpu.dot_dimension_numbers<[2], [2], [1], [1], [0, 0, 0, 1, 1, 1], [0], [0]>} : vector<8x8x128xbf16>, vector<8x16x128xbf16>, vector<8x8x16xf32> -> vector<8x8x16xf32>
    "tpu.trace_stop"() : () -> ()
    %cst_11 = arith.constant dense<0xFF800000> : vector<8x8xf32>
    %21 = vector.multi_reduction <maximumf>, %20, %cst_11 [2] : vector<8x8x16xf32> to vector<8x8xf32>
    %22 = vector.shape_cast %21 : vector<8x8xf32> to vector<8x8x1xf32>
    %23 = vector.broadcast %22 : vector<8x8x1xf32> to vector<8x8x16xf32>
    %24 = arith.subf %20, %23 : vector<8x8x16xf32>
    %25 = math.exp %24 : vector<8x8x16xf32>
    %cst_12 = arith.constant dense<0.000000e+00> : vector<8x8xf32>
    %26 = vector.multi_reduction <add>, %25, %cst_12 [2] : vector<8x8x16xf32> to vector<8x8xf32>
    %27 = vector.shape_cast %26 : vector<8x8xf32> to vector<8x8x1xf32>
    %28 = tpu.reciprocal %27 {approx = true} : vector<8x8x1xf32> -> vector<8x8x1xf32>
    %29 = vector.broadcast %28 : vector<8x8x1xf32> to vector<8x8x16xf32>
    %30 = arith.mulf %25, %29 : vector<8x8x16xf32>
    %31 = arith.truncf %30 : vector<8x8x16xf32> to vector<8x8x16xbf16>
    %32 = arith.truncf %0 : vector<8x16x128xf32> to vector<8x16x128xbf16>
    "tpu.trace_start"() <{level = 10 : i32, message = "bqk,bkd->bqd"}> : () -> ()
    %cst_13 = arith.constant dense<0.000000e+00> : vector<8x8x128xf32>
    %33 = tpu.matmul %31, %32, %cst_13 {dimension_numbers = #tpu.dot_dimension_numbers<[2], [1], [1], [2], [0, 0, 0, 1, 1, 2], [0], [0]>} : vector<8x8x16xbf16>, vector<8x16x128xbf16>, vector<8x8x128xf32> -> vector<8x8x128xf32>
    "tpu.trace_stop"() : () -> ()
    %34 = arith.truncf %9 : vector<8x16x128xf32> to vector<8x16x128xbf16>
    %35 = arith.truncf %15 : vector<8x8x128xf32> to vector<8x8x128xbf16>
    "tpu.trace_start"() <{level = 10 : i32, message = "bqd,bkd->bqk"}> : () -> ()
    %cst_14 = arith.constant dense<0.000000e+00> : vector<8x16x8xf32>
    %36 = tpu.matmul %34, %35, %cst_14 {dimension_numbers = #tpu.dot_dimension_numbers<[2], [2], [1], [1], [0, 0, 0, 1, 1, 1], [0], [0]>} : vector<8x16x128xbf16>, vector<8x8x128xbf16>, vector<8x16x8xf32> -> vector<8x16x8xf32>
    "tpu.trace_stop"() : () -> ()
    %cst_15 = arith.constant dense<0xFF800000> : vector<8x16xf32>
    %37 = vector.multi_reduction <maximumf>, %36, %cst_15 [2] : vector<8x16x8xf32> to vector<8x16xf32>
    %38 = vector.shape_cast %37 : vector<8x16xf32> to vector<8x16x1xf32>
    %39 = vector.broadcast %38 : vector<8x16x1xf32> to vector<8x16x8xf32>
    %40 = arith.subf %36, %39 : vector<8x16x8xf32>
    %41 = math.exp %40 : vector<8x16x8xf32>
    %cst_16 = arith.constant dense<0.000000e+00> : vector<8x16xf32>
    %42 = vector.multi_reduction <add>, %41, %cst_16 [2] : vector<8x16x8xf32> to vector<8x16xf32>
    %43 = vector.shape_cast %42 : vector<8x16xf32> to vector<8x16x1xf32>
    %44 = tpu.reciprocal %43 {approx = true} : vector<8x16x1xf32> -> vector<8x16x1xf32>
    %45 = vector.broadcast %44 : vector<8x16x1xf32> to vector<8x16x8xf32>
    %46 = arith.mulf %41, %45 : vector<8x16x8xf32>
    %47 = arith.truncf %46 : vector<8x16x8xf32> to vector<8x16x8xbf16>
    %48 = arith.truncf %1 : vector<8x8x128xf32> to vector<8x8x128xbf16>
    "tpu.trace_start"() <{level = 10 : i32, message = "bqk,bkd->bqd"}> : () -> ()
    %cst_17 = arith.constant dense<0.000000e+00> : vector<8x16x128xf32>
    %49 = tpu.matmul %47, %48, %cst_17 {dimension_numbers = #tpu.dot_dimension_numbers<[2], [1], [1], [2], [0, 0, 0, 1, 1, 2], [0], [0]>} : vector<8x16x8xbf16>, vector<8x8x128xbf16>, vector<8x16x128xf32> -> vector<8x16x128xf32>
    "tpu.trace_stop"() : () -> ()
    %50 = vector.shape_cast %49 : vector<8x16x128xf32> to vector<128x128xf32>
    %51 = arith.truncf %50 : vector<128x128xf32> to vector<128x128xbf16>
    %c0_18 = arith.constant 0 : index
    %c0_19 = arith.constant 0 : index
    %52 = vector.load %arg6[%c0_18, %c0_19] : memref<128x256xbf16, #tpu.memory_space<vmem>>, vector<128x256xbf16>
    %cst_20 = arith.constant dense<0.000000e+00> : vector<128x256xf32>
    %53 = tpu.matmul %51, %52, %cst_20 {dimension_numbers = #tpu.dot_dimension_numbers<[1], [0], [0], [1], [0, 0, 1, 1], [], []>} : vector<128x128xbf16>, vector<128x256xbf16>, vector<128x256xf32> -> vector<128x256xf32>
    %54 = vector.extract_strided_slice %53 {offsets = [0, 0], sizes = [128, 128], strides = [1, 1]} : vector<128x256xf32> to vector<128x128xf32>
    %55 = vector.shape_cast %54 : vector<128x128xf32> to vector<8x16x128xf32>
    %56 = vector.extract_strided_slice %53 {offsets = [0, 128], sizes = [128, 128], strides = [1, 1]} : vector<128x256xf32> to vector<128x128xf32>
    %57 = vector.shape_cast %56 : vector<128x128xf32> to vector<8x16x128xf32>
    %58 = vector.shape_cast %33 : vector<8x8x128xf32> to vector<64x128xf32>
    %59 = arith.truncf %58 : vector<64x128xf32> to vector<64x128xbf16>
    %c0_21 = arith.constant 0 : index
    %c0_22 = arith.constant 0 : index
    %60 = vector.load %arg5[%c0_21, %c0_22] : memref<128x256xbf16, #tpu.memory_space<vmem>>, vector<128x256xbf16>
    %cst_23 = arith.constant dense<0.000000e+00> : vector<64x256xf32>
    %61 = tpu.matmul %59, %60, %cst_23 {dimension_numbers = #tpu.dot_dimension_numbers<[1], [0], [0], [1], [0, 0, 1, 1], [], []>} : vector<64x128xbf16>, vector<128x256xbf16>, vector<64x256xf32> -> vector<64x256xf32>
    %62 = vector.extract_strided_slice %61 {offsets = [0, 0], sizes = [64, 128], strides = [1, 1]} : vector<64x256xf32> to vector<64x128xf32>
    %63 = vector.shape_cast %62 : vector<64x128xf32> to vector<8x8x128xf32>
    %64 = vector.extract_strided_slice %61 {offsets = [0, 128], sizes = [64, 128], strides = [1, 1]} : vector<64x256xf32> to vector<64x128xf32>
    %65 = vector.shape_cast %64 : vector<64x128xf32> to vector<8x8x128xf32>
    %66 = arith.truncf %57 : vector<8x16x128xf32> to vector<8x16x128xbf16>
    %67 = arith.truncf %55 : vector<8x16x128xf32> to vector<8x16x128xbf16>
    "tpu.trace_start"() <{level = 10 : i32, message = "bqd,bkd->bqk"}> : () -> ()
    %cst_24 = arith.constant dense<0.000000e+00> : vector<8x16x16xf32>
    %68 = tpu.matmul %66, %67, %cst_24 {dimension_numbers = #tpu.dot_dimension_numbers<[2], [2], [1], [1], [0, 0, 0, 1, 1, 1], [0], [0]>} : vector<8x16x128xbf16>, vector<8x16x128xbf16>, vector<8x16x16xf32> -> vector<8x16x16xf32>
    "tpu.trace_stop"() : () -> ()
    %cst_25 = arith.constant dense<0xFF800000> : vector<8x16xf32>
    %69 = vector.multi_reduction <maximumf>, %68, %cst_25 [2] : vector<8x16x16xf32> to vector<8x16xf32>
    %70 = vector.shape_cast %69 : vector<8x16xf32> to vector<8x16x1xf32>
    %71 = vector.broadcast %70 : vector<8x16x1xf32> to vector<8x16x16xf32>
    %72 = arith.subf %68, %71 : vector<8x16x16xf32>
    %73 = math.exp %72 : vector<8x16x16xf32>
    %cst_26 = arith.constant dense<0.000000e+00> : vector<8x16xf32>
    %74 = vector.multi_reduction <add>, %73, %cst_26 [2] : vector<8x16x16xf32> to vector<8x16xf32>
    %75 = vector.shape_cast %74 : vector<8x16xf32> to vector<8x16x1xf32>
    %76 = tpu.reciprocal %75 {approx = true} : vector<8x16x1xf32> -> vector<8x16x1xf32>
    %77 = vector.broadcast %76 : vector<8x16x1xf32> to vector<8x16x16xf32>
    %78 = arith.mulf %73, %77 : vector<8x16x16xf32>
    %79 = arith.truncf %78 : vector<8x16x16xf32> to vector<8x16x16xbf16>
    %80 = arith.truncf %49 : vector<8x16x128xf32> to vector<8x16x128xbf16>
    "tpu.trace_start"() <{level = 10 : i32, message = "bqk,bkd->bqd"}> : () -> ()
    %cst_27 = arith.constant dense<0.000000e+00> : vector<8x16x128xf32>
    %81 = tpu.matmul %79, %80, %cst_27 {dimension_numbers = #tpu.dot_dimension_numbers<[2], [1], [1], [2], [0, 0, 0, 1, 1, 2], [0], [0]>} : vector<8x16x16xbf16>, vector<8x16x128xbf16>, vector<8x16x128xf32> -> vector<8x16x128xf32>
    "tpu.trace_stop"() : () -> ()
    %82 = arith.mulf %81, %81 : vector<8x16x128xf32>
    %cst_28 = arith.constant dense<0.000000e+00> : vector<8x16xf32>
    %83 = vector.multi_reduction <add>, %82, %cst_28 [2] : vector<8x16x128xf32> to vector<8x16xf32>
    %84 = vector.shape_cast %83 : vector<8x16xf32> to vector<8x16x1xf32>
    %cst_29 = arith.constant 9.99999996E-13 : f32
    %85 = vector.broadcast %cst_29 : f32 to vector<8x16x1xf32>
    %86 = arith.addf %84, %85 : vector<8x16x1xf32>
    %87 = math.rsqrt %86 : vector<8x16x1xf32>
    %88 = vector.broadcast %87 : vector<8x16x1xf32> to vector<8x16x128xf32>
    %89 = arith.mulf %81, %88 : vector<8x16x128xf32>
    %90 = arith.truncf %65 : vector<8x8x128xf32> to vector<8x8x128xbf16>
    %91 = arith.truncf %63 : vector<8x8x128xf32> to vector<8x8x128xbf16>
    "tpu.trace_start"() <{level = 10 : i32, message = "bqd,bkd->bqk"}> : () -> ()
    %cst_30 = arith.constant dense<0.000000e+00> : vector<8x8x8xf32>
    %92 = tpu.matmul %90, %91, %cst_30 {dimension_numbers = #tpu.dot_dimension_numbers<[2], [2], [1], [1], [0, 0, 0, 1, 1, 1], [0], [0]>} : vector<8x8x128xbf16>, vector<8x8x128xbf16>, vector<8x8x8xf32> -> vector<8x8x8xf32>
    "tpu.trace_stop"() : () -> ()
    %cst_31 = arith.constant dense<0xFF800000> : vector<8x8xf32>
    %93 = vector.multi_reduction <maximumf>, %92, %cst_31 [2] : vector<8x8x8xf32> to vector<8x8xf32>
    %94 = vector.shape_cast %93 : vector<8x8xf32> to vector<8x8x1xf32>
    %95 = vector.broadcast %94 : vector<8x8x1xf32> to vector<8x8x8xf32>
    %96 = arith.subf %92, %95 : vector<8x8x8xf32>
    %97 = math.exp %96 : vector<8x8x8xf32>
    %cst_32 = arith.constant dense<0.000000e+00> : vector<8x8xf32>
    %98 = vector.multi_reduction <add>, %97, %cst_32 [2] : vector<8x8x8xf32> to vector<8x8xf32>
    %99 = vector.shape_cast %98 : vector<8x8xf32> to vector<8x8x1xf32>
    %100 = tpu.reciprocal %99 {approx = true} : vector<8x8x1xf32> -> vector<8x8x1xf32>
    %101 = vector.broadcast %100 : vector<8x8x1xf32> to vector<8x8x8xf32>
    %102 = arith.mulf %97, %101 : vector<8x8x8xf32>
    %103 = arith.truncf %102 : vector<8x8x8xf32> to vector<8x8x8xbf16>
    %104 = arith.truncf %33 : vector<8x8x128xf32> to vector<8x8x128xbf16>
    "tpu.trace_start"() <{level = 10 : i32, message = "bqk,bkd->bqd"}> : () -> ()
    %cst_33 = arith.constant dense<0.000000e+00> : vector<8x8x128xf32>
    %105 = tpu.matmul %103, %104, %cst_33 {dimension_numbers = #tpu.dot_dimension_numbers<[2], [1], [1], [2], [0, 0, 0, 1, 1, 2], [0], [0]>} : vector<8x8x8xbf16>, vector<8x8x128xbf16>, vector<8x8x128xf32> -> vector<8x8x128xf32>
    "tpu.trace_stop"() : () -> ()
    %106 = arith.mulf %105, %105 : vector<8x8x128xf32>
    %cst_34 = arith.constant dense<0.000000e+00> : vector<8x8xf32>
    %107 = vector.multi_reduction <add>, %106, %cst_34 [2] : vector<8x8x128xf32> to vector<8x8xf32>
    %108 = vector.shape_cast %107 : vector<8x8xf32> to vector<8x8x1xf32>
    %cst_35 = arith.constant 9.99999996E-13 : f32
    %109 = vector.broadcast %cst_35 : f32 to vector<8x8x1xf32>
    %110 = arith.addf %108, %109 : vector<8x8x1xf32>
    %111 = math.rsqrt %110 : vector<8x8x1xf32>
    %112 = vector.broadcast %111 : vector<8x8x1xf32> to vector<8x8x128xf32>
    %113 = arith.mulf %105, %112 : vector<8x8x128xf32>
    %114 = arith.mulf %0, %89 : vector<8x16x128xf32>
    %cst_36 = arith.constant dense<0.000000e+00> : vector<8x16xf32>
    %115 = vector.multi_reduction <add>, %114, %cst_36 [2] : vector<8x16x128xf32> to vector<8x16xf32>
    %116 = vector.shape_cast %115 : vector<8x16xf32> to vector<8x16x1xf32>
    %117 = arith.negf %116 : vector<8x16x1xf32>
    %118 = math.exp %117 : vector<8x16x1xf32>
    %cst_37 = arith.constant 1.000000e+00 : f32
    %119 = vector.broadcast %cst_37 : f32 to vector<8x16x1xf32>
    %120 = arith.addf %119, %118 : vector<8x16x1xf32>
    %121 = arith.divf %119, %120 : vector<8x16x1xf32>
    %122 = arith.mulf %1, %113 : vector<8x8x128xf32>
    %cst_38 = arith.constant dense<0.000000e+00> : vector<8x8xf32>
    %123 = vector.multi_reduction <add>, %122, %cst_38 [2] : vector<8x8x128xf32> to vector<8x8xf32>
    %124 = vector.shape_cast %123 : vector<8x8xf32> to vector<8x8x1xf32>
    %125 = arith.negf %124 : vector<8x8x1xf32>
    %126 = math.exp %125 : vector<8x8x1xf32>
    %cst_39 = arith.constant 1.000000e+00 : f32
    %127 = vector.broadcast %cst_39 : f32 to vector<8x8x1xf32>
    %128 = arith.addf %127, %126 : vector<8x8x1xf32>
    %129 = arith.divf %127, %128 : vector<8x8x1xf32>
    %130 = vector.shape_cast %0 : vector<8x16x128xf32> to vector<128x128xf32>
    %131 = vector.shape_cast %89 : vector<8x16x128xf32> to vector<128x128xf32>
    %132 = tpu.concatenate %130, %131 in 1 : vector<128x128xf32>, vector<128x128xf32> -> vector<128x256xf32>
    %133 = arith.truncf %132 : vector<128x256xf32> to vector<128x256xbf16>
    %c0_40 = arith.constant 0 : index
    %c0_41 = arith.constant 0 : index
    %134 = vector.load %arg7[%c0_40, %c0_41] : memref<256x128xbf16, #tpu.memory_space<vmem>>, vector<256x128xbf16>
    %cst_42 = arith.constant dense<0.000000e+00> : vector<128x128xf32>
    %135 = tpu.matmul %133, %134, %cst_42 {dimension_numbers = #tpu.dot_dimension_numbers<[1], [0], [0], [1], [0, 0, 1, 1], [], []>} : vector<128x256xbf16>, vector<256x128xbf16>, vector<128x128xf32> -> vector<128x128xf32>
    %136 = vector.shape_cast %135 : vector<128x128xf32> to vector<8x16x128xf32>
    %137 = vector.broadcast %121 : vector<8x16x1xf32> to vector<8x16x128xf32>
    %138 = arith.mulf %137, %136 : vector<8x16x128xf32>
    %cst_43 = arith.constant 0.000000e+00 : f32
    %139 = vector.broadcast %cst_43 : f32 to vector<8x16x128xf32>
    %140 = arith.maximumf %138, %139 : vector<8x16x128xf32>
    %141 = arith.addf %140, %0 : vector<8x16x128xf32>
    %142 = vector.shape_cast %1 : vector<8x8x128xf32> to vector<64x128xf32>
    %143 = vector.shape_cast %113 : vector<8x8x128xf32> to vector<64x128xf32>
    %144 = tpu.concatenate %142, %143 in 1 : vector<64x128xf32>, vector<64x128xf32> -> vector<64x256xf32>
    %145 = arith.truncf %144 : vector<64x256xf32> to vector<64x256xbf16>
    %c0_44 = arith.constant 0 : index
    %c0_45 = arith.constant 0 : index
    %146 = vector.load %arg8[%c0_44, %c0_45] : memref<256x128xbf16, #tpu.memory_space<vmem>>, vector<256x128xbf16>
    %cst_46 = arith.constant dense<0.000000e+00> : vector<64x128xf32>
    %147 = tpu.matmul %145, %146, %cst_46 {dimension_numbers = #tpu.dot_dimension_numbers<[1], [0], [0], [1], [0, 0, 1, 1], [], []>} : vector<64x256xbf16>, vector<256x128xbf16>, vector<64x128xf32> -> vector<64x128xf32>
    %148 = vector.shape_cast %147 : vector<64x128xf32> to vector<8x8x128xf32>
    %149 = vector.broadcast %129 : vector<8x8x1xf32> to vector<8x8x128xf32>
    %150 = arith.mulf %149, %148 : vector<8x8x128xf32>
    %cst_47 = arith.constant 0.000000e+00 : f32
    %151 = vector.broadcast %cst_47 : f32 to vector<8x8x128xf32>
    %152 = arith.maximumf %150, %151 : vector<8x8x128xf32>
    %153 = arith.addf %152, %1 : vector<8x8x128xf32>
    %154 = vector.shape_cast %141 : vector<8x16x128xf32> to vector<128x128xf32>
    %155 = arith.truncf %154 : vector<128x128xf32> to vector<128x128xbf16>
    %c0_48 = arith.constant 0 : index
    %c0_49 = arith.constant 0 : index
    %156 = vector.load %arg9[%c0_48, %c0_49] : memref<128x128xbf16, #tpu.memory_space<vmem>>, vector<128x128xbf16>
    %cst_50 = arith.constant dense<0.000000e+00> : vector<128x128xf32>
    %157 = tpu.matmul %155, %156, %cst_50 {dimension_numbers = #tpu.dot_dimension_numbers<[1], [0], [0], [1], [0, 0, 1, 1], [], []>} : vector<128x128xbf16>, vector<128x128xbf16>, vector<128x128xf32> -> vector<128x128xf32>
    %c0_51 = arith.constant 0 : index
    %c0_52 = arith.constant 0 : index
    %158 = vector.load %arg10[%c0_51, %c0_52] : memref<1x128xf32, #tpu.memory_space<vmem>>, vector<1x128xf32>
    %159 = vector.broadcast %158 : vector<1x128xf32> to vector<128x128xf32>
    %160 = arith.addf %157, %159 : vector<128x128xf32>
    %cst_53 = arith.constant 0.000000e+00 : f32
    %161 = vector.broadcast %cst_53 : f32 to vector<128x128xf32>
    %162 = arith.maximumf %160, %161 : vector<128x128xf32>
    %163 = arith.truncf %162 : vector<128x128xf32> to vector<128x128xbf16>
    %c0_54 = arith.constant 0 : index
    %c0_55 = arith.constant 0 : index
    %164 = vector.load %arg11[%c0_54, %c0_55] : memref<128x4xbf16, #tpu.memory_space<vmem>>, vector<128x4xbf16>
    %cst_56 = arith.constant dense<0.000000e+00> : vector<128x4xf32>
    %165 = tpu.matmul %163, %164, %cst_56 {dimension_numbers = #tpu.dot_dimension_numbers<[1], [0], [0], [1], [0, 0, 1, 1], [], []>} : vector<128x128xbf16>, vector<128x4xbf16>, vector<128x4xf32> -> vector<128x4xf32>
    %c0_57 = arith.constant 0 : index
    %c0_58 = arith.constant 0 : index
    %166 = vector.load %arg12[%c0_57, %c0_58] : memref<1x4xf32, #tpu.memory_space<vmem>>, vector<1x4xf32>
    %167 = vector.broadcast %166 : vector<1x4xf32> to vector<128x4xf32>
    %168 = arith.addf %165, %167 : vector<128x4xf32>
    %169 = vector.shape_cast %168 : vector<128x4xf32> to vector<8x16x4xf32>
    %cst_59 = arith.constant dense<0xFF800000> : vector<8x4xf32>
    %170 = vector.multi_reduction <maximumf>, %169, %cst_59 [1] : vector<8x16x4xf32> to vector<8x4xf32>
    %171 = vector.shape_cast %170 : vector<8x4xf32> to vector<8x1x4xf32>
    %172 = vector.broadcast %171 : vector<8x1x4xf32> to vector<8x16x4xf32>
    %173 = arith.subf %169, %172 : vector<8x16x4xf32>
    %174 = math.exp %173 : vector<8x16x4xf32>
    %cst_60 = arith.constant dense<0.000000e+00> : vector<8x4xf32>
    %175 = vector.multi_reduction <add>, %174, %cst_60 [1] : vector<8x16x4xf32> to vector<8x4xf32>
    %176 = vector.shape_cast %175 : vector<8x4xf32> to vector<8x1x4xf32>
    %177 = tpu.reciprocal %176 {approx = true} : vector<8x1x4xf32> -> vector<8x1x4xf32>
    %178 = vector.broadcast %177 : vector<8x1x4xf32> to vector<8x16x4xf32>
    %179 = arith.mulf %174, %178 : vector<8x16x4xf32>
    %cst_61 = arith.constant dense<0.000000e+00> : vector<8x16xf32>
    %180 = vector.multi_reduction <add>, %179, %cst_61 [2] : vector<8x16x4xf32> to vector<8x16xf32>
    %181 = vector.shape_cast %180 : vector<8x16xf32> to vector<8x16x1xf32>
    %cst_62 = arith.constant 4.000000e+00 : f32
    %182 = vector.broadcast %cst_62 : f32 to vector<8x16x1xf32>
    %183 = arith.divf %181, %182 : vector<8x16x1xf32>
    %184 = vector.broadcast %183 : vector<8x16x1xf32> to vector<8x16x128xf32>
    %185 = arith.mulf %184, %141 : vector<8x16x128xf32>
    %cst_63 = arith.constant dense<0.000000e+00> : vector<8x128xf32>
    %186 = vector.multi_reduction <add>, %185, %cst_63 [1] : vector<8x16x128xf32> to vector<8x128xf32>
    %187 = arith.mulf %186, %186 : vector<8x128xf32>
    %cst_64 = arith.constant dense<0.000000e+00> : vector<8xf32>
    %188 = vector.multi_reduction <add>, %187, %cst_64 [1] : vector<8x128xf32> to vector<8xf32>
    %189 = vector.shape_cast %188 : vector<8xf32> to vector<8x1xf32>
    %cst_65 = arith.constant 9.99999996E-13 : f32
    %190 = vector.broadcast %cst_65 : f32 to vector<8x1xf32>
    %191 = arith.addf %189, %190 : vector<8x1xf32>
    %192 = math.rsqrt %191 : vector<8x1xf32>
    %193 = vector.broadcast %192 : vector<8x1xf32> to vector<8x128xf32>
    %194 = arith.mulf %186, %193 : vector<8x128xf32>
    %c0_66 = arith.constant 0 : index
    %c0_67 = arith.constant 0 : index
    %195 = vector.load %arg17[%c0_66, %c0_67] : memref<8x128xf32, #tpu.memory_space<vmem>>, vector<8x128xf32>
    tpu.vector_store %arg17[%c0_66, %c0_67], %194 {strides = array<i32>} : memref<8x128xf32, #tpu.memory_space<vmem>>, vector<8x128xf32>,
    %196 = vector.shape_cast %153 : vector<8x8x128xf32> to vector<64x128xf32>
    %197 = arith.truncf %196 : vector<64x128xf32> to vector<64x128xbf16>
    %c0_68 = arith.constant 0 : index
    %c0_69 = arith.constant 0 : index
    %198 = vector.load %arg13[%c0_68, %c0_69] : memref<128x128xbf16, #tpu.memory_space<vmem>>, vector<128x128xbf16>
    %cst_70 = arith.constant dense<0.000000e+00> : vector<64x128xf32>
    %199 = tpu.matmul %197, %198, %cst_70 {dimension_numbers = #tpu.dot_dimension_numbers<[1], [0], [0], [1], [0, 0, 1, 1], [], []>} : vector<64x128xbf16>, vector<128x128xbf16>, vector<64x128xf32> -> vector<64x128xf32>
    %c0_71 = arith.constant 0 : index
    %c0_72 = arith.constant 0 : index
    %200 = vector.load %arg14[%c0_71, %c0_72] : memref<1x128xf32, #tpu.memory_space<vmem>>, vector<1x128xf32>
    %201 = vector.broadcast %200 : vector<1x128xf32> to vector<64x128xf32>
    %202 = arith.addf %199, %201 : vector<64x128xf32>
    %cst_73 = arith.constant 0.000000e+00 : f32
    %203 = vector.broadcast %cst_73 : f32 to vector<64x128xf32>
    %204 = arith.maximumf %202, %203 : vector<64x128xf32>
    %205 = arith.truncf %204 : vector<64x128xf32> to vector<64x128xbf16>
    %c0_74 = arith.constant 0 : index
    %c0_75 = arith.constant 0 : index
    %206 = vector.load %arg15[%c0_74, %c0_75] : memref<128x4xbf16, #tpu.memory_space<vmem>>, vector<128x4xbf16>
    %cst_76 = arith.constant dense<0.000000e+00> : vector<64x4xf32>
    %207 = tpu.matmul %205, %206, %cst_76 {dimension_numbers = #tpu.dot_dimension_numbers<[1], [0], [0], [1], [0, 0, 1, 1], [], []>} : vector<64x128xbf16>, vector<128x4xbf16>, vector<64x4xf32> -> vector<64x4xf32>
    %c0_77 = arith.constant 0 : index
    %c0_78 = arith.constant 0 : index
    %208 = vector.load %arg16[%c0_77, %c0_78] : memref<1x4xf32, #tpu.memory_space<vmem>>, vector<1x4xf32>
    %209 = vector.broadcast %208 : vector<1x4xf32> to vector<64x4xf32>
    %210 = arith.addf %207, %209 : vector<64x4xf32>
    %211 = vector.shape_cast %210 : vector<64x4xf32> to vector<8x8x4xf32>
    %cst_79 = arith.constant dense<0xFF800000> : vector<8x4xf32>
    %212 = vector.multi_reduction <maximumf>, %211, %cst_79 [1] : vector<8x8x4xf32> to vector<8x4xf32>
    %213 = vector.shape_cast %212 : vector<8x4xf32> to vector<8x1x4xf32>
    %214 = vector.broadcast %213 : vector<8x1x4xf32> to vector<8x8x4xf32>
    %215 = arith.subf %211, %214 : vector<8x8x4xf32>
    %216 = math.exp %215 : vector<8x8x4xf32>
    %cst_80 = arith.constant dense<0.000000e+00> : vector<8x4xf32>
    %217 = vector.multi_reduction <add>, %216, %cst_80 [1] : vector<8x8x4xf32> to vector<8x4xf32>
    %218 = vector.shape_cast %217 : vector<8x4xf32> to vector<8x1x4xf32>
    %219 = tpu.reciprocal %218 {approx = true} : vector<8x1x4xf32> -> vector<8x1x4xf32>
    %220 = vector.broadcast %219 : vector<8x1x4xf32> to vector<8x8x4xf32>
    %221 = arith.mulf %216, %220 : vector<8x8x4xf32>
    %cst_81 = arith.constant dense<0.000000e+00> : vector<8x8xf32>
    %222 = vector.multi_reduction <add>, %221, %cst_81 [2] : vector<8x8x4xf32> to vector<8x8xf32>
    %223 = vector.shape_cast %222 : vector<8x8xf32> to vector<8x8x1xf32>
    %cst_82 = arith.constant 4.000000e+00 : f32
    %224 = vector.broadcast %cst_82 : f32 to vector<8x8x1xf32>
    %225 = arith.divf %223, %224 : vector<8x8x1xf32>
    %226 = vector.broadcast %225 : vector<8x8x1xf32> to vector<8x8x128xf32>
    %227 = arith.mulf %226, %153 : vector<8x8x128xf32>
    %cst_83 = arith.constant dense<0.000000e+00> : vector<8x128xf32>
    %228 = vector.multi_reduction <add>, %227, %cst_83 [1] : vector<8x8x128xf32> to vector<8x128xf32>
    %229 = arith.mulf %228, %228 : vector<8x128xf32>
    %cst_84 = arith.constant dense<0.000000e+00> : vector<8xf32>
    %230 = vector.multi_reduction <add>, %229, %cst_84 [1] : vector<8x128xf32> to vector<8xf32>
    %231 = vector.shape_cast %230 : vector<8xf32> to vector<8x1xf32>
    %cst_85 = arith.constant 9.99999996E-13 : f32
    %232 = vector.broadcast %cst_85 : f32 to vector<8x1xf32>
    %233 = arith.addf %231, %232 : vector<8x1xf32>
    %234 = math.rsqrt %233 : vector<8x1xf32>
    %235 = vector.broadcast %234 : vector<8x1xf32> to vector<8x128xf32>
    %236 = arith.mulf %228, %235 : vector<8x128xf32>
    %c0_86 = arith.constant 0 : index
    %c0_87 = arith.constant 0 : index
    %237 = vector.load %arg18[%c0_86, %c0_87] : memref<8x128xf32, #tpu.memory_space<vmem>>, vector<8x128xf32>
    tpu.vector_store %arg18[%c0_86, %c0_87], %236 {strides = array<i32>} : memref<8x128xf32, #tpu.memory_space<vmem>>, vector<8x128xf32>,
    return
  }
  func.func @transform_0(%arg0: i32) -> (i32, i32, i32) {
    %c0_i32 = arith.constant 0 : i32
    %c0_i32_0 = arith.constant 0 : i32
    %c0_i32_1 = arith.constant 0 : i32
    return %arg0, %c0_i32, %c0_i32_0 : i32, i32, i32
  }
  func.func @transform_1(%arg0: i32) -> (i32, i32, i32) {
    %c0_i32 = arith.constant 0 : i32
    %c0_i32_0 = arith.constant 0 : i32
    %c0_i32_1 = arith.constant 0 : i32
    return %arg0, %c0_i32, %c0_i32_0 : i32, i32, i32
  }
  func.func @transform_2(%arg0: i32) -> (i32, i32) {
    %c0_i32 = arith.constant 0 : i32
    %c0_i32_0 = arith.constant 0 : i32
    %c0_i32_1 = arith.constant 0 : i32
    return %c0_i32, %c0_i32_0 : i32, i32
  }
  func.func @transform_3(%arg0: i32) -> (i32, i32) {
    %c0_i32 = arith.constant 0 : i32
    %c0_i32_0 = arith.constant 0 : i32
    %c0_i32_1 = arith.constant 0 : i32
    return %c0_i32, %c0_i32_0 : i32, i32
  }
  func.func @transform_4(%arg0: i32) -> (i32, i32) {
    %c0_i32 = arith.constant 0 : i32
    %c0_i32_0 = arith.constant 0 : i32
    %c0_i32_1 = arith.constant 0 : i32
    return %c0_i32, %c0_i32_0 : i32, i32
  }
  func.func @transform_5(%arg0: i32) -> (i32, i32) {
    %c0_i32 = arith.constant 0 : i32
    %c0_i32_0 = arith.constant 0 : i32
    %c0_i32_1 = arith.constant 0 : i32
    return %c0_i32, %c0_i32_0 : i32, i32
  }
  func.func @transform_6(%arg0: i32) -> (i32, i32) {
    %c0_i32 = arith.constant 0 : i32
    %c0_i32_0 = arith.constant 0 : i32
    %c0_i32_1 = arith.constant 0 : i32
    return %c0_i32, %c0_i32_0 : i32, i32
  }
  func.func @transform_7(%arg0: i32) -> (i32, i32) {
    %c0_i32 = arith.constant 0 : i32
    %c0_i32_0 = arith.constant 0 : i32
    %c0_i32_1 = arith.constant 0 : i32
    return %c0_i32, %c0_i32_0 : i32, i32
  }
  func.func @transform_8(%arg0: i32) -> (i32, i32) {
    %c0_i32 = arith.constant 0 : i32
    %c0_i32_0 = arith.constant 0 : i32
    %c0_i32_1 = arith.constant 0 : i32
    return %c0_i32, %c0_i32_0 : i32, i32
  }
  func.func @transform_9(%arg0: i32) -> (i32, i32) {
    %c0_i32 = arith.constant 0 : i32
    %c0_i32_0 = arith.constant 0 : i32
    %c0_i32_1 = arith.constant 0 : i32
    return %c0_i32, %c0_i32_0 : i32, i32
  }
  func.func @transform_10(%arg0: i32) -> (i32, i32) {
    %c0_i32 = arith.constant 0 : i32
    %c0_i32_0 = arith.constant 0 : i32
    %c0_i32_1 = arith.constant 0 : i32
    return %c0_i32, %c0_i32_0 : i32, i32
  }
  func.func @transform_11(%arg0: i32) -> (i32, i32) {
    %c0_i32 = arith.constant 0 : i32
    %c0_i32_0 = arith.constant 0 : i32
    %c0_i32_1 = arith.constant 0 : i32
    return %c0_i32, %c0_i32_0 : i32, i32
  }
  func.func @transform_12(%arg0: i32) -> (i32, i32) {
    %c0_i32 = arith.constant 0 : i32
    %c0_i32_0 = arith.constant 0 : i32
    %c0_i32_1 = arith.constant 0 : i32
    return %c0_i32, %c0_i32_0 : i32, i32
  }
  func.func @transform_13(%arg0: i32) -> (i32, i32) {
    %c0_i32 = arith.constant 0 : i32
    %c0_i32_0 = arith.constant 0 : i32
    %c0_i32_1 = arith.constant 0 : i32
    return %c0_i32, %c0_i32_0 : i32, i32
  }
  func.func @transform_14(%arg0: i32) -> (i32, i32) {
    %c0_i32 = arith.constant 0 : i32
    %c0_i32_0 = arith.constant 0 : i32
    %c0_i32_1 = arith.constant 0 : i32
    return %c0_i32, %c0_i32_0 : i32, i32
  }
  func.func @transform_15(%arg0: i32) -> (i32, i32) {
    %c0_i32 = arith.constant 0 : i32
    %c0_i32_0 = arith.constant 0 : i32
    %c0_i32_1 = arith.constant 0 : i32
    return %c0_i32, %c0_i32_0 : i32, i32
  }
  func.func @transform_16(%arg0: i32) -> (i32, i32) {
    %c0_i32 = arith.constant 0 : i32
    %c0_i32_0 = arith.constant 0 : i32
    return %arg0, %c0_i32 : i32, i32
  }
  func.func @transform_17(%arg0: i32) -> (i32, i32) {
    %c0_i32 = arith.constant 0 : i32
    %c0_i32_0 = arith.constant 0 : i32
    return %arg0, %c0_i32 : i32, i32
  }
}

</mosaic_0001>

<bundles_post_ra>
// kernel: tpu_custom_call.1
= control target key start
LH: loop header
LB: loop body
LE: loop exit
PB: predicated region body
PF: predicated region fallthrough
CT: control target
= control target key end

     0   :  { %s10789_s0 = inlined_call_operand.hbm [shape: f32[16,16,128], index: 0, kind: input, shape index: {}]   ;;  %s10790_s1 = inlined_call_operand.vmem [shape: f32[16,8,128], index: 1, kind: input, shape index: {}]   ;;  %s10791_s2 = inlined_call_operand.hbm [shape: bf16[128,256], index: 2, kind: input, shape index: {}]   ;;  %s10792_s3 = inlined_call_operand.hbm [shape: bf16[128,256], index: 3, kind: input, shape index: {}]   ;;  %s10793_s4 = inlined_call_operand.hbm [shape: bf16[128,256], index: 4, kind: input, shape index: {}]   ;;  %s10794_s5 = inlined_call_operand.hbm [shape: bf16[128,256], index: 5, kind: input, shape index: {}]   ;;  %s10795_s6 = inlined_call_operand.hbm [shape: bf16[256,128], index: 6, kind: input, shape index: {}]   ;;  %s10796_s7 = inlined_call_operand.hbm [shape: bf16[256,128], index: 7, kind: input, shape index: {}]   ;;  %s10797_s8 = inlined_call_operand.hbm [shape: bf16[128,128], index: 8, kind: input, shape index: {}]   ;;  %s10798_s9 = inlined_call_operand.vmem [shape: f32[1,128], index: 9, kind: input, shape index: {}]   ;;  %s10799_s10 = inlined_call_operand.vmem [shape: bf16[128,4], index: 10, kind: input, shape index: {}]   ;;  %s10800_s11 = inlined_call_operand.vmem [shape: f32[1,4], index: 11, kind: input, shape index: {}]   ;;  %s10801_s12 = inlined_call_operand.hbm [shape: bf16[128,128], index: 12, kind: input, shape index: {}]   ;;  %s10802_s13 = inlined_call_operand.vmem [shape: f32[1,128], index: 13, kind: input, shape index: {}]   ;;  %s10803_s14 = inlined_call_operand.vmem [shape: bf16[128,4], index: 14, kind: input, shape index: {}]   ;;  %s10804_s15 = inlined_call_operand.vmem [shape: f32[1,4], index: 15, kind: input, shape index: {}]   ;;  %s10805_s16 = inlined_call_operand.hbm [shape: f32[16,128], index: 16, kind: output, shape index: {0}]   ;;  %s10806_s17 = inlined_call_operand.hbm [shape: f32[16,128], index: 17, kind: output, shape index: {1}]  }
   0x1   :  { %10814 = sst [smem:[#allocation29_spill]] %s10789_s0 }
   0x2   :  { %10815 = sst [smem:[#allocation30_spill]] %s10790_s1 }
   0x3   :  { %10816 = sst [smem:[#allocation31_spill]] %s10791_s2 }
   0x4   :  { %10817 = sst [smem:[#allocation32_spill]] %s10792_s3 }
   0x5   :  { %10818 = sst [smem:[#allocation33_spill]] %s10793_s4 }
   0x6   :  { %10819 = sst [smem:[#allocation34_spill]] %s10794_s5 }
   0x7   :  { %10820 = sst [smem:[#allocation35_spill]] %s10795_s6 }
   0x8   :  { %10821 = sst [smem:[#allocation36_spill]] %s10796_s7 }
   0x9   :  { %10822 = sst [smem:[#allocation37_spill]] %s10797_s8 }
   0xa   :  { %10823 = sst [smem:[#allocation38_spill]] %s10800_s11 }
   0xb   :  { %10824 = sst [smem:[#allocation39_spill]] %s10804_s15 }
   0xc   :  { %10825 = sst [smem:[#allocation40_spill]] %s10805_s16 }
   0xd   :  { %10826 = sst [smem:[#allocation41_spill]] %s10806_s17 }
   0xe   :  { %23 = vsyncpa [#allocation3], 0 }
   0xf   :  { %25 = vsyncpa [#allocation3 + $0x1], 0 }
  0x10   :  { %26 = vsyncpa [#allocation6], 0 }
  0x11   :  { %27 = vsyncpa [#allocation9], 0 }
  0x12   :  { %28 = vsyncpa [#allocation12], 0 }
  0x13   :  { %29 = vsyncpa [#allocation15], 0 }
  0x14   :  { %30 = vsyncpa [#allocation4], 0 }
  0x15   :  { %32 = vsyncpa [#allocation4 + $0x1], 0 }
  0x16   :  { %33 = vsyncpa [#allocation19], 0 }
  0x17   :  { %35 = vsyncpa [#allocation19 + $0x1], 0  ;;  %s8279_s24 = smov 0   ;;  %s8281_s25 = smov 0  }
  0x18   :  { %s8283_s26 = smov 0   ;;  %s8285_s27 = smov 0  }
  0x19 LB: > { %s10827_s2 = sld [smem:[#allocation31_spill]]  ;;  %s8303_s30 = sadd.s32 4294967295, %s8174_s27   ;;  %s8174_s27 = sphi %s8285_s27, %s10899_s27   ;;  %s8170_s26 = sphi %s8283_s26, %s10898_s26   ;;  %s8166_s25 = sphi %s8281_s25, %s10897_s25   ;;  %s8162_s24 = sphi %s8279_s24, %s10896_s24  }
  0x1a   : > { %p6444_p0 = scmp.ge.s32.totalorder %s8174_s27, 1  ;;  %p62_p1 = scmp.eq.s32.totalorder %s8303_s30, 0 }
  0x1b   : > { %p444_p2 = scmp.lt.s32.totalorder %s8174_s27, 3  ;;  %s8176_s19 = smov [#allocation5]  }
  0x1c   : > { %s457_s1 = sshll.u32 %s8176_s19, 4  ;;  %s10829_s4 = sld [smem:[#allocation33_spill]]  ;;  %s458_s1 = int_to_ptr.vmem [resolvable:$true] %s457_s1 }
  0x1d   : > { %p8308_p3 = pnand %p6444_p0, %p444_p2  ;;  %s10831_s6 = sld [smem:[#allocation35_spill]] }
  0x1e   : > { %s10810_s16 = smov 128   ;;  %s10811_s15 = smov 8  }
  0x1f   : > { %s455_s0 = sshll.u32 %s10827_s2, 4  ;;  %p7214_p4 = pneg %p8308_p3  ;;  %s456_s0 = int_to_ptr.hbm [resolvable:$true] %s455_s0 }
  0x20   : > { %s8177_s2 = smov [#allocation8]   ;;  %s8180_s20 = smov [#allocation11]  }
  0x21   : > { %p8320_p6 = pnand %p7214_p4, %p62_p1  ;;  %s485_s17 = sshll.u32 %s8177_s2, 4  ;;  %s486_s17 = int_to_ptr.vmem [resolvable:$true] %s485_s17 }
  0x22   : > { %s483_s22 = sshll.u32 %s10829_s4, 4  ;;  %s513_s21 = sshll.u32 %s8180_s20, 4  ;;  %s484_s22 = int_to_ptr.hbm [resolvable:$true] %s483_s22  ;;  %s514_s21 = int_to_ptr.vmem [resolvable:$true] %s513_s21 }
  0x23   : > { %s511_s19 = sshll.u32 %s10831_s6, 4  ;;  %s10832_s8 = sld [smem:[#allocation37_spill]]  ;;  %s512_s19 = int_to_ptr.hbm [resolvable:$true] %s511_s19 }
  0x24   : > { %7217 = dma.hbm_to_vmem [thread:$0]  (!%p8320_p6), %s456_s0, 2048, %s458_s1, [#allocation6], %s10810_s16, %s10810_s16, %s10811_s15  }
  0x25   : > { %7223 = dma.hbm_to_vmem [thread:$0]  (!%p8320_p6), %s484_s22, 2048, %s486_s17, [#allocation9], %s10810_s16, %s10810_s16, %s10811_s15  }
  0x26   : > { %s8181_s4 = smov 64   ;;  %s8182_s6 = smov 4  }
  0x27   : > { %7229 = dma.hbm_to_vmem [thread:$0]  (!%p8320_p6), %s512_s19, 2048, %s514_s21, [#allocation12], %s8181_s4, %s8181_s4, %s8182_s6  }
  0x28   : > { %s8183_s0 = smov [#allocation14]   ;;  %s10833_s3 = sld [smem:[#allocation32_spill]] }
  0x29   : > { %s539_s29 = sshll.u32 %s10832_s8, 4  ;;  %s541_s1 = sshll.u32 %s8183_s0, 4  ;;  %s540_s29 = int_to_ptr.hbm [resolvable:$true] %s539_s29  ;;  %s542_s1 = int_to_ptr.vmem [resolvable:$true] %s541_s1 }
  0x2a   : > { %7235 = dma.hbm_to_vmem [thread:$0]  (!%p8320_p6), %s540_s29, 1024, %s542_s1, [#allocation15], %s8181_s4, %s8181_s4, %s8182_s6  }
  0x2b   : > { %s10834_s5 = sld [smem:[#allocation34_spill]]  ;;  %s8184_s19 = smov [#allocation7]  }
  0x2c   : > { %s471_s21 = sshll.u32 %s8184_s19, 4  ;;  %s8185_s11 = smov [#allocation10]   ;;  %s472_s21 = int_to_ptr.vmem [resolvable:$true] %s471_s21 }
  0x2d   : > { %s499_s0 = sshll.u32 %s8185_s11, 4  ;;  %s10835_s7 = sld [smem:[#allocation36_spill]]  ;;  %s500_s0 = int_to_ptr.vmem [resolvable:$true] %s499_s0 }
  0x2e   : > { %s469_s22 = sshll.u32 %s10833_s3, 4  ;;  %s562_s28 = sshll.u32 %s10801_s12, 4  ;;  %s470_s22 = int_to_ptr.hbm [resolvable:$true] %s469_s22  ;;  %s563_s28 = int_to_ptr.hbm [resolvable:$true] %s562_s28 }
  0x2f   : > { %7220 = dma.hbm_to_vmem [thread:$0]  (!%p8320_p6), %s470_s22, 2048, %s472_s21, [#allocation6], %s10810_s16, %s10810_s16, %s10811_s15  }
  0x30   : > { %s8186_s19 = smov [#allocation13]   ;;  %s8384_s17 = sadd.s32 1, %s8174_s27  }
  0x31   : > { %s497_s2 = sshll.u32 %s10834_s5, 4  ;;  %s527_s21 = sshll.u32 %s8186_s19, 4  ;;  %s498_s2 = int_to_ptr.hbm [resolvable:$true] %s497_s2  ;;  %s528_s21 = int_to_ptr.vmem [resolvable:$true] %s527_s21 }
  0x32   : > { %7226 = dma.hbm_to_vmem [thread:$0]  (!%p8320_p6), %s498_s2, 2048, %s500_s0, [#allocation9], %s10810_s16, %s10810_s16, %s10811_s15  }
  0x33   : > { %s525_s1 = sshll.u32 %s10835_s7, 4  ;;  %s8187_s2 = smov [#allocation16]   ;;  %s526_s1 = int_to_ptr.hbm [resolvable:$true] %s525_s1 }
  0x34   : > { %7232 = dma.hbm_to_vmem [thread:$0]  (!%p8320_p6), %s526_s1, 2048, %s528_s21, [#allocation12], %s8181_s4, %s8181_s4, %s8182_s6  }
  0x35   : > { %s564_s11 = sshll.u32 %s8187_s2, 4  ;;  %s6443_s0 = sadd.s32 4294967294, %s8174_s27   ;;  %s565_s11 = int_to_ptr.vmem [resolvable:$true] %s564_s11 }
  0x36   : > { %7238 = dma.hbm_to_vmem [thread:$0]  (!%p8320_p6), %s563_s28, 1024, %s565_s11, [#allocation15], %s8181_s4, %s8181_s4, %s8182_s6  }
  0x37   : > { %s45_s29 = ssub.s32 %s8174_s27, %s8384_s17  ;;  %s48_s20 = sadd.s32 1, %s8170_s26 }
  0x38   : > { %p46_p7 = scmp.eq.s32.totalorder %s45_s29, 0  ;;  %p55_p8 = scmp.ne.s32.totalorder %s8170_s26, %s8166_s25 }
  0x39   : > { %p56_p9 = scmp.eq.s32.totalorder %s8174_s27, 0  ;;  %p61_p10 = scmp.ne.s32.totalorder %s8166_s25, %s8162_s24 }
  0x3a   : > { %s8395_s1 = scalar_select %p46_p7, %s8170_s26, %s48_s20  }
  0x3b   : > { %p8397_p11 = por %p56_p9, %p55_p8  ;;  %p8403_p12 = por %p62_p1, %p61_p10 }
  0x3c   : > { %p405_p13 = scmp.eq.s32.totalorder %s8303_s30, 1  ;;  %p411_p0 = scmp.eq.s32.totalorder %s6443_s0, 1 }
  0x3d   : > { %p7258_p2 = scmp.lt.s32.totalorder %s8174_s27, 2  ;;  %s587_s6 = sand.u32 1, %s8170_s26  }
  0x3e   : > { %p8410_p4 = por %p405_p13, %p55_p8  ;;  %p8414_p6 = por %p411_p0, %p61_p10 }
  0x3f   : > { %s6454_s19 = sshll.u32 %s587_s6, 7  ;;  %s7047_s21 = sshll.u32 %s8174_s27, 7 }
  0x40   : > { %s10840_s29 = sld [smem:[#allocation29_spill]]  ;;  %s591_s16 = scalar_lea.vmem [#allocation2], %s6454_s19 }
  0x41   : > { %s600_s15 = sshll.u32 %s591_s16, 4  ;;  %p8424_p7 = pnand %p7258_p2, %p8397_p11  ;;  %s601_s15 = int_to_ptr.vmem [resolvable:$true] %s600_s15 }
  0x42   : > { %s588_s5 = scalar_lea.sflag [#allocation3], %s587_s6 }
  0x43   : > { %p8034_p9 = pneg %p8424_p7 }
  0x46   : > { %s597_s20 = scalar_lea.hbm %s10840_s29, %s7047_s21  ;;  %s8037_s21 = scalar_lea.hbm %s10840_s29, 256 }
  0x47   : > { %s598_s3 = sshll.u32 %s597_s20, 4  ;;  %s599_s3 = int_to_ptr.hbm [resolvable:$true] %s598_s3 }
  0x48   : > { %s8030_s7 = sshra.s32 %s599_s3, 4  ;;  %s8031_s7 = int_to_ptr.hbm [resolvable:$true] %s8030_s7 }
  0x49   : > { %s8032_s8 = scalar_lea.hbm %s8031_s7, 128  ;;  %p8038_p11 = scmp.lt.s32.totalorder %s8031_s7, %s10840_s29 }
  0x4a   : > { %p8033_p8 = scmp.ne.s32.totalorder %s8031_s7, %s8032_s8  ;;  %p8039_p0 = scmp.lt.s32.totalorder %s8037_s21, %s8032_s8 }
  0x4c   : > { %p8035_p10 = pnand %p8034_p9, %p8033_p8  ;;  %p8040_p2 = por %p8039_p0, %p8038_p11 }
  0x4e   : > { %p8036_p13 = pneg %p8035_p10 }
  0x50   : > { %p8041_p5 = pnand %p8040_p2, %p8036_p13 }
  0x52   : > { %8044 = shalt.err (!%p8041_p5)
}
  0x53   : > { %s10842_s6 = smov 8   ;;  %s10843_s11 = smov 128  }
  0x54   : > { %7242 = dma.hbm_to_vmem [thread:$0]  (!%p8424_p7), %s599_s3, 2048, %s601_s15, %s588_s5, %s10843_s11, %s10843_s11, %s10842_s6  }
  0x55   : > { %621 = sbr.rel (%p8308_p3) target bundleno = 3528 (0xdc8), region = 84 }
  0x5a   : > { %s8444_s20 = sand.u32 1, %s8166_s25  }
  0x5b   : > { %s6459_s7 = sshll.u32 %s8444_s20, 7  ;;  %s624_s8 = scalar_lea.sflag [#allocation3], %s8444_s20 }
  0x5c   : > { %s8448_s19 = scalar_lea.vmem [#allocation2], %s6459_s7 }
  0x5d   : > { %8133 = dma.done.wait (%p8403_p12), %s624_s8, 2048  }
  0x5e   : > { %8135 = vsyncadd (%p8403_p12), %s624_s8, 4294965248 }
  0x5f   : > { %8137 = dma.done.wait (%p62_p1), [#allocation6], 4096  }
  0x60   : > { %8139 = vsyncadd (%p62_p1), [#allocation6], 4294963200 }
  0x61   : > { %8141 = dma.done.wait (%p62_p1), [#allocation9], 4096  }
  0x62   : > { %8143 = vsyncadd (%p62_p1), [#allocation9], 4294963200 }
  0x63   : > { %8145 = dma.done.wait (%p62_p1), [#allocation12], 4096  }
  0x64   : > { %8147 = vsyncadd (%p62_p1), [#allocation12], 4294963200 }
  0x65   : > { %8149 = dma.done.wait (%p62_p1), [#allocation15], 2048  }
  0x66   : > { %8151 = vsyncadd (%p62_p1), [#allocation15], 4294965248  ;;  %v6530_v0 = vld [vmem:[#allocation5 + $0x70] sm:$0xf]  ;;  %v7063_v1 = vld [vmem:[#allocation5 + $0x74] sm:$0xf0] }
  0x67   : > { %v6522_v2 = vld [vmem:[#allocation5 + $0x60] sm:$0xf]  ;;  %v6531_v3 = vor.u32 %v7063_v1, %v6530_v0  ;;  %v7061_v4 = vld [vmem:[#allocation5 + $0x64] sm:$0xf0]  ;;  %v7078_v5 = vld [vmem:[#allocation7 + $0x74] sm:$0xf] }
  0x68   : > { %v6523_v6 = vor.u32 %v7061_v4, %v6522_v2  ;;  %v6514_v7 = vld [vmem:[#allocation5 + $0x50] sm:$0xf]  ;;  %v6596_v8 = vld [vmem:[#allocation7 + $0x78] sm:$0xf0]  ;;  %v7059_v9 = vld [vmem:[#allocation5 + $0x54] sm:$0xf0] }
  0x69   : > { %865 = vmatpush.bf16.msra.mxu0 %v6531_v3  ;;  %v6599_v10 = vor.u32 %v7078_v5, %v6596_v8  ;;  %v7076_v11 = vld [vmem:[#allocation7 + $0x64] sm:$0xf]  ;;  %v6588_v12 = vld [vmem:[#allocation7 + $0x68] sm:$0xf0]  ;;  %v6515_v14 = vor.u32 %v7059_v9, %v6514_v7  ;;  %v7074_v15 = vld [vmem:[#allocation7 + $0x54] sm:$0xf] }
  0x6a   : > { %v6591_v13 = vor.u32 %v7076_v11, %v6588_v12  ;;  %v6580_v16 = vld [vmem:[#allocation7 + $0x58] sm:$0xf0]  ;;  %v6506_v17 = vld [vmem:[#allocation5 + $0x40] sm:$0xf]  ;;  %v7057_v18 = vld [vmem:[#allocation5 + $0x44] sm:$0xf0] }
  0x6b   : > { %1092 = vmatpush.bf16.msra.mxu3 %v6599_v10  ;;  %v6583_v19 = vor.u32 %v7074_v15, %v6580_v16  ;;  %v6507_v20 = vor.u32 %v7057_v18, %v6506_v17  ;;  %v7072_v21 = vld [vmem:[#allocation7 + $0x44] sm:$0xf]  ;;  %v6572_v22 = vld [vmem:[#allocation7 + $0x48] sm:$0xf0]  ;;  %s8471_s3 = sshll.u32 %s8303_s30, 3  ;;  %s10844_s4 = sld [smem:[#allocation30_spill]] }
  0x6c   : > { %v6498_v23 = vld [vmem:[#allocation5 + $0x30] sm:$0xf]  ;;  %v7055_v24 = vld [vmem:[#allocation5 + $0x34] sm:$0xf0]  ;;  %v6575_v25 = vor.u32 %v7072_v21, %v6572_v22  ;;  %v7070_v27 = vld [vmem:[#allocation7 + $0x34] sm:$0xf] }
  0x6d   : > { %866 = vmatpush.bf16.msra.mxu0 %v6523_v6  ;;  %v6499_v26 = vor.u32 %v7055_v24, %v6498_v23  ;;  %v6564_v28 = vld [vmem:[#allocation7 + $0x38] sm:$0xf0]  ;;  %v6490_v29 = vld [vmem:[#allocation5 + $0x20] sm:$0xf]  ;;  %v7053_v30 = vld [vmem:[#allocation5 + $0x24] sm:$0xf0] }
  0x6e   : > { %p731_p1 = scmp.lt.s32.totalorder %s8471_s3, 15  ;;  %v6567_v31 = vor.u32 %v7070_v27, %v6564_v28  ;;  %v6491_v32 = vor.u32 %v7053_v30, %v6490_v29  ;;  %v7068_v33 = vld [vmem:[#allocation7 + $0x24] sm:$0xf]  ;;  %v6556_v34 = vld [vmem:[#allocation7 + $0x28] sm:$0xf0]  ;;  %v8497_v54 = vld [vmem:[%s8448_s19 + $0x10] sm:$0xff] }
  0x6f   : > { %1093 = vmatpush.bf16.msra.mxu3 %v6591_v13  ;;  %v6482_v35 = vld [vmem:[#allocation5 + $0x10] sm:$0xf]  ;;  %v7051_v36 = vld [vmem:[#allocation5 + $0x14] sm:$0xf0]  ;;  %v6559_v37 = vor.u32 %v7068_v33, %v6556_v34  ;;  %v7066_v39 = vld [vmem:[#allocation7 + $0x14] sm:$0xf] }
  0x70   : > { %s732_s5 = scalar_select %p731_p1, %s8471_s3, 15  ;;  %v6483_v38 = vor.u32 %v7051_v36, %v6482_v35  ;;  %v6548_v40 = vld [vmem:[#allocation7 + $0x18] sm:$0xf0]  ;;  %v6474_v41 = vld [vmem:[#allocation5] sm:$0xf]  ;;  %v8479_v46 = vld [vmem:[%s8448_s19 + $0x8] sm:$0xff] }
  0x71   : > { %867 = vmatpush.bf16.msra.mxu0 %v6515_v14  ;;  %v7049_v42 = vld [vmem:[#allocation5 + $0x4] sm:$0xf0]  ;;  %v8476_v43 = vld [vmem:[%s8448_s19] sm:$0xff]  ;;  %v6551_v44 = vor.u32 %v7066_v39, %v6548_v40  ;;  %v6540_v48 = vld [vmem:[#allocation7 + $0x8] sm:$0xf0]  ;;  %vm1297_vm0 = vcmask 130048  }
  0x72   : > { %s6471_s15 = sshll.u32 %s732_s5, 3  ;;  %v6475_v45 = vor.u32 %v7049_v42, %v6474_v41  ;;  %v7064_v47 = vld [vmem:[#allocation7 + $0x4] sm:$0xf]  ;;  %v8488_v49 = vpack.c.bf16 %v8479_v46, %v8476_v43  ;;  %v8500_v55 = vld [vmem:[%s8448_s19 + $0x18] sm:$0xff]  ;;  %v6594_v57 = vld [vmem:[#allocation7 + $0x70] sm:$0xf] }
  0x73   : > { %1094 = vmatpush.bf16.msra.mxu3 %v6583_v19  ;;  %s8484_s0 = scalar_lea.vmem %s10844_s4, %s6471_s15  ;;  %v6543_v50 = vor.u32 %v7064_v47, %v6540_v48  ;;  %v8504_v56 = vpack.c.bf16 %v8500_v55, %v8497_v54  ;;  %v7079_v58 = vld [vmem:[#allocation7 + $0x74] sm:$0xf0]  ;;  %v6586_v59 = vld [vmem:[#allocation7 + $0x60] sm:$0xf]  ;;  %v7077_v61 = vld [vmem:[#allocation7 + $0x64] sm:$0xf0] }
  0x74   : > { %v753_v51 = vld [vmem:[%s8484_s0] sm:$0xff]  ;;  %v754_v52 = vld [vmem:[%s8484_s0 + $0x8] sm:$0xff]  ;;  %v6595_v60 = vor.u32 %v7079_v58, %v6594_v57  ;;  %v755_v62 = vld [vmem:[%s8484_s0 + $0x10] sm:$0xff]  ;;  %v6587_v0 = vor.u32 %v7077_v61, %v6586_v59  ;;  %vm1770_vm1 = vcmask 64512   ;;  %vm1979_vm2 = vcmask 1043456   ;;  %s10891_s15 = sld [smem:[#allocation38_spill]] }
  0x75   : > { %868 = vmatpush.bf16.msra.mxu0 %v6507_v20  ;;  %v8492_v53 = vpack.c.bf16 %v754_v52, %v753_v51  ;;  %v756_v63 = vld [vmem:[%s8484_s0 + $0x18] sm:$0xff]  ;;  %v6578_v2 = vld [vmem:[#allocation7 + $0x50] sm:$0xf]  ;;  %v8513_v5 = vld [vmem:[%s8448_s19 + $0x20] sm:$0xff]  ;;  %s10892_s18 = sld [smem:[#allocation39_spill]]  ;;  %s6468_s4 = sshll.u32 %s8444_s20, 3 }
  0x76   : > { %1063 = vmatpush.bf16.msra.mxu2 %v6595_v60  ;;  %v8509_v1 = vpack.c.bf16 %v756_v63, %v755_v62  ;;  %v7075_v3 = vld [vmem:[#allocation7 + $0x54] sm:$0xf0]  ;;  %v8516_v6 = vld [vmem:[%s8448_s19 + $0x28] sm:$0xff]  ;;  %v6570_v8 = vld [vmem:[#allocation7 + $0x40] sm:$0xf]  ;;  %s10893_s2 = sld [smem:[#allocation40_spill]] }
  0x77   : > { %1095 = vmatpush.bf16.msra.mxu3 %v6575_v25  ;;  %v6579_v4 = vor.u32 %v7075_v3, %v6578_v2  ;;  %v8520_v7 = vpack.c.bf16 %v8516_v6, %v8513_v5  ;;  %v7073_v9 = vld [vmem:[#allocation7 + $0x44] sm:$0xf0]  ;;  %v6562_v11 = vld [vmem:[#allocation7 + $0x30] sm:$0xf]  ;;  %v7071_v12 = vld [vmem:[#allocation7 + $0x34] sm:$0xf0] }
  0x78   : > { %v6571_v10 = vor.u32 %v7073_v9, %v6570_v8  ;;  %v6563_v13 = vor.u32 %v7071_v12, %v6562_v11  ;;  %v6554_v14 = vld [vmem:[#allocation7 + $0x20] sm:$0xf]  ;;  %v7069_v15 = vld [vmem:[#allocation7 + $0x24] sm:$0xf0]  ;;  %v6546_v20 = vld [vmem:[#allocation7 + $0x10] sm:$0xf] }
  0x79   : > { %869 = vmatpush.bf16.msra.mxu0 %v6499_v26  ;;  %v757_v16 = vld [vmem:[%s8484_s0 + $0x20] sm:$0xff]  ;;  %v758_v17 = vld [vmem:[%s8484_s0 + $0x28] sm:$0xff]  ;;  %v6555_v19 = vor.u32 %v7069_v15, %v6554_v14  ;;  %v7067_v21 = vld [vmem:[#allocation7 + $0x14] sm:$0xf0]  ;;  %s721_s6 = scalar_lea.vmem [#allocation17], %s6468_s4 }
  0x7a   : > { %1064 = vmatpush.bf16.msra.mxu2 %v6587_v0  ;;  %v8525_v18 = vpack.c.bf16 %v758_v17, %v757_v16  ;;  %v6547_v22 = vor.u32 %v7067_v21, %v6546_v20  ;;  %v8529_v23 = vld [vmem:[%s8448_s19 + $0x30] sm:$0xff]  ;;  %v8532_v24 = vld [vmem:[%s8448_s19 + $0x38] sm:$0xff]  ;;  %v6538_v26 = vld [vmem:[#allocation7] sm:$0xf]  ;;  %s6235_s11 = sshll.u32 %s721_s6, 4  ;;  %s6236_s11 = int_to_ptr.vmem [resolvable:$true] %s6235_s11 }
  0x7b   : > { %1096 = vmatpush.bf16.msra.mxu3 %v6567_v31  ;;  %v8536_v25 = vpack.c.bf16 %v8532_v24, %v8529_v23  ;;  %v7065_v27 = vld [vmem:[#allocation7 + $0x4] sm:$0xf0]  ;;  %v8541_v29 = vld [vmem:[%s8448_s19 + $0x40] sm:$0xff]  ;;  %v760_v33 = vld [vmem:[%s8484_s0 + $0x38] sm:$0xff] }
  0x7c   : > { %10845 = vst [vmem:[#allocation27_spill] sm:$0xff] %v8525_v18  ;;  %v6539_v28 = vor.u32 %v7065_v27, %v6538_v26  ;;  %v8544_v30 = vld [vmem:[%s8448_s19 + $0x48] sm:$0xff]  ;;  %v8558_v35 = vld [vmem:[%s8448_s19 + $0x50] sm:$0xff]  ;;  %v8561_v36 = vld [vmem:[%s8448_s19 + $0x58] sm:$0xff]  ;;  %s6233_s23 = scalar_lea.hbm %s10893_s2, %s8471_s3  ;;  %s8080_s30 = scalar_lea.hbm %s10893_s2, 16 }
  0x7d   : > { %870 = vmatpush.bf16.msra.mxu0 %v6491_v32  ;;  %v8548_v31 = vpack.c.bf16 %v8544_v30, %v8541_v29  ;;  %v759_v32 = vld [vmem:[%s8484_s0 + $0x30] sm:$0xff]  ;;  %v8573_v39 = vld [vmem:[%s8448_s19 + $0x68] sm:$0xff]  ;;  %v8585_v42 = vld [vmem:[%s8448_s19 + $0x78] sm:$0xff]  ;;  %s10721_s7 = sshll.u32 %s6233_s23, 4  ;;  %s6238_s7 = int_to_ptr.hbm [resolvable:$true] %s10721_s7 }
  0x7e   : > { %1065 = vmatpush.bf16.msra.mxu2 %v6579_v4  ;;  %v8553_v34 = vpack.c.bf16 %v760_v33, %v759_v32  ;;  %v8582_v41 = vld [vmem:[%s8448_s19 + $0x70] sm:$0xff]  ;;  %s8074_s8 = sshra.s32 %s6238_s7, 4  ;;  %s8075_s8 = int_to_ptr.hbm [resolvable:$true] %s8074_s8 }
  0x7f   : > { %1097 = vmatpush.bf16.msra.mxu3 %v6559_v37  ;;  %v8565_v37 = vpack.c.bf16 %v8561_v36, %v8558_v35  ;;  %s8076_s5 = scalar_lea.hbm %s8075_s8, 8  ;;  %p8081_p7 = scmp.lt.s32.totalorder %s8075_s8, %s10893_s2 }
  0x80   : > { %10846 = vst [vmem:[#allocation28_spill] sm:$0xff] %v8553_v34  ;;  %p8077_p3 = scmp.ne.s32.totalorder %s8075_s8, %s8076_s5  ;;  %p8082_p8 = scmp.lt.s32.totalorder %s8080_s30, %s8076_s5 }
  0x81   : > { %871 = vmatpush.bf16.msra.mxu0 %v6483_v38  ;;  %v8570_v38 = vld [vmem:[%s8448_s19 + $0x60] sm:$0xff] }
  0x82   : > { %1066 = vmatpush.bf16.msra.mxu2 %v6571_v10  ;;  %v8577_v40 = vpack.c.bf16 %v8573_v39, %v8570_v38  ;;  %p8078_p5 = pnand %p8077_p3, %p8410_p4  ;;  %p8083_p9 = por %p8082_p8, %p8081_p7 }
  0x83   : > { %1098 = vmatpush.bf16.msra.mxu3 %v6551_v44  ;;  %v8589_v44 = vpack.c.bf16 %v8585_v42, %v8582_v41 }
  0x84   : > { %p8079_p12 = pneg %p8078_p5 }
  0x85   : > { %872 = vmatpush.bf16.msra.mxu0 %v6475_v45 }
  0x86   : > { %1067 = vmatpush.bf16.msra.mxu2 %v6563_v13  ;;  %p8084_p10 = pnand %p8083_p9, %p8079_p12 }
  0x87   : > { %1099 = vmatpush.bf16.msra.mxu3 %v6543_v50 }
  0x88   : > { %873 = vmatmul.bf16.vlgmr.msra.gmra.mxu0 %v8488_v49 }
  0x8a   : > { %1100 = vmatmul.bf16.vlgmr.msra.gmra.mxu3 %v8492_v53  ;;  %1068 = vmatpush.bf16.msra.mxu2 %v6555_v19 }
  0x8e   : > { %1069 = vmatpush.bf16.msra.mxu2 %v6547_v22 }
  0x92   : > { %1070 = vmatpush.bf16.msra.mxu2 %v6539_v28 }
  0x95   : > { %1071 = vmatmul.bf16.vlgmr.msra.gmra.mxu2 %v8492_v53 }
  0x98   : > { %878 = vmatmul.bf16.gmra.mxu0 %v8504_v56 }
  0x9a   : > { %1105 = vmatmul.bf16.gmra.mxu3 %v8509_v1 }
  0xa5   : > { %1076 = vmatmul.bf16.gmra.mxu2 %v8509_v1 }
  0xa8   : > { %883 = vmatmul.bf16.gmra.mxu0 %v8520_v7 }
  0xaa   : > { %1110 = vmatmul.bf16.gmra.mxu3 %v8525_v18 }
  0xb5   : > { %1081 = vmatmul.bf16.gmra.mxu2 %v8525_v18 }
  0xb8   : > { %888 = vmatmul.bf16.gmra.mxu0 %v8536_v25 }
  0xba   : > { %1115 = vmatmul.bf16.gmra.mxu3 %v8553_v34 }
  0xc5   : > { %1086 = vmatmul.bf16.gmra.mxu2 %v8553_v34 }
  0xc8   : > { %893 = vmatmul.bf16.gmra.mxu0 %v8548_v31 }
  0xd8   : > { %898 = vmatmul.bf16.gmra.mxu0 %v8565_v37 }
  0xe8   : > { %903 = vmatmul.bf16.gmra.mxu0 %v8577_v40 }
  0xf8   : > { %908 = vmatmul.bf16.gmra.mxu0 %v8589_v44 }
 0x105   : > { %v874_v45 = vpop.f32.mrf.mxu0 }
 0x106   : > { %v1129_v47 = vpack.c.bf16 %v874_v45, %v874_v45 }
 0x108   : > { %v1147_v51 = vunpack.c.l.b16 %v1129_v47 }
 0x10d   : > { %v876_v48 = vpop.f32.mrf.mxu0  ;;  %v1101_v58 = vpop.f32.mrf.mxu3 }
 0x10e   : > { %v1130_v50 = vpack.c.bf16 %v876_v48, %v876_v48  ;;  %v1121_v60 = vpack.c.bf16 %v1101_v58, %v1101_v58 }
 0x110   : > { %v1148_v52 = vunpack.c.l.b16 %v1130_v50 }
 0x112   : > { %v1149_v57 = vpack.c.b16 %v1148_v52, %v1147_v51 }
 0x114   : > { %1158 = vmatpush.bf16.xpose.msrb.mxu2 %v1149_v57 }
 0x115   : > { %v879_v59 = vpop.f32.mrf.mxu0  ;;  %v1103_v4 = vpop.f32.mrf.mxu3 }
 0x116   : > { %v1131_v61 = vpack.c.bf16 %v879_v59, %v879_v59  ;;  %v1122_v9 = vpack.c.bf16 %v1103_v4, %v1103_v4 }
 0x118   : > { %v1166_v0 = vunpack.c.l.b16 %v1131_v61  ;;  %v8592_v51 = vpop.f32.mrf.mxu2 }
 0x11b   : > { %1159 = vmatmul.bf16.vlgmr.msrb.gmra.mxu2 %v1121_v60 }
 0x11d   : > { %v881_v62 = vpop.f32.mrf.mxu0  ;;  %v1106_v17 = vpop.f32.mrf.mxu3 }
 0x11e   : > { %v1132_v63 = vpack.c.bf16 %v881_v62, %v881_v62  ;;  %v1123_v19 = vpack.c.bf16 %v1106_v17, %v1106_v17 }
 0x120   : > { %v1167_v2 = vunpack.c.l.b16 %v1132_v63  ;;  %v8594_v62 = vpop.f32.mrf.mxu2 }
 0x122   : > { %v1168_v3 = vpack.c.b16 %v1167_v2, %v1166_v0 }
 0x124   : > { %1177 = vmatpush.bf16.xpose.msrb.mxu3 %v1168_v3 }
 0x125   : > { %v884_v8 = vpop.f32.mrf.mxu0  ;;  %v1108_v32 = vpop.f32.mrf.mxu3 }
 0x126   : > { %v1133_v10 = vpack.c.bf16 %v884_v8, %v884_v8  ;;  %v1124_v45 = vpack.c.bf16 %v1108_v32, %v1108_v32 }
 0x128   : > { %v1185_v13 = vunpack.c.l.b16 %v1133_v10 }
 0x12b   : > { %1178 = vmatmul.bf16.vlgmr.msrb.gmra.mxu3 %v1122_v9  ;;  %v8596_v9 = vpop.f32.mrf.mxu2 }
 0x12d   : > { %v886_v11 = vpop.f32.mrf.mxu0  ;;  %v1111_v59 = vpop.f32.mrf.mxu3 }
 0x12e   : > { %v1134_v12 = vpack.c.bf16 %v886_v11, %v886_v11  ;;  %v1125_v61 = vpack.c.bf16 %v1111_v59, %v1111_v59 }
 0x130   : > { %v1186_v14 = vunpack.c.l.b16 %v1134_v12 }
 0x132   : > { %v1187_v15 = vpack.c.b16 %v1186_v14, %v1185_v13 }
 0x133   : > { %v8598_v14 = vpop.f32.mrf.mxu2 }
 0x134   : > { %1196 = vmatpush.bf16.xpose.msra.mxu2 %v1187_v15 }
 0x135   : > { %v889_v16 = vpop.f32.mrf.mxu0  ;;  %v1113_v11 = vpop.f32.mrf.mxu3 }
 0x136   : > { %v1135_v20 = vpack.c.bf16 %v889_v16, %v889_v16  ;;  %v1126_v12 = vpack.c.bf16 %v1113_v11, %v1113_v11 }
 0x138   : > { %v1204_v26 = vunpack.c.l.b16 %v1135_v20 }
 0x13b   : > { %1197 = vmatmul.bf16.vlgmr.msra.gmra.mxu2 %v1123_v19 }
 0x13d   : > { %v891_v21 = vpop.f32.mrf.mxu0 }
 0x13e   : > { %v1136_v22 = vpack.c.bf16 %v891_v21, %v891_v21 }
 0x140   : > { %v1205_v27 = vunpack.c.l.b16 %v1136_v22  ;;  %v1116_v22 = vpop.f32.mrf.mxu3 }
 0x142   : > { %v1206_v28 = vpack.c.b16 %v1205_v27, %v1204_v26  ;;  %v8600_v26 = vpop.f32.mrf.mxu2  ;;  %v1127_v27 = vpack.c.bf16 %v1116_v22, %v1116_v22 }
 0x144   : > { %1215 = vmatpush.bf16.xpose.msra.mxu3 %v1206_v28 }
 0x145   : > { %v894_v33 = vpop.f32.mrf.mxu0 }
 0x146   : > { %v1137_v47 = vpack.c.bf16 %v894_v33, %v894_v33 }
 0x148   : > { %v1223_v52 = vunpack.c.l.b16 %v1137_v47 }
 0x14b   : > { %1216 = vmatmul.bf16.vlgmr.msra.gmra.mxu3 %v1124_v45 }
 0x14d   : > { %v896_v48 = vpop.f32.mrf.mxu0 }
 0x14e   : > { %v1138_v50 = vpack.c.bf16 %v896_v48, %v896_v48  ;;  %v8602_v48 = vpop.f32.mrf.mxu2 }
 0x150   : > { %v1224_v57 = vunpack.c.l.b16 %v1138_v50 }
 0x152   : > { %v1225_v58 = vpack.c.b16 %v1224_v57, %v1223_v52  ;;  %v1118_v52 = vpop.f32.mrf.mxu3 }
 0x153   : > { %v1128_v57 = vpack.c.bf16 %v1118_v52, %v1118_v52 }
 0x154   : > { %1234 = vmatpush.bf16.xpose.msrb.mxu2 %v1225_v58 }
 0x155   : > { %v899_v60 = vpop.f32.mrf.mxu0 }
 0x156   : > { %v1139_v63 = vpack.c.bf16 %v899_v60, %v899_v60  ;;  %v8604_v58 = vpop.f32.mrf.mxu2 }
 0x158   : > { %v1242_v3 = vunpack.c.l.b16 %v1139_v63 }
 0x15b   : > { %1235 = vmatmul.bf16.vlgmr.msrb.gmra.mxu2 %v1125_v61 }
 0x15d   : > { %v901_v0 = vpop.f32.mrf.mxu0 }
 0x15e   : > { %v1140_v2 = vpack.c.bf16 %v901_v0, %v901_v0  ;;  %v8606_v59 = vpop.f32.mrf.mxu2 }
 0x160   : > { %v1243_v4 = vunpack.c.l.b16 %v1140_v2 }
 0x162   : > { %v1244_v8 = vpack.c.b16 %v1243_v4, %v1242_v3 }
 0x164   : > { %1253 = vmatpush.bf16.xpose.msrb.mxu3 %v1244_v8 }
 0x165   : > { %v904_v10 = vpop.f32.mrf.mxu0 }
 0x166   : > { %v1141_v13 = vpack.c.bf16 %v904_v10, %v904_v10 }
 0x168   : > { %v1261_v17 = vunpack.c.l.b16 %v1141_v13 }
 0x16b   : > { %1254 = vmatmul.bf16.vlgmr.msrb.gmra.mxu3 %v1126_v12 }
 0x16d   : > { %v906_v15 = vpop.f32.mrf.mxu0 }
 0x16e   : > { %v1142_v16 = vpack.c.bf16 %v906_v15, %v906_v15 }
 0x170   : > { %v1262_v19 = vunpack.c.l.b16 %v1142_v16 }
 0x172   : > { %v1263_v20 = vpack.c.b16 %v1262_v19, %v1261_v17  ;;  %v7062_v17 = vld [vmem:[#allocation5 + $0x74] sm:$0xf]  ;;  %v6532_v19 = vld [vmem:[#allocation5 + $0x78] sm:$0xf0] }
 0x174   : > { %1272 = vmatpush.bf16.xpose.msra.mxu2 %v1263_v20 }
 0x175   : > { %v909_v21 = vpop.f32.mrf.mxu0 }
 0x176   : > { %v1143_v28 = vpack.c.bf16 %v909_v21, %v909_v21  ;;  %v6535_v21 = vor.u32 %v7062_v17, %v6532_v19  ;;  %v7050_v19 = vld [vmem:[#allocation5 + $0x14] sm:$0xf] }
 0x178   : > { %v1280_v33 = vunpack.c.l.b16 %v1143_v28  ;;  %914 = vmatpush.bf16.msra.mxu1 %v6535_v21  ;;  %v6524_v28 = vld [vmem:[#allocation5 + $0x68] sm:$0xf0]  ;;  %v6484_v21 = vld [vmem:[#allocation5 + $0x18] sm:$0xf0] }
 0x17b   : > { %1273 = vmatmul.bf16.vlgmr.msra.gmra.mxu2 %v1127_v27  ;;  %v7060_v27 = vld [vmem:[#allocation5 + $0x64] sm:$0xf] }
 0x17d   : > { %v911_v32 = vpop.f32.mrf.mxu0 }
 0x17e   : > { %v1144_v45 = vpack.c.bf16 %v911_v32, %v911_v32  ;;  %v6527_v32 = vor.u32 %v7060_v27, %v6524_v28  ;;  %v6487_v27 = vor.u32 %v7050_v19, %v6484_v21  ;;  %v7048_v28 = vld [vmem:[#allocation5 + $0x4] sm:$0xf]  ;;  %v1395_v21 = vpack.c.bf16 %v8479_v46, %v8479_v46 }
 0x180   : > { %v1281_v47 = vunpack.c.l.b16 %v1144_v45  ;;  %915 = vmatpush.bf16.msra.mxu1 %v6527_v32  ;;  %v6516_v45 = vld [vmem:[#allocation5 + $0x58] sm:$0xf0]  ;;  %v6476_v32 = vld [vmem:[#allocation5 + $0x8] sm:$0xf0] }
 0x182   : > { %v1282_v50 = vpack.c.b16 %v1281_v47, %v1280_v33  ;;  %v7058_v33 = vld [vmem:[#allocation5 + $0x54] sm:$0xf] }
 0x184   : > { %1291 = vmatpush.bf16.xpose.msra.mxu3 %v1282_v50  ;;  %v6519_v50 = vor.u32 %v7058_v33, %v6516_v45  ;;  %v6479_v33 = vor.u32 %v7048_v28, %v6476_v32  ;;  %v1413_v32 = vunpack.c.l.b16 %v1395_v21  ;;  %v1403_v21 = vpack.c.bf16 %v8544_v30, %v8544_v30 }
 0x186   : > { %916 = vmatpush.bf16.msra.mxu1 %v6519_v50 }
 0x18b   : > { %1292 = vmatmul.bf16.vlgmr.msra.gmra.mxu3 %v1128_v57  ;;  %v7056_v57 = vld [vmem:[#allocation5 + $0x44] sm:$0xf] }
 0x19e   : > { %v8608_v60 = vpop.f32.mrf.mxu2 }
 0x19f   : > { %v1298_v61 = vsel %vm1297_vm0, %v8608_v60, -inf }
 0x1a0   : > { %1299 = vmax.xlane.f32.xlu0 %v1298_v61  ;;  %v6508_v61 = vld [vmem:[#allocation5 + $0x48] sm:$0xf0] }
 0x1a6   : > { %v1162_v63 = vpop.f32.mrf.mxu2 }
 0x1a7   : > { %v6511_v63 = vor.u32 %v7056_v57, %v6508_v61 }
 0x1a9   : > { %917 = vmatpush.bf16.msra.mxu1 %v6511_v63 }
 0x1ae   : > { %v8612_v0 = vpop.f32.mrf.mxu3 }
 0x1af   : > { %v1301_v2 = vsel %vm1297_vm0, %v8612_v0, -inf }
 0x1b0   : > { %1302 = vmax.xlane.f32.xlu0 %v1301_v2  ;;  %v7054_v2 = vld [vmem:[#allocation5 + $0x34] sm:$0xf] }
 0x1b6   : > { %v1181_v3 = vpop.f32.mrf.mxu3 }
 0x1b7   : > { %v6500_v3 = vld [vmem:[#allocation5 + $0x38] sm:$0xf0] }
 0x1be   : > { %v8616_v4 = vpop.f32.mrf.mxu2 }
 0x1bf   : > { %v1304_v16 = vsel %vm1297_vm0, %v8616_v4, -inf }
 0x1c6   : > { %v1200_v8 = vpop.f32.mrf.mxu2 }
 0x1c7   : > { %v6503_v8 = vor.u32 %v7054_v2, %v6500_v3 }
 0x1c9   : > { %918 = vmatpush.bf16.msra.mxu1 %v6503_v8 }
 0x1ce   : > { %v8618_v10 = vpop.f32.mrf.mxu3 }
 0x1cf   : > { %v1307_v52 = vsel %vm1297_vm0, %v8618_v10, -inf }
 0x1d6   : > { %v1219_v11 = vpop.f32.mrf.mxu3 }
 0x1de   : > { %v8620_v12 = vpop.f32.mrf.mxu2 }
 0x1df   : > { %v1310_v13 = vsel %vm1297_vm0, %v8620_v12, -inf }
 0x1e0   : > { %1311 = vmax.xlane.f32.xlu1 %v1310_v13 }
 0x1e6   : > { %v1238_v15 = vpop.f32.mrf.mxu2 }
 0x1e7   : > { %v7052_v15 = vld [vmem:[#allocation5 + $0x24] sm:$0xf] }
 0x1e8   : > { %1305 = vmax.xlane.f32.xlu1 %v1304_v16  ;;  %v6492_v16 = vld [vmem:[#allocation5 + $0x28] sm:$0xf0] }
 0x1e9   : > { %v6495_v17 = vor.u32 %v7052_v15, %v6492_v16 }
 0x1eb   : > { %919 = vmatpush.bf16.msra.mxu1 %v6495_v17 }
 0x1ee   : > { %v8626_v20 = vpop.f32.mrf.mxu3 }
 0x1ef   : > { %v1313_v22 = vsel %vm1297_vm0, %v8626_v20, -inf  ;;  %920 = vmatpush.bf16.msra.mxu1 %v6487_v27  ;;  %v1397_v27 = vpack.c.bf16 %v8500_v55, %v8500_v55 }
 0x1f0   : > { %1314 = vmax.xlane.f32.xlu2 %v1313_v22 }
 0x1f3   : > { %921 = vmatpush.bf16.msra.mxu1 %v6479_v33 }
 0x1f6   : > { %v1257_v47 = vpop.f32.mrf.mxu3  ;;  %922 = vmatmul.bf16.vlgmr.msra.gmra.mxu1 %v8488_v49 }
 0x1f8   : > { %1308 = vmax.xlane.f32.xlu2 %v1307_v52 }
 0x1fe   : > { %v8632_v11 = vpop.f32.mrf.mxu2 }
 0x1ff   : > { %v1316_v13 = vsel %vm1297_vm0, %v8632_v11, -inf }
 0x200   : > { %1317 = vmax.xlane.f32.xlu0 %v1316_v13 }
 0x206   : > { %v1276_v22 = vpop.f32.mrf.mxu2  ;;  %927 = vmatmul.bf16.gmra.mxu1 %v8504_v56 }
 0x207   : > { %v1396_v22 = vpack.c.bf16 %v8497_v54, %v8497_v54 }
 0x209   : > { %v1434_v33 = vunpack.c.l.b16 %v1396_v22 }
 0x20e   : > { %v8636_v45 = vpop.f32.mrf.mxu3 }
 0x20f   : > { %v1319_v47 = vsel %vm1297_vm0, %v8636_v45, -inf }
 0x210   : > { %1320 = vmax.xlane.f32.xlu1 %v1319_v47 }
 0x213   : > { %v1300_v50 = vpop.xlane.xlu0 %1299 }
 0x214   : > { %v1322_v52 = vsub.f32 %v8608_v60, %v1300_v50  ;;  %v1435_v50 = vunpack.c.l.b16 %v1397_v27 }
 0x216   : > { %v1330_v57 = vmul.f32 1.442695, %v1322_v52  ;;  %v1295_v61 = vpop.f32.mrf.mxu3  ;;  %932 = vmatmul.bf16.gmra.mxu1 %v8520_v7 }
 0x218   : > { %7317 = vpow2.f32 %v1330_v57  ;;  %v1436_v57 = vpack.c.b16 %v1435_v50, %v1434_v33  ;;  %v1404_v50 = vpack.c.bf16 %v8558_v35, %v8558_v35 }
 0x21a   : > { %1448 = vmatpush.bf16.msrb.mxu1 %v1436_v57  ;;  %v1522_v57 = vunpack.c.l.b16 %v1404_v50 }
 0x21e   : > { %v8642_v63 = vpop.eup %7317 }
 0x21f   : > { %v1346_v2 = vsel %vm1297_vm0, %v8642_v63, 0.0 }
 0x220   : > { %1347 = vadd.xlane.f32.xlu2 %v1346_v2 }
 0x223   : > { %v1303_v3 = vpop.xlane.xlu0 %1302 }
 0x224   : > { %v1323_v8 = vsub.f32 %v8612_v0, %v1303_v3  ;;  %v1394_v0 = vpack.c.bf16 %v8476_v43, %v8476_v43 }
 0x226   : > { %v1332_v13 = vmul.f32 1.442695, %v1323_v8  ;;  %937 = vmatmul.bf16.gmra.mxu1 %v8536_v25  ;;  %v1412_v28 = vunpack.c.l.b16 %v1394_v0  ;;  %v1402_v0 = vpack.c.bf16 %v8541_v29, %v8541_v29 }
 0x228   : > { %7319 = vpow2.f32 %v1332_v13  ;;  %v1414_v52 = vpack.c.b16 %v1413_v32, %v1412_v28  ;;  %v1500_v27 = vunpack.c.l.b16 %v1402_v0  ;;  %v1501_v28 = vunpack.c.l.b16 %v1403_v21 }
 0x22a   : > { %1426 = vmatpush.bf16.msrb.mxu0 %v1414_v52  ;;  %v1502_v33 = vpack.c.b16 %v1501_v28, %v1500_v27  ;;  %v1398_v27 = vpack.c.bf16 %v8513_v5, %v8513_v5  ;;  %v1399_v28 = vpack.c.bf16 %v8516_v6, %v8516_v6  ;;  %v1400_v5 = vpack.c.bf16 %v8529_v23, %v8529_v23 }
 0x22b   : > { %v1401_v6 = vpack.c.bf16 %v8532_v24, %v8532_v24 }
 0x22e   : > { %v8648_v15 = vpop.eup %7319  ;;  %1514 = vmatpush.bf16.msra.mxu0 %v1502_v33  ;;  %v1457_v33 = vunpack.c.l.b16 %v1399_v28 }
 0x22f   : > { %v1349_v60 = vsel %vm1297_vm0, %v8648_v15, 0.0 }
 0x230   : > { %1350 = vadd.xlane.f32.xlu0 %v1349_v60 }
 0x236   : > { %942 = vmatmul.bf16.gmra.mxu1 %v8548_v31 }
 0x246   : > { %947 = vmatmul.bf16.gmra.mxu1 %v8565_v37 }
 0x253   : > { %v1312_v16 = vpop.xlane.xlu1 %1311 }
 0x254   : > { %v1326_v17 = vsub.f32 %v8620_v12, %v1312_v16 }
 0x256   : > { %v1338_v19 = vmul.f32 1.442695, %v1326_v17  ;;  %952 = vmatmul.bf16.gmra.mxu1 %v8577_v40 }
 0x258   : > { %7321 = vpow2.f32 %v1338_v19 }
 0x25b   : > { %v1306_v47 = vpop.xlane.xlu1 %1305 }
 0x25c   : > { %v1324_v12 = vsub.f32 %v8616_v4, %v1306_v47 }
 0x25e   : > { %v8665_v61 = vpop.eup %7321  ;;  %v1334_v43 = vmul.f32 1.442695, %v1324_v12  ;;  %v1405_v12 = vpack.c.bf16 %v8561_v36, %v8561_v36 }
 0x25f   : > { %v1358_v46 = vsel %vm1297_vm0, %v8665_v61, 0.0 }
 0x260   : > { %7323 = vpow2.f32 %v1334_v43  ;;  %1359 = vadd.xlane.f32.xlu1 %v1358_v46  ;;  %v1523_v43 = vunpack.c.l.b16 %v1405_v12 }
 0x262   : > { %v1524_v46 = vpack.c.b16 %v1523_v43, %v1522_v57  ;;  %v1479_v57 = vunpack.c.l.b16 %v1401_v6 }
 0x263   : > { %v1315_v54 = vpop.xlane.xlu2 %1314 }
 0x264   : > { %v1327_v55 = vsub.f32 %v8626_v20, %v1315_v54  ;;  %1536 = vmatpush.bf16.msra.mxu1 %v1524_v46 }
 0x266   : > { %v8671_v2 = vpop.eup %7323  ;;  %v1340_v4 = vmul.f32 1.442695, %v1327_v55  ;;  %957 = vmatmul.bf16.gmra.mxu1 %v8589_v44 }
 0x267   : > { %v1352_v3 = vsel %vm1297_vm0, %v8671_v2, 0.0 }
 0x268   : > { %7325 = vpow2.f32 %v1340_v4  ;;  %1353 = vadd.xlane.f32.xlu2 %v1352_v3 }
 0x26b   : > { %v1309_v8 = vpop.xlane.xlu2 %1308 }
 0x26c   : > { %v1325_v13 = vsub.f32 %v8618_v10, %v1309_v8 }
 0x26e   : > { %v8676_v60 = vpop.eup %7325  ;;  %v1336_v16 = vmul.f32 1.442695, %v1325_v13  ;;  %v1602_v13 = vpack.c.bf16 %v8592_v51, %v8592_v51 }
 0x26f   : > { %v1361_v17 = vsel %vm1297_vm0, %v8676_v60, 0.0 }
 0x270   : > { %7327 = vpow2.f32 %v1336_v16  ;;  %1362 = vadd.xlane.f32.xlu0 %v1361_v17 }
 0x273   : > { %v1318_v20 = vpop.xlane.xlu0 %1317  ;;  %v8700_v54 = vpop.f32.mrf.mxu1 }
 0x274   : > { %v1328_v19 = vsub.f32 %v8632_v11, %v1318_v20 }
 0x276   : > { %v8686_v10 = vpop.eup %7327  ;;  %v1342_v22 = vmul.f32 1.442695, %v1328_v19 }
 0x277   : > { %v1355_v32 = vsel %vm1297_vm0, %v8686_v10, 0.0 }
 0x278   : > { %7329 = vpow2.f32 %v1342_v22  ;;  %1356 = vadd.xlane.f32.xlu1 %v1355_v32  ;;  %v1456_v32 = vunpack.c.l.b16 %v1398_v27  ;;  %v1604_v27 = vpack.c.bf16 %v8596_v9, %v8596_v9 }
 0x27b   : > { %v8706_v35 = vpop.f32.mrf.mxu1 }
 0x27e   : > { %v8690_v47 = vpop.eup %7329 }
 0x27f   : > { %v1364_v29 = vsel %vm1297_vm0, %v8690_v47, 0.0 }
 0x280   : > { %1365 = vadd.xlane.f32.xlu2 %v1364_v29  ;;  %v1458_v29 = vpack.c.b16 %v1457_v33, %v1456_v32 }
 0x282   : > { %1470 = vmatpush.bf16.msrb.mxu2 %v1458_v29 }
 0x283   : > { %v1321_v30 = vpop.xlane.xlu1 %1320  ;;  %v8712_v16 = vpop.f32.mrf.mxu1 }
 0x284   : > { %v1329_v11 = vsub.f32 %v8636_v45, %v1321_v30 }
 0x286   : > { %v1344_v52 = vmul.f32 1.442695, %v1329_v11 }
 0x288   : > { %7331 = vpow2.f32 %v1344_v52  ;;  %v1478_v52 = vunpack.c.l.b16 %v1400_v5 }
 0x28a   : > { %v1480_v46 = vpack.c.b16 %v1479_v57, %v1478_v52 }
 0x28b   : > { %v8714_v19 = vpop.f32.mrf.mxu1 }
 0x28c   : > { %1492 = vmatpush.bf16.msrb.mxu3 %v1480_v46  ;;  %v1589_v6 = vpack.c.bf16 %v8714_v19, %v8714_v19  ;;  %v1608_v19 = vpack.c.bf16 %v8604_v58, %v8604_v58 }
 0x28e   : > { %v8702_v55 = vpop.eup %7331 }
 0x28f   : > { %v1367_v4 = vsel %vm1297_vm0, %v8702_v55, 0.0 }
 0x290   : > { %1368 = vadd.xlane.f32.xlu0 %v1367_v4 }
 0x293   : > { %v1348_v45 = vpop.xlane.xlu2 %1347  ;;  %v8720_v51 = vpop.f32.mrf.mxu1 }
 0x294   : > { %7333 = vrcp.f32 %v1348_v45 }
 0x29a   : > { %v7334_v3 = vpop.eup %7333 }
 0x29b   : > { %v1378_v36 = vmul.f32 %v7334_v3, %v8642_v63  ;;  %v1603_v63 = vpack.c.bf16 %v8594_v62, %v8594_v62  ;;  %v8722_v22 = vpop.f32.mrf.mxu1  ;;  %v1407_v62 = vpack.c.bf16 %v8573_v39, %v8573_v39  ;;  %v1409_v39 = vpack.c.bf16 %v8585_v42, %v8585_v42 }
 0x29c   : > { %v1606_v42 = vpack.c.bf16 %v8600_v26, %v8600_v26 }
 0x29d   : > { %v1386_v8 = vpack.c.bf16 %v1378_v36, %v1378_v36  ;;  %v1545_v11 = vunpack.c.l.b16 %v1407_v62  ;;  %v1567_v3 = vunpack.c.l.b16 %v1409_v39  ;;  %v1633_v39 = vunpack.c.l.b16 %v1589_v6 }
 0x29f   : > { %6600 = vmatmul.msk.bf16.vlgmr.msrb.gmra.mxu0 %vm1297_vm0, %v1386_v8 }
 0x2a0   : > { %1623 = vmatpush.bf16.xpose.msrb.mxu0 %v1602_v13 }
 0x2a3   : > { %v1351_v17 = vpop.xlane.xlu0 %1350  ;;  %v8732_v12 = vpop.f32.mrf.mxu1 }
 0x2a4   : > { %7335 = vrcp.f32 %v1351_v17 }
 0x2aa   : > { %v7336_v20 = vpop.eup %7335 }
 0x2ab   : > { %v1379_v0 = vmul.f32 %v7336_v20, %v8648_v15  ;;  %v1406_v15 = vpack.c.bf16 %v8570_v38, %v8570_v38  ;;  %v1408_v38 = vpack.c.bf16 %v8582_v41, %v8582_v41  ;;  %v8742_v43 = vpop.f32.mrf.mxu1 }
 0x2ad   : > { %v1387_v21 = vpack.c.bf16 %v1379_v0, %v1379_v0  ;;  %v1544_v30 = vunpack.c.l.b16 %v1406_v15  ;;  %v1566_v45 = vunpack.c.l.b16 %v1408_v38 }
 0x2af   : > { %6601 = vmatmul.msk.bf16.vlgmr.msrb.gmra.mxu1 %vm1297_vm0, %v1387_v21  ;;  %v1546_v50 = vpack.c.b16 %v1545_v11, %v1544_v30  ;;  %v1568_v23 = vpack.c.b16 %v1567_v3, %v1566_v45  ;;  %v1586_v21 = vpack.c.bf16 %v8700_v54, %v8700_v54 }
 0x2b0   : > { %1643 = vmatpush.bf16.xpose.msrb.mxu1 %v1603_v63 }
 0x2b1   : > { %1558 = vmatpush.bf16.msra.mxu2 %v1546_v50  ;;  %1580 = vmatpush.bf16.msra.mxu3 %v1568_v23  ;;  %v1612_v26 = vunpack.c.l.b16 %v1586_v21 }
 0x2b3   : > { %v943_v13 = vpop.f32.mrf.mxu1 }
 0x2b4   : > { %v1594_v50 = vpack.c.bf16 %v943_v13, %v943_v13  ;;  %v1590_v13 = vpack.c.bf16 %v8720_v51, %v8720_v51  ;;  %v1592_v51 = vpack.c.bf16 %v8732_v12, %v8732_v12 }
 0x2b6   : > { %v1692_v57 = vunpack.c.l.b16 %v1594_v50 }
 0x2bb   : > { %v945_v28 = vpop.f32.mrf.mxu1 }
 0x2bc   : > { %v1595_v5 = vpack.c.bf16 %v945_v28, %v945_v28 }
 0x2be   : > { %v1693_v38 = vunpack.c.l.b16 %v1595_v5 }
 0x2c0   : > { %v1694_v3 = vpack.c.b16 %v1693_v38, %v1692_v57 }
 0x2c3   : > { %v948_v9 = vpop.f32.mrf.mxu1 }
 0x2d3   : > { %v1360_v4 = vpop.xlane.xlu1 %1359 }
 0x2d4   : > { %7337 = vrcp.f32 %v1360_v4  ;;  %v950_v4 = vpop.f32.mrf.mxu1 }
 0x2da   : > { %v7338_v36 = vpop.eup %7337 }
 0x2db   : > { %v1382_v24 = vmul.f32 %v7338_v36, %v8665_v61  ;;  %v1354_v8 = vpop.xlane.xlu2 %1353  ;;  %v1587_v61 = vpack.c.bf16 %v8706_v35, %v8706_v35  ;;  %v1607_v35 = vpack.c.bf16 %v8602_v48, %v8602_v48  ;;  %v1605_v48 = vpack.c.bf16 %v8598_v14, %v8598_v14 }
 0x2dc   : > { %7339 = vrcp.f32 %v1354_v8  ;;  %v1596_v36 = vpack.c.bf16 %v948_v9, %v948_v9  ;;  %v953_v8 = vpop.f32.mrf.mxu1 }
 0x2dd   : > { %v1390_v41 = vpack.c.bf16 %v1382_v24, %v1382_v24  ;;  %v1613_v32 = vunpack.c.l.b16 %v1587_v61  ;;  %v1597_v24 = vpack.c.bf16 %v950_v4, %v950_v4 }
 0x2df   : > { %6604 = vmatmul.msk.bf16.vlgmr.msra.gmra.mxu0 %vm1297_vm0, %v1390_v41  ;;  %v1614_v62 = vpack.c.b16 %v1613_v32, %v1612_v26  ;;  %v1712_v41 = vunpack.c.l.b16 %v1596_v36  ;;  %v1598_v26 = vpack.c.bf16 %v953_v8, %v953_v8  ;;  %v1672_v32 = vunpack.c.l.b16 %v1592_v51 }
 0x2e0   : > { %1703 = vmatpush.bf16.xpose.msra.mxu0 %v1606_v42  ;;  %v1713_v42 = vunpack.c.l.b16 %v1597_v24 }
 0x2e2   : > { %v7340_v17 = vpop.eup %7339  ;;  %v1714_v21 = vpack.c.b16 %v1713_v42, %v1712_v41 }
 0x2e3   : > { %v1380_v20 = vmul.f32 %v7340_v17, %v8671_v2  ;;  %v1363_v0 = vpop.xlane.xlu0 %1362  ;;  %v1652_v17 = vunpack.c.l.b16 %v1590_v13 }
 0x2e4   : > { %7341 = vrcp.f32 %v1363_v0  ;;  %v955_v28 = vpop.f32.mrf.mxu1 }
 0x2e5   : > { %v1388_v63 = vpack.c.bf16 %v1380_v20, %v1380_v20 }
 0x2e7   : > { %6602 = vmatmul.msk.bf16.vlgmr.msrb.gmra.mxu2 %vm1297_vm0, %v1388_v63 }
 0x2e8   : > { %1663 = vmatpush.bf16.xpose.msrb.mxu2 %v1604_v27  ;;  %v1609_v27 = vpack.c.bf16 %v8606_v59, %v8606_v59 }
 0x2ea   : > { %v7342_v33 = vpop.eup %7341 }
 0x2eb   : > { %v1383_v2 = vmul.f32 %v7342_v33, %v8676_v60  ;;  %v1357_v15 = vpop.xlane.xlu1 %1356  ;;  %v1588_v60 = vpack.c.bf16 %v8712_v16, %v8712_v16 }
 0x2ec   : > { %7343 = vrcp.f32 %v1357_v15 }
 0x2ed   : > { %v1391_v54 = vpack.c.bf16 %v1383_v2, %v1383_v2  ;;  %v1732_v2 = vunpack.c.l.b16 %v1598_v26 }
 0x2ef   : > { %6605 = vmatmul.msk.bf16.vlgmr.msra.gmra.mxu1 %vm1297_vm0, %v1391_v54  ;;  %1624 = vmatmul.bf16.vlgmr.msrb.gmra.mxu0 %v1614_v62  ;;  %v958_v62 = vpop.f32.mrf.mxu1 }
 0x2f0   : > { %1723 = vmatpush.bf16.xpose.msra.mxu1 %v1607_v35 }
 0x2f2   : > { %v7344_v29 = vpop.eup %7343 }
 0x2f3   : > { %v1381_v30 = vmul.f32 %v7344_v29, %v8686_v10  ;;  %v1366_v11 = vpop.xlane.xlu2 %1365  ;;  %v1632_v10 = vunpack.c.l.b16 %v1588_v60  ;;  %v1600_v29 = vpack.c.bf16 %v958_v62, %v958_v62 }
 0x2f4   : > { %7345 = vrcp.f32 %v1366_v11 }
 0x2f5   : > { %v1389_v52 = vpack.c.bf16 %v1381_v30, %v1381_v30  ;;  %v1634_v16 = vpack.c.b16 %v1633_v39, %v1632_v10  ;;  %v1752_v11 = vunpack.c.l.b16 %v1600_v29 }
 0x2f7   : > { %6603 = vmatmul.msk.bf16.vlgmr.msrb.gmra.mxu3 %vm1297_vm0, %v1389_v52  ;;  %v960_v9 = vpop.f32.mrf.mxu1 }
 0x2f8   : > { %1683 = vmatpush.bf16.xpose.msrb.mxu3 %v1605_v48  ;;  %v1601_v30 = vpack.c.bf16 %v960_v9, %v960_v9 }
 0x2fa   : > { %v7346_v46 = vpop.eup %7345  ;;  %v1753_v50 = vunpack.c.l.b16 %v1601_v30 }
 0x2fb   : > { %v1384_v45 = vmul.f32 %v7346_v46, %v8690_v47  ;;  %v1591_v47 = vpack.c.bf16 %v8722_v22, %v8722_v22  ;;  %v1593_v22 = vpack.c.bf16 %v8742_v43, %v8742_v43 }
 0x2fc   : > { %v1754_v43 = vpack.c.b16 %v1753_v50, %v1752_v11 }
 0x2fd   : > { %v1392_v23 = vpack.c.bf16 %v1384_v45, %v1384_v45  ;;  %v1653_v58 = vunpack.c.l.b16 %v1591_v47  ;;  %v1673_v33 = vunpack.c.l.b16 %v1593_v22 }
 0x2ff   : > { %6606 = vmatmul.msk.bf16.vlgmr.msra.gmra.mxu2 %vm1297_vm0, %v1392_v23  ;;  %1644 = vmatmul.bf16.vlgmr.msrb.gmra.mxu1 %v1634_v16  ;;  %v1654_v61 = vpack.c.b16 %v1653_v58, %v1652_v17  ;;  %v1674_v59 = vpack.c.b16 %v1673_v33, %v1672_v32 }
 0x300   : > { %1743 = vmatpush.bf16.xpose.msra.mxu2 %v1608_v19  ;;  %1704 = vmatmul.bf16.vlgmr.msra.gmra.mxu0 %v1694_v3 }
 0x303   : > { %v1369_v14 = vpop.xlane.xlu0 %1368 }
 0x304   : > { %7347 = vrcp.f32 %v1369_v14 }
 0x30a   : > { %v7348_v20 = vpop.eup %7347 }
 0x30b   : > { %v1385_v0 = vmul.f32 %v7348_v20, %v8702_v55  ;;  %v1599_v55 = vpack.c.bf16 %v955_v28, %v955_v28 }
 0x30d   : > { %v1393_v63 = vpack.c.bf16 %v1385_v0, %v1385_v0  ;;  %v1733_v15 = vunpack.c.l.b16 %v1599_v55 }
 0x30f   : > { %6607 = vmatmul.msk.bf16.vlgmr.msra.gmra.mxu3 %vm1297_vm0, %v1393_v63  ;;  %1664 = vmatmul.bf16.vlgmr.msrb.gmra.mxu2 %v1654_v61  ;;  %v1734_v54 = vpack.c.b16 %v1733_v15, %v1732_v2 }
 0x310   : > { %1763 = vmatpush.bf16.xpose.msra.mxu3 %v1609_v27  ;;  %1724 = vmatmul.bf16.vlgmr.msra.gmra.mxu1 %v1714_v21 }
 0x31c   : > { %v8784_v35 = vpop.f32.mrf.mxu0 }
 0x31f   : > { %1684 = vmatmul.bf16.vlgmr.msrb.gmra.mxu3 %v1674_v59  ;;  %1744 = vmatmul.bf16.vlgmr.msra.gmra.mxu2 %v1734_v54 }
 0x324   : > { %v1430_v12 = vpop.f32.mrf.mxu0 }
 0x32c   : > { %v8786_v5 = vpop.f32.mrf.mxu1 }
 0x32d   : > { %v8790_v60 = vpack.c.bf16 %v8786_v5, %v8784_v35 }
 0x32f   : > { %1764 = vmatmul.bf16.vlgmr.msra.gmra.mxu3 %v1754_v43 }
 0x334   : > { %v1452_v6 = vpop.f32.mrf.mxu1 }
 0x35c   : > { %v8792_v52 = vpop.f32.mrf.mxu0 }
 0x364   : > { %v1518_v48 = vpop.f32.mrf.mxu0 }
 0x36a   : > { %v8794_v57 = vpop.f32.mrf.mxu2 }
 0x36c   : > { %v8796_v38 = vpop.f32.mrf.mxu1  ;;  %v1625_v10 = vpop.f32.mrf.mxu0 }
 0x36d   : > { %v8800_v39 = vpack.c.bf16 %v8796_v38, %v8792_v52  ;;  %v1771_v46 = vsel %vm1770_vm1, %v1625_v10, -inf }
 0x36e   : > { %1772 = vmax.xlane.f32.xlu1 %v1771_v46 }
 0x372   : > { %v1474_v4 = vpop.f32.mrf.mxu2 }
 0x374   : > { %v1540_v45 = vpop.f32.mrf.mxu1  ;;  %v1627_v3 = vpop.f32.mrf.mxu0 }
 0x375   : > { %v1774_v16 = vsel %vm1770_vm1, %v1627_v3, -inf }
 0x376   : > { %1775 = vmax.xlane.f32.xlu2 %v1774_v16 }
 0x37a   : > { %v8804_v23 = vpop.f32.mrf.mxu3 }
 0x37b   : > { %v8808_v19 = vpack.c.bf16 %v8804_v23, %v8794_v57 }
 0x37c   : > { %v1645_v14 = vpop.f32.mrf.mxu1 }
 0x37d   : > { %v1777_v36 = vsel %vm1770_vm1, %v1645_v14, -inf  ;;  %v8827_v22 = vpop.f32.mrf.mxu0 }
 0x37e   : > { %1778 = vmax.xlane.f32.xlu0 %v1777_v36  ;;  %v1795_v26 = vsel %vm1770_vm1, %v8827_v22, -inf }
 0x382   : > { %v1496_v24 = vpop.f32.mrf.mxu3  ;;  %v8811_v8 = vpop.f32.mrf.mxu2 }
 0x384   : > { %v1647_v13 = vpop.f32.mrf.mxu1 }
 0x385   : > { %v1780_v47 = vsel %vm1770_vm1, %v1647_v13, -inf  ;;  %v8835_v29 = vpop.f32.mrf.mxu0 }
 0x386   : > { %1781 = vmax.xlane.f32.xlu1 %v1780_v47  ;;  %v1798_v50 = vsel %vm1770_vm1, %v8835_v29, -inf }
 0x38a   : > { %v1562_v41 = vpop.f32.mrf.mxu2 }
 0x392   : > { %v8814_v42 = vpop.f32.mrf.mxu3  ;;  %v1665_v17 = vpop.f32.mrf.mxu2 }
 0x393   : > { %v8818_v58 = vpack.c.bf16 %v8814_v42, %v8811_v8  ;;  %v1783_v20 = vsel %vm1770_vm1, %v1665_v17, -inf }
 0x394   : > { %1784 = vmax.xlane.f32.xlu2 %v1783_v20 }
 0x39a   : > { %v1584_v0 = vpop.f32.mrf.mxu3  ;;  %v1667_v21 = vpop.f32.mrf.mxu2 }
 0x39b   : > { %v1786_v61 = vsel %vm1770_vm1, %v1667_v21, -inf }
 0x39c   : > { %1787 = vmax.xlane.f32.xlu0 %v1786_v61 }
 0x3a2   : > { %v1685_v63 = vpop.f32.mrf.mxu3 }
 0x3a3   : > { %v1789_v27 = vsel %vm1770_vm1, %v1685_v63, -inf }
 0x3a4   : > { %1790 = vmax.xlane.f32.xlu1 %v1789_v27 }
 0x3aa   : > { %v8823_v28 = vpop.f32.mrf.mxu3 }
 0x3ab   : > { %v1792_v51 = vsel %vm1770_vm1, %v8823_v28, -inf }
 0x3ac   : > { %1793 = vmax.xlane.f32.xlu2 %v1792_v51 }
 0x3b4   : > { %1796 = vmax.xlane.f32.xlu2 %v1795_v26 }
 0x3e1   : > { %v1773_v55 = vpop.xlane.xlu1 %1772 }
 0x3e2   : > { %v1819_v32 = vsub.f32 %v1625_v10, %v1773_v55 }
 0x3e4   : > { %v1835_v33 = vmul.f32 1.442695, %v1819_v32 }
 0x3e6   : > { %7349 = vpow2.f32 %v1835_v33 }
 0x3e9   : > { %v1776_v2 = vpop.xlane.xlu2 %1775 }
 0x3ea   : > { %v1820_v15 = vsub.f32 %v1627_v3, %v1776_v2 }
 0x3ec   : > { %v8831_v62 = vpop.eup %7349  ;;  %v1837_v59 = vmul.f32 1.442695, %v1820_v15 }
 0x3ed   : > { %v1867_v54 = vsel %vm1770_vm1, %v8831_v62, 0.0 }
 0x3ee   : > { %7351 = vpow2.f32 %v1837_v59  ;;  %1868 = vadd.xlane.f32.xlu0 %v1867_v54  ;;  %v8873_v59 = vpop.f32.mrf.mxu3 }
 0x3ef   : > { %v1813_v54 = vsel %vm1770_vm1, %v8873_v59, -inf }
 0x3f1   : > { %v1779_v9 = vpop.xlane.xlu0 %1778 }
 0x3f2   : > { %v1821_v30 = vsub.f32 %v1645_v14, %v1779_v9  ;;  %v8851_v14 = vpop.f32.mrf.mxu2 }
 0x3f4   : > { %v8837_v12 = vpop.eup %7351  ;;  %v1839_v11 = vmul.f32 1.442695, %v1821_v30 }
 0x3f5   : > { %v1870_v43 = vsel %vm1770_vm1, %v8837_v12, 0.0 }
 0x3f6   : > { %7353 = vpow2.f32 %v1839_v11  ;;  %1799 = vmax.xlane.f32.xlu0 %v1798_v50  ;;  %1871 = vadd.xlane.f32.xlu1 %v1870_v43  ;;  %v1807_v50 = vsel %vm1770_vm1, %v8851_v14, -inf }
 0x3f9   : > { %v1782_v6 = vpop.xlane.xlu1 %1781 }
 0x3fa   : > { %v1822_v48 = vsub.f32 %v1647_v13, %v1782_v6  ;;  %v8853_v13 = vpop.f32.mrf.mxu1  ;;  %v8859_v61 = vpop.f32.mrf.mxu2 }
 0x3fb   : > { %v1801_v47 = vsel %vm1770_vm1, %v8853_v13, -inf }
 0x3fc   : > { %v8843_v10 = vpop.eup %7353  ;;  %v1841_v46 = vmul.f32 1.442695, %v1822_v48  ;;  %v8884_v48 = vpop.f32.mrf.mxu3 }
 0x3fd   : > { %v1873_v4 = vsel %vm1770_vm1, %v8843_v10, 0.0 }
 0x3fe   : > { %7355 = vpow2.f32 %v1841_v46  ;;  %1874 = vadd.xlane.f32.xlu1 %v1873_v4 }
 0x402   : > { %v8865_v55 = vpop.f32.mrf.mxu1 }
 0x403   : > { %v1804_v2 = vsel %vm1770_vm1, %v8865_v55, -inf }
 0x404   : > { %v8847_v45 = vpop.eup %7355 }
 0x405   : > { %v1876_v3 = vsel %vm1770_vm1, %v8847_v45, 0.0 }
 0x406   : > { %1877 = vadd.xlane.f32.xlu2 %v1876_v3 }
 0x407   : > { %v1785_v16 = vpop.xlane.xlu2 %1784 }
 0x408   : > { %v1823_v36 = vsub.f32 %v1665_v17, %v1785_v16  ;;  %v1810_v17 = vsel %vm1770_vm1, %v8859_v61, -inf  ;;  %v1816_v16 = vsel %vm1770_vm1, %v8884_v48, -inf }
 0x40a   : > { %v1843_v24 = vmul.f32 1.442695, %v1823_v36 }
 0x40c   : > { %7357 = vpow2.f32 %v1843_v24 }
 0x40e   : > { %1802 = vmax.xlane.f32.xlu2 %v1801_v47 }
 0x40f   : > { %v1788_v41 = vpop.xlane.xlu0 %1787 }
 0x410   : > { %v1824_v20 = vsub.f32 %v1667_v21, %v1788_v41 }
 0x412   : > { %v8857_v0 = vpop.eup %7357  ;;  %v1845_v27 = vmul.f32 1.442695, %v1824_v20 }
 0x413   : > { %v1879_v51 = vsel %vm1770_vm1, %v8857_v0, 0.0 }
 0x414   : > { %7359 = vpow2.f32 %v1845_v27  ;;  %1880 = vadd.xlane.f32.xlu0 %v1879_v51  ;;  %v7740_v27 = vld [vmem:[%s8484_s0 + $0x8] sm:$0xff] }
 0x415   : > { %v1964_v51 = vpack.c.bf16 %v7740_v27, %v7740_v27 }
 0x416   : > { %1811 = vmax.xlane.f32.xlu2 %v1810_v17 }
 0x417   : > { %v1791_v26 = vpop.xlane.xlu1 %1790  ;;  %v2006_v17 = vsel %vm1979_vm2, %v1964_v51, 0 }
 0x418   : > { %v1825_v32 = vsub.f32 %v1685_v63, %v1791_v26  ;;  %2015 = vmatpush.bf16.msrb.mxu1 %v2006_v17 }
 0x41a   : > { %v8867_v33 = vpop.eup %7359  ;;  %v1847_v21 = vmul.f32 1.442695, %v1825_v32 }
 0x41b   : > { %v1882_v15 = vsel %vm1770_vm1, %v8867_v33, 0.0 }
 0x41c   : > { %7361 = vpow2.f32 %v1847_v21  ;;  %1805 = vmax.xlane.f32.xlu0 %v1804_v2  ;;  %1883 = vadd.xlane.f32.xlu1 %v1882_v15 }
 0x41e   : > { %1814 = vmax.xlane.f32.xlu2 %v1813_v54 }
 0x41f   : > { %v1794_v9 = vpop.xlane.xlu2 %1793 }
 0x420   : > { %v1826_v63 = vsub.f32 %v8823_v28, %v1794_v9 }
 0x422   : > { %v8878_v30 = vpop.eup %7361  ;;  %v1849_v11 = vmul.f32 1.442695, %v1826_v63 }
 0x423   : > { %v1885_v43 = vsel %vm1770_vm1, %v8878_v30, 0.0 }
 0x424   : > { %7363 = vpow2.f32 %v1849_v11  ;;  %1808 = vmax.xlane.f32.xlu1 %v1807_v50  ;;  %1886 = vadd.xlane.f32.xlu0 %v1885_v43 }
 0x427   : > { %v1797_v6 = vpop.xlane.xlu2 %1796 }
 0x428   : > { %v1827_v46 = vsub.f32 %v8827_v22, %v1797_v6  ;;  %v7739_v22 = vld [vmem:[%s8484_s0] sm:$0xff] }
 0x429   : > { %v1963_v47 = vpack.c.bf16 %v7739_v22, %v7739_v22 }
 0x42a   : > { %v8887_v4 = vpop.eup %7363  ;;  %v1851_v28 = vmul.f32 1.442695, %v1827_v46 }
 0x42b   : > { %v1888_v3 = vsel %vm1770_vm1, %v8887_v4, 0.0  ;;  %v1981_v41 = vsel %vm1979_vm2, %v1963_v47, 0 }
 0x42c   : > { %7365 = vpow2.f32 %v1851_v28  ;;  %1889 = vadd.xlane.f32.xlu1 %v1888_v3  ;;  %1817 = vmax.xlane.f32.xlu0 %v1816_v16 }
 0x42d   : > { %1990 = vmatpush.bf16.msrb.mxu0 %v1981_v41 }
 0x432   : > { %v8893_v36 = vpop.eup %7365 }
 0x433   : > { %v1891_v24 = vsel %vm1770_vm1, %v8893_v36, 0.0 }
 0x434   : > { %1892 = vadd.xlane.f32.xlu1 %v1891_v24  ;;  %v7741_v24 = vld [vmem:[%s8484_s0 + $0x10] sm:$0xff] }
 0x435   : > { %v1965_v22 = vpack.c.bf16 %v7741_v24, %v7741_v24 }
 0x461   : > { %v1869_v20 = vpop.xlane.xlu0 %1868 }
 0x462   : > { %7367 = vrcp.f32 %v1869_v20 }
 0x468   : > { %v7368_v21 = vpop.eup %7367 }
 0x469   : > { %v1800_v26 = vpop.xlane.xlu0 %1799  ;;  %v1872_v32 = vpop.xlane.xlu1 %1871  ;;  %v1931_v54 = vmul.f32 %v7368_v21, %v8831_v62 }
 0x46a   : > { %v1828_v2 = vsub.f32 %v8835_v29, %v1800_v26  ;;  %7369 = vrcp.f32 %v1872_v32 }
 0x46b   : > { %v1947_v63 = vpack.c.bf16 %v1931_v54, %v1931_v54 }
 0x46c   : > { %v1853_v15 = vmul.f32 1.442695, %v1828_v2 }
 0x46d   : > { %v1973_v46 = vunpack.c.l.b16 %v1947_v63  ;;  %v7742_v63 = vld [vmem:[%s8484_s0 + $0x18] sm:$0xff] }
 0x46e   : > { %7371 = vpow2.f32 %v1853_v15 }
 0x470   : > { %v7370_v9 = vpop.eup %7369 }
 0x471   : > { %v1932_v11 = vmul.f32 %v7370_v9, %v8837_v12  ;;  %v1875_v50 = vpop.xlane.xlu1 %1874  ;;  %v2031_v12 = vsel %vm1979_vm2, %v1965_v22, 0  ;;  %v7743_v22 = vld [vmem:[%s8484_s0 + $0x20] sm:$0xff] }
 0x472   : > { %7373 = vrcp.f32 %v1875_v50  ;;  %2040 = vmatpush.bf16.msrb.mxu2 %v2031_v12  ;;  %v1967_v12 = vpack.c.bf16 %v7743_v22, %v7743_v22 }
 0x473   : > { %v1948_v43 = vpack.c.bf16 %v1932_v11, %v1932_v11  ;;  %v1966_v11 = vpack.c.bf16 %v7742_v63, %v7742_v63 }
 0x474   : > { %v8904_v6 = vpop.eup %7371 }
 0x475   : > { %v1974_v28 = vunpack.c.l.b16 %v1948_v43  ;;  %v1894_v29 = vsel %vm1770_vm1, %v8904_v6, 0.0 }
 0x476   : > { %1895 = vadd.xlane.f32.xlu2 %v1894_v29 }
 0x477   : > { %v1975_v3 = vpack.c.b16 %v1974_v28, %v1973_v46 }
 0x478   : > { %v7374_v16 = vpop.eup %7373 }
 0x479   : > { %6608 = vmatmul.msk.bf16.vlgmr.msrb.gmra.mxu0 %vm1770_vm1, %v1975_v3  ;;  %v1878_v62 = vpop.xlane.xlu2 %1877  ;;  %v1933_v47 = vmul.f32 %v7374_v16, %v8843_v10 }
 0x47a   : > { %7375 = vrcp.f32 %v1878_v62 }
 0x47b   : > { %v1949_v20 = vpack.c.bf16 %v1933_v47, %v1933_v47  ;;  %v6674_v47 = vld [vmem:[#allocation10 + $0x70] sm:$0xf] }
 0x47d   : > { %v1999_v21 = vunpack.c.l.b16 %v1949_v20 }
 0x480   : > { %v7376_v41 = vpop.eup %7375 }
 0x481   : > { %v1934_v27 = vmul.f32 %v7376_v41, %v8847_v45  ;;  %v1803_v51 = vpop.xlane.xlu2 %1802  ;;  %v7095_v41 = vld [vmem:[#allocation10 + $0x74] sm:$0xf0] }
 0x482   : > { %v1829_v17 = vsub.f32 %v8853_v13, %v1803_v51  ;;  %v2056_v13 = vsel %vm1979_vm2, %v1966_v11, 0 }
 0x483   : > { %v1950_v26 = vpack.c.bf16 %v1934_v27, %v1934_v27  ;;  %2065 = vmatpush.bf16.msrb.mxu3 %v2056_v13  ;;  %v6675_v27 = vor.u32 %v7095_v41, %v6674_v47 }
 0x484   : > { %v1855_v32 = vmul.f32 1.442695, %v1829_v17 }
 0x485   : > { %v2000_v2 = vunpack.c.l.b16 %v1950_v26 }
 0x486   : > { %7377 = vpow2.f32 %v1855_v32 }
 0x487   : > { %v2001_v15 = vpack.c.b16 %v2000_v2, %v1999_v21  ;;  %v1881_v54 = vpop.xlane.xlu0 %1880 }
 0x488   : > { %7379 = vrcp.f32 %v1881_v54 }
 0x489   : > { %6609 = vmatmul.msk.bf16.vlgmr.msrb.gmra.mxu1 %vm1770_vm1, %v2001_v15  ;;  %v1812_v9 = vpop.xlane.xlu2 %1811 }
 0x48a   : > { %v1832_v10 = vsub.f32 %v8859_v61, %v1812_v9 }
 0x48c   : > { %v8917_v50 = vpop.eup %7377  ;;  %v1861_v45 = vmul.f32 1.442695, %v1832_v10 }
 0x48d   : > { %v1897_v43 = vsel %vm1770_vm1, %v8917_v50, 0.0 }
 0x48e   : > { %7381 = vpow2.f32 %v1861_v45  ;;  %1898 = vadd.xlane.f32.xlu0 %v1897_v43  ;;  %v7380_v29 = vpop.eup %7379 }
 0x48f   : > { %v1806_v46 = vpop.xlane.xlu0 %1805  ;;  %v1884_v28 = vpop.xlane.xlu1 %1883  ;;  %v1935_v24 = vmul.f32 %v7380_v29, %v8857_v0 }
 0x490   : > { %v1830_v3 = vsub.f32 %v8865_v55, %v1806_v46  ;;  %7383 = vrcp.f32 %v1884_v28  ;;  %v2081_v55 = vsel %vm1979_vm2, %v1967_v12, 0 }
 0x491   : > { %v1815_v61 = vpop.xlane.xlu2 %1814  ;;  %2090 = vmatpush.bf16.msra.mxu0 %v2081_v55 }
 0x492   : > { %v1857_v62 = vmul.f32 1.442695, %v1830_v3  ;;  %v1833_v16 = vsub.f32 %v8873_v59, %v1815_v61  ;;  %v1951_v59 = vpack.c.bf16 %v1935_v24, %v1935_v24 }
 0x494   : > { %v8926_v20 = vpop.eup %7381  ;;  %7385 = vpow2.f32 %v1857_v62  ;;  %v1863_v51 = vmul.f32 1.442695, %v1833_v16  ;;  %v2024_v10 = vunpack.c.l.b16 %v1951_v59  ;;  %v7091_v59 = vld [vmem:[#allocation10 + $0x54] sm:$0xf0] }
 0x495   : > { %v1906_v17 = vsel %vm1770_vm1, %v8926_v20, 0.0  ;;  %2276 = vmatpush.bf16.msrb.mxu0 %v6675_v27 }
 0x496   : > { %v7384_v26 = vpop.eup %7383  ;;  %1907 = vadd.xlane.f32.xlu0 %v1906_v17  ;;  %7387 = vpow2.f32 %v1863_v51  ;;  %v6666_v51 = vld [vmem:[#allocation10 + $0x60] sm:$0xf]  ;;  %v7093_v17 = vld [vmem:[#allocation10 + $0x64] sm:$0xf0] }
 0x497   : > { %v1936_v0 = vmul.f32 %v7384_v26, %v8867_v33  ;;  %v1887_v32 = vpop.xlane.xlu0 %1886  ;;  %v1809_v21 = vpop.xlane.xlu1 %1808  ;;  %v6667_v55 = vor.u32 %v7093_v17, %v6666_v51  ;;  %v6658_v26 = vld [vmem:[#allocation10 + $0x50] sm:$0xf]  ;;  %v6660_v51 = vld [vmem:[#allocation10 + $0x58] sm:$0xf0] }
 0x498   : > { %v1831_v2 = vsub.f32 %v8851_v14, %v1809_v21  ;;  %7389 = vrcp.f32 %v1887_v32  ;;  %v7089_v32 = vld [vmem:[#allocation10 + $0x44] sm:$0xf0] }
 0x499   : > { %v1952_v15 = vpack.c.bf16 %v1936_v0, %v1936_v0  ;;  %2277 = vmatpush.bf16.msrb.mxu0 %v6667_v55  ;;  %v6659_v0 = vor.u32 %v7091_v59, %v6658_v26  ;;  %v7088_v59 = vld [vmem:[#allocation10 + $0x44] sm:$0xf] }
 0x49a   : > { %v8933_v54 = vpop.eup %7385  ;;  %v1859_v9 = vmul.f32 1.442695, %v1831_v2  ;;  %v6642_v2 = vld [vmem:[#allocation10 + $0x30] sm:$0xf] }
 0x49b   : > { %v2025_v63 = vunpack.c.l.b16 %v1952_v15  ;;  %v1900_v11 = vsel %vm1770_vm1, %v8933_v54, 0.0  ;;  %v7087_v15 = vld [vmem:[#allocation10 + $0x34] sm:$0xf0] }
 0x49c   : > { %7391 = vpow2.f32 %v1859_v9  ;;  %1901 = vadd.xlane.f32.xlu1 %v1900_v11  ;;  %v8937_v33 = vpop.eup %7387  ;;  %v6643_v9 = vor.u32 %v7087_v15, %v6642_v2  ;;  %v7086_v2 = vld [vmem:[#allocation10 + $0x34] sm:$0xf]  ;;  %v6644_v15 = vld [vmem:[#allocation10 + $0x38] sm:$0xf0] }
 0x49d   : > { %v2026_v45 = vpack.c.b16 %v2025_v63, %v2024_v10  ;;  %v1909_v62 = vsel %vm1770_vm1, %v8937_v33, 0.0  ;;  %2278 = vmatpush.bf16.msrb.mxu0 %v6659_v0  ;;  %v6634_v10 = vld [vmem:[#allocation10 + $0x20] sm:$0xf]  ;;  %v7085_v63 = vld [vmem:[#allocation10 + $0x24] sm:$0xf0] }
 0x49e   : > { %v7390_v43 = vpop.eup %7389  ;;  %v6635_v11 = vor.u32 %v7085_v63, %v6634_v10  ;;  %v6652_v0 = vld [vmem:[#allocation10 + $0x48] sm:$0xf0]  ;;  %v6647_v63 = vor.u32 %v7086_v2, %v6644_v15  ;;  %v7110_v2 = vld [vmem:[#allocation8 + $0x74] sm:$0xf] }
 0x49f   : > { %6610 = vmatmul.msk.bf16.vlgmr.msrb.gmra.mxu2 %vm1770_vm1, %v2026_v45  ;;  %v1890_v13 = vpop.xlane.xlu1 %1889  ;;  %v1818_v14 = vpop.xlane.xlu0 %1817  ;;  %v1937_v3 = vmul.f32 %v7390_v43, %v8878_v30  ;;  %v6626_v45 = vld [vmem:[#allocation10 + $0x10] sm:$0xf]  ;;  %v7744_v43 = vld [vmem:[%s8484_s0 + $0x28] sm:$0xff] }
 0x4a0   : > { %7393 = vrcp.f32 %v1890_v13  ;;  %v1834_v46 = vsub.f32 %v8884_v48, %v1818_v14  ;;  %v7083_v13 = vld [vmem:[#allocation10 + $0x14] sm:$0xf0] }
 0x4a1   : > { %v1953_v24 = vpack.c.bf16 %v1937_v3, %v1937_v3  ;;  %v6627_v14 = vor.u32 %v7083_v13, %v6626_v45  ;;  %v6676_v3 = vld [vmem:[#allocation10 + $0x78] sm:$0xf0]  ;;  %v7084_v45 = vld [vmem:[#allocation10 + $0x24] sm:$0xf]  ;;  %v6636_v13 = vld [vmem:[#allocation10 + $0x28] sm:$0xf0] }
 0x4a2   : > { %v8941_v28 = vpop.eup %7391  ;;  %v1865_v29 = vmul.f32 1.442695, %v1834_v46  ;;  %v1968_v46 = vpack.c.bf16 %v7744_v43, %v7744_v43 }
 0x4a3   : > { %v1903_v61 = vsel %vm1770_vm1, %v8941_v28, 0.0  ;;  %v2049_v47 = vunpack.c.l.b16 %v1953_v24  ;;  %v6618_v24 = vld [vmem:[#allocation10] sm:$0xf] }
 0x4a4   : > { %7395 = vpow2.f32 %v1865_v29  ;;  %1904 = vadd.xlane.f32.xlu2 %v1903_v61  ;;  %1910 = vadd.xlane.f32.xlu1 %v1909_v62  ;;  %v7094_v29 = vld [vmem:[#allocation10 + $0x74] sm:$0xf]  ;;  %v2106_v62 = vsel %vm1979_vm2, %v1968_v46, 0  ;;  %v6639_v46 = vor.u32 %v7084_v45, %v6636_v13 }
 0x4a5   : > { %2115 = vmatpush.bf16.msra.mxu1 %v2106_v62  ;;  %v7111_v62 = vld [vmem:[#allocation8 + $0x74] sm:$0xf0] }
 0x4a6   : > { %v7394_v16 = vpop.eup %7393 }
 0x4a7   : > { %v1938_v22 = vmul.f32 %v7394_v16, %v8887_v4  ;;  %v6650_v4 = vld [vmem:[#allocation10 + $0x40] sm:$0xf]  ;;  %v1893_v61 = vpop.xlane.xlu1 %1892  ;;  %v6679_v16 = vor.u32 %v7094_v29, %v6676_v3  ;;  %v7745_v29 = vld [vmem:[%s8484_s0 + $0x30] sm:$0xff] }
 0x4a8   : > { %v6651_v21 = vor.u32 %v7089_v32, %v6650_v4  ;;  %7397 = vrcp.f32 %v1893_v61  ;;  %v6655_v32 = vor.u32 %v7088_v59, %v6652_v0  ;;  %v1969_v3 = vpack.c.bf16 %v7745_v29, %v7745_v29  ;;  %v6738_v61 = vld [vmem:[#allocation8 + $0x70] sm:$0xf]  ;;  %v7746_v59 = vld [vmem:[%s8484_s0 + $0x38] sm:$0xff] }
 0x4a9   : > { %v1954_v12 = vpack.c.bf16 %v1938_v22, %v1938_v22  ;;  %v7081_v22 = vld [vmem:[#allocation10 + $0x4] sm:$0xf0]  ;;  %2325 = vmatpush.bf16.msrb.mxu1 %v6679_v16  ;;  %v1970_v0 = vpack.c.bf16 %v7746_v59, %v7746_v59  ;;  %v6716_v59 = vld [vmem:[#allocation8 + $0x48] sm:$0xf0] }
 0x4aa   : > { %v8949_v48 = vpop.eup %7395  ;;  %2279 = vmatpush.bf16.msrb.mxu0 %v6651_v21 }
 0x4ab   : > { %v2050_v41 = vunpack.c.l.b16 %v1954_v12  ;;  %v1912_v30 = vsel %vm1770_vm1, %v8949_v48, 0.0  ;;  %v6619_v12 = vor.u32 %v7081_v22, %v6618_v24  ;;  %v2131_v24 = vsel %vm1979_vm2, %v1969_v3, 0 }
 0x4ac   : > { %1913 = vadd.xlane.f32.xlu2 %v1912_v30  ;;  %v6739_v22 = vor.u32 %v7111_v62, %v6738_v61  ;;  %2140 = vmatpush.bf16.msra.mxu2 %v2131_v24  ;;  %v6732_v61 = vld [vmem:[#allocation8 + $0x68] sm:$0xf0]  ;;  %v6706_v24 = vld [vmem:[#allocation8 + $0x30] sm:$0xf] }
 0x4ad   : > { %v2051_v27 = vpack.c.b16 %v2050_v41, %v2049_v47  ;;  %v7092_v47 = vld [vmem:[#allocation10 + $0x64] sm:$0xf]  ;;  %v6668_v41 = vld [vmem:[#allocation10 + $0x68] sm:$0xf0] }
 0x4ae   : > { %2280 = vmatpush.bf16.msrb.mxu0 %v6643_v9  ;;  %v6671_v30 = vor.u32 %v7092_v47, %v6668_v41  ;;  %v7398_v26 = vpop.eup %7397  ;;  %v6730_v41 = vld [vmem:[#allocation8 + $0x60] sm:$0xf] }
 0x4af   : > { %6611 = vmatmul.msk.bf16.vlgmr.msrb.gmra.mxu3 %vm1770_vm1, %v2051_v27  ;;  %v7090_v27 = vld [vmem:[#allocation10 + $0x54] sm:$0xf]  ;;  %v1939_v4 = vmul.f32 %v7398_v26, %v8893_v36 }
 0x4b0   : > { %2326 = vmatpush.bf16.msrb.mxu1 %v6671_v30  ;;  %v6663_v55 = vor.u32 %v7090_v27, %v6660_v51  ;;  %2474 = vmatpush.bf16.msrb.mxu2 %v6739_v22  ;;  %v7109_v30 = vld [vmem:[#allocation8 + $0x64] sm:$0xf0]  ;;  %v7080_v51 = vld [vmem:[#allocation10 + $0x4] sm:$0xf]  ;;  %v7103_v22 = vld [vmem:[#allocation8 + $0x34] sm:$0xf0] }
 0x4b1   : > { %v1955_v9 = vpack.c.bf16 %v1939_v4, %v1939_v4  ;;  %v6731_v27 = vor.u32 %v7109_v30, %v6730_v41  ;;  %v6724_v41 = vld [vmem:[#allocation8 + $0x58] sm:$0xf0] }
 0x4b2   : > { %2281 = vmatpush.bf16.msrb.mxu0 %v6635_v11 }
 0x4b4   : > { %2327 = vmatpush.bf16.msrb.mxu1 %v6663_v55  ;;  %2475 = vmatpush.bf16.msrb.mxu2 %v6731_v27 }
 0x4b6   : > { %2282 = vmatpush.bf16.msrb.mxu0 %v6627_v14  ;;  %v2074_v14 = vunpack.c.l.b16 %v1955_v9  ;;  %v2156_v9 = vsel %vm1979_vm2, %v1970_v0, 0 }
 0x4b7   : > { %2165 = vmatpush.bf16.msra.mxu3 %v2156_v9 }
 0x4b8   : > { %2328 = vmatpush.bf16.msrb.mxu1 %v6655_v32  ;;  %v6722_v32 = vld [vmem:[#allocation8 + $0x50] sm:$0xf] }
 0x4ba   : > { %2283 = vmatpush.bf16.msrb.mxu0 %v6619_v12  ;;  %v6628_v12 = vld [vmem:[#allocation10 + $0x18] sm:$0xf0] }
 0x4bc   : > { %2329 = vmatpush.bf16.msrb.mxu1 %v6647_v63  ;;  %v6740_v63 = vld [vmem:[#allocation8 + $0x78] sm:$0xf0] }
 0x4c0   : > { %2330 = vmatpush.bf16.msrb.mxu1 %v6639_v46  ;;  %v7108_v46 = vld [vmem:[#allocation8 + $0x64] sm:$0xf] }
 0x4c1   : > { %v6735_v62 = vor.u32 %v7108_v46, %v6732_v61 }
 0x4e9   : > { %v1896_v17 = vpop.xlane.xlu2 %1895 }
 0x4ea   : > { %7399 = vrcp.f32 %v1896_v17  ;;  %v6620_v17 = vld [vmem:[#allocation10 + $0x8] sm:$0xf0] }
 0x4eb   : > { %v6623_v26 = vor.u32 %v7080_v51, %v6620_v17  ;;  %v6698_v51 = vld [vmem:[#allocation8 + $0x20] sm:$0xf]  ;;  %v7101_v17 = vld [vmem:[#allocation8 + $0x24] sm:$0xf0] }
 0x4f0   : > { %v7400_v21 = vpop.eup %7399 }
 0x4f1   : > { %v1940_v10 = vmul.f32 %v7400_v21, %v8904_v6  ;;  %v7082_v6 = vld [vmem:[#allocation10 + $0x14] sm:$0xf]  ;;  %v7107_v21 = vld [vmem:[#allocation8 + $0x54] sm:$0xf0] }
 0x4f2   : > { %v6631_v47 = vor.u32 %v7082_v6, %v6628_v12  ;;  %v7106_v6 = vld [vmem:[#allocation8 + $0x54] sm:$0xf] }
 0x4f3   : > { %v1956_v11 = vpack.c.bf16 %v1940_v10, %v1940_v10  ;;  %v6723_v10 = vor.u32 %v7107_v21, %v6722_v32  ;;  %v6727_v30 = vor.u32 %v7106_v6, %v6724_v41  ;;  %v6690_v32 = vld [vmem:[#allocation8 + $0x10] sm:$0xf] }
 0x4f4   : > { %2331 = vmatpush.bf16.msrb.mxu1 %v6631_v47  ;;  %v6707_v47 = vor.u32 %v7103_v22, %v6706_v24  ;;  %v6692_v24 = vld [vmem:[#allocation8 + $0x18] sm:$0xf0] }
 0x4f5   : > { %v2075_v43 = vunpack.c.l.b16 %v1956_v11  ;;  %v6743_v11 = vor.u32 %v7110_v2, %v6740_v63  ;;  %2476 = vmatpush.bf16.msrb.mxu2 %v6723_v10 }
 0x4f6   : > { %v1992_v36 = vpop.f32.mrf.mxu0 }
 0x4f7   : > { %v2076_v16 = vpack.c.b16 %v2075_v43, %v2074_v14  ;;  %v2964_v55 = vpack.c.bf16 %v1992_v36, %v1992_v36  ;;  %2503 = vmatpush.bf16.msrb.mxu3 %v6743_v11  ;;  %v6714_v14 = vld [vmem:[#allocation8 + $0x40] sm:$0xf]  ;;  %v7105_v43 = vld [vmem:[#allocation8 + $0x44] sm:$0xf0] }
 0x4f8   : > { %2332 = vmatpush.bf16.msrb.mxu1 %v6623_v26  ;;  %v6715_v3 = vor.u32 %v7105_v43, %v6714_v14  ;;  %v6699_v26 = vor.u32 %v7101_v17, %v6698_v51  ;;  %v6682_v11 = vld [vmem:[#allocation8] sm:$0xf] }
 0x4f9   : > { %6612 = vmatmul.msk.bf16.vlgmr.msra.gmra.mxu0 %vm1770_vm1, %v2076_v16  ;;  %v2987_v45 = vunpack.c.l.b16 %v2964_v55  ;;  %v7104_v55 = vld [vmem:[#allocation8 + $0x44] sm:$0xf] }
 0x4fa   : > { %2477 = vmatpush.bf16.msrb.mxu2 %v6715_v3  ;;  %v6719_v0 = vor.u32 %v7104_v55, %v6716_v59  ;;  %v7096_v59 = vld [vmem:[#allocation8 + $0x4] sm:$0xf] }
 0x4fb   : > { %2504 = vmatpush.bf16.msrb.mxu3 %v6735_v62 }
 0x4fe   : > { %v1994_v4 = vpop.f32.mrf.mxu0  ;;  %2478 = vmatpush.bf16.msrb.mxu2 %v6707_v47 }
 0x4ff   : > { %v2965_v15 = vpack.c.bf16 %v1994_v4, %v1994_v4  ;;  %v8963_v12 = vpack.c.bf16 %v1994_v4, %v1992_v36  ;;  %2505 = vmatpush.bf16.msrb.mxu3 %v6727_v30  ;;  %v7099_v36 = vld [vmem:[#allocation8 + $0x14] sm:$0xf0]  ;;  %v7102_v4 = vld [vmem:[#allocation8 + $0x34] sm:$0xf] }
 0x500   : > { %v6691_v2 = vor.u32 %v7099_v36, %v6690_v32 }
 0x501   : > { %v2988_v13 = vunpack.c.l.b16 %v2965_v15  ;;  %v1899_v16 = vpop.xlane.xlu0 %1898  ;;  %v6708_v15 = vld [vmem:[#allocation8 + $0x38] sm:$0xf0] }
 0x502   : > { %7401 = vrcp.f32 %v1899_v16  ;;  %2479 = vmatpush.bf16.msrb.mxu2 %v6699_v26  ;;  %v6711_v63 = vor.u32 %v7102_v4, %v6708_v15  ;;  %v7098_v16 = vld [vmem:[#allocation8 + $0x14] sm:$0xf] }
 0x503   : > { %v2989_v29 = vpack.c.b16 %v2988_v13, %v2987_v45  ;;  %2506 = vmatpush.bf16.msrb.mxu3 %v6719_v0  ;;  %v7097_v45 = vld [vmem:[#allocation8 + $0x4] sm:$0xf0]  ;;  %v7100_v13 = vld [vmem:[#allocation8 + $0x24] sm:$0xf]  ;;  %v6695_v51 = vor.u32 %v7098_v16, %v6692_v24  ;;  %v6684_v0 = vld [vmem:[#allocation8 + $0x8] sm:$0xf0] }
 0x504   : > { %v6683_v46 = vor.u32 %v7097_v45, %v6682_v11  ;;  %v6687_v4 = vor.u32 %v7096_v59, %v6684_v0 }
 0x505   : > { %3001 = vmatpush.bf16.msra.mxu0 %v2989_v29  ;;  %v6700_v29 = vld [vmem:[#allocation8 + $0x28] sm:$0xf0] }
 0x506   : > { %v2017_v27 = vpop.f32.mrf.mxu1  ;;  %2480 = vmatpush.bf16.msrb.mxu2 %v6691_v2  ;;  %v6703_v3 = vor.u32 %v7100_v13, %v6700_v29 }
 0x507   : > { %2507 = vmatpush.bf16.msrb.mxu3 %v6711_v63  ;;  %v2966_v17 = vpack.c.bf16 %v2017_v27, %v2017_v27 }
 0x508   : > { %v7402_v9 = vpop.eup %7401 }
 0x509   : > { %2284 = vmatmul.bf16.vlgmr.msrb.gmra.mxu0 %v8963_v12  ;;  %v1908_v10 = vpop.xlane.xlu0 %1907  ;;  %v1941_v14 = vmul.f32 %v7402_v9, %v8917_v50 }
 0x50a   : > { %2481 = vmatpush.bf16.msrb.mxu2 %v6683_v46 }
 0x50b   : > { %2508 = vmatpush.bf16.msrb.mxu3 %v6703_v3  ;;  %v1957_v22 = vpack.c.bf16 %v1941_v14, %v1941_v14 }
 0x50d   : > { %v2099_v32 = vunpack.c.l.b16 %v1957_v22 }
 0x50e   : > { %v2019_v43 = vpop.f32.mrf.mxu1 }
 0x50f   : > { %v1902_v21 = vpop.xlane.xlu1 %1901  ;;  %v2967_v62 = vpack.c.bf16 %v2019_v43, %v2019_v43  ;;  %v2173_v6 = vpack.c.bf16 %v2019_v43, %v2017_v27  ;;  %2509 = vmatpush.bf16.msrb.mxu3 %v6695_v51 }
 0x510   : > { %7403 = vrcp.f32 %v1902_v21  ;;  %v3015_v21 = vunpack.c.l.b16 %v2966_v17 }
 0x511   : > { %7405 = vrcp.f32 %v1908_v10  ;;  %v3016_v26 = vunpack.c.l.b16 %v2967_v62 }
 0x513   : > { %v3017_v15 = vpack.c.b16 %v3016_v26, %v3015_v21  ;;  %2510 = vmatpush.bf16.msrb.mxu3 %v6687_v4 }
 0x516   : > { %v7404_v61 = vpop.eup %7403 }
 0x517   : > { %v1942_v47 = vmul.f32 %v7404_v61, %v8933_v54  ;;  %v1911_v41 = vpop.xlane.xlu1 %1910  ;;  %v1905_v30 = vpop.xlane.xlu2 %1904 }
 0x518   : > { %v7406_v50 = vpop.eup %7405  ;;  %7407 = vrcp.f32 %v1905_v30 }
 0x519   : > { %v1958_v55 = vpack.c.bf16 %v1942_v47, %v1942_v47  ;;  %2289 = vmatmul.bf16.gmra.mxu0 %v2173_v6  ;;  %7409 = vrcp.f32 %v1911_v41  ;;  %v1944_v2 = vmul.f32 %v7406_v50, %v8926_v20 }
 0x51b   : > { %v2100_v36 = vunpack.c.l.b16 %v1958_v55  ;;  %v1960_v63 = vpack.c.bf16 %v1944_v2, %v1944_v2 }
 0x51d   : > { %v2101_v54 = vpack.c.b16 %v2100_v36, %v2099_v32  ;;  %v2125_v43 = vunpack.c.l.b16 %v1960_v63 }
 0x51e   : > { %v7408_v9 = vpop.eup %7407 }
 0x51f   : > { %v1914_v27 = vpop.xlane.xlu2 %1913  ;;  %6613 = vmatmul.msk.bf16.vlgmr.msra.gmra.mxu1 %vm1770_vm1, %v2101_v54  ;;  %v7410_v10 = vpop.eup %7409  ;;  %v1943_v11 = vmul.f32 %v7408_v9, %v8941_v28 }
 0x520   : > { %7411 = vrcp.f32 %v1914_v27  ;;  %3029 = vmatpush.bf16.msra.mxu1 %v3017_v15  ;;  %v1945_v14 = vmul.f32 %v7410_v10, %v8937_v33 }
 0x521   : > { %v1959_v45 = vpack.c.bf16 %v1943_v11, %v1943_v11 }
 0x522   : > { %v8971_v13 = vpop.f32.mrf.mxu2  ;;  %v1961_v3 = vpack.c.bf16 %v1945_v14, %v1945_v14 }
 0x523   : > { %v2124_v20 = vunpack.c.l.b16 %v1959_v45 }
 0x524   : > { %v2149_v28 = vunpack.c.l.b16 %v1961_v3 }
 0x525   : > { %v2126_v29 = vpack.c.b16 %v2125_v43, %v2124_v20 }
 0x526   : > { %v7412_v46 = vpop.eup %7411 }
 0x527   : > { %v1946_v61 = vmul.f32 %v7412_v46, %v8949_v48  ;;  %6614 = vmatmul.msk.bf16.vlgmr.msra.gmra.mxu2 %vm1770_vm1, %v2126_v29 }
 0x529   : > { %v1962_v62 = vpack.c.bf16 %v1946_v61, %v1946_v61 }
 0x52a   : > { %v8976_v16 = vpop.f32.mrf.mxu2 }
 0x52b   : > { %v2150_v24 = vunpack.c.l.b16 %v1962_v62  ;;  %v2174_v22 = vpack.c.bf16 %v8976_v16, %v8971_v13 }
 0x52d   : > { %v2151_v47 = vpack.c.b16 %v2150_v24, %v2149_v28  ;;  %2294 = vmatmul.bf16.gmra.mxu0 %v2174_v22 }
 0x52f   : > { %6615 = vmatmul.msk.bf16.vlgmr.msra.gmra.mxu3 %vm1770_vm1, %v2151_v47  ;;  %2333 = vmatmul.bf16.vlgmr.msrb.gmra.mxu1 %v8963_v12 }
 0x532   : > { %v8982_v33 = vpop.f32.mrf.mxu3 }
 0x537   : > { %2482 = vmatmul.bf16.vlgmr.msrb.gmra.mxu2 %v8790_v60 }
 0x53a   : > { %v8985_v48 = vpop.f32.mrf.mxu3 }
 0x53b   : > { %v2175_v41 = vpack.c.bf16 %v8985_v48, %v8982_v33 }
 0x53d   : > { %2299 = vmatmul.bf16.gmra.mxu0 %v2175_v41 }
 0x53f   : > { %2338 = vmatmul.bf16.gmra.mxu1 %v2173_v6  ;;  %2511 = vmatmul.bf16.vlgmr.msrb.gmra.mxu3 %v8790_v60 }
 0x547   : > { %2487 = vmatmul.bf16.gmra.mxu2 %v8808_v19 }
 0x54f   : > { %2343 = vmatmul.bf16.gmra.mxu1 %v2174_v22  ;;  %2516 = vmatmul.bf16.gmra.mxu3 %v8808_v19 }
 0x557   : > { %2492 = vmatmul.bf16.gmra.mxu2 %v8800_v39 }
 0x55f   : > { %2348 = vmatmul.bf16.gmra.mxu1 %v2175_v41  ;;  %2521 = vmatmul.bf16.gmra.mxu3 %v8800_v39 }
 0x567   : > { %2497 = vmatmul.bf16.gmra.mxu2 %v8818_v58 }
 0x56f   : > { %2526 = vmatmul.bf16.gmra.mxu3 %v8818_v58 }
 0x576   : > { %v2092_v12 = vpop.f32.mrf.mxu0 }
 0x577   : > { %v2972_v30 = vpack.c.bf16 %v2092_v12, %v2092_v12 }
 0x579   : > { %v3099_v60 = vunpack.c.l.b16 %v2972_v30 }
 0x57e   : > { %v2094_v51 = vpop.f32.mrf.mxu0 }
 0x57f   : > { %v2176_v6 = vpack.c.bf16 %v2094_v51, %v2092_v12  ;;  %v2973_v17 = vpack.c.bf16 %v2094_v51, %v2094_v51 }
 0x581   : > { %v3100_v50 = vunpack.c.l.b16 %v2973_v17  ;;  %2304 = vmatmul.bf16.gmra.mxu0 %v2176_v6  ;;  %2353 = vmatmul.bf16.gmra.mxu1 %v2176_v6 }
 0x583   : > { %v3101_v55 = vpack.c.b16 %v3100_v50, %v3099_v60 }
 0x585   : > { %3113 = vmatpush.bf16.msrb.mxu0 %v3101_v55 }
 0x586   : > { %v2285_v19 = vpop.f32.mrf.mxu0 }
 0x587   : > { %v2548_v26 = vpack.c.bf16 %v2285_v19, %v2285_v19 }
 0x589   : > { %v2572_v39 = vunpack.c.l.b16 %v2548_v26 }
 0x58e   : > { %v2287_v59 = vpop.f32.mrf.mxu0 }
 0x58f   : > { %v2549_v0 = vpack.c.bf16 %v2287_v59, %v2287_v59 }
 0x591   : > { %v2573_v32 = vunpack.c.l.b16 %v2549_v0 }
 0x593   : > { %v2574_v36 = vpack.c.b16 %v2573_v32, %v2572_v39 }
 0x595   : > { %2583 = vmatpush.bf16.xpose.msra.mxu2 %v2574_v36 }
 0x596   : > { %v2290_v58 = vpop.f32.mrf.mxu0 }
 0x597   : > { %v2550_v21 = vpack.c.bf16 %v2290_v58, %v2290_v58 }
 0x599   : > { %v2598_v15 = vunpack.c.l.b16 %v2550_v21 }
 0x59c   : > { %v2117_v4 = vpop.f32.mrf.mxu1 }
 0x59d   : > { %v2974_v27 = vpack.c.bf16 %v2117_v4, %v2117_v4 }
 0x59e   : > { %v2292_v2 = vpop.f32.mrf.mxu0 }
 0x59f   : > { %v2551_v54 = vpack.c.bf16 %v2292_v2, %v2292_v2  ;;  %v3127_v14 = vunpack.c.l.b16 %v2974_v27 }
 0x5a1   : > { %v2599_v9 = vunpack.c.l.b16 %v2551_v54 }
 0x5a3   : > { %v2600_v10 = vpack.c.b16 %v2599_v9, %v2598_v15 }
 0x5a4   : > { %v2119_v63 = vpop.f32.mrf.mxu1 }
 0x5a5   : > { %v2177_v11 = vpack.c.bf16 %v2119_v63, %v2117_v4  ;;  %v2975_v45 = vpack.c.bf16 %v2119_v63, %v2119_v63  ;;  %2609 = vmatpush.bf16.xpose.msra.mxu3 %v2600_v10 }
 0x5a7   : > { %v3128_v43 = vunpack.c.l.b16 %v2975_v45  ;;  %2309 = vmatmul.bf16.gmra.mxu0 %v2177_v11  ;;  %2358 = vmatmul.bf16.gmra.mxu1 %v2177_v11 }
 0x5a9   : > { %v3129_v20 = vpack.c.b16 %v3128_v43, %v3127_v14 }
 0x5aa   : > { %v2295_v46 = vpop.f32.mrf.mxu0  ;;  %v8996_v29 = vpop.f32.mrf.mxu2 }
 0x5ab   : > { %3141 = vmatpush.bf16.msrb.mxu1 %v3129_v20  ;;  %v2552_v61 = vpack.c.bf16 %v2295_v46, %v2295_v46 }
 0x5ac   : > { %v2334_v3 = vpop.f32.mrf.mxu1 }
 0x5ad   : > { %v2532_v28 = vpack.c.bf16 %v2334_v3, %v2334_v3  ;;  %v2624_v41 = vunpack.c.l.b16 %v2552_v61 }
 0x5af   : > { %v2566_v6 = vunpack.c.l.b16 %v2532_v28 }
 0x5b2   : > { %v2297_v62 = vpop.f32.mrf.mxu0  ;;  %v8998_v24 = vpop.f32.mrf.mxu2 }
 0x5b3   : > { %v2553_v22 = vpack.c.bf16 %v2297_v62, %v2297_v62  ;;  %v2178_v12 = vpack.c.bf16 %v8998_v24, %v8996_v29  ;;  %v9002_v50 = vpop.f32.mrf.mxu3 }
 0x5b4   : > { %v2336_v47 = vpop.f32.mrf.mxu1 }
 0x5b5   : > { %v2625_v30 = vunpack.c.l.b16 %v2553_v22  ;;  %v2533_v51 = vpack.c.bf16 %v2336_v47, %v2336_v47 }
 0x5b7   : > { %v2626_v17 = vpack.c.b16 %v2625_v30, %v2624_v41  ;;  %v2567_v60 = vunpack.c.l.b16 %v2533_v51  ;;  %2314 = vmatmul.bf16.gmra.mxu0 %v2178_v12  ;;  %2363 = vmatmul.bf16.gmra.mxu1 %v2178_v12 }
 0x5b9   : > { %v2568_v55 = vpack.c.b16 %v2567_v60, %v2566_v6  ;;  %2635 = vmatpush.bf16.xpose.msrb.mxu2 %v2626_v17 }
 0x5ba   : > { %v2300_v19 = vpop.f32.mrf.mxu0  ;;  %v9008_v12 = vpop.f32.mrf.mxu2 }
 0x5bb   : > { %2584 = vmatmul.bf16.vlgmr.msra.gmra.mxu2 %v2568_v55  ;;  %v2554_v59 = vpack.c.bf16 %v2300_v19, %v2300_v19  ;;  %v9004_v0 = vpop.f32.mrf.mxu3 }
 0x5bc   : > { %v2339_v26 = vpop.f32.mrf.mxu1  ;;  %v2179_v4 = vpack.c.bf16 %v9004_v0, %v9002_v50 }
 0x5bd   : > { %v2534_v32 = vpack.c.bf16 %v2339_v26, %v2339_v26  ;;  %v2650_v21 = vunpack.c.l.b16 %v2554_v59 }
 0x5bf   : > { %v2592_v15 = vunpack.c.l.b16 %v2534_v32 }
 0x5c2   : > { %v2302_v39 = vpop.f32.mrf.mxu0  ;;  %v9010_v30 = vpop.f32.mrf.mxu2 }
 0x5c3   : > { %v2555_v36 = vpack.c.bf16 %v2302_v39, %v2302_v39  ;;  %v9012_v17 = vpop.f32.mrf.mxu3 }
 0x5c4   : > { %v2341_v58 = vpop.f32.mrf.mxu1 }
 0x5c5   : > { %v2651_v2 = vunpack.c.l.b16 %v2555_v36  ;;  %v2535_v54 = vpack.c.bf16 %v2341_v58, %v2341_v58 }
 0x5c7   : > { %v2652_v9 = vpack.c.b16 %v2651_v2, %v2650_v21  ;;  %v2593_v27 = vunpack.c.l.b16 %v2535_v54  ;;  %2319 = vmatmul.bf16.gmra.mxu0 %v2179_v4  ;;  %2368 = vmatmul.bf16.gmra.mxu1 %v2179_v4 }
 0x5c9   : > { %v2594_v10 = vpack.c.b16 %v2593_v27, %v2592_v15  ;;  %2661 = vmatpush.bf16.xpose.msrb.mxu3 %v2652_v9 }
 0x5ca   : > { %v9014_v60 = vpop.f32.mrf.mxu2 }
 0x5cb   : > { %2610 = vmatmul.bf16.vlgmr.msra.gmra.mxu3 %v2594_v10  ;;  %v9016_v39 = vpop.f32.mrf.mxu3 }
 0x5cc   : > { %v2344_v63 = vpop.f32.mrf.mxu1 }
 0x5cd   : > { %v2536_v11 = vpack.c.bf16 %v2344_v63, %v2344_v63 }
 0x5cf   : > { %v2618_v43 = vunpack.c.l.b16 %v2536_v11 }
 0x5d2   : > { %v9018_v2 = vpop.f32.mrf.mxu2 }
 0x5d3   : > { %v9020_v27 = vpop.f32.mrf.mxu3 }
 0x5d4   : > { %v2346_v45 = vpop.f32.mrf.mxu1 }
 0x5d5   : > { %v2537_v14 = vpack.c.bf16 %v2346_v45, %v2346_v45 }
 0x5d7   : > { %v2619_v20 = vunpack.c.l.b16 %v2537_v14 }
 0x5d9   : > { %v2620_v46 = vpack.c.b16 %v2619_v20, %v2618_v43 }
 0x5da   : > { %v9022_v10 = vpop.f32.mrf.mxu2 }
 0x5db   : > { %2636 = vmatmul.bf16.vlgmr.msrb.gmra.mxu2 %v2620_v46  ;;  %v9024_v63 = vpop.f32.mrf.mxu3 }
 0x5dc   : > { %v2349_v3 = vpop.f32.mrf.mxu1 }
 0x5dd   : > { %v2538_v61 = vpack.c.bf16 %v2349_v3, %v2349_v3 }
 0x5df   : > { %v2644_v22 = vunpack.c.l.b16 %v2538_v61 }
 0x5e2   : > { %v9026_v11 = vpop.f32.mrf.mxu2 }
 0x5e3   : > { %v9028_v43 = vpop.f32.mrf.mxu3 }
 0x5e4   : > { %v2351_v62 = vpop.f32.mrf.mxu1 }
 0x5e5   : > { %v2539_v28 = vpack.c.bf16 %v2351_v62, %v2351_v62 }
 0x5e7   : > { %v2645_v47 = vunpack.c.l.b16 %v2539_v28 }
 0x5e9   : > { %v2646_v41 = vpack.c.b16 %v2645_v47, %v2644_v22 }
 0x5ea   : > { %v9030_v20 = vpop.f32.mrf.mxu2 }
 0x5eb   : > { %2662 = vmatmul.bf16.vlgmr.msrb.gmra.mxu3 %v2646_v41  ;;  %v9032_v41 = vpop.f32.mrf.mxu3 }
 0x5fe   : > { %v2305_v51 = vpop.f32.mrf.mxu0  ;;  %v2354_v6 = vpop.f32.mrf.mxu1 }
 0x5ff   : > { %v2556_v55 = vpack.c.bf16 %v2305_v51, %v2305_v51  ;;  %v2540_v21 = vpack.c.bf16 %v2354_v6, %v2354_v6 }
 0x601   : > { %v2676_v32 = vunpack.c.l.b16 %v2556_v55  ;;  %v2670_v15 = vunpack.c.l.b16 %v2540_v21 }
 0x606   : > { %v2307_v19 = vpop.f32.mrf.mxu0  ;;  %v2356_v59 = vpop.f32.mrf.mxu1 }
 0x607   : > { %v2557_v26 = vpack.c.bf16 %v2307_v19, %v2307_v19  ;;  %v2541_v58 = vpack.c.bf16 %v2356_v59, %v2356_v59  ;;  %v9034_v59 = vpop.f32.mrf.mxu2 }
 0x609   : > { %v2677_v36 = vunpack.c.l.b16 %v2557_v26  ;;  %v2671_v54 = vunpack.c.l.b16 %v2541_v58  ;;  %v2969_v58 = vpack.c.bf16 %v8976_v16, %v8976_v16 }
 0x60b   : > { %v2678_v4 = vpack.c.b16 %v2677_v36, %v2676_v32  ;;  %v2672_v9 = vpack.c.b16 %v2671_v54, %v2670_v15  ;;  %v2968_v54 = vpack.c.bf16 %v8971_v13, %v8971_v13 }
 0x60d   : > { %2687 = vmatpush.bf16.xpose.msra.mxu2 %v2678_v4  ;;  %v9038_v4 = vpop.f32.mrf.mxu3 }
 0x614   : > { %2688 = vmatmul.bf16.vlgmr.msra.gmra.mxu2 %v2672_v9 }
 0x624   : > { %v2310_v45 = vpop.f32.mrf.mxu0  ;;  %v2359_v14 = vpop.f32.mrf.mxu1 }
 0x625   : > { %v2558_v46 = vpack.c.bf16 %v2310_v45, %v2310_v45  ;;  %v2542_v6 = vpack.c.bf16 %v2359_v14, %v2359_v14  ;;  %v3044_v14 = vunpack.c.l.b16 %v2969_v58  ;;  %v9050_v58 = vpop.f32.mrf.mxu3 }
 0x627   : > { %v2702_v28 = vunpack.c.l.b16 %v2558_v46  ;;  %v2696_v32 = vunpack.c.l.b16 %v2542_v6  ;;  %v2976_v6 = vpack.c.bf16 %v8996_v29, %v8996_v29  ;;  %v2971_v29 = vpack.c.bf16 %v8985_v48, %v8985_v48 }
 0x628   : > { %v2979_v48 = vpack.c.bf16 %v9004_v0, %v9004_v0 }
 0x62c   : > { %v2312_v3 = vpop.f32.mrf.mxu0  ;;  %v2361_v61 = vpop.f32.mrf.mxu1 }
 0x62d   : > { %v2559_v62 = vpack.c.bf16 %v2312_v3, %v2312_v3  ;;  %v2543_v47 = vpack.c.bf16 %v2361_v61, %v2361_v61 }
 0x62f   : > { %v2703_v22 = vunpack.c.l.b16 %v2559_v62  ;;  %v2697_v55 = vunpack.c.l.b16 %v2543_v47 }
 0x631   : > { %v2704_v51 = vpack.c.b16 %v2703_v22, %v2702_v28  ;;  %v2698_v36 = vpack.c.b16 %v2697_v55, %v2696_v32  ;;  %v3043_v28 = vunpack.c.l.b16 %v2968_v54  ;;  %v2977_v22 = vpack.c.bf16 %v8998_v24, %v8998_v24 }
 0x633   : > { %2713 = vmatpush.bf16.xpose.msra.mxu3 %v2704_v51  ;;  %v3045_v51 = vpack.c.b16 %v3044_v14, %v3043_v28  ;;  %v2970_v14 = vpack.c.bf16 %v8982_v33, %v8982_v33  ;;  %v3072_v28 = vunpack.c.l.b16 %v2971_v29 }
 0x634   : > { %v2315_v19 = vpop.f32.mrf.mxu0  ;;  %v2364_v26 = vpop.f32.mrf.mxu1 }
 0x635   : > { %v2560_v21 = vpack.c.bf16 %v2315_v19, %v2315_v19  ;;  %v2544_v13 = vpack.c.bf16 %v2364_v26, %v2364_v26 }
 0x637   : > { %v2728_v3 = vunpack.c.l.b16 %v2560_v21  ;;  %v2722_v21 = vunpack.c.l.b16 %v2544_v13  ;;  %v3071_v13 = vunpack.c.l.b16 %v2970_v14 }
 0x63a   : > { %2714 = vmatmul.bf16.vlgmr.msra.gmra.mxu3 %v2698_v36  ;;  %v3156_v36 = vunpack.c.l.b16 %v2977_v22 }
 0x63c   : > { %v2317_v15 = vpop.f32.mrf.mxu0  ;;  %v2366_v9 = vpop.f32.mrf.mxu1 }
 0x63d   : > { %v2561_v45 = vpack.c.bf16 %v2317_v15, %v2317_v15  ;;  %v2545_v16 = vpack.c.bf16 %v2366_v9, %v2366_v9  ;;  %v3155_v15 = vunpack.c.l.b16 %v2976_v6 }
 0x63e   : > { %v9042_v46 = vpop.f32.mrf.mxu2 }
 0x63f   : > { %v2729_v61 = vunpack.c.l.b16 %v2561_v45  ;;  %v2772_v62 = vsel %vm1297_vm0, %v9042_v46, -inf  ;;  %v2723_v55 = vunpack.c.l.b16 %v2545_v16  ;;  %v3157_v26 = vpack.c.b16 %v3156_v36, %v3155_v15 }
 0x640   : > { %2773 = vmax.xlane.f32.xlu0 %v2772_v62  ;;  %v2978_v36 = vpack.c.bf16 %v9002_v50, %v9002_v50  ;;  %v3184_v15 = vunpack.c.l.b16 %v2979_v48 }
 0x641   : > { %v2730_v47 = vpack.c.b16 %v2729_v61, %v2728_v3  ;;  %v2724_v9 = vpack.c.b16 %v2723_v55, %v2722_v21 }
 0x643   : > { %2739 = vmatpush.bf16.xpose.msrb.mxu2 %v2730_v47 }
 0x644   : > { %v2320_v19 = vpop.f32.mrf.mxu0  ;;  %v2369_v32 = vpop.f32.mrf.mxu1 }
 0x645   : > { %v2562_v45 = vpack.c.bf16 %v2320_v19, %v2320_v19  ;;  %v3073_v19 = vpack.c.b16 %v3072_v28, %v3071_v13  ;;  %v2546_v33 = vpack.c.bf16 %v2369_v32, %v2369_v32 }
 0x646   : > { %v9052_v54 = vpop.f32.mrf.mxu2 }
 0x647   : > { %v2775_v24 = vsel %vm1297_vm0, %v9052_v54, -inf  ;;  %v2754_v22 = vunpack.c.l.b16 %v2562_v45 }
 0x648   : > { %2776 = vmax.xlane.f32.xlu1 %v2775_v24  ;;  %v2748_v24 = vunpack.c.l.b16 %v2546_v33 }
 0x64a   : > { %2740 = vmatmul.bf16.vlgmr.msrb.gmra.mxu2 %v2724_v9 }
 0x64b   : > { %3057 = vmatpush.bf16.msra.mxu2 %v3045_v51 }
 0x64c   : > { %v2322_v3 = vpop.f32.mrf.mxu0  ;;  %v2371_v62 = vpop.f32.mrf.mxu1 }
 0x64d   : > { %v2563_v61 = vpack.c.bf16 %v2322_v3, %v2322_v3  ;;  %v2547_v6 = vpack.c.bf16 %v2371_v62, %v2371_v62 }
 0x64e   : > { %v9060_v16 = vpop.f32.mrf.mxu3 }
 0x64f   : > { %3169 = vmatpush.bf16.msrb.mxu2 %v3157_v26  ;;  %v2755_v47 = vunpack.c.l.b16 %v2563_v61  ;;  %v2778_v51 = vsel %vm1297_vm0, %v9060_v16, -inf  ;;  %v2749_v21 = vunpack.c.l.b16 %v2547_v6  ;;  %v3183_v26 = vunpack.c.l.b16 %v2978_v36 }
 0x650   : > { %2779 = vmax.xlane.f32.xlu2 %v2778_v51 }
 0x651   : > { %v2756_v55 = vpack.c.b16 %v2755_v47, %v2754_v22  ;;  %v2750_v45 = vpack.c.b16 %v2749_v21, %v2748_v24  ;;  %v3185_v14 = vpack.c.b16 %v3184_v15, %v3183_v26 }
 0x653   : > { %2765 = vmatpush.bf16.xpose.msrb.mxu3 %v2756_v55 }
 0x656   : > { %v2613_v9 = vpop.f32.mrf.mxu3 }
 0x657   : > { %v2781_v29 = vsel %vm1297_vm0, %v2613_v9, -inf }
 0x658   : > { %2782 = vmax.xlane.f32.xlu0 %v2781_v29 }
 0x65a   : > { %2766 = vmatmul.bf16.vlgmr.msrb.gmra.mxu3 %v2750_v45 }
 0x65b   : > { %3085 = vmatpush.bf16.msra.mxu3 %v3073_v19 }
 0x65e   : > { %v2637_v0 = vpop.f32.mrf.mxu2 }
 0x65f   : > { %3197 = vmatpush.bf16.msrb.mxu3 %v3185_v14  ;;  %v2784_v32 = vsel %vm1297_vm0, %v2637_v0, -inf }
 0x660   : > { %2785 = vmax.xlane.f32.xlu1 %v2784_v32 }
 0x666   : > { %v9070_v3 = vpop.f32.mrf.mxu2 }
 0x667   : > { %v2787_v50 = vsel %vm1297_vm0, %v9070_v3, -inf }
 0x668   : > { %2788 = vmax.xlane.f32.xlu2 %v2787_v50 }
 0x66e   : > { %v2663_v61 = vpop.f32.mrf.mxu3 }
 0x66f   : > { %v2790_v62 = vsel %vm1297_vm0, %v2663_v61, -inf }
 0x670   : > { %2791 = vmax.xlane.f32.xlu0 %v2790_v62 }
 0x676   : > { %v9075_v28 = vpop.f32.mrf.mxu3 }
 0x677   : > { %v2793_v22 = vsel %vm1297_vm0, %v9075_v28, -inf }
 0x678   : > { %2794 = vmax.xlane.f32.xlu1 %v2793_v22 }
 0x697   : > { %v9079_v47 = vpop.f32.mrf.mxu2 }
 0x698   : > { %v2796_v51 = vsel %vm1297_vm0, %v9079_v47, -inf }
 0x699   : > { %2797 = vmax.xlane.f32.xlu2 %v2796_v51 }
 0x69f   : > { %v9083_v13 = vpop.f32.mrf.mxu2 }
 0x6a0   : > { %v2799_v6 = vsel %vm1297_vm0, %v9083_v13, -inf }
 0x6a1   : > { %2800 = vmax.xlane.f32.xlu0 %v2799_v6 }
 0x6b3   : > { %v2774_v36 = vpop.xlane.xlu0 %2773 }
 0x6b4   : > { %v2820_v21 = vsub.f32 %v9042_v46, %v2774_v36 }
 0x6b6   : > { %v2836_v26 = vmul.f32 1.442695, %v2820_v21 }
 0x6b8   : > { %7413 = vpow2.f32 %v2836_v26 }
 0x6bb   : > { %v2777_v29 = vpop.xlane.xlu1 %2776 }
 0x6bc   : > { %v2821_v14 = vsub.f32 %v9052_v54, %v2777_v29 }
 0x6bd   : > { %v9087_v48 = vpop.f32.mrf.mxu3 }
 0x6be   : > { %v2802_v55 = vsel %vm1297_vm0, %v9087_v48, -inf  ;;  %v2838_v46 = vmul.f32 1.442695, %v2821_v14 }
 0x6bf   : > { %2803 = vmax.xlane.f32.xlu1 %v2802_v55  ;;  %v9105_v55 = vpop.eup %7413 }
 0x6c0   : > { %7415 = vpow2.f32 %v2838_v46 }
 0x6c3   : > { %v2780_v22 = vpop.xlane.xlu2 %2779 }
 0x6c5   : > { %v9091_v19 = vpop.f32.mrf.mxu3 }
 0x6c6   : > { %v2805_v33 = vsel %vm1297_vm0, %v9091_v19, -inf  ;;  %v9114_v29 = vpop.eup %7415 }
 0x6c7   : > { %2806 = vmax.xlane.f32.xlu2 %v2805_v33  ;;  %v2822_v33 = vsub.f32 %v9060_v16, %v2780_v22 }
 0x6cb   : > { %v2783_v45 = vpop.xlane.xlu0 %2782 }
 0x6cc   : > { %v2823_v32 = vsub.f32 %v2613_v9, %v2783_v45  ;;  %v2868_v9 = vsel %vm1297_vm0, %v9105_v55, 0.0 }
 0x6cd   : > { %v9096_v15 = vpop.f32.mrf.mxu2 }
 0x6ce   : > { %v2808_v24 = vsel %vm1297_vm0, %v9096_v15, -inf  ;;  %v2842_v51 = vmul.f32 1.442695, %v2823_v32 }
 0x6cf   : > { %2809 = vmax.xlane.f32.xlu0 %v2808_v24  ;;  %v2840_v24 = vmul.f32 1.442695, %v2822_v33 }
 0x6d0   : > { %7417 = vpow2.f32 %v2842_v51 }
 0x6d1   : > { %7419 = vpow2.f32 %v2840_v24 }
 0x6d3   : > { %v2786_v6 = vpop.xlane.xlu1 %2785 }
 0x6d4   : > { %v2824_v36 = vsub.f32 %v2637_v0, %v2786_v6 }
 0x6d5   : > { %v9101_v50 = vpop.f32.mrf.mxu2 }
 0x6d6   : > { %v2811_v62 = vsel %vm1297_vm0, %v9101_v50, -inf  ;;  %v2844_v26 = vmul.f32 1.442695, %v2824_v36  ;;  %v9116_v45 = vpop.eup %7417 }
 0x6d7   : > { %2812 = vmax.xlane.f32.xlu1 %v2811_v62  ;;  %v2871_v62 = vsel %vm1297_vm0, %v9114_v29, 0.0  ;;  %v2877_v51 = vsel %vm1297_vm0, %v9116_v45, 0.0 }
 0x6d8   : > { %7421 = vpow2.f32 %v2844_v26 }
 0x6db   : > { %v2789_v14 = vpop.xlane.xlu2 %2788 }
 0x6dc   : > { %v2825_v46 = vsub.f32 %v9070_v3, %v2789_v14 }
 0x6dd   : > { %v9108_v54 = vpop.f32.mrf.mxu3 }
 0x6de   : > { %v2814_v21 = vsel %vm1297_vm0, %v9108_v54, -inf  ;;  %v2846_v33 = vmul.f32 1.442695, %v2825_v46 }
 0x6df   : > { %2869 = vadd.xlane.f32.xlu1 %v2868_v9  ;;  %2815 = vmax.xlane.f32.xlu2 %v2814_v21 }
 0x6e3   : > { %v2792_v16 = vpop.xlane.xlu0 %2791 }
 0x6e4   : > { %v2826_v0 = vsub.f32 %v2663_v61, %v2792_v16  ;;  %v9127_v61 = vpop.eup %7419 }
 0x6e5   : > { %v9118_v32 = vpop.f32.mrf.mxu3  ;;  %v9129_v36 = vpop.eup %7421  ;;  %v2874_v14 = vsel %vm1297_vm0, %v9127_v61, 0.0 }
 0x6e6   : > { %v2848_v22 = vmul.f32 1.442695, %v2826_v0  ;;  %v2817_v6 = vsel %vm1297_vm0, %v9118_v32, -inf  ;;  %v2880_v26 = vsel %vm1297_vm0, %v9129_v36, 0.0 }
 0x6e7   : > { %2878 = vadd.xlane.f32.xlu1 %v2877_v51  ;;  %2872 = vadd.xlane.f32.xlu2 %v2871_v62 }
 0x6e8   : > { %7423 = vpow2.f32 %v2848_v22  ;;  %2818 = vmax.xlane.f32.xlu0 %v2817_v6 }
 0x6e9   : > { %7425 = vpow2.f32 %v2846_v33 }
 0x6eb   : > { %v2795_v9 = vpop.xlane.xlu1 %2794 }
 0x6ec   : > { %v2827_v21 = vsub.f32 %v9075_v28, %v2795_v9 }
 0x6ee   : > { %v9132_v3 = vpop.eup %7423  ;;  %v2850_v24 = vmul.f32 1.442695, %v2827_v21 }
 0x6ef   : > { %2881 = vadd.xlane.f32.xlu2 %v2880_v26  ;;  %v2886_v16 = vsel %vm1297_vm0, %v9132_v3, 0.0  ;;  %v9140_v0 = vpop.eup %7425 }
 0x6f0   : > { %7427 = vpow2.f32 %v2850_v24  ;;  %2875 = vadd.xlane.f32.xlu0 %v2874_v14  ;;  %2887 = vadd.xlane.f32.xlu1 %v2886_v16  ;;  %v2883_v62 = vsel %vm1297_vm0, %v9140_v0, 0.0 }
 0x6f6   : > { %v9142_v28 = vpop.eup %7427 }
 0x6f7   : > { %v2889_v46 = vsel %vm1297_vm0, %v9142_v28, 0.0 }
 0x6f8   : > { %2884 = vadd.xlane.f32.xlu0 %v2883_v62  ;;  %2890 = vadd.xlane.f32.xlu2 %v2889_v46 }
 0x70c   : > { %v2798_v22 = vpop.xlane.xlu2 %2797 }
 0x70d   : > { %v2828_v51 = vsub.f32 %v9079_v47, %v2798_v22 }
 0x70f   : > { %v2852_v6 = vmul.f32 1.442695, %v2828_v51 }
 0x711   : > { %7429 = vpow2.f32 %v2852_v6 }
 0x714   : > { %v2801_v33 = vpop.xlane.xlu0 %2800 }
 0x715   : > { %v2829_v9 = vsub.f32 %v9083_v13, %v2801_v33 }
 0x717   : > { %v9150_v21 = vpop.eup %7429  ;;  %v2854_v24 = vmul.f32 1.442695, %v2829_v9 }
 0x718   : > { %v2892_v26 = vsel %vm1297_vm0, %v9150_v21, 0.0 }
 0x719   : > { %7431 = vpow2.f32 %v2854_v24  ;;  %2893 = vadd.xlane.f32.xlu0 %v2892_v26 }
 0x71f   : > { %v9154_v14 = vpop.eup %7431 }
 0x720   : > { %v2895_v16 = vsel %vm1297_vm0, %v9154_v14, 0.0 }
 0x721   : > { %2896 = vadd.xlane.f32.xlu1 %v2895_v16 }
 0x732   : > { %v2804_v47 = vpop.xlane.xlu1 %2803 }
 0x733   : > { %v2830_v62 = vsub.f32 %v9087_v48, %v2804_v47 }
 0x735   : > { %v2856_v46 = vmul.f32 1.442695, %v2830_v62 }
 0x737   : > { %7433 = vpow2.f32 %v2856_v46 }
 0x73a   : > { %v2807_v13 = vpop.xlane.xlu2 %2806 }
 0x73b   : > { %v2831_v22 = vsub.f32 %v9091_v19, %v2807_v13 }
 0x73d   : > { %v9160_v51 = vpop.eup %7433  ;;  %v2858_v6 = vmul.f32 1.442695, %v2831_v22 }
 0x73e   : > { %v2898_v33 = vsel %vm1297_vm0, %v9160_v51, 0.0 }
 0x73f   : > { %7435 = vpow2.f32 %v2858_v6  ;;  %2899 = vadd.xlane.f32.xlu2 %v2898_v33 }
 0x742   : > { %v2810_v9 = vpop.xlane.xlu0 %2809 }
 0x743   : > { %v2832_v24 = vsub.f32 %v9096_v15, %v2810_v9 }
 0x745   : > { %v9165_v26 = vpop.eup %7435  ;;  %v2860_v16 = vmul.f32 1.442695, %v2832_v24 }
 0x746   : > { %v2901_v48 = vsel %vm1297_vm0, %v9165_v26, 0.0 }
 0x747   : > { %7437 = vpow2.f32 %v2860_v16  ;;  %2902 = vadd.xlane.f32.xlu0 %v2901_v48 }
 0x74a   : > { %v2813_v19 = vpop.xlane.xlu1 %2812 }
 0x74b   : > { %v2833_v47 = vsub.f32 %v9101_v50, %v2813_v19 }
 0x74d   : > { %v9170_v62 = vpop.eup %7437  ;;  %v2862_v46 = vmul.f32 1.442695, %v2833_v47 }
 0x74e   : > { %v2904_v13 = vsel %vm1297_vm0, %v9170_v62, 0.0 }
 0x74f   : > { %7439 = vpow2.f32 %v2862_v46  ;;  %2905 = vadd.xlane.f32.xlu1 %v2904_v13 }
 0x752   : > { %v2870_v15 = vpop.xlane.xlu1 %2869  ;;  %v2816_v22 = vpop.xlane.xlu2 %2815 }
 0x753   : > { %v2834_v6 = vsub.f32 %v9108_v54, %v2816_v22  ;;  %7441 = vrcp.f32 %v2870_v15 }
 0x755   : > { %v9175_v33 = vpop.eup %7439  ;;  %v2864_v9 = vmul.f32 1.442695, %v2834_v6 }
 0x756   : > { %v2907_v24 = vsel %vm1297_vm0, %v9175_v33, 0.0 }
 0x757   : > { %7443 = vpow2.f32 %v2864_v9  ;;  %2908 = vadd.xlane.f32.xlu2 %v2907_v24 }
 0x759   : > { %v7442_v48 = vpop.eup %7441 }
 0x75a   : > { %v2879_v50 = vpop.xlane.xlu1 %2878  ;;  %v2873_v16 = vpop.xlane.xlu2 %2872  ;;  %v2932_v54 = vmul.f32 %v7442_v48, %v9105_v55 }
 0x75b   : > { %v2819_v19 = vpop.xlane.xlu0 %2818  ;;  %7445 = vrcp.f32 %v2873_v16 }
 0x75c   : > { %v2835_v47 = vsub.f32 %v9118_v32, %v2819_v19  ;;  %7447 = vrcp.f32 %v2879_v50  ;;  %v2948_v6 = vpack.c.bf16 %v2932_v54, %v2932_v54 }
 0x75d   : > { %v9180_v46 = vpop.eup %7443 }
 0x75e   : > { %v2866_v13 = vmul.f32 1.442695, %v2835_v47  ;;  %v2910_v15 = vsel %vm1297_vm0, %v9180_v46, 0.0  ;;  %v2982_v55 = vunpack.c.l.b16 %v2948_v6 }
 0x75f   : > { %2911 = vadd.xlane.f32.xlu0 %v2910_v15 }
 0x760   : > { %7449 = vpow2.f32 %v2866_v13 }
 0x761   : > { %v7446_v22 = vpop.eup %7445 }
 0x762   : > { %v2882_v9 = vpop.xlane.xlu2 %2881  ;;  %v2933_v24 = vmul.f32 %v7446_v22, %v9114_v29  ;;  %v7448_v16 = vpop.eup %7447  ;;  %v3452_v29 = vpack.c.bf16 %v9008_v12, %v9008_v12 }
 0x763   : > { %v2876_v34 = vpop.xlane.xlu0 %2875  ;;  %v2888_v32 = vpop.xlane.xlu1 %2887  ;;  %v2935_v50 = vmul.f32 %v7448_v16, %v9116_v45 }
 0x764   : > { %7451 = vrcp.f32 %v2876_v34  ;;  %v2949_v19 = vpack.c.bf16 %v2933_v24, %v2933_v24 }
 0x765   : > { %7453 = vrcp.f32 %v2882_v9  ;;  %v2951_v34 = vpack.c.bf16 %v2935_v50, %v2935_v50 }
 0x766   : > { %v9186_v18 = vpop.eup %7449  ;;  %v2983_v48 = vunpack.c.l.b16 %v2949_v19  ;;  %7455 = vrcp.f32 %v2888_v32 }
 0x767   : > { %v2913_v47 = vsel %vm1297_vm0, %v9186_v18, 0.0  ;;  %v3011_v16 = vunpack.c.l.b16 %v2951_v34 }
 0x768   : > { %2914 = vadd.xlane.f32.xlu1 %v2913_v47  ;;  %v2984_v54 = vpack.c.b16 %v2983_v48, %v2982_v55 }
 0x76a   : > { %v7452_v13 = vpop.eup %7451  ;;  %6744 = vmatmul.msk.bf16.vlgmr.msra.gmra.mxu0 %vm1297_vm0, %v2984_v54 }
 0x76b   : > { %v2934_v15 = vmul.f32 %v7452_v13, %v9127_v61  ;;  %v2885_v22 = vpop.xlane.xlu0 %2884  ;;  %v2891_v6 = vpop.xlane.xlu2 %2890  ;;  %3467 = vmatpush.bf16.xpose.msra.mxu0 %v3452_v29  ;;  %v3453_v61 = vpack.c.bf16 %v9010_v30, %v9010_v30  ;;  %v3454_v30 = vpack.c.bf16 %v9014_v60, %v9014_v60 }
 0x76c   : > { %v7454_v9 = vpop.eup %7453  ;;  %7457 = vrcp.f32 %v2885_v22 }
 0x76d   : > { %v7456_v45 = vpop.eup %7455  ;;  %v2950_v24 = vpack.c.bf16 %v2934_v15, %v2934_v15  ;;  %7459 = vrcp.f32 %v2891_v6  ;;  %v2936_v32 = vmul.f32 %v7454_v9, %v9129_v36 }
 0x76e   : > { %v2938_v55 = vmul.f32 %v7456_v45, %v9132_v3 }
 0x76f   : > { %v3010_v19 = vunpack.c.l.b16 %v2950_v24  ;;  %v2952_v47 = vpack.c.bf16 %v2936_v32, %v2936_v32 }
 0x770   : > { %v2954_v13 = vpack.c.bf16 %v2938_v55, %v2938_v55 }
 0x771   : > { %v3012_v12 = vpack.c.b16 %v3011_v16, %v3010_v19  ;;  %v3038_v15 = vunpack.c.l.b16 %v2952_v47  ;;  %v3660_v47 = vpack.c.bf16 %v8784_v35, %v8784_v35  ;;  %v3448_v35 = vpack.c.bf16 %v9028_v43, %v9028_v43 }
 0x772   : > { %v7458_v50 = vpop.eup %7457  ;;  %v3066_v3 = vunpack.c.l.b16 %v2954_v13 }
 0x773   : > { %v7460_v48 = vpop.eup %7459  ;;  %v2937_v54 = vmul.f32 %v7458_v50, %v9140_v0  ;;  %6745 = vmatmul.msk.bf16.vlgmr.msra.gmra.mxu1 %vm1297_vm0, %v3012_v12  ;;  %v3455_v0 = vpack.c.bf16 %v9018_v2, %v9018_v2 }
 0x774   : > { %v2939_v29 = vmul.f32 %v7460_v48, %v9142_v28  ;;  %3480 = vmatpush.bf16.xpose.msra.mxu1 %v3453_v61  ;;  %v3456_v48 = vpack.c.bf16 %v9022_v10, %v9022_v10 }
 0x775   : > { %v2953_v34 = vpack.c.bf16 %v2937_v54, %v2937_v54 }
 0x776   : > { %v2955_v36 = vpack.c.bf16 %v2939_v29, %v2939_v29 }
 0x777   : > { %v3039_v22 = vunpack.c.l.b16 %v2953_v34  ;;  %v3664_v34 = vpack.c.bf16 %v8792_v52, %v8792_v52  ;;  %v3457_v52 = vpack.c.bf16 %v9026_v11, %v9026_v11  ;;  %v3445_v11 = vpack.c.bf16 %v9016_v39, %v9016_v39 }
 0x778   : > { %v3067_v6 = vunpack.c.l.b16 %v2955_v36 }
 0x779   : > { %v3040_v9 = vpack.c.b16 %v3039_v22, %v3038_v15 }
 0x77a   : > { %v3068_v45 = vpack.c.b16 %v3067_v6, %v3066_v3  ;;  %v3748_v6 = vsel %vm1979_vm2, %v3664_v34, 0 }
 0x77b   : > { %6746 = vmatmul.msk.bf16.vlgmr.msra.gmra.mxu2 %vm1297_vm0, %v3040_v9 }
 0x77c   : > { %3493 = vmatpush.bf16.xpose.msra.mxu2 %v3454_v30  ;;  %6747 = vmatmul.msk.bf16.vlgmr.msra.gmra.mxu3 %vm1297_vm0, %v3068_v45 }
 0x77d   : > { %3506 = vmatpush.bf16.xpose.msra.mxu3 %v3455_v0 }
 0x78c   : > { %v2894_v28 = vpop.xlane.xlu0 %2893 }
 0x78d   : > { %7461 = vrcp.f32 %v2894_v28 }
 0x793   : > { %v7462_v16 = vpop.eup %7461 }
 0x794   : > { %v2897_v24 = vpop.xlane.xlu1 %2896  ;;  %v2940_v32 = vmul.f32 %v7462_v16, %v9150_v21  ;;  %v3444_v21 = vpack.c.bf16 %v9012_v17, %v9012_v17 }
 0x795   : > { %7463 = vrcp.f32 %v2897_v24 }
 0x796   : > { %v2956_v55 = vpack.c.bf16 %v2940_v32, %v2940_v32 }
 0x798   : > { %v3094_v50 = vunpack.c.l.b16 %v2956_v55 }
 0x79b   : > { %v7464_v19 = vpop.eup %7463 }
 0x79c   : > { %v2941_v60 = vmul.f32 %v7464_v19, %v9154_v14  ;;  %v3672_v14 = vsel %vm1979_vm2, %v3660_v47, 0  ;;  %v3661_v19 = vpack.c.bf16 %v8786_v5, %v8786_v5 }
 0x79e   : > { %v2957_v12 = vpack.c.bf16 %v2941_v60, %v2941_v60 }
 0x7a0   : > { %v3095_v2 = vunpack.c.l.b16 %v2957_v12 }
 0x7a2   : > { %v3096_v61 = vpack.c.b16 %v3095_v2, %v3094_v50  ;;  %v3458_v50 = vpack.c.bf16 %v9030_v20, %v9030_v20  ;;  %v3662_v20 = vpack.c.bf16 %v8794_v57, %v8794_v57 }
 0x7a4   : > { %6748 = vmatmul.msk.bf16.vlgmr.msrb.gmra.mxu0 %vm1297_vm0, %v3096_v61 }
 0x7a5   : > { %3519 = vmatpush.bf16.xpose.msrb.mxu0 %v3456_v48 }
 0x7b2   : > { %v2900_v54 = vpop.xlane.xlu2 %2899 }
 0x7b3   : > { %7465 = vrcp.f32 %v2900_v54 }
 0x7b4   : > { %3468 = vmatmul.bf16.vlgmr.msra.gmra.mxu0 %v3444_v21  ;;  %v3665_v21 = vpack.c.bf16 %v8796_v38, %v8796_v38  ;;  %v3666_v38 = vpack.c.bf16 %v8811_v8, %v8811_v8  ;;  %v3667_v8 = vpack.c.bf16 %v8814_v42, %v8814_v42 }
 0x7b5   : > { %3681 = vmatpush.bf16.msra.mxu0 %v3672_v14 }
 0x7b6   : > { %v3767_v57 = vsel %vm1979_vm2, %v3665_v21, 0  ;;  %v3786_v34 = vsel %vm1979_vm2, %v3666_v38, 0 }
 0x7b9   : > { %v7466_v29 = vpop.eup %7465 }
 0x7ba   : > { %v2903_v13 = vpop.xlane.xlu0 %2902  ;;  %v2942_v10 = vmul.f32 %v7466_v29, %v9160_v51  ;;  %v3449_v29 = vpack.c.bf16 %v9032_v41, %v9032_v41  ;;  %v3450_v41 = vpack.c.bf16 %v9038_v4, %v9038_v4  ;;  %v3805_v4 = vsel %vm1979_vm2, %v3667_v8, 0 }
 0x7bb   : > { %7467 = vrcp.f32 %v2903_v13  ;;  %v3446_v13 = vpack.c.bf16 %v9020_v27, %v9020_v27  ;;  %v3663_v27 = vpack.c.bf16 %v8804_v23, %v8804_v23  ;;  %v3451_v23 = vpack.c.bf16 %v9050_v58, %v9050_v58 }
 0x7bc   : > { %v2958_v15 = vpack.c.bf16 %v2942_v10, %v2942_v10  ;;  %v3459_v10 = vpack.c.bf16 %v9034_v59, %v9034_v59  ;;  %v3447_v59 = vpack.c.bf16 %v9024_v63, %v9024_v63 }
 0x7be   : > { %v3122_v9 = vunpack.c.l.b16 %v2958_v15 }
 0x7c1   : > { %v7468_v36 = vpop.eup %7467 }
 0x7c2   : > { %v2943_v17 = vmul.f32 %v7468_v36, %v9165_v26  ;;  %v2906_v22 = vpop.xlane.xlu1 %2905  ;;  %v3729_v36 = vsel %vm1979_vm2, %v3663_v27, 0 }
 0x7c3   : > { %7469 = vrcp.f32 %v2906_v22 }
 0x7c4   : > { %v2959_v3 = vpack.c.bf16 %v2943_v17, %v2943_v17  ;;  %3520 = vmatmul.bf16.vlgmr.msrb.gmra.mxu0 %v3448_v35 }
 0x7c5   : > { %3757 = vmatpush.bf16.msrb.mxu0 %v3748_v6 }
 0x7c6   : > { %v3123_v30 = vunpack.c.l.b16 %v2959_v3 }
 0x7c8   : > { %v3124_v51 = vpack.c.b16 %v3123_v30, %v3122_v9 }
 0x7c9   : > { %v7470_v43 = vpop.eup %7469 }
 0x7ca   : > { %v2909_v45 = vpop.xlane.xlu2 %2908  ;;  %6749 = vmatmul.msk.bf16.vlgmr.msrb.gmra.mxu1 %vm1297_vm0, %v3124_v51  ;;  %v2944_v26 = vmul.f32 %v7470_v43, %v9170_v62  ;;  %v3691_v62 = vsel %vm1979_vm2, %v3661_v19, 0 }
 0x7cb   : > { %7471 = vrcp.f32 %v2909_v45  ;;  %3532 = vmatpush.bf16.xpose.msrb.mxu1 %v3457_v52 }
 0x7cc   : > { %v2960_v28 = vpack.c.bf16 %v2944_v26, %v2944_v26 }
 0x7ce   : > { %v3150_v55 = vunpack.c.l.b16 %v2960_v28 }
 0x7d1   : > { %v7472_v0 = vpop.eup %7471 }
 0x7d2   : > { %v2945_v24 = vmul.f32 %v7472_v0, %v9175_v33  ;;  %v2912_v16 = vpop.xlane.xlu0 %2911 }
 0x7d3   : > { %7473 = vrcp.f32 %v2912_v16 }
 0x7d4   : > { %v2961_v32 = vpack.c.bf16 %v2945_v24, %v2945_v24 }
 0x7d6   : > { %v3151_v60 = vunpack.c.l.b16 %v2961_v32 }
 0x7d8   : > { %v3152_v12 = vpack.c.b16 %v3151_v60, %v3150_v55 }
 0x7d9   : > { %v7474_v2 = vpop.eup %7473 }
 0x7da   : > { %6750 = vmatmul.msk.bf16.vlgmr.msrb.gmra.mxu2 %vm1297_vm0, %v3152_v12  ;;  %3481 = vmatmul.bf16.vlgmr.msra.gmra.mxu1 %v3445_v11  ;;  %v2946_v5 = vmul.f32 %v7474_v2, %v9180_v46 }
 0x7db   : > { %v2915_v33 = vpop.xlane.xlu1 %2914  ;;  %3545 = vmatpush.bf16.xpose.msrb.mxu2 %v3458_v50  ;;  %3700 = vmatpush.bf16.msra.mxu1 %v3691_v62 }
 0x7dc   : > { %7475 = vrcp.f32 %v2915_v33  ;;  %v2962_v48 = vpack.c.bf16 %v2946_v5, %v2946_v5 }
 0x7de   : > { %v3178_v54 = vunpack.c.l.b16 %v2962_v48 }
 0x7e2   : > { %v7476_v61 = vpop.eup %7475 }
 0x7e3   : > { %v2947_v39 = vmul.f32 %v7476_v61, %v9186_v18  ;;  %v3710_v18 = vsel %vm1979_vm2, %v3662_v20, 0 }
 0x7e5   : > { %v2963_v47 = vpack.c.bf16 %v2947_v39, %v2947_v39 }
 0x7e7   : > { %v3179_v14 = vunpack.c.l.b16 %v2963_v47  ;;  %v9268_v35 = vpop.f32.mrf.mxu0 }
 0x7e9   : > { %v3180_v46 = vpack.c.b16 %v3179_v14, %v3178_v54 }
 0x7ea   : > { %3494 = vmatmul.bf16.vlgmr.msra.gmra.mxu2 %v3446_v13  ;;  %3533 = vmatmul.bf16.vlgmr.msrb.gmra.mxu1 %v3449_v29 }
 0x7eb   : > { %6751 = vmatmul.msk.bf16.vlgmr.msrb.gmra.mxu3 %vm1297_vm0, %v3180_v46  ;;  %3719 = vmatpush.bf16.msra.mxu2 %v3710_v18 }
 0x7ec   : > { %3558 = vmatpush.bf16.xpose.msrb.mxu3 %v3459_v10  ;;  %3776 = vmatpush.bf16.msrb.mxu1 %v3767_v57 }
 0x7ef   : > { %v9270_v63 = vpop.f32.mrf.mxu0 }
 0x7f0   : > { %v9277_v42 = vpop.f32.mrf.mxu1 }
 0x7f8   : > { %v9279_v58 = vpop.f32.mrf.mxu1 }
 0x7fa   : > { %3546 = vmatmul.bf16.vlgmr.msrb.gmra.mxu2 %v3450_v41 }
 0x7fb   : > { %3507 = vmatmul.bf16.vlgmr.msra.gmra.mxu3 %v3447_v59  ;;  %3795 = vmatpush.bf16.msrb.mxu2 %v3786_v34 }
 0x7fc   : > { %3738 = vmatpush.bf16.msra.mxu3 %v3729_v36 }
 0x7fe   : > { %v9283_v52 = vpop.f32.mrf.mxu2 }
 0x7ff   : > { %v9290_v28 = vpop.f32.mrf.mxu3 }
 0x806   : > { %v9287_v43 = vpop.f32.mrf.mxu2 }
 0x807   : > { %v9297_v55 = vpop.f32.mrf.mxu3 }
 0x80b   : > { %3559 = vmatmul.bf16.vlgmr.msrb.gmra.mxu3 %v3451_v23 }
 0x80c   : > { %3814 = vmatpush.bf16.msrb.mxu3 %v3805_v4 }
 0x821   : > { %v9272_v15 = vpop.f32.mrf.mxu0 }
 0x829   : > { %v9274_v17 = vpop.f32.mrf.mxu0 }
 0x831   : > { %v3469_v22 = vpop.f32.mrf.mxu0 }
 0x832   : > { %v3564_v3 = vsel %vm1770_vm1, %v3469_v22, -inf }
 0x833   : > { %3565 = vmax.xlane.f32.xlu2 %v3564_v3 }
 0x839   : > { %v3471_v6 = vpop.f32.mrf.mxu0 }
 0x841   : > { %v3521_v9 = vpop.f32.mrf.mxu0 }
 0x842   : > { %v3576_v32 = vsel %vm1770_vm1, %v3521_v9, -inf }
 0x847   : > { %v9281_v30 = vpop.f32.mrf.mxu1 }
 0x849   : > { %v3523_v51 = vpop.f32.mrf.mxu0 }
 0x84f   : > { %v9285_v45 = vpop.f32.mrf.mxu1 }
 0x857   : > { %v3482_v26 = vpop.f32.mrf.mxu1 }
 0x858   : > { %v3567_v0 = vsel %vm1770_vm1, %v3482_v26, -inf }
 0x859   : > { %3568 = vmax.xlane.f32.xlu0 %v3567_v0 }
 0x85d   : > { %v9292_v24 = vpop.f32.mrf.mxu2 }
 0x85f   : > { %v3484_v16 = vpop.f32.mrf.mxu1 }
 0x861   : > { %3577 = vmax.xlane.f32.xlu0 %v3576_v32 }
 0x865   : > { %v9295_v19 = vpop.f32.mrf.mxu2 }
 0x867   : > { %v3534_v60 = vpop.f32.mrf.mxu1 }
 0x868   : > { %v3579_v5 = vsel %vm1770_vm1, %v3534_v60, -inf }
 0x86d   : > { %v3495_v11 = vpop.f32.mrf.mxu2 }
 0x86e   : > { %v9299_v12 = vpop.f32.mrf.mxu3  ;;  %v3570_v50 = vsel %vm1770_vm1, %v3495_v11, -inf }
 0x86f   : > { %3571 = vmax.xlane.f32.xlu1 %v3570_v50  ;;  %v3536_v62 = vpop.f32.mrf.mxu1 }
 0x875   : > { %v3497_v33 = vpop.f32.mrf.mxu2 }
 0x876   : > { %v9302_v2 = vpop.f32.mrf.mxu3 }
 0x877   : > { %3580 = vmax.xlane.f32.xlu1 %v3579_v5 }
 0x87d   : > { %v3547_v61 = vpop.f32.mrf.mxu2 }
 0x87e   : > { %v3508_v48 = vpop.f32.mrf.mxu3  ;;  %v3582_v21 = vsel %vm1770_vm1, %v3547_v61, -inf }
 0x87f   : > { %v3573_v39 = vsel %vm1770_vm1, %v3508_v48, -inf }
 0x880   : > { %3574 = vmax.xlane.f32.xlu2 %v3573_v39 }
 0x885   : > { %v3549_v47 = vpop.f32.mrf.mxu2 }
 0x886   : > { %v3510_v20 = vpop.f32.mrf.mxu3  ;;  %v3204_v47 = vmul.f32 %v9268_v35, %v9268_v35 }
 0x888   : > { %3583 = vmax.xlane.f32.xlu2 %v3582_v21 }
 0x88e   : > { %v3560_v54 = vpop.f32.mrf.mxu3 }
 0x88f   : > { %v3585_v14 = vsel %vm1770_vm1, %v3560_v54, -inf }
 0x890   : > { %3586 = vmax.xlane.f32.xlu0 %v3585_v14 }
 0x896   : > { %v3562_v13 = vpop.f32.mrf.mxu3 }
 0x8a6   : > { %v3566_v29 = vpop.xlane.xlu2 %3565 }
 0x8a7   : > { %v3588_v46 = vsub.f32 %v3469_v22, %v3566_v29  ;;  %v3207_v29 = vmul.f32 %v9279_v58, %v9279_v58 }
 0x8a9   : > { %v3596_v10 = vmul.f32 1.442695, %v3588_v46 }
 0x8ab   : > { %7477 = vpow2.f32 %v3596_v10 }
 0x8b1   : > { %v9308_v18 = vpop.eup %7477 }
 0x8b2   : > { %v3612_v57 = vsel %vm1770_vm1, %v9308_v18, 0.0 }
 0x8b3   : > { %3613 = vadd.xlane.f32.xlu1 %v3612_v57  ;;  %v3210_v57 = vmul.f32 %v9290_v28, %v9290_v28 }
 0x8cc   : > { %v3569_v38 = vpop.xlane.xlu0 %3568 }
 0x8cd   : > { %v3589_v27 = vsub.f32 %v3482_v26, %v3569_v38 }
 0x8cf   : > { %v3598_v41 = vmul.f32 1.442695, %v3589_v27 }
 0x8d1   : > { %7479 = vpow2.f32 %v3598_v41  ;;  %v3213_v41 = vmul.f32 %v9274_v17, %v9274_v17 }
 0x8d4   : > { %v3578_v59 = vpop.xlane.xlu0 %3577 }
 0x8d5   : > { %v3592_v34 = vsub.f32 %v3521_v9, %v3578_v59  ;;  %v3208_v59 = vmul.f32 %v9283_v52, %v9283_v52 }
 0x8d7   : > { %v9312_v36 = vpop.eup %7479  ;;  %v3604_v8 = vmul.f32 1.442695, %v3592_v34  ;;  %v3206_v34 = vmul.f32 %v9277_v42, %v9277_v42 }
 0x8d8   : > { %v3615_v23 = vsel %vm1770_vm1, %v9312_v36, 0.0 }
 0x8d9   : > { %7481 = vpow2.f32 %v3604_v8  ;;  %3616 = vadd.xlane.f32.xlu2 %v3615_v23  ;;  %v3214_v8 = vmul.f32 %v9281_v30, %v9281_v30  ;;  %v3211_v23 = vmul.f32 %v9297_v55, %v9297_v55 }
 0x8df   : > { %v9316_v4 = vpop.eup %7481 }
 0x8e0   : > { %v3624_v22 = vsel %vm1770_vm1, %v9316_v4, 0.0 }
 0x8e1   : > { %3625 = vadd.xlane.f32.xlu2 %v3624_v22  ;;  %v3209_v22 = vmul.f32 %v9287_v43, %v9287_v43 }
 0x8e2   : > { %v3572_v3 = vpop.xlane.xlu1 %3571 }
 0x8e3   : > { %v3590_v6 = vsub.f32 %v3495_v11, %v3572_v3 }
 0x8e5   : > { %v3600_v51 = vmul.f32 1.442695, %v3590_v6  ;;  %v3212_v6 = vmul.f32 %v9272_v15, %v9272_v15 }
 0x8e7   : > { %7483 = vpow2.f32 %v3600_v51 }
 0x8ea   : > { %v3581_v26 = vpop.xlane.xlu1 %3580 }
 0x8eb   : > { %v3593_v9 = vsub.f32 %v3534_v60, %v3581_v26 }
 0x8ed   : > { %v9320_v0 = vpop.eup %7483  ;;  %v3606_v16 = vmul.f32 1.442695, %v3593_v9 }
 0x8ee   : > { %v3618_v32 = vsel %vm1770_vm1, %v9320_v0, 0.0 }
 0x8ef   : > { %7485 = vpow2.f32 %v3606_v16  ;;  %3619 = vadd.xlane.f32.xlu0 %v3618_v32 }
 0x8f3   : > { %v3575_v50 = vpop.xlane.xlu2 %3574 }
 0x8f4   : > { %v3591_v62 = vsub.f32 %v3508_v48, %v3575_v50 }
 0x8f5   : > { %v9324_v33 = vpop.eup %7485 }
 0x8f6   : > { %v3602_v5 = vmul.f32 1.442695, %v3591_v62  ;;  %v3627_v11 = vsel %vm1770_vm1, %v9324_v33, 0.0 }
 0x8f7   : > { %3628 = vadd.xlane.f32.xlu0 %v3627_v11 }
 0x8f8   : > { %7487 = vpow2.f32 %v3602_v5 }
 0x8fb   : > { %v3584_v39 = vpop.xlane.xlu2 %3583 }
 0x8fc   : > { %v3594_v60 = vsub.f32 %v3547_v61, %v3584_v39 }
 0x8fe   : > { %v9330_v20 = vpop.eup %7487  ;;  %v3608_v21 = vmul.f32 1.442695, %v3594_v60  ;;  %v7119_v60 = vld [vmem:[#allocation11 + $0x38] sm:$0xff] }
 0x8ff   : > { %v3621_v14 = vsel %vm1770_vm1, %v9330_v20, 0.0  ;;  %3220 = vadd.xlane.f32.xlu0 %v3204_v47  ;;  %v7127_v47 = vld [vmem:[#allocation11 + $0x78] sm:$0xff] }
 0x900   : > { %7489 = vpow2.f32 %v3608_v21  ;;  %3622 = vadd.xlane.f32.xlu1 %v3621_v14  ;;  %v7126_v14 = vld [vmem:[#allocation11 + $0x70] sm:$0xff] }
 0x903   : > { %v3587_v48 = vpop.xlane.xlu0 %3586 }
 0x904   : > { %v3595_v13 = vsub.f32 %v3560_v54, %v3587_v48  ;;  %v3205_v54 = vmul.f32 %v9270_v63, %v9270_v63 }
 0x906   : > { %v9336_v46 = vpop.eup %7489  ;;  %v3610_v61 = vmul.f32 1.442695, %v3595_v13  ;;  %v7125_v13 = vld [vmem:[#allocation11 + $0x68] sm:$0xff] }
 0x907   : > { %v3630_v10 = vsel %vm1770_vm1, %v9336_v46, 0.0  ;;  %3226 = vadd.xlane.f32.xlu0 %v3207_v29  ;;  %v7116_v29 = vld [vmem:[#allocation11 + $0x20] sm:$0xff] }
 0x908   : > { %7491 = vpow2.f32 %v3610_v61  ;;  %3631 = vadd.xlane.f32.xlu1 %v3630_v10  ;;  %v7124_v61 = vld [vmem:[#allocation11 + $0x60] sm:$0xff] }
 0x90e   : > { %v9342_v38 = vpop.eup %7491 }
 0x90f   : > { %3232 = vadd.xlane.f32.xlu0 %v3210_v57  ;;  %v3633_v27 = vsel %vm1770_vm1, %v9342_v38, 0.0 }
 0x910   : > { %3222 = vadd.xlane.f32.xlu1 %v3205_v54  ;;  %3634 = vadd.xlane.f32.xlu2 %v3633_v27  ;;  %v7115_v27 = vld [vmem:[#allocation11 + $0x18] sm:$0xff] }
 0x917   : > { %3238 = vadd.xlane.f32.xlu0 %v3213_v41  ;;  %v7123_v41 = vld [vmem:[#allocation11 + $0x58] sm:$0xff] }
 0x918   : > { %3228 = vadd.xlane.f32.xlu1 %v3208_v59  ;;  %3224 = vadd.xlane.f32.xlu2 %v3206_v34  ;;  %v7114_v59 = vld [vmem:[#allocation11 + $0x10] sm:$0xff] }
 0x919   : > { %v7122_v34 = vld [vmem:[#allocation11 + $0x50] sm:$0xff] }
 0x91f   : > { %3240 = vadd.xlane.f32.xlu0 %v3214_v8 }
 0x920   : > { %3234 = vadd.xlane.f32.xlu1 %v3211_v23  ;;  %3230 = vadd.xlane.f32.xlu2 %v3209_v22 }
 0x926   : > { %v3614_v3 = vpop.xlane.xlu1 %3613 }
 0x927   : > { %7493 = vrcp.f32 %v3614_v3 }
 0x928   : > { %3236 = vadd.xlane.f32.xlu2 %v3212_v6 }
 0x92d   : > { %v7494_v51 = vpop.eup %7493 }
 0x92e   : > { %v3644_v26 = vmul.f32 %v7494_v51, %v9308_v18  ;;  %v7118_v18 = vld [vmem:[#allocation11 + $0x30] sm:$0xff]  ;;  %v7113_v51 = vld [vmem:[#allocation11 + $0x8] sm:$0xff] }
 0x930   : > { %v3652_v9 = vpack.c.bf16 %v3644_v26, %v3644_v26  ;;  %v7121_v26 = vld [vmem:[#allocation11 + $0x48] sm:$0xff] }
 0x932   : > { %6752 = vmatmul.msk.bf16.vlgmr.msra.gmra.mxu0 %vm1770_vm1, %v3652_v9 }
 0x933   : > { %4604 = vmatpush.bf16.msra.mxu0 %v7119_v60 }
 0x937   : > { %4605 = vmatpush.bf16.msra.mxu0 %v7118_v18 }
 0x94c   : > { %v3617_v16 = vpop.xlane.xlu2 %3616 }
 0x94d   : > { %7495 = vrcp.f32 %v3617_v16  ;;  %v7112_v16 = vld [vmem:[#allocation11] sm:$0xff] }
 0x953   : > { %v7496_v32 = vpop.eup %7495 }
 0x954   : > { %v3645_v50 = vmul.f32 %v7496_v32, %v9312_v36  ;;  %v3626_v62 = vpop.xlane.xlu2 %3625  ;;  %v7117_v36 = vld [vmem:[#allocation11 + $0x28] sm:$0xff]  ;;  %v7120_v32 = vld [vmem:[#allocation11 + $0x40] sm:$0xff] }
 0x955   : > { %7497 = vrcp.f32 %v3626_v62  ;;  %4606 = vmatpush.bf16.msra.mxu0 %v7117_v36 }
 0x956   : > { %v3653_v5 = vpack.c.bf16 %v3645_v50, %v3645_v50 }
 0x958   : > { %6753 = vmatmul.msk.bf16.vlgmr.msra.gmra.mxu1 %vm1770_vm1, %v3653_v5 }
 0x959   : > { %4653 = vmatpush.bf16.msra.mxu1 %v7127_v47  ;;  %4607 = vmatpush.bf16.msra.mxu0 %v7116_v29 }
 0x95b   : > { %v7498_v11 = vpop.eup %7497 }
 0x95c   : > { %v3648_v39 = vmul.f32 %v7498_v11, %v9316_v4 }
 0x95d   : > { %4654 = vmatpush.bf16.msra.mxu1 %v7126_v14  ;;  %4608 = vmatpush.bf16.msra.mxu0 %v7115_v27 }
 0x95e   : > { %v3656_v21 = vpack.c.bf16 %v3648_v39, %v3648_v39 }
 0x960   : > { %6756 = vmatmul.msk.bf16.vlgmr.msrb.gmra.mxu0 %vm1770_vm1, %v3656_v21 }
 0x961   : > { %4655 = vmatpush.bf16.msra.mxu1 %v7125_v13  ;;  %4609 = vmatpush.bf16.msra.mxu0 %v7114_v59 }
 0x962   : > { %v3620_v48 = vpop.xlane.xlu0 %3619 }
 0x963   : > { %7499 = vrcp.f32 %v3620_v48 }
 0x965   : > { %4656 = vmatpush.bf16.msra.mxu1 %v7124_v61  ;;  %4610 = vmatpush.bf16.msra.mxu0 %v7113_v51 }
 0x969   : > { %v7500_v4 = vpop.eup %7499  ;;  %4657 = vmatpush.bf16.msra.mxu1 %v7123_v41  ;;  %4611 = vmatpush.bf16.msra.mxu0 %v7112_v16 }
 0x96a   : > { %v3646_v10 = vmul.f32 %v7500_v4, %v9320_v0  ;;  %v3629_v57 = vpop.xlane.xlu0 %3628 }
 0x96b   : > { %7501 = vrcp.f32 %v3629_v57 }
 0x96c   : > { %v3654_v54 = vpack.c.bf16 %v3646_v10, %v3646_v10 }
 0x96d   : > { %4658 = vmatpush.bf16.msra.mxu1 %v7122_v34 }
 0x96e   : > { %6754 = vmatmul.msk.bf16.vlgmr.msra.gmra.mxu2 %vm1770_vm1, %v3654_v54 }
 0x970   : > { %4612 = vmatmul.bf16.vlgmr.msra.gmra.mxu0 %v8488_v49 }
 0x971   : > { %v7502_v8 = vpop.eup %7501  ;;  %4659 = vmatpush.bf16.msra.mxu1 %v7121_v26 }
 0x972   : > { %v3649_v23 = vmul.f32 %v7502_v8, %v9324_v33  ;;  %v3221_v22 = vpop.xlane.xlu0 %3220 }
 0x973   : > { %v3623_v3 = vpop.xlane.xlu1 %3622  ;;  %v3252_v0 = vadd.f32 1e-12, %v3221_v22 }
 0x974   : > { %v3657_v6 = vpack.c.bf16 %v3649_v23, %v3649_v23  ;;  %7503 = vrcp.f32 %v3623_v3 }
 0x975   : > { %7505 = vrsqrt.f32 %v3252_v0  ;;  %4660 = vmatpush.bf16.msra.mxu1 %v7120_v32  ;;  %vm3274_vm4 = vweird.f32 %v3252_v0 }
 0x976   : > { %6757 = vmatmul.msk.bf16.vlgmr.msrb.gmra.mxu1 %vm1770_vm1, %v3657_v6 }
 0x97a   : > { %v7504_v9 = vpop.eup %7503  ;;  %v3227_v39 = vpop.xlane.xlu0 %3226 }
 0x97b   : > { %v3647_v50 = vmul.f32 %v7504_v9, %v9330_v20  ;;  %v3632_v33 = vpop.xlane.xlu1 %3631  ;;  %v7506_v62 = vpop.eup %7505  ;;  %v9376_v48 = vadd.f32 1e-12, %v3227_v39 }
 0x97c   : > { %7507 = vrcp.f32 %v3632_v33  ;;  %v3269_v11 = vmul.f32 %v7506_v62, %v3252_v0  ;;  %vm3275_vm3 = vweird.f32 %v7506_v62 }
 0x97d   : > { %v3655_v5 = vpack.c.bf16 %v3647_v50, %v3647_v50  ;;  %vm3276_vm5 = vmor %vm3274_vm4, %vm3275_vm3  ;;  %vm3304_vm13 = vweird.f32 %v9376_v48 }
 0x97e   : > { %v3270_v14 = vmul.f32 %v7506_v62, %v3269_v11 }
 0x97f   : > { %6755 = vmatmul.msk.bf16.vlgmr.msra.gmra.mxu3 %vm1770_vm1, %v3655_v5 }
 0x980   : > { %v3271_v13 = vmul.f32 0.5, %v3270_v14  ;;  %4617 = vmatmul.bf16.gmra.mxu0 %v8504_v56 }
 0x982   : > { %v7508_v60 = vpop.eup %7507  ;;  %v3272_v4 = vsub.f32 1.5, %v3271_v13 }
 0x983   : > { %v3650_v47 = vmul.f32 %v7508_v60, %v9336_v46  ;;  %v3223_v21 = vpop.xlane.xlu1 %3222  ;;  %v3635_v18 = vpop.xlane.xlu2 %3634 }
 0x984   : > { %v3253_v20 = vadd.f32 1e-12, %v3223_v21  ;;  %7509 = vrcp.f32 %v3635_v18  ;;  %v3273_v59 = vmul.f32 %v7506_v62, %v3272_v4 }
 0x985   : > { %v3658_v36 = vpack.c.bf16 %v3650_v47, %v3650_v47 }
 0x986   : > { %7511 = vrsqrt.f32 %v3253_v20  ;;  %v3277_v6 = vsel %vm3276_vm5, %v7506_v62, %v3273_v59  ;;  %vm3284_vm7 = vweird.f32 %v3253_v20 }
 0x987   : > { %6758 = vmatmul.msk.bf16.vlgmr.msrb.gmra.mxu2 %vm1770_vm1, %v3658_v36  ;;  %7513 = vrsqrt.f32 %v9376_v48  ;;  %v9392_v0 = vmul.f32 %v3277_v6, %v9268_v35 }
 0x98a   : > { %v7510_v49 = vpop.eup %7509 }
 0x98b   : > { %v3225_v29 = vpop.xlane.xlu2 %3224  ;;  %v3651_v46 = vmul.f32 %v7510_v49, %v9342_v38  ;;  %v3229_v34 = vpop.xlane.xlu1 %3228 }
 0x98c   : > { %v7512_v61 = vpop.eup %7511  ;;  %v3254_v10 = vadd.f32 1e-12, %v3225_v29  ;;  %v9387_v22 = vadd.f32 1e-12, %v3229_v34 }
 0x98d   : > { %v3279_v57 = vmul.f32 %v7512_v61, %v3253_v20  ;;  %v9381_v54 = vpop.eup %7513  ;;  %v3659_v27 = vpack.c.bf16 %v3651_v46, %v3651_v46  ;;  %vm3285_vm6 = vweird.f32 %v7512_v61  ;;  %v3233_v20 = vpop.xlane.xlu0 %3232 }
 0x98e   : > { %7515 = vrsqrt.f32 %v3254_v10  ;;  %v3299_v8 = vmul.f32 %v9381_v54, %v9376_v48  ;;  %vm3286_vm8 = vmor %vm3284_vm7, %vm3285_vm6  ;;  %vm3305_vm10 = vweird.f32 %v9381_v54  ;;  %vm3294_vm11 = vweird.f32 %v3254_v10 }
 0x98f   : > { %v3280_v41 = vmul.f32 %v7512_v61, %v3279_v57  ;;  %6759 = vmatmul.msk.bf16.vlgmr.msrb.gmra.mxu3 %vm1770_vm1, %v3659_v27  ;;  %7517 = vrsqrt.f32 %v9387_v22  ;;  %vm3306_vm14 = vmor %vm3304_vm13, %vm3305_vm10  ;;  %vm3314_vm3 = vweird.f32 %v9387_v22 }
 0x990   : > { %v3300_v56 = vmul.f32 %v9381_v54, %v3299_v8  ;;  %4622 = vmatmul.bf16.gmra.mxu0 %v8520_v7 }
 0x991   : > { %v3281_v23 = vmul.f32 0.5, %v3280_v41 }
 0x992   : > { %v3301_v62 = vmul.f32 0.5, %v3300_v56 }
 0x993   : > { %v3282_v38 = vsub.f32 1.5, %v3281_v23  ;;  %v3231_v3 = vpop.xlane.xlu2 %3230  ;;  %v3235_v35 = vpop.xlane.xlu1 %3234 }
 0x994   : > { %v7516_v51 = vpop.eup %7515  ;;  %v3257_v9 = vadd.f32 1e-12, %v3231_v3  ;;  %v3302_v47 = vsub.f32 1.5, %v3301_v62  ;;  %v9406_v13 = vadd.f32 1e-12, %v3235_v35 }
 0x995   : > { %v3283_v26 = vmul.f32 %v7512_v61, %v3282_v38  ;;  %v3289_v16 = vmul.f32 %v7516_v51, %v3254_v10  ;;  %v9399_v60 = vpop.eup %7517  ;;  %vm3295_vm9 = vweird.f32 %v7516_v51 }
 0x996   : > { %7519 = vrsqrt.f32 %v3257_v9  ;;  %v3309_v36 = vmul.f32 %v9399_v60, %v9387_v22  ;;  %vm3296_vm12 = vmor %vm3294_vm11, %vm3295_vm9  ;;  %vm3315_vm0 = vweird.f32 %v9399_v60  ;;  %vm3324_vm1 = vweird.f32 %v3257_v9 }
 0x997   : > { %v3287_v32 = vsel %vm3286_vm8, %v7512_v61, %v3283_v26  ;;  %v3290_v33 = vmul.f32 %v7516_v51, %v3289_v16  ;;  %v9409_v61 = vadd.f32 1e-12, %v3233_v20  ;;  %7521 = vrsqrt.f32 %v9406_v13  ;;  %vm3316_vm4 = vmor %vm3314_vm3, %vm3315_vm0 }
 0x998   : > { %v9395_v50 = vmul.f32 %v3287_v32, %v9270_v63  ;;  %v3303_v63 = vmul.f32 %v9381_v54, %v3302_v47  ;;  %v3310_v7 = vmul.f32 %v9399_v60, %v3309_v36  ;;  %vm3344_vm7 = vweird.f32 %v9406_v13 }
 0x999   : > { %v3291_v11 = vmul.f32 0.5, %v3290_v33  ;;  %7523 = vrsqrt.f32 %v9409_v61  ;;  %vm3334_vm9 = vweird.f32 %v9409_v61 }
 0x99a   : > { %v4468_v5 = vpack.c.bf16 %v9395_v50, %v9392_v0  ;;  %v3307_v4 = vsel %vm3306_vm14, %v9381_v54, %v3303_v63  ;;  %v3311_v48 = vmul.f32 0.5, %v3310_v7  ;;  %v3216_v63 = vmul.f32 %v9292_v24, %v9292_v24 }
 0x99b   : > { %v3292_v39 = vsub.f32 1.5, %v3291_v11  ;;  %v9419_v57 = vmul.f32 %v3307_v4, %v9279_v58 }
 0x99c   : > { %4661 = vmatmul.bf16.vlgmr.msra.gmra.mxu1 %v4468_v5  ;;  %v7520_v21 = vpop.eup %7519  ;;  %v3312_v34 = vsub.f32 1.5, %v3311_v48 }
 0x99d   : > { %v3293_v18 = vmul.f32 %v7516_v51, %v3292_v39  ;;  %v3319_v14 = vmul.f32 %v7520_v21, %v3257_v9  ;;  %v7522_v59 = vpop.eup %7521  ;;  %vm3325_vm15 = vweird.f32 %v7520_v21  ;;  %v3215_v9 = vmul.f32 %v9285_v45, %v9285_v45 }
 0x99e   : > { %v3339_v8 = vmul.f32 %v7522_v59, %v9406_v13  ;;  %v3313_v6 = vmul.f32 %v9399_v60, %v3312_v34  ;;  %vm3326_vm2 = vmor %vm3324_vm1, %vm3325_vm15  ;;  %vm3345_vm5 = vweird.f32 %v7522_v59 }
 0x99f   : > { %v3320_v49 = vmul.f32 %v7520_v21, %v3319_v14  ;;  %v3297_v29 = vsel %vm3296_vm12, %v7516_v51, %v3293_v18  ;;  %v7524_v54 = vpop.eup %7523  ;;  %v3239_v51 = vpop.xlane.xlu0 %3238  ;;  %vm3346_vm8 = vmor %vm3344_vm7, %vm3345_vm5 }
 0x9a0   : > { %v9415_v46 = vmul.f32 %v3297_v29, %v9277_v42  ;;  %v3237_v42 = vpop.xlane.xlu2 %3236  ;;  %4627 = vmatmul.bf16.gmra.mxu0 %v8536_v25  ;;  %v3329_v3 = vmul.f32 %v7524_v54, %v9409_v61  ;;  %v3340_v26 = vmul.f32 %v7522_v59, %v3339_v8  ;;  %v3261_v25 = vadd.f32 1e-12, %v3239_v51 }
 0x9a1   : > { %v3321_v10 = vmul.f32 0.5, %v3320_v49  ;;  %v3260_v56 = vadd.f32 1e-12, %v3237_v42  ;;  %v3317_v33 = vsel %vm3316_vm4, %v9399_v60, %v3313_v6  ;;  %vm3335_vm6 = vweird.f32 %v7524_v54 }
 0x9a2   : > { %v4469_v27 = vpack.c.bf16 %v9419_v57, %v9415_v46  ;;  %v3330_v32 = vmul.f32 %v7524_v54, %v3329_v3  ;;  %v3341_v5 = vmul.f32 0.5, %v3340_v26  ;;  %v9440_v39 = vmul.f32 %v3317_v33, %v9283_v52  ;;  %vm3336_vm10 = vmor %vm3334_vm9, %vm3335_vm6 }
 0x9a3   : > { %v3322_v41 = vsub.f32 1.5, %v3321_v10  ;;  %7525 = vrsqrt.f32 %v3260_v56  ;;  %vm3354_vm13 = vweird.f32 %v3260_v56  ;;  %vm3364_vm15 = vweird.f32 %v3261_v25 }
 0x9a4   : > { %7527 = vrsqrt.f32 %v3261_v25  ;;  %v3331_v22 = vmul.f32 0.5, %v3330_v32  ;;  %v3217_v26 = vmul.f32 %v9295_v19, %v9295_v19 }
 0x9a5   : > { %v3323_v23 = vmul.f32 %v7520_v21, %v3322_v41 }
 0x9a6   : > { %v3332_v18 = vsub.f32 1.5, %v3331_v22 }
 0x9a7   : > { %v3327_v16 = vsel %vm3326_vm2, %v7520_v21, %v3323_v23  ;;  %v3342_v21 = vsub.f32 1.5, %v3341_v5 }
 0x9a8   : > { %v9435_v62 = vmul.f32 %v3327_v16, %v9287_v43  ;;  %v3333_v52 = vmul.f32 %v7524_v54, %v3332_v18  ;;  %v3241_v16 = vpop.xlane.xlu0 %3240 }
 0x9a9   : > { %v7526_v60 = vpop.eup %7525  ;;  %v3343_v35 = vmul.f32 %v7522_v59, %v3342_v21  ;;  %v3262_v32 = vadd.f32 1e-12, %v3241_v16 }
 0x9aa   : > { %v4470_v47 = vpack.c.bf16 %v9435_v62, %v9440_v39  ;;  %v7528_v43 = vpop.eup %7527  ;;  %v3349_v14 = vmul.f32 %v7526_v60, %v3260_v56  ;;  %v3337_v7 = vsel %vm3336_vm10, %v7524_v54, %v3333_v52  ;;  %vm3355_vm11 = vweird.f32 %v7526_v60 }
 0x9ab   : > { %v3359_v20 = vmul.f32 %v7528_v43, %v3261_v25  ;;  %v3347_v49 = vsel %vm3346_vm8, %v7522_v59, %v3343_v35  ;;  %v9453_v10 = vmul.f32 %v3337_v7, %v9290_v28  ;;  %vm3365_vm12 = vweird.f32 %v7528_v43  ;;  %vm3356_vm14 = vmor %vm3354_vm13, %vm3355_vm11  ;;  %v9501_v35 = vld [vmem:[%s8448_s19 + $0x8] sm:$0xff]  ;;  %v9510_v7 = vld [vmem:[%s8448_s19] sm:$0xff] }
 0x9ac   : > { %4666 = vmatmul.bf16.gmra.mxu1 %v4469_v27  ;;  %v3350_v36 = vmul.f32 %v7526_v60, %v3349_v14  ;;  %v9450_v4 = vmul.f32 %v3347_v49, %v9297_v55  ;;  %vm3366_vm0 = vmor %vm3364_vm15, %vm3365_vm12  ;;  %v3218_v25 = vmul.f32 %v9299_v12, %v9299_v12  ;;  %7529 = vrsqrt.f32 %v3262_v32  ;;  %v7748_v49 = vld [vmem:[%s8448_s19 + $0x20] sm:$0xff] }
 0x9ad   : > { %v3360_v29 = vmul.f32 %v7528_v43, %v3359_v20  ;;  %v3941_v14 = vmul.f32 %v9501_v35, %v9395_v50  ;;  %v3940_v50 = vmul.f32 %v9510_v7, %v9392_v0  ;;  %vm3374_vm2 = vweird.f32 %v3262_v32 }
 0x9ae   : > { %v4471_v13 = vpack.c.bf16 %v9450_v4, %v9453_v10 }
 0x9af   : > { %v9424_v38 = vpop.f32.mrf.mxu0  ;;  %v3361_v48 = vmul.f32 0.5, %v3360_v29  ;;  %v3944_v29 = vmul.f32 %v7748_v49, %v9440_v39  ;;  %v7751_v39 = vld [vmem:[%s8448_s19 + $0x38] sm:$0xff] }
 0x9b0   : > { %v3820_v58 = vmul.f32 %v9424_v38, %v9424_v38  ;;  %4632 = vmatmul.bf16.gmra.mxu0 %v8548_v31  ;;  %v3351_v31 = vmul.f32 0.5, %v3350_v36  ;;  %v7139_v49 = vld [vmem:[#allocation13 + $0x58] sm:$0xff] }
 0x9b1   : > { %v3362_v41 = vsub.f32 1.5, %v3361_v48  ;;  %v9515_v48 = vld [vmem:[%s8448_s19 + $0x10] sm:$0xff] }
 0x9b2   : > { %3828 = vadd.xlane.f32.xlu1 %v3820_v58  ;;  %v3352_v27 = vsub.f32 1.5, %v3351_v31 }
 0x9b3   : > { %v3363_v59 = vmul.f32 %v7528_v43, %v3362_v41  ;;  %v3947_v41 = vmul.f32 %v7751_v39, %v9450_v4  ;;  %v7758_v39 = vld [vmem:[%s8484_s0] sm:$0xff] }
 0x9b4   : > { %v3353_v61 = vmul.f32 %v7526_v60, %v3352_v27 }
 0x9b5   : > { %v3367_v34 = vsel %vm3366_vm0, %v7528_v43, %v3363_v59  ;;  %v3219_v43 = vmul.f32 %v9302_v2, %v9302_v2  ;;  %v9527_v59 = vld [vmem:[%s8448_s19 + $0x28] sm:$0xff] }
 0x9b6   : > { %v3357_v55 = vsel %vm3356_vm14, %v7526_v60, %v3353_v61  ;;  %v9466_v23 = vmul.f32 %v3367_v34, %v9274_v17  ;;  %v9522_v61 = vld [vmem:[%s8448_s19 + $0x18] sm:$0xff] }
 0x9b7   : > { %v3685_v11 = vpop.f32.mrf.mxu0  ;;  %v9463_v8 = vmul.f32 %v3357_v55, %v9272_v15  ;;  %v3943_v0 = vmul.f32 %v9522_v61, %v9419_v57  ;;  %v7134_v57 = vld [vmem:[#allocation13 + $0x30] sm:$0xff] }
 0x9ba   : > { %3242 = vadd.xlane.f32.xlu1 %v3215_v9 }
 0x9bc   : > { %4671 = vmatmul.bf16.gmra.mxu1 %v4470_v47  ;;  %v7530_v47 = vpop.eup %7529 }
 0x9bd   : > { %v3369_v21 = vmul.f32 %v7530_v47, %v3262_v32  ;;  %vm3375_vm1 = vweird.f32 %v7530_v47 }
 0x9be   : > { %vm3376_vm3 = vmor %vm3374_vm2, %vm3375_vm1 }
 0x9c0   : > { %4637 = vmatmul.bf16.gmra.mxu0 %v8565_v37  ;;  %v4472_v37 = vpack.c.bf16 %v9466_v23, %v9463_v8 }
 0x9c2   : > { %3244 = vadd.xlane.f32.xlu1 %v3216_v63  ;;  %v3370_v63 = vmul.f32 %v7530_v47, %v3369_v21  ;;  %v7140_v21 = vld [vmem:[#allocation13 + $0x60] sm:$0xff] }
 0x9c4   : > { %v3371_v20 = vmul.f32 0.5, %v3370_v63 }
 0x9c6   : > { %v3372_v31 = vsub.f32 1.5, %v3371_v20 }
 0x9c8   : > { %v3373_v27 = vmul.f32 %v7530_v47, %v3372_v31 }
 0x9ca   : > { %v3377_v55 = vsel %vm3376_vm3, %v7530_v47, %v3373_v27  ;;  %v7132_v47 = vld [vmem:[#allocation13 + $0x20] sm:$0xff]  ;;  %v7138_v27 = vld [vmem:[#allocation13 + $0x50] sm:$0xff] }
 0x9cc   : > { %4676 = vmatmul.bf16.gmra.mxu1 %v4471_v13  ;;  %v3942_v13 = vmul.f32 %v9515_v48, %v9415_v46  ;;  %v3945_v46 = vmul.f32 %v9527_v59, %v9435_v62 }
 0x9d0   : > { %4642 = vmatmul.bf16.gmra.mxu0 %v8577_v40 }
 0x9d5   : > { %v9458_v28 = vpop.f32.mrf.mxu1 }
 0x9d6   : > { %v3821_v54 = vmul.f32 %v9458_v28, %v9458_v28 }
 0x9d8   : > { %3830 = vadd.xlane.f32.xlu2 %v3821_v54  ;;  %v7135_v54 = vld [vmem:[#allocation13 + $0x38] sm:$0xff] }
 0x9d9   : > { %4882 = vmatpush.bf16.msra.mxu2 %v7135_v54  ;;  %v7129_v54 = vld [vmem:[#allocation13 + $0x8] sm:$0xff] }
 0x9dc   : > { %4681 = vmatmul.bf16.gmra.mxu1 %v4472_v37  ;;  %v7143_v37 = vld [vmem:[#allocation13 + $0x78] sm:$0xff] }
 0x9dd   : > { %v3704_v42 = vpop.f32.mrf.mxu1  ;;  %v9470_v58 = vpop.f32.mrf.mxu0  ;;  %4911 = vmatpush.bf16.msra.mxu3 %v7143_v37  ;;  %4883 = vmatpush.bf16.msra.mxu2 %v7134_v57 }
 0x9de   : > { %v3824_v9 = vmul.f32 %v9470_v58, %v9470_v58  ;;  %v9532_v42 = vmul.f32 %v3377_v55, %v9281_v30 }
 0x9e0   : > { %4647 = vmatmul.bf16.gmra.mxu0 %v8589_v44 }
 0x9e5   : > { %v3761_v3 = vpop.f32.mrf.mxu0 }
 0x9e6   : > { %v7142_v3 = vld [vmem:[#allocation13 + $0x70] sm:$0xff] }
 0x9e7   : > { %4912 = vmatpush.bf16.msra.mxu3 %v7142_v3  ;;  %v7128_v3 = vld [vmem:[#allocation13] sm:$0xff] }
 0x9f1   : > { %v9474_v6 = vpop.f32.mrf.mxu2 }
 0x9f2   : > { %v3822_v15 = vmul.f32 %v9474_v6, %v9474_v6 }
 0x9f3   : > { %v9478_v51 = vpop.f32.mrf.mxu1 }
 0x9f4   : > { %3832 = vadd.xlane.f32.xlu2 %v3822_v15  ;;  %v3825_v17 = vmul.f32 %v9478_v51, %v9478_v51  ;;  %v7754_v15 = vld [vmem:[%s8448_s19 + $0x30] sm:$0xff] }
 0x9f5   : > { %v3946_v62 = vmul.f32 %v7754_v15, %v9453_v10 }
 0x9f6   : > { %3838 = vadd.xlane.f32.xlu1 %v3825_v17  ;;  %v7755_v17 = vld [vmem:[%s8448_s19 + $0x50] sm:$0xff] }
 0x9f9   : > { %v3723_v56 = vpop.f32.mrf.mxu2 }
 0x9fa   : > { %v3950_v56 = vmul.f32 %v7755_v17, %v9532_v42  ;;  %v7759_v17 = vld [vmem:[%s8448_s19 + $0x58] sm:$0xff] }
 0x9fb   : > { %v3780_v40 = vpop.f32.mrf.mxu1 }
 0x9fc   : > { %3246 = vadd.xlane.f32.xlu2 %v3217_v26  ;;  %v7756_v26 = vld [vmem:[%s8448_s19 + $0x40] sm:$0xff] }
 0x9fd   : > { %v3948_v40 = vmul.f32 %v7756_v26, %v9463_v8 }
 0xa02   : > { %v9484_v44 = vpop.f32.mrf.mxu3 }
 0xa03   : > { %v3823_v33 = vmul.f32 %v9484_v44, %v9484_v44 }
 0xa04   : > { %3248 = vadd.xlane.f32.xlu2 %v3218_v25 }
 0xa05   : > { %3834 = vadd.xlane.f32.xlu0 %v3823_v33  ;;  %v7133_v33 = vld [vmem:[#allocation13 + $0x28] sm:$0xff] }
 0xa06   : > { %4884 = vmatpush.bf16.msra.mxu2 %v7133_v33  ;;  %v7760_v33 = vld [vmem:[%s8448_s19 + $0x60] sm:$0xff] }
 0xa0a   : > { %v3742_v5 = vpop.f32.mrf.mxu3  ;;  %v9490_v11 = vpop.f32.mrf.mxu2  ;;  %4885 = vmatpush.bf16.msra.mxu2 %v7132_v47 }
 0xa0b   : > { %v3826_v22 = vmul.f32 %v9490_v11, %v9490_v11  ;;  %v7141_v5 = vld [vmem:[#allocation13 + $0x68] sm:$0xff] }
 0xa0c   : > { %4913 = vmatpush.bf16.msra.mxu3 %v7141_v5 }
 0xa0d   : > { %3836 = vadd.xlane.f32.xlu0 %v3824_v9  ;;  %3840 = vadd.xlane.f32.xlu1 %v3826_v22  ;;  %v7757_v22 = vld [vmem:[%s8448_s19 + $0x48] sm:$0xff] }
 0xa0e   : > { %v3949_v8 = vmul.f32 %v7757_v22, %v9466_v23 }
 0xa10   : > { %4914 = vmatpush.bf16.msra.mxu3 %v7140_v21 }
 0xa12   : > { %v3799_v60 = vpop.f32.mrf.mxu2  ;;  %v9496_v18 = vpop.f32.mrf.mxu3 }
 0xa13   : > { %v3827_v52 = vmul.f32 %v9496_v18, %v9496_v18 }
 0xa14   : > { %4915 = vmatpush.bf16.msra.mxu3 %v7139_v49 }
 0xa15   : > { %3250 = vadd.xlane.f32.xlu0 %v3219_v43  ;;  %3958 = vadd.xlane.f32.xlu1 %v3941_v14 }
 0xa16   : > { %3842 = vadd.xlane.f32.xlu2 %v3827_v52 }
 0xa18   : > { %4916 = vmatpush.bf16.msra.mxu3 %v7138_v27 }
 0xa1a   : > { %v3818_v36 = vpop.f32.mrf.mxu3 }
 0xa1b   : > { %v7131_v36 = vld [vmem:[#allocation13 + $0x18] sm:$0xff] }
 0xa1c   : > { %4886 = vmatpush.bf16.msra.mxu2 %v7131_v36 }
 0xa1d   : > { %3964 = vadd.xlane.f32.xlu1 %v3944_v29  ;;  %3956 = vadd.xlane.f32.xlu0 %v3940_v50 }
 0xa1e   : > { %3960 = vadd.xlane.f32.xlu2 %v3942_v13  ;;  %v7130_v13 = vld [vmem:[#allocation13 + $0x10] sm:$0xff] }
 0xa20   : > { %4887 = vmatpush.bf16.msra.mxu2 %v7130_v13 }
 0xa24   : > { %4888 = vmatpush.bf16.msra.mxu2 %v7129_v54 }
 0xa25   : > { %3970 = vadd.xlane.f32.xlu1 %v3947_v41  ;;  %3962 = vadd.xlane.f32.xlu0 %v3943_v0  ;;  %v3829_v34 = vpop.xlane.xlu1 %3828 }
 0xa26   : > { %3966 = vadd.xlane.f32.xlu2 %v3945_v46  ;;  %v3844_v4 = vadd.f32 1e-12, %v3829_v34 }
 0xa28   : > { %7531 = vrsqrt.f32 %v3844_v4  ;;  %vm3858_vm5 = vweird.f32 %v3844_v4  ;;  %4889 = vmatpush.bf16.msra.mxu2 %v7128_v3 }
 0xa2b   : > { %4890 = vmatmul.bf16.vlgmr.msra.gmra.mxu2 %v8492_v53 }
 0xa2d   : > { %3968 = vadd.xlane.f32.xlu0 %v3946_v62  ;;  %3976 = vadd.xlane.f32.xlu1 %v3950_v56  ;;  %v3243_v30 = vpop.xlane.xlu1 %3242  ;;  %v7136_v62 = vld [vmem:[#allocation13 + $0x40] sm:$0xff] }
 0xa2e   : > { %v7532_v16 = vpop.eup %7531  ;;  %3972 = vadd.xlane.f32.xlu2 %v3948_v40  ;;  %v3263_v25 = vadd.f32 1e-12, %v3243_v30 }
 0xa2f   : > { %v3853_v32 = vmul.f32 %v7532_v16, %v3844_v4  ;;  %vm3859_vm4 = vweird.f32 %v7532_v16 }
 0xa30   : > { %7533 = vrsqrt.f32 %v3263_v25  ;;  %vm3860_vm6 = vmor %vm3858_vm5, %vm3859_vm4  ;;  %vm3384_vm8 = vweird.f32 %v3263_v25 }
 0xa31   : > { %v3854_v10 = vmul.f32 %v7532_v16, %v3853_v32 }
 0xa33   : > { %v3855_v9 = vmul.f32 0.5, %v3854_v10 }
 0xa35   : > { %v3856_v60 = vsub.f32 1.5, %v3855_v9  ;;  %3974 = vadd.xlane.f32.xlu0 %v3949_v8  ;;  %v3245_v43 = vpop.xlane.xlu1 %3244 }
 0xa36   : > { %v7534_v14 = vpop.eup %7533  ;;  %v3264_v63 = vadd.f32 1e-12, %v3245_v43 }
 0xa37   : > { %v3379_v52 = vmul.f32 %v7534_v14, %v3263_v25  ;;  %v3857_v20 = vmul.f32 %v7532_v16, %v3856_v60  ;;  %vm3385_vm7 = vweird.f32 %v7534_v14  ;;  %v7761_v60 = vld [vmem:[%s8484_s0 + $0x8] sm:$0xff] }
 0xa38   : > { %7535 = vrsqrt.f32 %v3264_v63  ;;  %vm3386_vm9 = vmor %vm3384_vm8, %vm3385_vm7  ;;  %vm3394_vm11 = vweird.f32 %v3264_v63 }
 0xa39   : > { %v3380_v29 = vmul.f32 %v7534_v14, %v3379_v52  ;;  %v3861_v23 = vsel %vm3860_vm6, %v7532_v16, %v3857_v20  ;;  %v10847_v52 = vld [vmem:[#allocation27_spill] sm:$0xff] }
 0xa3a   : > { %v9543_v50 = vmul.f32 %v3861_v23, %v9424_v38  ;;  %v7137_v38 = vld [vmem:[#allocation13 + $0x48] sm:$0xff] }
 0xa3b   : > { %v3381_v31 = vmul.f32 0.5, %v3380_v29  ;;  %4917 = vmatpush.bf16.msra.mxu3 %v7137_v38  ;;  %4895 = vmatmul.bf16.gmra.mxu2 %v8509_v1 }
 0xa3c   : > { %v4292_v41 = vmul.f32 %v7758_v39, %v9543_v50 }
 0xa3d   : > { %v3382_v0 = vsub.f32 1.5, %v3381_v31 }
 0xa3e   : > { %v7536_v46 = vpop.eup %7535  ;;  %4300 = vadd.xlane.f32.xlu0 %v4292_v41 }
 0xa3f   : > { %v3389_v55 = vmul.f32 %v7536_v46, %v3264_v63  ;;  %v3383_v34 = vmul.f32 %v7534_v14, %v3382_v0  ;;  %vm3395_vm10 = vweird.f32 %v7536_v46  ;;  %4918 = vmatpush.bf16.msra.mxu3 %v7136_v62  ;;  %v7150_v62 = vld [vmem:[#allocation14 + $0x30] sm:$0xff] }
 0xa40   : > { %vm3396_vm12 = vmor %vm3394_vm11, %vm3395_vm10 }
 0xa41   : > { %v3390_v37 = vmul.f32 %v7536_v46, %v3389_v55  ;;  %v3387_v4 = vsel %vm3386_vm9, %v7534_v14, %v3383_v34  ;;  %v10848_v55 = vld [vmem:[#allocation28_spill] sm:$0xff] }
 0xa42   : > { %v3439_v57 = vmul.f32 %v3387_v4, %v9285_v45 }
 0xa43   : > { %v3391_v15 = vmul.f32 0.5, %v3390_v37 }
 0xa44   : > { %v3951_v56 = vmul.f32 %v7759_v17, %v3439_v57  ;;  %v4473_v26 = vpack.c.bf16 %v3439_v57, %v9532_v42 }
 0xa45   : > { %v3392_v40 = vsub.f32 1.5, %v3391_v15 }
 0xa46   : > { %3978 = vadd.xlane.f32.xlu2 %v3951_v56  ;;  %4686 = vmatmul.bf16.gmra.mxu1 %v4473_v26  ;;  %v7762_v26 = vld [vmem:[%s8484_s0 + $0x10] sm:$0xff] }
 0xa47   : > { %v3393_v30 = vmul.f32 %v7536_v46, %v3392_v40 }
 0xa49   : > { %v3397_v45 = vsel %vm3396_vm12, %v7536_v46, %v3393_v30  ;;  %v7151_v46 = vld [vmem:[#allocation14 + $0x38] sm:$0xff] }
 0xa4a   : > { %v9552_v16 = vmul.f32 %v3397_v45, %v9292_v24  ;;  %5040 = vmatpush.bf16.msrb.mxu2 %v7151_v46 }
 0xa4b   : > { %v3831_v25 = vpop.xlane.xlu2 %3830  ;;  %4900 = vmatmul.bf16.gmra.mxu2 %v10847_v52  ;;  %v7763_v52 = vld [vmem:[%s8448_s19 + $0x68] sm:$0xff] }
 0xa4c   : > { %v3845_v32 = vadd.f32 1e-12, %v3831_v25  ;;  %v3952_v42 = vmul.f32 %v7760_v33, %v9552_v16 }
 0xa4e   : > { %7537 = vrsqrt.f32 %v3845_v32  ;;  %3980 = vadd.xlane.f32.xlu2 %v3952_v42  ;;  %vm3868_vm14 = vweird.f32 %v3845_v32  ;;  %5041 = vmatpush.bf16.msrb.mxu2 %v7150_v62 }
 0xa54   : > { %v7538_v5 = vpop.eup %7537 }
 0xa55   : > { %v3863_v10 = vmul.f32 %v7538_v5, %v3845_v32  ;;  %vm3869_vm13 = vweird.f32 %v7538_v5 }
 0xa56   : > { %vm3870_vm15 = vmor %vm3868_vm14, %vm3869_vm13 }
 0xa57   : > { %v3864_v9 = vmul.f32 %v7538_v5, %v3863_v10 }
 0xa59   : > { %v3865_v22 = vmul.f32 0.5, %v3864_v9 }
 0xa5b   : > { %v3866_v8 = vsub.f32 1.5, %v3865_v22  ;;  %4905 = vmatmul.bf16.gmra.mxu2 %v10848_v55 }
 0xa5d   : > { %v3867_v53 = vmul.f32 %v7538_v5, %v3866_v8 }
 0xa5f   : > { %v3871_v24 = vsel %vm3870_vm15, %v7538_v5, %v3867_v53  ;;  %v7149_v5 = vld [vmem:[#allocation14 + $0x28] sm:$0xff] }
 0xa60   : > { %v3933_v47 = vmul.f32 %v3871_v24, %v9458_v28  ;;  %5042 = vmatpush.bf16.msrb.mxu2 %v7149_v5 }
 0xa62   : > { %v4750_v21 = vpack.c.bf16 %v3933_v47, %v9543_v50  ;;  %v4293_v43 = vmul.f32 %v7761_v60, %v3933_v47 }
 0xa64   : > { %4919 = vmatmul.bf16.vlgmr.msra.gmra.mxu3 %v4750_v21  ;;  %4302 = vadd.xlane.f32.xlu1 %v4293_v43 }
 0xa67   : > { %v3833_v14 = vpop.xlane.xlu2 %3832 }
 0xa68   : > { %v3846_v63 = vadd.f32 1e-12, %v3833_v14  ;;  %v9598_v14 = vpop.f32.mrf.mxu0 }
 0xa69   : > { %v3839_v1 = vpop.xlane.xlu1 %3838 }
 0xa6a   : > { %7539 = vrsqrt.f32 %v3846_v63  ;;  %v9561_v20 = vadd.f32 1e-12, %v3839_v1  ;;  %vm3878_vm1 = vweird.f32 %v3846_v63 }
 0xa6c   : > { %7541 = vrsqrt.f32 %v9561_v20  ;;  %vm3908_vm12 = vweird.f32 %v9561_v20 }
 0xa6f   : > { %v3247_v36 = vpop.xlane.xlu2 %3246 }
 0xa70   : > { %v7540_v49 = vpop.eup %7539  ;;  %v3265_v29 = vadd.f32 1e-12, %v3247_v36 }
 0xa71   : > { %v3873_v23 = vmul.f32 %v7540_v49, %v3846_v63  ;;  %vm3879_vm0 = vweird.f32 %v7540_v49 }
 0xa72   : > { %7543 = vrsqrt.f32 %v3265_v29  ;;  %v9564_v31 = vpop.eup %7541  ;;  %vm3880_vm2 = vmor %vm3878_vm1, %vm3879_vm0  ;;  %vm3404_vm4 = vweird.f32 %v3265_v29 }
 0xa73   : > { %v3874_v28 = vmul.f32 %v7540_v49, %v3873_v23  ;;  %v3903_v38 = vmul.f32 %v9564_v31, %v9561_v20  ;;  %vm3909_vm6 = vweird.f32 %v9564_v31 }
 0xa74   : > { %vm9631_vm14 = vmor %vm3908_vm12, %vm3909_vm6 }
 0xa75   : > { %v3875_v50 = vmul.f32 0.5, %v3874_v28  ;;  %v3904_v17 = vmul.f32 %v9564_v31, %v3903_v38 }
 0xa77   : > { %v3876_v13 = vsub.f32 1.5, %v3875_v50  ;;  %v3249_v27 = vpop.xlane.xlu2 %3248  ;;  %v3905_v10 = vmul.f32 0.5, %v3904_v17  ;;  %v9604_v50 = vpop.f32.mrf.mxu1 }
 0xa78   : > { %v7544_v39 = vpop.eup %7543  ;;  %v9566_v41 = vadd.f32 1e-12, %v3249_v27  ;;  %v3835_v0 = vpop.xlane.xlu0 %3834 }
 0xa79   : > { %v3399_v34 = vmul.f32 %v7544_v39, %v3265_v29  ;;  %v9569_v54 = vadd.f32 1e-12, %v3835_v0  ;;  %v3877_v37 = vmul.f32 %v7540_v49, %v3876_v13  ;;  %vm3405_vm3 = vweird.f32 %v7544_v39 }
 0xa7a   : > { %7545 = vrsqrt.f32 %v9566_v41  ;;  %vm3406_vm5 = vmor %vm3404_vm4, %vm3405_vm3  ;;  %v3906_v60 = vsub.f32 1.5, %v3905_v10  ;;  %vm3414_vm9 = vweird.f32 %v9566_v41 }
 0xa7b   : > { %v3400_v4 = vmul.f32 %v7544_v39, %v3399_v34  ;;  %7547 = vrsqrt.f32 %v9569_v54  ;;  %v3881_v57 = vsel %vm3880_vm2, %v7540_v49, %v3877_v37  ;;  %v7148_v49 = vld [vmem:[#allocation14 + $0x20] sm:$0xff]  ;;  %vm3888_vm11 = vweird.f32 %v9569_v54 }
 0xa7c   : > { %v9576_v15 = vmul.f32 %v3881_v57, %v9474_v6  ;;  %v3907_v55 = vmul.f32 %v9564_v31, %v3906_v60  ;;  %5043 = vmatpush.bf16.msrb.mxu2 %v7148_v49  ;;  %v7145_v60 = vld [vmem:[#allocation14 + $0x8] sm:$0xff] }
 0xa7d   : > { %v3401_v3 = vmul.f32 0.5, %v3400_v4 }
 0xa7e   : > { %v4294_v40 = vmul.f32 %v7762_v26, %v9576_v15  ;;  %v3911_v17 = vsel %vm9631_vm14, %v9564_v31, %v3907_v55  ;;  %v7764_v26 = vld [vmem:[%s8448_s19 + $0x70] sm:$0xff] }
 0xa7f   : > { %v3402_v56 = vsub.f32 1.5, %v3401_v3  ;;  %v9653_v10 = vmul.f32 %v3911_v17, %v9478_v51 }
 0xa80   : > { %v9581_v30 = vpop.eup %7545  ;;  %v3841_v45 = vpop.xlane.xlu1 %3840  ;;  %4304 = vadd.xlane.f32.xlu1 %v4294_v40 }
 0xa81   : > { %v3837_v25 = vpop.xlane.xlu0 %3836  ;;  %v9583_v32 = vpop.eup %7547  ;;  %v3409_v33 = vmul.f32 %v9581_v30, %v9566_v41  ;;  %v9587_v6 = vadd.f32 1e-12, %v3841_v45  ;;  %v3403_v22 = vmul.f32 %v7544_v39, %v3402_v56  ;;  %vm3415_vm7 = vweird.f32 %v9581_v30  ;;  %v7147_v41 = vld [vmem:[#allocation14 + $0x18] sm:$0xff] }
 0xa82   : > { %v9589_v42 = vadd.f32 1e-12, %v3837_v25  ;;  %v3883_v9 = vmul.f32 %v9583_v32, %v9569_v54  ;;  %vm3889_vm8 = vweird.f32 %v9583_v32  ;;  %vm3416_vm10 = vmor %vm3414_vm9, %vm3415_vm7  ;;  %5044 = vmatpush.bf16.msrb.mxu2 %v7147_v41  ;;  %v7765_v25 = vld [vmem:[%s8484_s0 + $0x18] sm:$0xff] }
 0xa83   : > { %v3410_v8 = vmul.f32 %v9581_v30, %v3409_v33  ;;  %v3407_v24 = vsel %vm3406_vm5, %v7544_v39, %v3403_v22  ;;  %vm3890_vm13 = vmor %vm3888_vm11, %vm3889_vm8 }
 0xa84   : > { %v3884_v53 = vmul.f32 %v9583_v32, %v3883_v9  ;;  %7549 = vrsqrt.f32 %v9589_v42  ;;  %v3441_v21 = vmul.f32 %v3407_v24, %v9295_v19  ;;  %v9657_v9 = vpop.f32.mrf.mxu0  ;;  %vm3898_vm0 = vweird.f32 %v9589_v42 }
 0xa85   : > { %v3411_v47 = vmul.f32 0.5, %v3410_v8  ;;  %7551 = vrsqrt.f32 %v9587_v6 }
 0xa86   : > { %v3885_v43 = vmul.f32 0.5, %v3884_v53  ;;  %v3953_v1 = vmul.f32 %v7763_v52, %v3441_v21  ;;  %v4474_v36 = vpack.c.bf16 %v3441_v21, %v9552_v16 }
 0xa87   : > { %v3412_v63 = vsub.f32 1.5, %v3411_v47  ;;  %v9664_v47 = vpop.f32.mrf.mxu1 }
 0xa88   : > { %v3886_v29 = vsub.f32 1.5, %v3885_v43  ;;  %v3959_v23 = vpop.xlane.xlu1 %3958  ;;  %3982 = vadd.xlane.f32.xlu0 %v3953_v1  ;;  %4691 = vmatmul.bf16.gmra.mxu1 %v4474_v36  ;;  %v7766_v36 = vld [vmem:[%s8484_s0 + $0x28] sm:$0xff] }
 0xa89   : > { %v3251_v28 = vpop.xlane.xlu0 %3250  ;;  %v3843_v19 = vpop.xlane.xlu2 %3842  ;;  %v6761_v13 = vmul.f32 -1.442695, %v3959_v23  ;;  %v3413_v16 = vmul.f32 %v9581_v30, %v3412_v63  ;;  %v4297_v49 = vmul.f32 %v7766_v36, %v9653_v10 }
 0xa8a   : > { %v9607_v27 = vadd.f32 1e-12, %v3251_v28  ;;  %v9610_v39 = vpop.eup %7549  ;;  %v3887_v0 = vmul.f32 %v9583_v32, %v3886_v29  ;;  %v9614_v46 = vadd.f32 1e-12, %v3843_v19 }
 0xa8b   : > { %v9617_v34 = vpop.eup %7551  ;;  %v3893_v38 = vmul.f32 %v9610_v39, %v9589_v42  ;;  %7553 = vpow2.f32 %v6761_v13  ;;  %v3417_v37 = vsel %vm3416_vm10, %v9581_v30, %v3413_v16  ;;  %v7146_v30 = vld [vmem:[#allocation14 + $0x10] sm:$0xff]  ;;  %vm3899_vm15 = vweird.f32 %v9610_v39  ;;  %v7144_v13 = vld [vmem:[#allocation14] sm:$0xff] }
 0xa8c   : > { %7555 = vrsqrt.f32 %v9614_v46  ;;  %v9638_v20 = vmul.f32 %v3417_v37, %v9299_v12  ;;  %v3891_v57 = vsel %vm3890_vm13, %v9583_v32, %v3887_v0  ;;  %v3913_v3 = vmul.f32 %v9617_v34, %v9587_v6  ;;  %5045 = vmatpush.bf16.msrb.mxu2 %v7146_v30  ;;  %vm3900_vm1 = vmor %vm3898_vm0, %vm3899_vm15  ;;  %v7767_v37 = vld [vmem:[%s8484_s0 + $0x20] sm:$0xff]  ;;  %v9688_v17 = vpop.f32.mrf.mxu0 }
 0xa8d   : > { %v3894_v4 = vmul.f32 %v9610_v39, %v3893_v38  ;;  %7557 = vrsqrt.f32 %v9607_v27  ;;  %v3935_v62 = vmul.f32 %v3891_v57, %v9484_v44  ;;  %vm3928_vm2 = vweird.f32 %v9614_v46 }
 0xa8e   : > { %v3954_v40 = vmul.f32 %v7764_v26, %v9638_v20  ;;  %v3914_v22 = vmul.f32 %v9617_v34, %v3913_v3  ;;  %vm3424_vm6 = vweird.f32 %v9607_v27  ;;  %vm3919_vm7 = vweird.f32 %v9617_v34 }
 0xa8f   : > { %v3895_v56 = vmul.f32 0.5, %v3894_v4  ;;  %v4751_v12 = vpack.c.bf16 %v3935_v62, %v9576_v15  ;;  %v4295_v32 = vmul.f32 %v7765_v25, %v3935_v62  ;;  %v9694_v30 = vpop.f32.mrf.mxu1  ;;  %vm3918_vm10 = vweird.f32 %v9587_v6 }
 0xa90   : > { %3984 = vadd.xlane.f32.xlu0 %v3954_v40  ;;  %v3965_v43 = vpop.xlane.xlu1 %3964  ;;  %v3915_v1 = vmul.f32 0.5, %v3914_v22  ;;  %5046 = vmatpush.bf16.msrb.mxu2 %v7145_v60  ;;  %vm9731_vm11 = vmor %vm3918_vm10, %vm3919_vm7 }
 0xa91   : > { %v3957_v45 = vpop.xlane.xlu0 %3956  ;;  %v7554_v33 = vpop.eup %7553  ;;  %v3896_v5 = vsub.f32 1.5, %v3895_v56  ;;  %4924 = vmatmul.bf16.gmra.mxu3 %v4751_v12  ;;  %4306 = vadd.xlane.f32.xlu2 %v4295_v32  ;;  %v6764_v28 = vmul.f32 -1.442695, %v3965_v43 }
 0xa92   : > { %v3961_v44 = vpop.xlane.xlu2 %3960  ;;  %v9655_v31 = vpop.eup %7555  ;;  %v9660_v8 = vadd.f32 1.0, %v7554_v33  ;;  %v6760_v53 = vmul.f32 -1.442695, %v3957_v45  ;;  %v3916_v57 = vsub.f32 1.5, %v3915_v1 }
 0xa93   : > { %v6762_v15 = vmul.f32 -1.442695, %v3961_v44  ;;  %v9662_v24 = vpop.eup %7557  ;;  %v3923_v51 = vmul.f32 %v9655_v31, %v9614_v46  ;;  %v3897_v21 = vmul.f32 %v9610_v39, %v3896_v5  ;;  %vm3929_vm3 = vweird.f32 %v9655_v31  ;;  %v7167_v5 = vld [vmem:[#allocation16 + $0x38] sm:$0xff] }
 0xa94   : > { %7559 = vrcp.f32 %v9660_v8  ;;  %v3419_v52 = vmul.f32 %v9662_v24, %v9607_v27  ;;  %5047 = vmatpush.bf16.msrb.mxu2 %v7144_v13  ;;  %vm3425_vm4 = vweird.f32 %v9662_v24  ;;  %vm3930_vm5 = vmor %vm3928_vm2, %vm3929_vm3  ;;  %5754 = vmatpush.bf16.msrb.mxu0 %v7167_v5  ;;  %vm4072_vm12 = vweird.f32 %v9660_v8 }
 0xa95   : > { %v3924_v63 = vmul.f32 %v9655_v31, %v3923_v51  ;;  %7561 = vpow2.f32 %v6762_v15  ;;  %v3901_v29 = vsel %vm3900_vm1, %v9610_v39, %v3897_v21  ;;  %vm9710_vm8 = vmor %vm3424_vm6, %vm3425_vm4  ;;  %v3917_v51 = vmul.f32 %v9617_v34, %v3916_v57 }
 0xa96   : > { %7563 = vpow2.f32 %v6760_v53  ;;  %v3420_v23 = vmul.f32 %v9662_v24, %v3419_v52  ;;  %v3936_v19 = vmul.f32 %v3901_v29, %v9470_v58  ;;  %v4078_v53 = vand.u32 2147483648, %v9660_v8 }
 0xa97   : > { %v3925_v42 = vmul.f32 0.5, %v3924_v63  ;;  %7565 = vpow2.f32 %v6764_v28  ;;  %v4076_v60 = vand.u32 2147483647, %v9660_v8 }
 0xa98   : > { %v3421_v0 = vmul.f32 0.5, %v3420_v23  ;;  %4310 = vadd.xlane.f32.xlu0 %v4297_v49  ;;  %v4296_v54 = vmul.f32 %v7767_v37, %v3936_v19  ;;  %v4752_v27 = vpack.c.bf16 %v9653_v10, %v3936_v19  ;;  %v7768_v10 = vld [vmem:[%s8484_s0 + $0x38] sm:$0xff]  ;;  %v3971_v52 = vpop.xlane.xlu1 %3970  ;;  %v4079_v49 = vor.u32 1.1754944e-38, %v4078_v53 }
 0xa99   : > { %v3926_v16 = vsub.f32 1.5, %v3925_v42  ;;  %v3963_v38 = vpop.xlane.xlu0 %3962  ;;  %v9751_v42 = vpop.f32.mrf.mxu0  ;;  %vm4077_vm14 = vcmp.eq.f32.partialorder %v4076_v60, 8.507059e+37 }
 0xa9a   : > { %v3967_v55 = vpop.xlane.xlu2 %3966  ;;  %v9681_v41 = vpop.eup %7559  ;;  %v3422_v3 = vsub.f32 1.5, %v3421_v0  ;;  %v6763_v26 = vmul.f32 -1.442695, %v3963_v38  ;;  %4308 = vadd.xlane.f32.xlu2 %v4296_v54 }
 0xa9b   : > { %v6765_v39 = vmul.f32 -1.442695, %v3967_v55  ;;  %v7562_v4 = vpop.eup %7561  ;;  %v4068_v58 = vmul.f32 %v9681_v41, %v9660_v8  ;;  %v3927_v40 = vmul.f32 %v9655_v31, %v3926_v16  ;;  %vm4073_vm9 = vweird.f32 %v9681_v41  ;;  %v7769_v16 = vld [vmem:[%s8448_s19 + $0x78] sm:$0xff]  ;;  %v9761_v55 = vpop.f32.mrf.mxu1 }
 0xa9c   : > { %v7564_v62 = vpop.eup %7563  ;;  %v9691_v56 = vadd.f32 1.0, %v7562_v4  ;;  %v3423_v12 = vmul.f32 %v9662_v24, %v3422_v3  ;;  %vm9740_vm13 = vmor %vm4072_vm12, %vm4073_vm9 }
 0xa9d   : > { %v4069_v45 = vsub.f32 1.0, %v4068_v58  ;;  %v9701_v25 = vadd.f32 1.0, %v7564_v62  ;;  %7567 = vpow2.f32 %v6765_v39  ;;  %v3931_v32 = vsel %vm3930_vm5, %v9655_v31, %v3927_v40  ;;  %v7566_v22 = vpop.eup %7565  ;;  %v7166_v40 = vld [vmem:[#allocation16 + $0x30] sm:$0xff] }
 0xa9e   : > { %7569 = vrcp.f32 %v9691_v56  ;;  %v9717_v44 = vmul.f32 %v3931_v32, %v9496_v18  ;;  %v3427_v31 = vsel %vm9710_vm8, %v9662_v24, %v3423_v12  ;;  %v7770_v32 = vld [vmem:[%s8484_s0 + $0x30] sm:$0xff]  ;;  %5755 = vmatpush.bf16.msrb.mxu0 %v7166_v40  ;;  %vm4087_vm3 = vweird.f32 %v9691_v56 }
 0xa9f   : > { %v4070_v33 = vmul.f32 %v9681_v41, %v4069_v45  ;;  %7571 = vrcp.f32 %v9701_v25  ;;  %v3443_v43 = vmul.f32 %v3427_v31, %v9302_v2  ;;  %v3921_v2 = vsel %vm9731_vm11, %v9617_v34, %v3917_v51 }
 0xaa0   : > { %7573 = vpow2.f32 %v6763_v26  ;;  %v4299_v18 = vmul.f32 %v7768_v10, %v9717_v44  ;;  %v6767_v34 = vmul.f32 -1.442695, %v3971_v52  ;;  %v3938_v37 = vmul.f32 %v3921_v2, %v9490_v11  ;;  %v3977_v2 = vpop.xlane.xlu1 %3976 }
 0xaa1   : > { %v4071_v15 = vadd.f32 %v9681_v41, %v4070_v33  ;;  %4929 = vmatmul.bf16.gmra.mxu3 %v4752_v27  ;;  %v4475_v29 = vpack.c.bf16 %v3443_v43, %v9638_v20  ;;  %v3969_v13 = vpop.xlane.xlu0 %3968  ;;  %v3955_v0 = vmul.f32 %v7769_v16, %v3443_v43  ;;  %v4665_v20 = vadd.f32 %v9664_v47, %v9657_v9 }
 0xaa2   : > { %4314 = vadd.xlane.f32.xlu2 %v4299_v18  ;;  %v4061_v4 = vand.u32 2147483647, %v9701_v25  ;;  %v4063_v57 = vand.u32 2147483648, %v9701_v25  ;;  %v6766_v9 = vmul.f32 -1.442695, %v3969_v13  ;;  %vm4057_vm0 = vweird.f32 %v9701_v25 }
 0xaa3   : > { %v7568_v21 = vpop.eup %7567  ;;  %v4075_v36 = vsel %vm9740_vm13, %v9681_v41, %v4071_v15  ;;  %4696 = vmatmul.bf16.gmra.mxu1 %v4475_v29  ;;  %v9765_v41 = vadd.f32 1.0, %v7566_v22  ;;  %3986 = vadd.xlane.f32.xlu1 %v3955_v0  ;;  %v4663_v11 = vadd.f32 %v9604_v50, %v9598_v14  ;;  %v4298_v33 = vmul.f32 %v7770_v32, %v3938_v37  ;;  %v9784_v53 = vpop.f32.mrf.mxu1 }
 0xaa4   : > { %v9738_v63 = vpop.eup %7569  ;;  %v9756_v19 = vadd.f32 1.0, %v7568_v21  ;;  %v4080_v54 = vsel %vm4077_vm14, %v4079_v49, %v4075_v36  ;;  %v4064_v26 = vor.u32 1.1754944e-38, %v4063_v57  ;;  %vm4062_vm2 = vcmp.eq.f32.partialorder %v4061_v4, 8.507059e+37 }
 0xaa5   : > { %v7572_v1 = vpop.eup %7571  ;;  %v4083_v23 = vmul.f32 %v9738_v63, %v9691_v56  ;;  %v4703_v3 = vmul.f32 %v4665_v20, %v4080_v54  ;;  %v4753_v50 = vpack.c.bf16 %v9717_v44, %v3938_v37  ;;  %v4091_v51 = vand.u32 2147483647, %v9691_v56 }
 0xaa6   : > { %v7574_v8 = vpop.eup %7573  ;;  %v4053_v28 = vmul.f32 %v7572_v1, %v9701_v25  ;;  %vm4058_vm15 = vweird.f32 %v7572_v1  ;;  %v9780_v25 = vpop.f32.mrf.mxu0  ;;  %vm4088_vm4 = vweird.f32 %v9738_v63  ;;  %v4093_v6 = vand.u32 2147483648, %v9691_v56 }
 0xaa7   : > { %v9763_v38 = vadd.f32 1.0, %v7574_v8  ;;  %v4084_v47 = vsub.f32 1.0, %v4083_v23  ;;  %vm4059_vm1 = vmor %vm4057_vm0, %vm4058_vm15  ;;  %v4719_v27 = vmax.f32 %v4703_v3, 0.0  ;;  %v4670_v56 = vadd.f32 %v9761_v55, %v9751_v42 }
 0xaa8   : > { %v4054_v39 = vsub.f32 1.0, %v4053_v28  ;;  %vm9807_vm6 = vmor %vm4087_vm3, %vm4088_vm4  ;;  %v4094_v16 = vor.u32 1.1754944e-38, %v4093_v6  ;;  %vm4092_vm9 = vcmp.eq.f32.partialorder %v4091_v51, 8.507059e+37  ;;  %v4668_v4 = vadd.f32 %v9694_v30, %v9688_v17 }
 0xaa9   : > { %7575 = vrcp.f32 %v9763_v38  ;;  %v4085_v45 = vmul.f32 %v9738_v63, %v4084_v47  ;;  %v9795_v43 = vadd.f32 %v9501_v35, %v4719_v27  ;;  %v4106_v36 = vand.u32 2147483647, %v9763_v38  ;;  %v3975_v8 = vpop.xlane.xlu0 %3974 }
 0xaaa   : > { %v4055_v58 = vmul.f32 %v7572_v1, %v4054_v39  ;;  %7577 = vrcp.f32 %v9756_v19  ;;  %v4108_v49 = vand.u32 2147483648, %v9763_v38  ;;  %vm4102_vm7 = vweird.f32 %v9763_v38  ;;  %v3973_v39 = vpop.xlane.xlu2 %3972 }
 0xaab   : > { %7579 = vpow2.f32 %v6767_v34  ;;  %4312 = vadd.xlane.f32.xlu1 %v4298_v33  ;;  %v4086_v24 = vadd.f32 %v9738_v63, %v4085_v45  ;;  %vm4107_vm10 = vcmp.eq.f32.partialorder %v4106_v36, 8.507059e+37  ;;  %v6769_v37 = vmul.f32 -1.442695, %v3975_v8  ;;  %v4674_v57 = vpop.f32.mrf.mxu1 }
 0xaac   : > { %7581 = vrcp.f32 %v9765_v41  ;;  %v4056_v62 = vadd.f32 %v7572_v1, %v4055_v58  ;;  %v4109_v0 = vor.u32 1.1754944e-38, %v4108_v49  ;;  %v6768_v47 = vmul.f32 -1.442695, %v3973_v39 }
 0xaad   : > { %7583 = vpow2.f32 %v6766_v9  ;;  %v4090_v23 = vsel %vm9807_vm6, %v9738_v63, %v4086_v24  ;;  %vm4132_vm13 = vweird.f32 %v9756_v19  ;;  %vm4117_vm15 = vweird.f32 %v9765_v41 }
 0xaae   : > { %v4060_v12 = vsel %vm4059_vm1, %v7572_v1, %v4056_v62  ;;  %v4095_v54 = vsel %vm4092_vm9, %v4094_v16, %v4090_v23  ;;  %v4625_v42 = vpop.f32.mrf.mxu0 }
 0xaaf   : > { %v7576_v46 = vpop.eup %7575  ;;  %v4065_v5 = vsel %vm4062_vm2, %v4064_v26, %v4060_v12  ;;  %v4704_v58 = vmul.f32 %v4668_v4, %v4095_v54  ;;  %v4138_v12 = vand.u32 2147483648, %v9756_v19  ;;  %v7164_v54 = vld [vmem:[#allocation16 + $0x20] sm:$0xff] }
 0xab0   : > { %v9778_v31 = vpop.eup %7577  ;;  %v4098_v14 = vmul.f32 %v7576_v46, %v9763_v38  ;;  %v4702_v22 = vmul.f32 %v4663_v11, %v4065_v5  ;;  %vm4103_vm5 = vweird.f32 %v7576_v46 }
 0xab1   : > { %v7580_v15 = vpop.eup %7579  ;;  %4934 = vmatmul.bf16.gmra.mxu3 %v4753_v50  ;;  %v4128_v44 = vmul.f32 %v9778_v31, %v9756_v19  ;;  %vm4104_vm8 = vmor %vm4102_vm7, %vm4103_vm5  ;;  %v4301_v62 = vpop.xlane.xlu0 %4300  ;;  %v4720_v17 = vmax.f32 %v4704_v58, 0.0  ;;  %vm4133_vm11 = vweird.f32 %v9778_v31 }
 0xab2   : > { %v9788_v10 = vpop.eup %7581  ;;  %v4099_v18 = vsub.f32 1.0, %v4098_v14  ;;  %v4718_v21 = vmax.f32 %v4702_v22, 0.0  ;;  %v9821_v13 = vadd.f32 1.0, %v7580_v15  ;;  %v6776_v40 = vmul.f32 -1.442695, %v4301_v62  ;;  %vm9847_vm14 = vmor %vm4132_vm13, %vm4133_vm11  ;;  %v7165_v22 = vld [vmem:[#allocation16 + $0x28] sm:$0xff] }
 0xab3   : > { %v7584_v60 = vpop.eup %7583  ;;  %v4113_v29 = vmul.f32 %v9788_v10, %v9765_v41  ;;  %v4129_v20 = vsub.f32 1.0, %v4128_v44  ;;  %vm4118_vm12 = vweird.f32 %v9788_v10  ;;  %v4123_v14 = vand.u32 2147483648, %v9765_v41  ;;  %5756 = vmatpush.bf16.msrb.mxu0 %v7165_v22 }
 0xab4   : > { %v4100_v52 = vmul.f32 %v7576_v46, %v4099_v18  ;;  %v9799_v1 = vadd.f32 %v9510_v7, %v4718_v21  ;;  %v9812_v35 = vadd.f32 1.0, %v7584_v60  ;;  %v9861_v18 = vpop.f32.mrf.mxu1  ;;  %vm9867_vm0 = vmor %vm4117_vm15, %vm4118_vm12  ;;  %v4139_v60 = vor.u32 1.1754944e-38, %v4138_v12 }
 0xab5   : > { %v4114_v38 = vsub.f32 1.0, %v4113_v29  ;;  %v4130_v9 = vmul.f32 %v9778_v31, %v4129_v20  ;;  %v4124_v36 = vor.u32 1.1754944e-38, %v4123_v14  ;;  %v4675_v29 = vadd.f32 %v4674_v57, %v4625_v42  ;;  %v7163_v57 = vld [vmem:[#allocation16 + $0x18] sm:$0xff] }
 0xab6   : > { %v4964_v7 = vpack.c.bf16 %v9795_v43, %v9799_v1  ;;  %v4101_v28 = vadd.f32 %v7576_v46, %v4100_v52  ;;  %7585 = vrcp.f32 %v9812_v35  ;;  %v9851_v15 = vpop.f32.mrf.mxu0  ;;  %vm4147_vm4 = vweird.f32 %v9812_v35 }
 0xab7   : > { %7587 = vrcp.f32 %v9821_v13  ;;  %v4115_v3 = vmul.f32 %v9788_v10, %v4114_v38  ;;  %v4131_v30 = vadd.f32 %v9778_v31, %v4130_v9  ;;  %5757 = vmatpush.bf16.msrb.mxu0 %v7164_v54  ;;  %v4151_v9 = vand.u32 2147483647, %v9812_v35 }
 0xab8   : > { %5048 = vmatmul.bf16.vlgmr.msrb.gmra.mxu2 %v4964_v7  ;;  %v4105_v34 = vsel %vm4104_vm8, %v7576_v46, %v4101_v28  ;;  %7589 = vpow2.f32 %v6769_v37  ;;  %v4136_v46 = vand.u32 2147483647, %v9756_v19  ;;  %v4121_v19 = vand.u32 2147483647, %v9765_v41 }
 0xab9   : > { %v4110_v63 = vsel %vm4107_vm10, %v4109_v0, %v4105_v34  ;;  %7591 = vpow2.f32 %v6768_v47  ;;  %v4116_v45 = vadd.f32 %v9788_v10, %v4115_v3  ;;  %v4135_v51 = vsel %vm9847_vm14, %v9778_v31, %v4131_v30  ;;  %v3979_v24 = vpop.xlane.xlu2 %3978  ;;  %v7771_v30 = vld [vmem:[%s8448_s19 + $0x20] sm:$0xff] }
 0xaba   : > { %v4705_v55 = vmul.f32 %v4670_v56, %v4110_v63  ;;  %7593 = vpow2.f32 %v6776_v40  ;;  %vm4137_vm1 = vcmp.eq.f32.partialorder %v4136_v46, 8.507059e+37  ;;  %v6771_v8 = vmul.f32 -1.442695, %v3979_v24 }
 0xabb   : > { %v4120_v6 = vsel %vm9867_vm0, %v9788_v10, %v4116_v45  ;;  %v4140_v49 = vsel %vm4137_vm1, %v4139_v60, %v4135_v51  ;;  %vm4122_vm2 = vcmp.eq.f32.partialorder %v4121_v19, 8.507059e+37  ;;  %v4673_v28 = vadd.f32 %v9784_v53, %v9780_v25  ;;  %5758 = vmatpush.bf16.msrb.mxu0 %v7163_v57 }
 0xabc   : > { %v4721_v11 = vmax.f32 %v4705_v55, 0.0  ;;  %v9830_v26 = vpop.eup %7585  ;;  %v4125_v23 = vsel %vm4122_vm2, %v4124_v36, %v4120_v6  ;;  %v4707_v16 = vmul.f32 %v4675_v29, %v4140_v49  ;;  %v6770_v0 = vmul.f32 -1.442695, %v3977_v2  ;;  %v4679_v25 = vpop.f32.mrf.mxu1 }
 0xabd   : > { %v9836_v32 = vpop.eup %7587  ;;  %v4143_v27 = vmul.f32 %v9830_v26, %v9812_v35  ;;  %v4706_v34 = vmul.f32 %v4673_v28, %v4125_v23  ;;  %vm4148_vm3 = vweird.f32 %v9830_v26  ;;  %v4153_v55 = vand.u32 2147483648, %v9812_v35 }
 0xabe   : > { %v9839_v33 = vadd.f32 %v9522_v61, %v4721_v11  ;;  %v7590_v5 = vpop.eup %7589  ;;  %v9854_v61 = vadd.f32 %v9515_v48, %v4720_v17  ;;  %v4158_v21 = vmul.f32 %v9836_v32, %v9821_v13  ;;  %v4723_v37 = vmax.f32 %v4707_v16, 0.0  ;;  %v4630_v63 = vpop.f32.mrf.mxu0  ;;  %vm9899_vm5 = vmor %vm4147_vm4, %vm4148_vm3 }
 0xabf   : > { %v7592_v41 = vpop.eup %7591  ;;  %v9871_v44 = vadd.f32 1.0, %v7590_v5  ;;  %v4144_v52 = vsub.f32 1.0, %v4143_v27  ;;  %v4722_v42 = vmax.f32 %v4706_v34, 0.0  ;;  %vm4163_vm6 = vweird.f32 %v9836_v32 }
 0xac0   : > { %v4965_v31 = vpack.c.bf16 %v9839_v33, %v9854_v61  ;;  %v9878_v7 = vadd.f32 1.0, %v7592_v41  ;;  %v4159_v56 = vsub.f32 1.0, %v4158_v21  ;;  %v7594_v10 = vpop.eup %7593  ;;  %v9897_v58 = vadd.f32 %v9527_v59, %v4723_v37  ;;  %v7772_v37 = vld [vmem:[%s8448_s19 + $0x30] sm:$0xff] }
 0xac1   : > { %7595 = vrcp.f32 %v9871_v44  ;;  %v4145_v20 = vmul.f32 %v9830_v26, %v4144_v52  ;;  %v9886_v39 = vadd.f32 1.0, %v7594_v10  ;;  %v4168_v59 = vand.u32 2147483648, %v9821_v13  ;;  %v3981_v23 = vpop.xlane.xlu2 %3980 }
 0xac2   : > { %7597 = vpow2.f32 %v6771_v8  ;;  %v4160_v38 = vmul.f32 %v9836_v32, %v4159_v56  ;;  %v9914_v40 = vadd.f32 %v7771_v30, %v4722_v42  ;;  %v4154_v45 = vor.u32 1.1754944e-38, %v4153_v55  ;;  %v7160_v55 = vld [vmem:[#allocation16] sm:$0xff] }
 0xac3   : > { %7599 = vrcp.f32 %v9878_v7  ;;  %v4146_v53 = vadd.f32 %v9830_v26, %v4145_v20  ;;  %vm4162_vm7 = vweird.f32 %v9821_v13  ;;  %v4166_v12 = vand.u32 2147483647, %v9821_v13  ;;  %v7161_v20 = vld [vmem:[#allocation16 + $0x8] sm:$0xff] }
 0xac4   : > { %7601 = vpow2.f32 %v6770_v0  ;;  %v4161_v62 = vadd.f32 %v9836_v32, %v4160_v38  ;;  %vm4152_vm8 = vcmp.eq.f32.partialorder %v4151_v9, 8.507059e+37  ;;  %vm9920_vm9 = vmor %vm4162_vm7, %vm4163_vm6  ;;  %v4966_v14 = vpack.c.bf16 %v9897_v58, %v9914_v40 }
 0xac5   : > { %7603 = vrcp.f32 %v9886_v39  ;;  %v4150_v35 = vsel %vm9899_vm5, %v9830_v26, %v4146_v53  ;;  %v4678_v22 = vadd.f32 %v9861_v18, %v9851_v15  ;;  %v4169_v51 = vor.u32 1.1754944e-38, %v4168_v59  ;;  %v7162_v18 = vld [vmem:[#allocation16 + $0x10] sm:$0xff] }
 0xac6   : > { %v4155_v50 = vsel %vm4152_vm8, %v4154_v45, %v4150_v35  ;;  %v4165_v13 = vsel %vm9920_vm9, %v9836_v32, %v4161_v62  ;;  %vm4167_vm10 = vcmp.eq.f32.partialorder %v4166_v12, 8.507059e+37  ;;  %v9937_v41 = vpop.f32.mrf.mxu0  ;;  %v4680_v52 = vadd.f32 %v4679_v25, %v4630_v63  ;;  %5759 = vmatpush.bf16.msrb.mxu0 %v7162_v18  ;;  %v4891_v12 = vpop.f32.mrf.mxu2 }
 0xac7   : > { %v9890_v4 = vpop.eup %7595  ;;  %v4170_v32 = vsel %vm4167_vm10, %v4169_v51, %v4165_v13  ;;  %v4708_v6 = vmul.f32 %v4678_v22, %v4155_v50  ;;  %v6772_v34 = vmul.f32 -1.442695, %v3981_v23  ;;  %v4198_v63 = vand.u32 2147483648, %v9871_v44 }
 0xac8   : > { %5053 = vmatmul.bf16.gmra.mxu2 %v4965_v31  ;;  %v7598_v47 = vpop.eup %7597  ;;  %v4188_v17 = vmul.f32 %v9890_v4, %v9871_v44  ;;  %v9939_v31 = vpop.f32.mrf.mxu1  ;;  %v4709_v29 = vmul.f32 %v4680_v52, %v4170_v32  ;;  %vm4193_vm11 = vweird.f32 %v9890_v4  ;;  %vm4192_vm13 = vweird.f32 %v9871_v44 }
 0xac9   : > { %v9905_v11 = vpop.eup %7599  ;;  %v9918_v5 = vadd.f32 1.0, %v7598_v47  ;;  %v4724_v2 = vmax.f32 %v4708_v6, 0.0  ;;  %v4196_v42 = vand.u32 2147483647, %v9871_v44  ;;  %v4183_v62 = vand.u32 2147483648, %v9878_v7  ;;  %vm9970_vm14 = vmor %vm4192_vm13, %vm4193_vm11  ;;  %v7773_v44 = vld [vmem:[%s8448_s19 + $0x38] sm:$0xff] }
 0xaca   : > { %v7602_v46 = vpop.eup %7601  ;;  %v4173_v26 = vmul.f32 %v9905_v11, %v9878_v7  ;;  %v4189_v48 = vsub.f32 1.0, %v4188_v17  ;;  %v4725_v10 = vmax.f32 %v4709_v29, 0.0  ;;  %vm4178_vm12 = vweird.f32 %v9905_v11  ;;  %5760 = vmatpush.bf16.msrb.mxu0 %v7161_v20 }
 0xacb   : > { %v9933_v21 = vpop.eup %7603  ;;  %v9935_v24 = vadd.f32 1.0, %v7602_v46  ;;  %7605 = vrcp.f32 %v9918_v5  ;;  %v9954_v54 = vadd.f32 %v7772_v37, %v4724_v2  ;;  %vm4177_vm15 = vweird.f32 %v9878_v7 }
 0xacc   : > { %v4174_v15 = vsub.f32 1.0, %v4173_v26  ;;  %v4349_v36 = vmul.f32 %v9933_v21, %v9886_v39  ;;  %v4190_v49 = vmul.f32 %v9890_v4, %v4189_v48  ;;  %v9975_v35 = vadd.f32 %v7773_v44, %v4725_v10  ;;  %vm9986_vm0 = vmor %vm4177_vm15, %vm4178_vm12  ;;  %v7774_v44 = vld [vmem:[%s8448_s19 + $0x48] sm:$0xff] }
 0xacd   : > { %v4181_v59 = vand.u32 2147483647, %v9878_v7  ;;  %v4199_v27 = vor.u32 1.1754944e-38, %v4198_v63  ;;  %vm4197_vm1 = vcmp.eq.f32.partialorder %v4196_v42, 8.507059e+37  ;;  %v4184_v13 = vor.u32 1.1754944e-38, %v4183_v62 }
 0xace   : > { %v4175_v8 = vmul.f32 %v9905_v11, %v4174_v15  ;;  %v4350_v56 = vsub.f32 1.0, %v4349_v36  ;;  %v4191_v0 = vadd.f32 %v9890_v4, %v4190_v49  ;;  %v4635_v57 = vpop.f32.mrf.mxu0  ;;  %v4967_v26 = vpack.c.bf16 %v9975_v35, %v9954_v54  ;;  %5761 = vmatpush.bf16.msrb.mxu0 %v7160_v55  ;;  %v4893_v37 = vpop.f32.mrf.mxu2 }
 0xacf   : > { %vm4354_vm2 = vweird.f32 %v9933_v21  ;;  %vm4182_vm3 = vcmp.eq.f32.partialorder %v4181_v59, 8.507059e+37  ;;  %v4683_v6 = vadd.f32 %v9939_v31, %v9937_v41  ;;  %vm4353_vm4 = vweird.f32 %v9886_v39 }
 0xad0   : > { %v4176_v53 = vadd.f32 %v9905_v11, %v4175_v8  ;;  %v4684_v9 = vpop.f32.mrf.mxu1  ;;  %v4351_v3 = vmul.f32 %v9933_v21, %v4350_v56  ;;  %v4195_v30 = vsel %vm9970_vm14, %v9890_v4, %v4191_v0  ;;  %vm10004_vm5 = vmor %vm4353_vm4, %vm4354_vm2  ;;  %vm4222_vm8 = vweird.f32 %v9918_v5 }
 0xad1   : > { %v9947_v28 = vpop.eup %7605  ;;  %v4685_v4 = vadd.f32 %v4684_v9, %v4635_v57  ;;  %v4200_v22 = vsel %vm4197_vm1, %v4199_v27, %v4195_v30  ;;  %v4226_v9 = vand.u32 2147483647, %v9918_v5  ;;  %vm4207_vm13 = vweird.f32 %v9935_v24 }
 0xad2   : > { %v4218_v47 = vmul.f32 %v9947_v28, %v9918_v5  ;;  %v4180_v7 = vsel %vm9986_vm0, %v9905_v11, %v4176_v53  ;;  %v4359_v11 = vand.u32 2147483648, %v9886_v39  ;;  %vm4223_vm9 = vweird.f32 %v9947_v28 }
 0xad3   : > { %v4185_v32 = vsel %vm4182_vm3, %v4184_v13, %v4180_v7  ;;  %v4711_v15 = vmul.f32 %v4685_v4, %v4200_v22  ;;  %vm10033_vm15 = vmor %vm4222_vm8, %vm4223_vm9  ;;  %v7775_v7 = vld [vmem:[%s8448_s19 + $0x40] sm:$0xff]  ;;  %vm4227_vm1 = vcmp.eq.f32.partialorder %v4226_v9, 8.507059e+37 }
 0xad4   : > { %v4710_v41 = vmul.f32 %v4683_v6, %v4185_v32  ;;  %v4360_v31 = vor.u32 1.1754944e-38, %v4359_v11 }
 0xad5   : > { %v4727_v20 = vmax.f32 %v4711_v15, 0.0 }
 0xad6   : > { %v4638_v18 = vpop.f32.mrf.mxu0  ;;  %v4726_v55 = vmax.f32 %v4710_v41, 0.0 }
 0xad7   : > { %v4303_v19 = vpop.xlane.xlu1 %4302  ;;  %v10024_v59 = vadd.f32 %v7774_v44, %v4727_v20  ;;  %v7778_v20 = vld [vmem:[%s8448_s19 + $0x58] sm:$0xff] }
 0xad8   : > { %5058 = vmatmul.bf16.gmra.mxu2 %v4966_v14  ;;  %v6777_v60 = vmul.f32 -1.442695, %v4303_v19  ;;  %v4219_v14 = vsub.f32 1.0, %v4218_v47  ;;  %v4352_v19 = vadd.f32 %v9933_v21, %v4351_v3  ;;  %v4687_v36 = vpop.f32.mrf.mxu1  ;;  %v4228_v47 = vand.u32 2147483648, %v9918_v5 }
 0xad9   : > { %v10041_v4 = vadd.f32 %v7775_v7, %v4726_v55  ;;  %v4213_v5 = vand.u32 2147483648, %v9935_v24  ;;  %v4688_v32 = vadd.f32 %v4687_v36, %v4638_v18 }
 0xada   : > { %7607 = vpow2.f32 %v6777_v60  ;;  %v4357_v60 = vand.u32 2147483647, %v9886_v39  ;;  %v4220_v49 = vmul.f32 %v9947_v28, %v4219_v14  ;;  %v4356_v2 = vsel %vm10004_vm5, %v9933_v21, %v4352_v19 }
 0xadb   : > { %7609 = vrcp.f32 %v9935_v24  ;;  %v4211_v14 = vand.u32 2147483647, %v9935_v24  ;;  %v4229_v13 = vor.u32 1.1754944e-38, %v4228_v47  ;;  %v4214_v29 = vor.u32 1.1754944e-38, %v4213_v5 }
 0xadc   : > { %vm4358_vm6 = vcmp.eq.f32.partialorder %v4357_v60, 8.507059e+37 }
 0xadd   : > { %v4361_v21 = vsel %vm4358_vm6, %v4360_v31, %v4356_v2  ;;  %vm4212_vm2 = vcmp.eq.f32.partialorder %v4211_v14, 8.507059e+37 }
 0xae0   : > { %v7608_v16 = vpop.eup %7607  ;;  %v4689_v22 = vpop.f32.mrf.mxu1 }
 0xae1   : > { %v9951_v38 = vadd.f32 1.0, %v7608_v16  ;;  %v9957_v25 = vpop.eup %7609 }
 0xae2   : > { %v4203_v45 = vmul.f32 %v9957_v25, %v9935_v24  ;;  %vm4208_vm14 = vweird.f32 %v9957_v25  ;;  %v7777_v24 = vld [vmem:[%s8484_s0 + $0x8] sm:$0xff] }
 0xae3   : > { %7611 = vrcp.f32 %v9951_v38  ;;  %v4374_v56 = vand.u32 2147483648, %v9951_v38  ;;  %v4372_v0 = vand.u32 2147483647, %v9951_v38  ;;  %vm4368_vm10 = vweird.f32 %v9951_v38  ;;  %vm10050_vm0 = vmor %vm4207_vm13, %vm4208_vm14 }
 0xae4   : > { %7613 = vpow2.f32 %v6772_v34  ;;  %v4204_v48 = vsub.f32 1.0, %v4203_v45  ;;  %v4221_v34 = vadd.f32 %v9947_v28, %v4220_v49 }
 0xae5   : > { %v4375_v3 = vor.u32 1.1754944e-38, %v4374_v56  ;;  %vm4373_vm12 = vcmp.eq.f32.partialorder %v4372_v0, 8.507059e+37 }
 0xae6   : > { %v4205_v39 = vmul.f32 %v9957_v25, %v4204_v48  ;;  %v4968_v48 = vpack.c.bf16 %v10024_v59, %v10041_v4 }
 0xae7   : > { %v4920_v50 = vpop.f32.mrf.mxu3 }
 0xae8   : > { %5063 = vmatmul.bf16.gmra.mxu2 %v4967_v26  ;;  %v4921_v8 = vadd.f32 %v4920_v50, %v4891_v12  ;;  %v4206_v30 = vadd.f32 %v9957_v25, %v4205_v39  ;;  %v4225_v12 = vsel %vm10033_vm15, %v9947_v28, %v4221_v34  ;;  %v4640_v50 = vpop.f32.mrf.mxu0 }
 0xae9   : > { %v7612_v51 = vpop.eup %7611  ;;  %v4230_v11 = vsel %vm4227_vm1, %v4229_v13, %v4225_v12  ;;  %v4690_v6 = vadd.f32 %v4689_v22, %v4640_v50 }
 0xaea   : > { %v4364_v52 = vmul.f32 %v7612_v51, %v9951_v38  ;;  %v7614_v16 = vpop.eup %7613  ;;  %vm4369_vm7 = vweird.f32 %v7612_v51  ;;  %v4940_v53 = vmul.f32 %v4921_v8, %v4361_v21  ;;  %v4210_v60 = vsel %vm10050_vm0, %v9957_v25, %v4206_v30 }
 0xaeb   : > { %v10018_v57 = vadd.f32 1.0, %v7614_v16  ;;  %vm4370_vm11 = vmor %vm4368_vm10, %vm4369_vm7  ;;  %v4713_v2 = vmul.f32 %v4690_v6, %v4230_v11 }
 0xaec   : > { %v4365_v23 = vsub.f32 1.0, %v4364_v52  ;;  %v4948_v46 = vmax.f32 %v4940_v53, 0.0  ;;  %v7776_v52 = vld [vmem:[%s8484_s0] sm:$0xff] }
 0xaed   : > { %7615 = vrcp.f32 %v10018_v57  ;;  %v4729_v31 = vmax.f32 %v4713_v2, 0.0  ;;  %v4243_v12 = vand.u32 2147483648, %v10018_v57  ;;  %vm4237_vm4 = vweird.f32 %v10018_v57 }
 0xaee   : > { %v4366_v10 = vmul.f32 %v7612_v51, %v4365_v23  ;;  %v10060_v15 = vadd.f32 %v7776_v52, %v4948_v46  ;;  %v4215_v23 = vsel %vm4212_vm2, %v4214_v29, %v4210_v60  ;;  %v4241_v5 = vand.u32 2147483647, %v10018_v57 }
 0xaef   : > { %v4922_v63 = vpop.f32.mrf.mxu3  ;;  %v4712_v41 = vmul.f32 %v4688_v32, %v4215_v23  ;;  %v10074_v34 = vadd.f32 %v7778_v20, %v4729_v31 }
 0xaf0   : > { %v4367_v42 = vadd.f32 %v7612_v51, %v4366_v10  ;;  %v4923_v17 = vadd.f32 %v4922_v63, %v4893_v37  ;;  %v10070_v10 = vpop.f32.mrf.mxu2  ;;  %v7779_v37 = vld [vmem:[%s8448_s19 + $0x50] sm:$0xff]  ;;  %vm4242_vm6 = vcmp.eq.f32.partialorder %v4241_v5, 8.507059e+37  ;;  %v7780_v5 = vld [vmem:[%s8448_s19 + $0x60] sm:$0xff] }
 0xaf1   : > { %v4728_v0 = vmax.f32 %v4712_v41, 0.0 }
 0xaf2   : > { %v4371_v62 = vsel %vm4370_vm11, %v7612_v51, %v4367_v42 }
 0xaf3   : > { %v4376_v45 = vsel %vm4373_vm12, %v4375_v3, %v4371_v62  ;;  %v4305_v26 = vpop.xlane.xlu1 %4304  ;;  %v7616_v25 = vpop.eup %7615  ;;  %v10077_v63 = vadd.f32 %v7779_v37, %v4728_v0 }
 0xaf4   : > { %v4941_v27 = vmul.f32 %v4923_v17, %v4376_v45  ;;  %v6778_v19 = vmul.f32 -1.442695, %v4305_v26  ;;  %v4233_v16 = vmul.f32 %v7616_v25, %v10018_v57  ;;  %v4643_v45 = vpop.f32.mrf.mxu0  ;;  %vm4238_vm3 = vweird.f32 %v7616_v25 }
 0xaf5   : > { %v4969_v17 = vpack.c.bf16 %v10074_v34, %v10077_v63  ;;  %vm10093_vm5 = vmor %vm4237_vm4, %vm4238_vm3 }
 0xaf6   : > { %v4949_v51 = vmax.f32 %v4941_v27, 0.0  ;;  %7617 = vpow2.f32 %v6778_v19  ;;  %v4234_v21 = vsub.f32 1.0, %v4233_v16  ;;  %v4244_v19 = vor.u32 1.1754944e-38, %v4243_v12 }
 0xaf8   : > { %v10063_v49 = vadd.f32 %v7777_v24, %v4949_v51  ;;  %5068 = vmatmul.bf16.gmra.mxu2 %v4968_v48  ;;  %v4235_v44 = vmul.f32 %v7616_v25, %v4234_v21  ;;  %v10088_v38 = vpop.f32.mrf.mxu2 }
 0xafa   : > { %v5682_v8 = vpack.c.bf16 %v10063_v49, %v10060_v15  ;;  %v4236_v27 = vadd.f32 %v7616_v25, %v4235_v44 }
 0xafb   : > { %v3983_v18 = vpop.xlane.xlu0 %3982 }
 0xafc   : > { %5762 = vmatmul.bf16.vlgmr.msrb.gmra.mxu0 %v5682_v8  ;;  %v7618_v36 = vpop.eup %7617  ;;  %v6773_v39 = vmul.f32 -1.442695, %v3983_v18  ;;  %v4240_v51 = vsel %vm10093_vm5, %v7616_v25, %v4236_v27  ;;  %v4645_v18 = vpop.f32.mrf.mxu0 }
 0xafd   : > { %v10067_v56 = vadd.f32 1.0, %v7618_v36  ;;  %v4245_v29 = vsel %vm4242_vm6, %v4244_v19, %v4240_v51 }
 0xafe   : > { %7619 = vpow2.f32 %v6773_v39 }
 0xaff   : > { %7621 = vrcp.f32 %v10067_v56  ;;  %v4389_v0 = vand.u32 2147483648, %v10067_v56  ;;  %vm4383_vm11 = vweird.f32 %v10067_v56 }
 0xb00   : > { %v10108_v41 = vpop.f32.mrf.mxu2 }
 0xb03   : > { %v3985_v53 = vpop.xlane.xlu0 %3984 }
 0xb04   : > { %v7620_v42 = vpop.eup %7619  ;;  %v4307_v55 = vpop.xlane.xlu2 %4306  ;;  %v6774_v9 = vmul.f32 -1.442695, %v3985_v53  ;;  %v4387_v53 = vand.u32 2147483647, %v10067_v56 }
 0xb05   : > { %v10079_v47 = vpop.eup %7621  ;;  %v10081_v3 = vadd.f32 1.0, %v7620_v42  ;;  %v6779_v62 = vmul.f32 -1.442695, %v4307_v55  ;;  %v4692_v46 = vpop.f32.mrf.mxu1 }
 0xb06   : > { %7623 = vpow2.f32 %v6774_v9  ;;  %v4379_v30 = vmul.f32 %v10079_v47, %v10067_v56  ;;  %v4693_v48 = vadd.f32 %v4692_v46, %v4643_v45  ;;  %vm4384_vm8 = vweird.f32 %v10079_v47 }
 0xb07   : > { %7625 = vrcp.f32 %v10081_v3  ;;  %v4256_v2 = vand.u32 2147483647, %v10081_v3  ;;  %v4258_v8 = vand.u32 2147483648, %v10081_v3  ;;  %vm4252_vm9 = vweird.f32 %v10081_v3  ;;  %vm10121_vm13 = vmor %vm4383_vm11, %vm4384_vm8 }
 0xb08   : > { %5073 = vmatmul.bf16.gmra.mxu2 %v4969_v17  ;;  %7627 = vpow2.f32 %v6779_v62  ;;  %v4380_v7 = vsub.f32 1.0, %v4379_v30  ;;  %v4714_v23 = vmul.f32 %v4693_v48, %v4245_v29  ;;  %v4390_v46 = vor.u32 1.1754944e-38, %v4389_v0  ;;  %v10149_v29 = vpop.f32.mrf.mxu2 }
 0xb09   : > { %v4259_v37 = vor.u32 1.1754944e-38, %v4258_v8  ;;  %vm4257_vm12 = vcmp.eq.f32.partialorder %v4256_v2, 8.507059e+37  ;;  %vm4388_vm14 = vcmp.eq.f32.partialorder %v4387_v53, 8.507059e+37 }
 0xb0a   : > { %v4381_v52 = vmul.f32 %v10079_v47, %v4380_v7  ;;  %v4730_v42 = vmax.f32 %v4714_v23, 0.0  ;;  %v7158_v23 = vld [vmem:[%s10799_s10 + $0x30] sm:$0xff] }
 0xb0b   : > { %v4311_v26 = vpop.xlane.xlu0 %4310 }
 0xb0c   : > { %v7624_v14 = vpop.eup %7623  ;;  %v6781_v50 = vmul.f32 -1.442695, %v4311_v26  ;;  %v4382_v39 = vadd.f32 %v10079_v47, %v4381_v52 }
 0xb0d   : > { %v7626_v13 = vpop.eup %7625  ;;  %v4309_v60 = vpop.xlane.xlu2 %4308  ;;  %v10102_v6 = vadd.f32 1.0, %v7624_v14 }
 0xb0e   : > { %v7628_v28 = vpop.eup %7627  ;;  %7629 = vpow2.f32 %v6781_v50  ;;  %v4248_v11 = vmul.f32 %v7626_v13, %v10081_v3  ;;  %v6780_v57 = vmul.f32 -1.442695, %v4309_v60  ;;  %vm4253_vm7 = vweird.f32 %v7626_v13  ;;  %v4694_v36 = vpop.f32.mrf.mxu1  ;;  %v7159_v60 = vld [vmem:[%s10799_s10 + $0x38] sm:$0xff] }
 0xb0f   : > { %v10100_v32 = vadd.f32 1.0, %v7628_v28  ;;  %vm4254_vm10 = vmor %vm4252_vm9, %vm4253_vm7  ;;  %v4695_v9 = vadd.f32 %v4694_v36, %v4645_v18  ;;  %v4386_v56 = vsel %vm10121_vm13, %v10079_v47, %v4382_v39  ;;  %v10136_v50 = vadd.f32 %v7780_v5, %v4730_v42  ;;  %5181 = vmatpush.bf16.msrb.mxu3 %v7159_v60  ;;  %v7782_v5 = vld [vmem:[%s8484_s0 + $0x10] sm:$0xff] }
 0xb10   : > { %v4249_v24 = vsub.f32 1.0, %v4248_v11  ;;  %v4391_v47 = vsel %vm4388_vm14, %v4390_v46, %v4386_v56  ;;  %v4271_v56 = vand.u32 2147483647, %v10102_v6  ;;  %v10186_v60 = vpop.f32.mrf.mxu2  ;;  %vm4267_vm9 = vweird.f32 %v10102_v6 }
 0xb11   : > { %7631 = vrcp.f32 %v10100_v32  ;;  %v4402_v51 = vand.u32 2147483647, %v10100_v32  ;;  %v4404_v48 = vand.u32 2147483648, %v10100_v32  ;;  %vm4398_vm0 = vweird.f32 %v10100_v32 }
 0xb12   : > { %7633 = vpow2.f32 %v6780_v57  ;;  %v4250_v25 = vmul.f32 %v7626_v13, %v4249_v24  ;;  %vm10227_vm13 = vcmp.eq.f32.partialorder %v4271_v56, 8.507059e+37 }
 0xb13   : > { %7635 = vrcp.f32 %v10102_v6  ;;  %vm4403_vm2 = vcmp.eq.f32.partialorder %v4402_v51, 8.507059e+37  ;;  %v4405_v39 = vor.u32 1.1754944e-38, %v4404_v48  ;;  %5182 = vmatpush.bf16.msrb.mxu3 %v7158_v23 }
 0xb14   : > { %v7630_v31 = vpop.eup %7629  ;;  %v4251_v16 = vadd.f32 %v7626_v13, %v4250_v25  ;;  %v4925_v20 = vpop.f32.mrf.mxu3 }
 0xb15   : > { %v10115_v21 = vadd.f32 1.0, %v7630_v31  ;;  %v4315_v3 = vpop.xlane.xlu2 %4314  ;;  %v4926_v14 = vadd.f32 %v4925_v20, %v10070_v10  ;;  %v7781_v10 = vld [vmem:[%s8448_s19 + $0x68] sm:$0xff] }
 0xb16   : > { %v4255_v55 = vsel %vm4254_vm10, %v7626_v13, %v4251_v16  ;;  %v6783_v30 = vmul.f32 -1.442695, %v4315_v3  ;;  %v3987_v22 = vpop.xlane.xlu1 %3986 }
 0xb17   : > { %v7632_v17 = vpop.eup %7631  ;;  %7637 = vrcp.f32 %v10115_v21  ;;  %v4260_v44 = vsel %vm4257_vm12, %v4259_v37, %v4255_v55  ;;  %v6775_v28 = vmul.f32 -1.442695, %v3987_v22  ;;  %v4942_v8 = vmul.f32 %v4926_v14, %v4391_v47 }
 0xb18   : > { %v7634_v45 = vpop.eup %7633  ;;  %v4715_v12 = vmul.f32 %v4695_v9, %v4260_v44  ;;  %v4394_v27 = vmul.f32 %v7632_v17, %v10100_v32  ;;  %7639 = vpow2.f32 %v6783_v30  ;;  %vm4399_vm15 = vweird.f32 %v7632_v17  ;;  %v7157_v9 = vld [vmem:[%s10799_s10 + $0x28] sm:$0xff] }
 0xb19   : > { %v10130_v26 = vpop.eup %7635  ;;  %v10132_v7 = vadd.f32 1.0, %v7634_v45  ;;  %vm4400_vm1 = vmor %vm4398_vm0, %vm4399_vm15  ;;  %v4950_v42 = vmax.f32 %v4942_v8, 0.0  ;;  %5183 = vmatpush.bf16.msrb.mxu3 %v7157_v9  ;;  %vm4428_vm8 = vweird.f32 %v10115_v21 }
 0xb1a   : > { %v4731_v13 = vmax.f32 %v4715_v12, 0.0  ;;  %v4395_v19 = vsub.f32 1.0, %v4394_v27  ;;  %v4263_v24 = vmul.f32 %v10130_v26, %v10102_v6  ;;  %vm4268_vm4 = vweird.f32 %v10130_v26 }
 0xb1b   : > { %7641 = vrcp.f32 %v10132_v7  ;;  %v4417_v47 = vand.u32 2147483647, %v10132_v7  ;;  %v4419_v22 = vand.u32 2147483648, %v10132_v7  ;;  %vm4413_vm5 = vweird.f32 %v10132_v7  ;;  %vm10223_vm12 = vmor %vm4267_vm9, %vm4268_vm4 }
 0xb1c   : > { %v10145_v11 = vadd.f32 %v7781_v10, %v4731_v13  ;;  %v4396_v57 = vmul.f32 %v7632_v17, %v4395_v19  ;;  %v4927_v52 = vpop.f32.mrf.mxu3  ;;  %7643 = vpow2.f32 %v6775_v28  ;;  %v4264_v37 = vsub.f32 1.0, %v4263_v24  ;;  %v7156_v19 = vld [vmem:[%s10799_s10 + $0x20] sm:$0xff]  ;;  %v7783_v28 = vld [vmem:[%s8484_s0 + $0x18] sm:$0xff]  ;;  %v4648_v24 = vpop.f32.mrf.mxu0 }
 0xb1d   : > { %v10151_v2 = vpop.eup %7637  ;;  %v4928_v20 = vadd.f32 %v4927_v52, %v10088_v38  ;;  %v10175_v13 = vadd.f32 %v7782_v5, %v4950_v42  ;;  %5184 = vmatpush.bf16.msrb.mxu3 %v7156_v19  ;;  %vm4418_vm10 = vcmp.eq.f32.partialorder %v4417_v47, 8.507059e+37 }
 0xb1e   : > { %v4397_v25 = vadd.f32 %v7632_v17, %v4396_v57  ;;  %v4970_v18 = vpack.c.bf16 %v10145_v11, %v10136_v50  ;;  %v7640_v36 = vpop.eup %7639  ;;  %v4424_v31 = vmul.f32 %v10151_v2, %v10115_v21  ;;  %v4313_v3 = vpop.xlane.xlu1 %4312  ;;  %v4265_v46 = vmul.f32 %v10130_v26, %v4264_v37  ;;  %v7175_v57 = vld [vmem:[%s10803_s14 + $0x38] sm:$0xff] }
 0xb1f   : > { %v10161_v16 = vadd.f32 1.0, %v7640_v36  ;;  %v6782_v38 = vmul.f32 -1.442695, %v4313_v3  ;;  %vm4429_vm6 = vweird.f32 %v10151_v2  ;;  %v4273_v36 = vand.u32 2147483648, %v10102_v6  ;;  %5863 = vmatpush.bf16.msrb.mxu1 %v7175_v57  ;;  %v7153_v57 = vld [vmem:[%s10799_s10 + $0x8] sm:$0xff]  ;;  %v7785_v6 = vld [vmem:[%s8484_s0 + $0x20] sm:$0xff] }
 0xb20   : > { %v4401_v0 = vsel %vm4400_vm1, %v7632_v17, %v4397_v25  ;;  %5078 = vmatmul.bf16.gmra.mxu2 %v4970_v18  ;;  %v4425_v55 = vsub.f32 1.0, %v4424_v31  ;;  %v4266_v8 = vadd.f32 %v10130_v26, %v4265_v46  ;;  %v4697_v23 = vpop.f32.mrf.mxu1  ;;  %v4420_v31 = vor.u32 1.1754944e-38, %v4419_v22  ;;  %vm10217_vm11 = vmor %vm4428_vm8, %vm4429_vm6  ;;  %v7154_v46 = vld [vmem:[%s10799_s10 + $0x10] sm:$0xff] }
 0xb21   : > { %v7642_v53 = vpop.eup %7641  ;;  %v4406_v32 = vsel %vm4403_vm2, %v4405_v39, %v4401_v0  ;;  %7645 = vrcp.f32 %v10161_v16  ;;  %v4432_v0 = vand.u32 2147483647, %v10115_v21 }
 0xb22   : > { %v4943_v62 = vmul.f32 %v4928_v20, %v4406_v32  ;;  %v4409_v17 = vmul.f32 %v7642_v53, %v10132_v7  ;;  %v7644_v44 = vpop.eup %7643  ;;  %v4426_v30 = vmul.f32 %v10151_v2, %v4425_v55  ;;  %7647 = vpow2.f32 %v6782_v38  ;;  %v7155_v20 = vld [vmem:[%s10799_s10 + $0x18] sm:$0xff]  ;;  %v7152_v32 = vld [vmem:[%s10799_s10] sm:$0xff] }
 0xb23   : > { %v10171_v45 = vadd.f32 1.0, %v7644_v44  ;;  %vm4414_vm3 = vweird.f32 %v7642_v53  ;;  %v4434_v7 = vand.u32 2147483648, %v10115_v21  ;;  %vm4433_vm14 = vcmp.eq.f32.partialorder %v4432_v0, 8.507059e+37  ;;  %5185 = vmatpush.bf16.msrb.mxu3 %v7155_v20 }
 0xb24   : > { %v4951_v12 = vmax.f32 %v4943_v62, 0.0  ;;  %v4410_v27 = vsub.f32 1.0, %v4409_v17  ;;  %v4930_v14 = vpop.f32.mrf.mxu3  ;;  %v4427_v10 = vadd.f32 %v10151_v2, %v4426_v30  ;;  %vm10203_vm7 = vmor %vm4413_vm5, %vm4414_vm3  ;;  %v4270_v17 = vsel %vm10223_vm12, %v10130_v26, %v4266_v8 }
 0xb25   : > { %7649 = vrcp.f32 %v10171_v45  ;;  %v4931_v44 = vadd.f32 %v4930_v14, %v10108_v41  ;;  %v4435_v38 = vor.u32 1.1754944e-38, %v4434_v7  ;;  %v4274_v30 = vor.u32 1.1754944e-38, %v4273_v36 }
 0xb26   : > { %v10184_v51 = vadd.f32 %v7783_v28, %v4951_v12  ;;  %v4411_v48 = vmul.f32 %v7642_v53, %v4410_v27  ;;  %v4431_v55 = vsel %vm10217_vm11, %v10151_v2, %v4427_v10  ;;  %v4698_v27 = vadd.f32 %v4697_v23, %v4648_v24  ;;  %v10251_v28 = vpop.f32.mrf.mxu2  ;;  %v4650_v23 = vpop.f32.mrf.mxu0 }
 0xb27   : > { %v10195_v52 = vpop.eup %7645  ;;  %v4436_v26 = vsel %vm4433_vm14, %v4435_v38, %v4431_v55  ;;  %v4275_v41 = vsel %vm10227_vm13, %v4274_v30, %v4270_v17  ;;  %v4288_v19 = vand.u32 2147483648, %v10171_v45  ;;  %5186 = vmatpush.bf16.msrb.mxu3 %v7154_v46  ;;  %vm4282_vm0 = vweird.f32 %v10171_v45  ;;  %v7174_v38 = vld [vmem:[%s10803_s14 + $0x30] sm:$0xff] }
 0xb28   : > { %v4412_v25 = vadd.f32 %v7642_v53, %v4411_v48  ;;  %v5683_v18 = vpack.c.bf16 %v10184_v51, %v10175_v13  ;;  %v7648_v21 = vpop.eup %7647  ;;  %v4454_v9 = vmul.f32 %v10195_v52, %v10161_v16  ;;  %v4286_v48 = vand.u32 2147483647, %v10171_v45  ;;  %5864 = vmatpush.bf16.msrb.mxu1 %v7174_v38 }
 0xb29   : > { %v10236_v3 = vadd.f32 1.0, %v7648_v21  ;;  %v4716_v24 = vmul.f32 %v4698_v27, %v4275_v41  ;;  %v4289_v39 = vor.u32 1.1754944e-38, %v4288_v19  ;;  %vm4459_vm3 = vweird.f32 %v10195_v52 }
 0xb2a   : > { %v4416_v37 = vsel %vm10203_vm7, %v7642_v53, %v4412_v25  ;;  %5767 = vmatmul.bf16.gmra.mxu0 %v5683_v18  ;;  %v4455_v22 = vsub.f32 1.0, %v4454_v9  ;;  %v4699_v25 = vpop.f32.mrf.mxu1  ;;  %vm4287_vm2 = vcmp.eq.f32.partialorder %v4286_v48, 8.507059e+37  ;;  %vm4458_vm5 = vweird.f32 %v10161_v16 }
 0xb2b   : > { %v4421_v53 = vsel %vm4418_vm10, %v4420_v31, %v4416_v37  ;;  %v7650_v62 = vpop.eup %7649  ;;  %7651 = vrcp.f32 %v10236_v3  ;;  %v7784_v31 = vld [vmem:[%s8484_s0 + $0x28] sm:$0xff]  ;;  %v4700_v42 = vadd.f32 %v4699_v25, %v4650_v23  ;;  %5187 = vmatpush.bf16.msrb.mxu3 %v7153_v57  ;;  %v4449_v30 = vand.u32 2147483648, %v10236_v3  ;;  %vm10286_vm6 = vmor %vm4458_vm5, %vm4459_vm3 }
 0xb2c   : > { %v4932_v56 = vpop.f32.mrf.mxu3  ;;  %v4278_v12 = vmul.f32 %v7650_v62, %v10171_v45  ;;  %v4944_v5 = vmul.f32 %v4931_v44, %v4421_v53  ;;  %vm4283_vm15 = vweird.f32 %v7650_v62  ;;  %v4456_v7 = vmul.f32 %v10195_v52, %v4455_v22 }
 0xb2d   : > { %v4933_v2 = vadd.f32 %v4932_v56, %v10149_v29  ;;  %vm4284_vm1 = vmor %vm4282_vm0, %vm4283_vm15  ;;  %v4732_v45 = vmax.f32 %v4716_v24, 0.0  ;;  %v4462_v44 = vand.u32 2147483647, %v10161_v16  ;;  %v4447_v56 = vand.u32 2147483647, %v10236_v3 }
 0xb2e   : > { %v4279_v14 = vsub.f32 1.0, %v4278_v12  ;;  %v4952_v8 = vmax.f32 %v4944_v5, 0.0  ;;  %v7786_v5 = vld [vmem:[%s8448_s19 + $0x70] sm:$0xff]  ;;  %vm4443_vm7 = vweird.f32 %v10236_v3  ;;  %vm5230_vm11 = vcmask 31744  }
 0xb2f   : > { %v4945_v47 = vmul.f32 %v4933_v2, %v4436_v26  ;;  %v4464_v2 = vand.u32 2147483648, %v10161_v16  ;;  %5188 = vmatpush.bf16.msrb.mxu3 %v7152_v32  ;;  %v10282_v26 = vadd.f32 %v7786_v5, %v4732_v45  ;;  %vm4448_vm9 = vcmp.eq.f32.partialorder %v4447_v56, 8.507059e+37  ;;  %v7789_v45 = vld [vmem:[%s8484_s0 + $0x30] sm:$0xff] }
 0xb30   : > { %v4280_v29 = vmul.f32 %v7650_v62, %v4279_v14  ;;  %v10267_v53 = vadd.f32 %v7785_v6, %v4952_v8  ;;  %vm4463_vm10 = vcmp.eq.f32.partialorder %v4462_v44, 8.507059e+37  ;;  %v10301_v8 = vld [vmem:[%s10798_s9] ss:$0 sm:$0xff]  ;;  %v7170_v5 = vld [vmem:[%s10803_s14 + $0x10] sm:$0xff]  ;;  %vm5606_vm13 = vcmask 1041409  }
 0xb31   : > { %v4953_v10 = vmax.f32 %v4945_v47, 0.0  ;;  %v7652_v36 = vpop.eup %7651  ;;  %v7787_v47 = vld [vmem:[%s8448_s19 + $0x78] sm:$0xff]  ;;  %v4465_v48 = vor.u32 1.1754944e-38, %v4464_v2  ;;  %v7172_v2 = vld [vmem:[%s10803_s14 + $0x20] sm:$0xff]  ;;  %vm5608_vm14 = vcmask 1042434   ;;  %vm5610_vm15 = vcmask 1043459  }
 0xb32   : > { %v4281_v18 = vadd.f32 %v7650_v62, %v4280_v29  ;;  %v4439_v21 = vmul.f32 %v7652_v36, %v10236_v3  ;;  %vm4444_vm4 = vweird.f32 %v7652_v36  ;;  %v4450_v29 = vor.u32 1.1754944e-38, %v4449_v30  ;;  %s6218_s19 = scalar_lea.sflag [#allocation4], %s8444_s20 }
 0xb33   : > { %v10260_v0 = vadd.f32 %v7784_v31, %v4953_v10  ;;  %vm4445_vm8 = vmor %vm4443_vm7, %vm4444_vm4  ;;  %vm5612_vm0 = vcmask 1044484   ;;  %vm5618_vm3 = vcmask 1047559  }
 0xb34   : > { %v4935_v20 = vpop.f32.mrf.mxu3  ;;  %v4285_v37 = vsel %vm4284_vm1, %v7650_v62, %v4281_v18  ;;  %v4440_v17 = vsub.f32 1.0, %v4439_v21  ;;  %v4457_v62 = vadd.f32 %v10195_v52, %v4456_v7  ;;  %vm5614_vm1 = vcmask 1045509  }
 0xb35   : > { %v4290_v55 = vsel %vm4287_vm2, %v4289_v39, %v4285_v37  ;;  %v5684_v12 = vpack.c.bf16 %v10260_v0, %v10267_v53  ;;  %v4936_v24 = vadd.f32 %v4935_v20, %v10186_v60  ;;  %v7788_v37 = vld [vmem:[%s8484_s0 + $0x38] sm:$0xff]  ;;  %vm5616_vm2 = vcmask 1046534  }
 0xb36   : > { %v4717_v9 = vmul.f32 %v4700_v42, %v4290_v55  ;;  %v4441_v27 = vmul.f32 %v7652_v36, %v4440_v17  ;;  %v4461_v16 = vsel %vm10286_vm6, %v10195_v52, %v4457_v62  ;;  %v7173_v55 = vld [vmem:[%s10803_s14 + $0x28] sm:$0xff] }
 0xb37   : > { %v4466_v25 = vsel %vm4463_vm10, %v4465_v48, %v4461_v16  ;;  %5865 = vmatpush.bf16.msrb.mxu1 %v7173_v55  ;;  %v7169_v48 = vld [vmem:[%s10803_s14 + $0x8] sm:$0xff] }
 0xb38   : > { %v4733_v46 = vmax.f32 %v4717_v9, 0.0  ;;  %v4442_v19 = vadd.f32 %v7652_v36, %v4441_v27  ;;  %v7171_v27 = vld [vmem:[%s10803_s14 + $0x18] sm:$0xff] }
 0xb3a   : > { %5772 = vmatmul.bf16.gmra.mxu0 %v5684_v12  ;;  %v10291_v22 = vadd.f32 %v7787_v47, %v4733_v46  ;;  %v4446_v57 = vsel %vm4445_vm8, %v7652_v36, %v4442_v19 }
 0xb3b   : > { %v5049_v41 = vpop.f32.mrf.mxu2  ;;  %v4451_v23 = vsel %vm4448_vm9, %v4450_v29, %v4446_v57  ;;  %5866 = vmatpush.bf16.msrb.mxu1 %v7172_v2 }
 0xb3c   : > { %v4937_v10 = vpop.f32.mrf.mxu3  ;;  %v4971_v3 = vpack.c.bf16 %v10291_v22, %v10282_v26  ;;  %v4946_v18 = vmul.f32 %v4936_v24, %v4451_v23  ;;  %v5050_v36 = vadd.f32 %v10301_v8, %v5049_v41 }
 0xb3d   : > { %v4938_v52 = vadd.f32 %v4937_v10, %v10251_v28  ;;  %v7168_v10 = vld [vmem:[%s10803_s14] sm:$0xff] }
 0xb3e   : > { %5083 = vmatmul.bf16.gmra.mxu2 %v4971_v3  ;;  %v4954_v60 = vmax.f32 %v4946_v18, 0.0  ;;  %v5089_v21 = vmax.f32 %v5050_v36, 0.0 }
 0xb3f   : > { %v4947_v7 = vmul.f32 %v4938_v52, %v4466_v25  ;;  %5867 = vmatpush.bf16.msrb.mxu1 %v7171_v27 }
 0xb40   : > { %v10312_v6 = vadd.f32 %v7789_v45, %v4954_v60 }
 0xb41   : > { %v4955_v39 = vmax.f32 %v4947_v7, 0.0 }
 0xb43   : > { %v5051_v31 = vpop.f32.mrf.mxu2  ;;  %v10309_v42 = vadd.f32 %v7788_v37, %v4955_v39  ;;  %5868 = vmatpush.bf16.msrb.mxu1 %v7170_v5  ;;  %v7314_v39 = vld [vmem:[%s10802_s13] ss:$0 sm:$0xff] }
 0xb44   : > { %v5052_v20 = vadd.f32 %v10301_v8, %v5051_v31 }
 0xb45   : > { %v5685_v9 = vpack.c.bf16 %v10309_v42, %v10312_v6 }
 0xb46   : > { %v5090_v32 = vmax.f32 %v5052_v20, 0.0 }
 0xb47   : > { %5869 = vmatpush.bf16.msrb.mxu1 %v7169_v48 }
 0xb48   : > { %v5105_v28 = vpack.c.bf16 %v5090_v32, %v5089_v21 }
 0xb4a   : > { %5189 = vmatmul.bf16.vlgmr.msrb.gmra.mxu3 %v5105_v28  ;;  %5777 = vmatmul.bf16.gmra.mxu0 %v5685_v9 }
 0xb4b   : > { %v5054_v17 = vpop.f32.mrf.mxu2  ;;  %5870 = vmatpush.bf16.msrb.mxu1 %v7168_v10 }
 0xb4c   : > { %v5055_v62 = vadd.f32 %v10301_v8, %v5054_v17 }
 0xb4e   : > { %v5091_v56 = vmax.f32 %v5055_v62, 0.0 }
 0xb53   : > { %v5056_v44 = vpop.f32.mrf.mxu2 }
 0xb54   : > { %v5057_v38 = vadd.f32 %v10301_v8, %v5056_v44 }
 0xb56   : > { %v5092_v30 = vmax.f32 %v5057_v38, 0.0 }
 0xb58   : > { %v5106_v12 = vpack.c.bf16 %v5092_v30, %v5091_v56 }
 0xb5a   : > { %5194 = vmatmul.bf16.gmra.mxu3 %v5106_v12 }
 0xb5b   : > { %v5059_v46 = vpop.f32.mrf.mxu2 }
 0xb5c   : > { %v5060_v41 = vadd.f32 %v10301_v8, %v5059_v46 }
 0xb5e   : > { %v5093_v19 = vmax.f32 %v5060_v41, 0.0 }
 0xb63   : > { %v5061_v14 = vpop.f32.mrf.mxu2 }
 0xb64   : > { %v5062_v47 = vadd.f32 %v10301_v8, %v5061_v14 }
 0xb66   : > { %v5094_v16 = vmax.f32 %v5062_v47, 0.0 }
 0xb68   : > { %v5107_v29 = vpack.c.bf16 %v5094_v16, %v5093_v19 }
 0xb6a   : > { %5199 = vmatmul.bf16.gmra.mxu3 %v5107_v29 }
 0xb6b   : > { %v5064_v57 = vpop.f32.mrf.mxu2 }
 0xb6c   : > { %v5065_v24 = vadd.f32 %v10301_v8, %v5064_v57 }
 0xb6e   : > { %v5095_v23 = vmax.f32 %v5065_v24, 0.0 }
 0xb73   : > { %v5066_v3 = vpop.f32.mrf.mxu2 }
 0xb74   : > { %v5067_v52 = vadd.f32 %v10301_v8, %v5066_v3 }
 0xb76   : > { %v5096_v25 = vmax.f32 %v5067_v52, 0.0 }
 0xb78   : > { %v5108_v18 = vpack.c.bf16 %v5096_v25, %v5095_v23 }
 0xb79   : > { %v5763_v7 = vpop.f32.mrf.mxu0 }
 0xb7a   : > { %5204 = vmatmul.bf16.gmra.mxu3 %v5108_v18  ;;  %v5764_v60 = vadd.f32 %v7314_v39, %v5763_v7 }
 0xb7b   : > { %v5069_v36 = vpop.f32.mrf.mxu2 }
 0xb7c   : > { %v5070_v20 = vadd.f32 %v10301_v8, %v5069_v36  ;;  %v5783_v32 = vmax.f32 %v5764_v60, 0.0 }
 0xb7e   : > { %v5097_v55 = vmax.f32 %v5070_v20, 0.0 }
 0xb81   : > { %v5765_v31 = vpop.f32.mrf.mxu0 }
 0xb82   : > { %v5766_v37 = vadd.f32 %v7314_v39, %v5765_v31 }
 0xb83   : > { %v5071_v21 = vpop.f32.mrf.mxu2 }
 0xb84   : > { %v5072_v45 = vadd.f32 %v10301_v8, %v5071_v21  ;;  %v5784_v28 = vmax.f32 %v5766_v37, 0.0 }
 0xb86   : > { %v5098_v9 = vmax.f32 %v5072_v45, 0.0  ;;  %v5791_v17 = vpack.c.bf16 %v5784_v28, %v5783_v32 }
 0xb88   : > { %v5109_v62 = vpack.c.bf16 %v5098_v9, %v5097_v55  ;;  %5871 = vmatmul.bf16.vlgmr.msrb.gmra.mxu1 %v5791_v17 }
 0xb8a   : > { %5209 = vmatmul.bf16.gmra.mxu3 %v5109_v62 }
 0xb8b   : > { %v5074_v44 = vpop.f32.mrf.mxu2 }
 0xb8c   : > { %v5075_v38 = vadd.f32 %v10301_v8, %v5074_v44  ;;  %v10354_v44 = vld [vmem:[%s10891_s15] ss:$0 sm:$0xff] }
 0xb8e   : > { %v5099_v12 = vmax.f32 %v5075_v38, 0.0 }
 0xb93   : > { %v5076_v56 = vpop.f32.mrf.mxu2 }
 0xb94   : > { %v5077_v30 = vadd.f32 %v10301_v8, %v5076_v56 }
 0xb96   : > { %v5100_v2 = vmax.f32 %v5077_v30, 0.0 }
 0xb98   : > { %v5110_v46 = vpack.c.bf16 %v5100_v2, %v5099_v12 }
 0xb9a   : > { %5214 = vmatmul.bf16.gmra.mxu3 %v5110_v46 }
 0xba3   : > { %v5079_v27 = vpop.f32.mrf.mxu2 }
 0xba4   : > { %v5080_v41 = vadd.f32 %v10301_v8, %v5079_v27 }
 0xba6   : > { %v5101_v19 = vmax.f32 %v5080_v41, 0.0 }
 0xba7   : > { %v5768_v5 = vpop.f32.mrf.mxu0 }
 0xba8   : > { %v5769_v16 = vadd.f32 %v7314_v39, %v5768_v5 }
 0xbaa   : > { %v5785_v24 = vmax.f32 %v5769_v16, 0.0 }
 0xbab   : > { %v5081_v14 = vpop.f32.mrf.mxu2 }
 0xbac   : > { %v5082_v47 = vadd.f32 %v10301_v8, %v5081_v14 }
 0xbae   : > { %v5102_v29 = vmax.f32 %v5082_v47, 0.0 }
 0xbaf   : > { %v5770_v48 = vpop.f32.mrf.mxu0 }
 0xbb0   : > { %v5111_v10 = vpack.c.bf16 %v5102_v29, %v5101_v19  ;;  %v5771_v57 = vadd.f32 %v7314_v39, %v5770_v48 }
 0xbb2   : > { %v5786_v3 = vmax.f32 %v5771_v57, 0.0  ;;  %5219 = vmatmul.bf16.gmra.mxu3 %v5111_v10 }
 0xbb4   : > { %v5792_v52 = vpack.c.bf16 %v5786_v3, %v5785_v24 }
 0xbb6   : > { %5876 = vmatmul.bf16.gmra.mxu1 %v5792_v52 }
 0xbb7   : > { %v5773_v23 = vpop.f32.mrf.mxu0 }
 0xbb8   : > { %v5774_v25 = vadd.f32 %v7314_v39, %v5773_v23 }
 0xbba   : > { %v5787_v36 = vmax.f32 %v5774_v25, 0.0 }
 0xbbf   : > { %v5775_v18 = vpop.f32.mrf.mxu0 }
 0xbc0   : > { %v5776_v7 = vadd.f32 %v7314_v39, %v5775_v18 }
 0xbc1   : > { %v5084_v60 = vpop.f32.mrf.mxu2 }
 0xbc2   : > { %v5788_v31 = vmax.f32 %v5776_v7, 0.0  ;;  %v5085_v21 = vadd.f32 %v10301_v8, %v5084_v60 }
 0xbc4   : > { %v5793_v20 = vpack.c.bf16 %v5788_v31, %v5787_v36  ;;  %v5103_v55 = vmax.f32 %v5085_v21, 0.0 }
 0xbc6   : > { %5881 = vmatmul.bf16.gmra.mxu1 %v5793_v20 }
 0xbc7   : > { %v5778_v37 = vpop.f32.mrf.mxu0 }
 0xbc8   : > { %v5779_v17 = vadd.f32 %v7314_v39, %v5778_v37 }
 0xbc9   : > { %v5086_v32 = vpop.f32.mrf.mxu2 }
 0xbca   : > { %v5087_v45 = vadd.f32 %v10301_v8, %v5086_v32  ;;  %v5789_v30 = vmax.f32 %v5779_v17, 0.0 }
 0xbcc   : > { %v5104_v9 = vmax.f32 %v5087_v45, 0.0 }
 0xbcd   : > { %v5190_v28 = vpop.f32.mrf.mxu3 }
 0xbce   : > { %v5112_v62 = vpack.c.bf16 %v5104_v9, %v5103_v55  ;;  %v5191_v2 = vadd.f32 %v10354_v44, %v5190_v28 }
 0xbcf   : > { %v5780_v38 = vpop.f32.mrf.mxu0 }
 0xbd0   : > { %v5781_v56 = vadd.f32 %v7314_v39, %v5780_v38  ;;  %5224 = vmatmul.bf16.gmra.mxu3 %v5112_v62  ;;  %v5231_v5 = vsel %vm5230_vm11, %v5191_v2, -inf }
 0xbd2   : > { %v5790_v12 = vmax.f32 %v5781_v56, 0.0 }
 0xbd4   : > { %v5794_v46 = vpack.c.bf16 %v5790_v12, %v5789_v30 }
 0xbd5   : > { %v5192_v8 = vpop.f32.mrf.mxu3 }
 0xbd6   : > { %v5193_v27 = vadd.f32 %v10354_v44, %v5192_v8  ;;  %5886 = vmatmul.bf16.gmra.mxu1 %v5794_v46 }
 0xbd8   : > { %v5232_v41 = vsel %vm5230_vm11, %v5193_v27, -inf }
 0xbd9   : > { %v5233_v14 = vmax.f32 %v5231_v5, %v5232_v41 }
 0xbdb   : > { %v5234_v47 = vrot.slane %v5233_v14, 4 }
 0xbdd   : > { %v5235_v19 = vmax.f32 %v5233_v14, %v5234_v47  ;;  %v5195_v16 = vpop.f32.mrf.mxu3 }
 0xbde   : > { %v5196_v10 = vadd.f32 %v10354_v44, %v5195_v16 }
 0xbdf   : > { %v5236_v39 = vrot.slane %v5235_v19, 2 }
 0xbe0   : > { %v5240_v25 = vsel %vm5230_vm11, %v5196_v10, -inf }
 0xbe1   : > { %v5237_v29 = vmax.f32 %v5235_v19, %v5236_v39 }
 0xbe3   : > { %v5238_v48 = vrot.slane %v5237_v29, 1 }
 0xbe5   : > { %v5239_v57 = vmax.f32 %v5237_v29, %v5238_v48  ;;  %v5197_v24 = vpop.f32.mrf.mxu3 }
 0xbe6   : > { %v5198_v3 = vadd.f32 %v10354_v44, %v5197_v24 }
 0xbe7   : > { %v5303_v52 = vsub.f32 %v5191_v2, %v5239_v57  ;;  %v5304_v23 = vsub.f32 %v5193_v27, %v5239_v57 }
 0xbe8   : > { %v5241_v18 = vsel %vm5230_vm11, %v5198_v3, -inf }
 0xbe9   : > { %v5319_v7 = vmul.f32 1.442695, %v5303_v52  ;;  %v5321_v36 = vmul.f32 1.442695, %v5304_v23  ;;  %v5242_v60 = vmax.f32 %v5240_v25, %v5241_v18 }
 0xbeb   : > { %7653 = vpow2.f32 %v5319_v7  ;;  %v5243_v31 = vrot.slane %v5242_v60, 4 }
 0xbec   : > { %7655 = vpow2.f32 %v5321_v36 }
 0xbed   : > { %v5244_v20 = vmax.f32 %v5242_v60, %v5243_v31  ;;  %v5200_v37 = vpop.f32.mrf.mxu3 }
 0xbee   : > { %v5201_v38 = vadd.f32 %v10354_v44, %v5200_v37 }
 0xbef   : > { %v5245_v21 = vrot.slane %v5244_v20, 2 }
 0xbf0   : > { %v5249_v5 = vsel %vm5230_vm11, %v5201_v38, -inf }
 0xbf1   : > { %v7654_v32 = vpop.eup %7653  ;;  %v5246_v45 = vmax.f32 %v5244_v20, %v5245_v21 }
 0xbf2   : > { %v7656_v28 = vpop.eup %7655  ;;  %v5351_v55 = vsel %vm5230_vm11, %v7654_v32, 0.0 }
 0xbf3   : > { %v5352_v9 = vsel %vm5230_vm11, %v7656_v28, 0.0  ;;  %v5247_v17 = vrot.slane %v5246_v45, 1 }
 0xbf4   : > { %v5353_v62 = vadd.f32 %v5352_v9, %v5351_v55 }
 0xbf5   : > { %v5248_v56 = vmax.f32 %v5246_v45, %v5247_v17  ;;  %v5202_v30 = vpop.f32.mrf.mxu3 }
 0xbf6   : > { %v5354_v12 = vrot.slane %v5353_v62, 4  ;;  %v5203_v2 = vadd.f32 %v10354_v44, %v5202_v30 }
 0xbf7   : > { %v5305_v46 = vsub.f32 %v5196_v10, %v5248_v56  ;;  %v5306_v8 = vsub.f32 %v5198_v3, %v5248_v56 }
 0xbf8   : > { %v5355_v27 = vadd.f32 %v5354_v12, %v5353_v62  ;;  %v5250_v41 = vsel %vm5230_vm11, %v5203_v2, -inf }
 0xbf9   : > { %v5323_v14 = vmul.f32 1.442695, %v5305_v46  ;;  %v5325_v47 = vmul.f32 1.442695, %v5306_v8  ;;  %v5251_v19 = vmax.f32 %v5249_v5, %v5250_v41 }
 0xbfa   : > { %v5356_v39 = vrot.slane %v5355_v27, 2 }
 0xbfb   : > { %7657 = vpow2.f32 %v5323_v14  ;;  %v5252_v16 = vrot.slane %v5251_v19, 4 }
 0xbfc   : > { %7659 = vpow2.f32 %v5325_v47  ;;  %v5357_v57 = vadd.f32 %v5356_v39, %v5355_v27 }
 0xbfd   : > { %v5253_v29 = vmax.f32 %v5251_v19, %v5252_v16  ;;  %v5205_v48 = vpop.f32.mrf.mxu3 }
 0xbfe   : > { %v5358_v52 = vrot.slane %v5357_v57, 1  ;;  %v5206_v31 = vadd.f32 %v10354_v44, %v5205_v48  ;;  %v10389_v48 = vld [vmem:[%s10892_s18] ss:$0 sm:$0xff] }
 0xbff   : > { %v5254_v24 = vrot.slane %v5253_v29, 2 }
 0xc00   : > { %v5359_v3 = vadd.f32 %v5358_v52, %v5357_v57  ;;  %v5258_v62 = vsel %vm5230_vm11, %v5206_v31, -inf }
 0xc01   : > { %v10370_v23 = vpop.eup %7657  ;;  %v5255_v10 = vmax.f32 %v5253_v29, %v5254_v24 }
 0xc02   : > { %v10372_v25 = vpop.eup %7659  ;;  %v5360_v18 = vsel %vm5230_vm11, %v10370_v23, 0.0  ;;  %7661 = vrcp.f32 %v5359_v3 }
 0xc03   : > { %v5361_v7 = vsel %vm5230_vm11, %v10372_v25, 0.0  ;;  %v5256_v36 = vrot.slane %v5255_v10, 1 }
 0xc04   : > { %v5362_v60 = vadd.f32 %v5361_v7, %v5360_v18 }
 0xc05   : > { %v5257_v20 = vmax.f32 %v5255_v10, %v5256_v36  ;;  %v5207_v37 = vpop.f32.mrf.mxu3  ;;  %v10382_v30 = vpop.f32.mrf.mxu1 }
 0xc06   : > { %v5363_v21 = vrot.slane %v5362_v60, 4  ;;  %v5208_v45 = vadd.f32 %v10354_v44, %v5207_v37 }
 0xc07   : > { %v5307_v55 = vsub.f32 %v5201_v38, %v5257_v20  ;;  %v5308_v9 = vsub.f32 %v5203_v2, %v5257_v20 }
 0xc08   : > { %v5364_v17 = vadd.f32 %v5363_v21, %v5362_v60  ;;  %v5259_v56 = vsel %vm5230_vm11, %v5208_v45, -inf  ;;  %v7662_v12 = vpop.eup %7661 }
 0xc09   : > { %v5327_v46 = vmul.f32 1.442695, %v5307_v55  ;;  %v5329_v8 = vmul.f32 1.442695, %v5308_v9  ;;  %v5260_v27 = vmax.f32 %v5258_v62, %v5259_v56  ;;  %v5432_v5 = vmul.f32 %v7662_v12, %v7656_v28 }
 0xc0a   : > { %v5431_v41 = vmul.f32 %v7662_v12, %v7654_v32  ;;  %v5365_v47 = vrot.slane %v5364_v17, 2 }
 0xc0b   : > { %7663 = vpow2.f32 %v5327_v46  ;;  %v5261_v14 = vrot.slane %v5260_v27, 4  ;;  %v5450_v38 = vsel %vm5230_vm11, %v5432_v5, 0.0 }
 0xc0c   : > { %7665 = vpow2.f32 %v5329_v8  ;;  %v5447_v2 = vsel %vm5230_vm11, %v5431_v41, 0.0  ;;  %5451 = vadd.xlane.f32.xlu1 %v5450_v38  ;;  %v5366_v39 = vadd.f32 %v5365_v47, %v5364_v17 }
 0xc0d   : > { %v5262_v19 = vmax.f32 %v5260_v27, %v5261_v14  ;;  %5448 = vadd.xlane.f32.xlu0 %v5447_v2  ;;  %v5210_v16 = vpop.f32.mrf.mxu3  ;;  %v5874_v28 = vpop.f32.mrf.mxu1 }
 0xc0e   : > { %v5367_v32 = vrot.slane %v5366_v39, 1  ;;  %v5875_v52 = vadd.f32 %v10389_v48, %v5874_v28  ;;  %v5211_v37 = vadd.f32 %v10354_v44, %v5210_v16 }
 0xc0f   : > { %v5263_v29 = vrot.slane %v5262_v19, 2 }
 0xc10   : > { %v5368_v10 = vadd.f32 %v5367_v32, %v5366_v39  ;;  %v5899_v60 = vsel %vm5230_vm11, %v5875_v52, -inf  ;;  %v5267_v27 = vsel %vm5230_vm11, %v5211_v37, -inf }
 0xc11   : > { %v10391_v57 = vpop.eup %7663  ;;  %v5264_v24 = vmax.f32 %v5262_v19, %v5263_v29  ;;  %v5900_v21 = vrot.slane %v5899_v60, 4 }
 0xc12   : > { %v10394_v3 = vpop.eup %7665  ;;  %v5369_v18 = vsel %vm5230_vm11, %v10391_v57, 0.0  ;;  %7667 = vrcp.f32 %v5368_v10 }
 0xc13   : > { %v5370_v7 = vsel %vm5230_vm11, %v10394_v3, 0.0  ;;  %v5265_v36 = vrot.slane %v5264_v24, 1  ;;  %v5901_v62 = vmax.f32 %v5899_v60, %v5900_v21 }
 0xc14   : > { %v5371_v20 = vadd.f32 %v5370_v7, %v5369_v18 }
 0xc15   : > { %v5266_v55 = vmax.f32 %v5264_v24, %v5265_v36  ;;  %v5212_v9 = vpop.f32.mrf.mxu3  ;;  %v5902_v5 = vrot.slane %v5901_v62, 2 }
 0xc16   : > { %v5372_v17 = vrot.slane %v5371_v20, 4  ;;  %v5213_v56 = vadd.f32 %v10354_v44, %v5212_v9 }
 0xc17   : > { %v5309_v12 = vsub.f32 %v5206_v31, %v5266_v55  ;;  %v5310_v46 = vsub.f32 %v5208_v45, %v5266_v55  ;;  %v5903_v19 = vmax.f32 %v5901_v62, %v5902_v5 }
 0xc18   : > { %v5373_v8 = vadd.f32 %v5372_v17, %v5371_v20  ;;  %v5268_v41 = vsel %vm5230_vm11, %v5213_v56, -inf  ;;  %v7668_v2 = vpop.eup %7667 }
 0xc19   : > { %v5331_v14 = vmul.f32 1.442695, %v5309_v12  ;;  %v5333_v47 = vmul.f32 1.442695, %v5310_v46  ;;  %v5269_v38 = vmax.f32 %v5267_v27, %v5268_v41  ;;  %v5434_v39 = vmul.f32 %v7668_v2, %v10372_v25 }
 0xc1a   : > { %v5904_v29 = vrot.slane %v5903_v19, 1  ;;  %v5433_v31 = vmul.f32 %v7668_v2, %v10370_v23  ;;  %v5374_v45 = vrot.slane %v5373_v8, 2 }
 0xc1b   : > { %7669 = vpow2.f32 %v5331_v14  ;;  %v5270_v16 = vrot.slane %v5269_v38, 4  ;;  %v5456_v28 = vsel %vm5230_vm11, %v5434_v39, 0.0 }
 0xc1c   : > { %7671 = vpow2.f32 %v5333_v47  ;;  %v5905_v10 = vmax.f32 %v5903_v19, %v5904_v29  ;;  %5457 = vadd.xlane.f32.xlu0 %v5456_v28  ;;  %v5453_v18 = vsel %vm5230_vm11, %v5433_v31, 0.0  ;;  %v5375_v7 = vadd.f32 %v5374_v45, %v5373_v8 }
 0xc1d   : > { %v5271_v32 = vmax.f32 %v5269_v38, %v5270_v16  ;;  %v5215_v24 = vpop.f32.mrf.mxu3  ;;  %5454 = vadd.xlane.f32.xlu2 %v5453_v18 }
 0xc1e   : > { %v5949_v60 = vsub.f32 %v5875_v52, %v5905_v10  ;;  %v5376_v20 = vrot.slane %v5375_v7, 1  ;;  %v5216_v8 = vadd.f32 %v10354_v44, %v5215_v24 }
 0xc1f   : > { %v5272_v36 = vrot.slane %v5271_v32, 2 }
 0xc20   : > { %v5958_v9 = vmul.f32 1.442695, %v5949_v60  ;;  %v5377_v17 = vadd.f32 %v5376_v20, %v5375_v7  ;;  %v5276_v2 = vsel %vm5230_vm11, %v5216_v8, -inf }
 0xc21   : > { %v10409_v21 = vpop.eup %7669  ;;  %v5273_v25 = vmax.f32 %v5271_v32, %v5272_v36 }
 0xc22   : > { %v10411_v55 = vpop.eup %7671  ;;  %v5378_v23 = vsel %vm5230_vm11, %v10409_v21, 0.0  ;;  %7673 = vpow2.f32 %v5958_v9 }
 0xc23   : > { %v5379_v62 = vsel %vm5230_vm11, %v10411_v55, 0.0  ;;  %v5274_v12 = vrot.slane %v5273_v25, 1  ;;  %7675 = vrcp.f32 %v5377_v17 }
 0xc24   : > { %v5380_v46 = vadd.f32 %v5379_v62, %v5378_v23 }
 0xc25   : > { %v5275_v52 = vmax.f32 %v5273_v25, %v5274_v12  ;;  %v5217_v27 = vpop.f32.mrf.mxu3 }
 0xc26   : > { %v5381_v5 = vrot.slane %v5380_v46, 4  ;;  %v5218_v41 = vadd.f32 %v10354_v44, %v5217_v27 }
 0xc27   : > { %v5311_v14 = vsub.f32 %v5211_v37, %v5275_v52  ;;  %v5312_v47 = vsub.f32 %v5213_v56, %v5275_v52 }
 0xc28   : > { %v5382_v38 = vadd.f32 %v5381_v5, %v5380_v46  ;;  %v5277_v19 = vsel %vm5230_vm11, %v5218_v41, -inf  ;;  %v10421_v31 = vpop.eup %7673 }
 0xc29   : > { %v5335_v16 = vmul.f32 1.442695, %v5311_v14  ;;  %v5337_v39 = vmul.f32 1.442695, %v5312_v47  ;;  %v5278_v29 = vmax.f32 %v5276_v2, %v5277_v19  ;;  %v7676_v45 = vpop.eup %7675  ;;  %v5979_v32 = vsel %vm5230_vm11, %v10421_v31, 0.0 }
 0xc2a   : > { %v5383_v24 = vrot.slane %v5382_v38, 2  ;;  %v5980_v10 = vrot.slane %v5979_v32, 4  ;;  %v5435_v37 = vmul.f32 %v7676_v45, %v10391_v57  ;;  %v5436_v56 = vmul.f32 %v7676_v45, %v10394_v3 }
 0xc2b   : > { %7677 = vpow2.f32 %v5335_v16  ;;  %v5279_v28 = vrot.slane %v5278_v29, 4 }
 0xc2c   : > { %7679 = vpow2.f32 %v5337_v39  ;;  %v5384_v7 = vadd.f32 %v5383_v24, %v5382_v38  ;;  %v5981_v36 = vadd.f32 %v5980_v10, %v5979_v32  ;;  %v5459_v60 = vsel %vm5230_vm11, %v5435_v37, 0.0 }
 0xc2d   : > { %v5280_v18 = vmax.f32 %v5278_v29, %v5279_v28  ;;  %v5462_v20 = vsel %vm5230_vm11, %v5436_v56, 0.0  ;;  %5460 = vadd.xlane.f32.xlu1 %v5459_v60  ;;  %v10441_v10 = vadd.f32 %v10389_v48, %v10382_v30 }
 0xc2e   : > { %5463 = vadd.xlane.f32.xlu2 %v5462_v20  ;;  %v5385_v23 = vrot.slane %v5384_v7, 1  ;;  %v5982_v17 = vrot.slane %v5981_v36, 2 }
 0xc2f   : > { %v5281_v25 = vrot.slane %v5280_v18, 2 }
 0xc30   : > { %v5386_v12 = vadd.f32 %v5385_v23, %v5384_v7  ;;  %v5983_v38 = vadd.f32 %v5982_v17, %v5981_v36 }
 0xc31   : > { %v10429_v9 = vpop.eup %7677  ;;  %v5282_v62 = vmax.f32 %v5280_v18, %v5281_v25 }
 0xc32   : > { %v10431_v46 = vpop.eup %7679  ;;  %v5387_v57 = vsel %vm5230_vm11, %v10429_v9, 0.0  ;;  %7681 = vrcp.f32 %v5386_v12  ;;  %v5984_v28 = vrot.slane %v5983_v38, 1 }
 0xc33   : > { %v5388_v3 = vsel %vm5230_vm11, %v10431_v46, 0.0  ;;  %v5283_v52 = vrot.slane %v5282_v62, 1  ;;  %v5877_v5 = vpop.f32.mrf.mxu1 }
 0xc34   : > { %v5389_v27 = vadd.f32 %v5388_v3, %v5387_v57  ;;  %v5878_v47 = vadd.f32 %v10389_v48, %v5877_v5  ;;  %v5985_v60 = vadd.f32 %v5984_v28, %v5983_v38 }
 0xc35   : > { %v5284_v14 = vmax.f32 %v5282_v62, %v5283_v52  ;;  %v5220_v19 = vpop.f32.mrf.mxu3 }
 0xc36   : > { %v5390_v2 = vrot.slane %v5389_v27, 4  ;;  %v5906_v29 = vsel %vm5230_vm11, %v5878_v47, -inf  ;;  %v10448_v30 = vadd.f32 %v10354_v44, %v5220_v19 }
 0xc37   : > { %v5313_v16 = vsub.f32 %v5216_v8, %v5284_v14  ;;  %v5314_v39 = vsub.f32 %v5218_v41, %v5284_v14  ;;  %v5907_v32 = vrot.slane %v5906_v29, 4 }
 0xc38   : > { %v5391_v45 = vadd.f32 %v5390_v2, %v5389_v27  ;;  %v7682_v24 = vpop.eup %7681  ;;  %v5285_v2 = vsel %vm5230_vm11, %v10448_v30, -inf }
 0xc39   : > { %v5339_v37 = vmul.f32 1.442695, %v5313_v16  ;;  %v5341_v56 = vmul.f32 1.442695, %v5314_v39  ;;  %v5908_v18 = vmax.f32 %v5906_v29, %v5907_v32  ;;  %v5438_v7 = vmul.f32 %v7682_v24, %v10411_v55 }
 0xc3a   : > { %v5437_v36 = vmul.f32 %v7682_v24, %v10409_v21  ;;  %v5392_v8 = vrot.slane %v5391_v45, 2  ;;  %v5892_v55 = vsel %vm5230_vm11, %v10441_v10, -inf }
 0xc3b   : > { %7683 = vpow2.f32 %v5339_v37  ;;  %v5909_v41 = vrot.slane %v5908_v18, 2  ;;  %v5468_v20 = vsel %vm5230_vm11, %v5438_v7, 0.0  ;;  %v5879_v23 = vpop.f32.mrf.mxu1  ;;  %v5893_v38 = vrot.slane %v5892_v55, 4 }
 0xc3c   : > { %7685 = vpow2.f32 %v5341_v56  ;;  %v5465_v25 = vsel %vm5230_vm11, %v5437_v36, 0.0  ;;  %5469 = vadd.xlane.f32.xlu1 %v5468_v20  ;;  %v10451_v17 = vadd.f32 %v10389_v48, %v5879_v23  ;;  %v5393_v21 = vadd.f32 %v5392_v8, %v5391_v45 }
 0xc3d   : > { %5466 = vadd.xlane.f32.xlu0 %v5465_v25  ;;  %7687 = vrcp.f32 %v5985_v60  ;;  %v5910_v62 = vmax.f32 %v5908_v18, %v5909_v41  ;;  %v5222_v12 = vpop.f32.mrf.mxu3  ;;  %v5894_v8 = vmax.f32 %v5892_v55, %v5893_v38 }
 0xc3e   : > { %v5913_v57 = vsel %vm5230_vm11, %v10451_v17, -inf  ;;  %v10458_v3 = vadd.f32 %v10354_v44, %v5222_v12  ;;  %v5394_v52 = vrot.slane %v5393_v21, 1 }
 0xc3f   : > { %v5911_v27 = vrot.slane %v5910_v62, 1  ;;  %v5914_v5 = vrot.slane %v5913_v57, 4 }
 0xc40   : > { %v5286_v19 = vsel %vm5230_vm11, %v10458_v3, -inf  ;;  %v5395_v16 = vadd.f32 %v5394_v52, %v5393_v21 }
 0xc41   : > { %v10460_v14 = vpop.eup %7683  ;;  %v5912_v45 = vmax.f32 %v5910_v62, %v5911_v27  ;;  %v5915_v32 = vmax.f32 %v5913_v57, %v5914_v5  ;;  %v5287_v28 = vmax.f32 %v5285_v2, %v5286_v19  ;;  %v5895_v5 = vrot.slane %v5894_v8, 2 }
 0xc42   : > { %v10466_v39 = vpop.eup %7685  ;;  %v5396_v29 = vsel %vm5230_vm11, %v10460_v14, 0.0  ;;  %7689 = vrcp.f32 %v5395_v16 }
 0xc43   : > { %v7688_v24 = vpop.eup %7687  ;;  %v5397_v37 = vsel %vm5230_vm11, %v10466_v39, 0.0  ;;  %v5950_v18 = vsub.f32 %v5878_v47, %v5912_v45  ;;  %v5916_v7 = vrot.slane %v5915_v32, 2  ;;  %v5288_v36 = vrot.slane %v5287_v28, 4  ;;  %v5882_v60 = vpop.f32.mrf.mxu1 }
 0xc44   : > { %v5398_v56 = vadd.f32 %v5397_v37, %v5396_v29  ;;  %v6037_v41 = vmul.f32 %v7688_v24, %v10421_v31  ;;  %v10474_v20 = vadd.f32 %v10389_v48, %v5882_v60 }
 0xc45   : > { %v5960_v23 = vmul.f32 1.442695, %v5950_v18  ;;  %v5917_v21 = vmax.f32 %v5915_v32, %v5916_v7  ;;  %v5289_v62 = vmax.f32 %v5287_v28, %v5288_v36 }
 0xc46   : > { %v5399_v25 = vrot.slane %v5398_v56, 4  ;;  %v6047_v12 = vsel %vm5230_vm11, %v6037_v41, 0.0  ;;  %v5920_v57 = vsel %vm5230_vm11, %v10474_v20, -inf }
 0xc47   : > { %7691 = vpow2.f32 %v5960_v23  ;;  %v5918_v47 = vrot.slane %v5917_v21, 1  ;;  %v5290_v27 = vrot.slane %v5289_v62, 2  ;;  %6048 = vadd.xlane.f32.xlu0 %v6047_v12  ;;  %v5921_v31 = vrot.slane %v5920_v57, 4 }
 0xc48   : > { %v5400_v52 = vadd.f32 %v5399_v25, %v5398_v56  ;;  %v7690_v55 = vpop.eup %7689 }
 0xc49   : > { %v5919_v38 = vmax.f32 %v5917_v21, %v5918_v47  ;;  %v5291_v2 = vmax.f32 %v5289_v62, %v5290_v27  ;;  %v5440_v19 = vmul.f32 %v7690_v55, %v10431_v46  ;;  %v5439_v16 = vmul.f32 %v7690_v55, %v10429_v9 }
 0xc4a   : > { %v5922_v29 = vmax.f32 %v5920_v57, %v5921_v31  ;;  %v5401_v45 = vrot.slane %v5400_v52, 2  ;;  %v5896_v9 = vmax.f32 %v5894_v8, %v5895_v5 }
 0xc4b   : > { %v5951_v32 = vsub.f32 %v10451_v17, %v5919_v38  ;;  %v5292_v28 = vrot.slane %v5291_v2, 1  ;;  %v5474_v24 = vsel %vm5230_vm11, %v5440_v19, 0.0  ;;  %v5471_v37 = vsel %vm5230_vm11, %v5439_v16, 0.0  ;;  %v5884_v56 = vpop.f32.mrf.mxu1 }
 0xc4c   : > { %v5923_v18 = vrot.slane %v5922_v29, 2  ;;  %5475 = vadd.xlane.f32.xlu2 %v5474_v24  ;;  %5472 = vadd.xlane.f32.xlu1 %v5471_v37  ;;  %v10485_v7 = vadd.f32 %v10389_v48, %v5884_v56  ;;  %v5402_v36 = vadd.f32 %v5401_v45, %v5400_v52 }
 0xc4d   : > { %v10487_v46 = vpop.eup %7691  ;;  %v5962_v60 = vmul.f32 1.442695, %v5951_v32  ;;  %v5293_v41 = vmax.f32 %v5291_v2, %v5292_v28  ;;  %v5897_v2 = vrot.slane %v5896_v9, 1 }
 0xc4e   : > { %v5986_v17 = vsel %vm5230_vm11, %v10487_v46, 0.0  ;;  %v5924_v25 = vmax.f32 %v5922_v29, %v5923_v18  ;;  %v5927_v23 = vsel %vm5230_vm11, %v10485_v7, -inf  ;;  %v5403_v21 = vrot.slane %v5402_v36, 1 }
 0xc4f   : > { %v5987_v62 = vrot.slane %v5986_v17, 4  ;;  %7693 = vpow2.f32 %v5962_v60  ;;  %v5315_v12 = vsub.f32 %v10448_v30, %v5293_v41  ;;  %v5316_v57 = vsub.f32 %v10458_v3, %v5293_v41 }
 0xc50   : > { %v5925_v52 = vrot.slane %v5924_v25, 1  ;;  %v5928_v47 = vrot.slane %v5927_v23, 4  ;;  %v5404_v27 = vadd.f32 %v5403_v21, %v5402_v36  ;;  %v5898_v41 = vmax.f32 %v5896_v9, %v5897_v2 }
 0xc51   : > { %v5988_v8 = vadd.f32 %v5987_v62, %v5986_v17  ;;  %v5343_v55 = vmul.f32 1.442695, %v5315_v12  ;;  %v5345_v5 = vmul.f32 1.442695, %v5316_v57 }
 0xc52   : > { %v5926_v31 = vmax.f32 %v5924_v25, %v5925_v52  ;;  %v5929_v38 = vmax.f32 %v5927_v23, %v5928_v47  ;;  %7695 = vrcp.f32 %v5404_v27 }
 0xc53   : > { %v5989_v19 = vrot.slane %v5988_v8, 2  ;;  %7697 = vpow2.f32 %v5343_v55  ;;  %v5887_v16 = vpop.f32.mrf.mxu1  ;;  %v5225_v30 = vpop.f32.mrf.mxu3 }
 0xc54   : > { %7699 = vpow2.f32 %v5345_v5  ;;  %v5952_v29 = vsub.f32 %v10474_v20, %v5926_v31  ;;  %v5930_v45 = vrot.slane %v5929_v38, 2  ;;  %v10497_v3 = vadd.f32 %v10389_v48, %v5887_v16 }
 0xc55   : > { %v10499_v32 = vpop.eup %7693  ;;  %v5990_v17 = vadd.f32 %v5989_v19, %v5988_v8  ;;  %v10514_v27 = vadd.f32 %v10354_v44, %v5225_v30  ;;  %v5948_v19 = vsub.f32 %v10441_v10, %v5898_v41 }
 0xc56   : > { %v5993_v28 = vsel %vm5230_vm11, %v10499_v32, 0.0  ;;  %v5964_v24 = vmul.f32 1.442695, %v5952_v29  ;;  %v5931_v37 = vmax.f32 %v5929_v38, %v5930_v45  ;;  %v5934_v56 = vsel %vm5230_vm11, %v10497_v3, -inf }
 0xc57   : > { %v5994_v18 = vrot.slane %v5993_v28, 4  ;;  %v5935_v36 = vrot.slane %v5934_v56, 4  ;;  %v5991_v9 = vrot.slane %v5990_v17, 1 }
 0xc58   : > { %v7696_v60 = vpop.eup %7695  ;;  %7701 = vpow2.f32 %v5964_v24  ;;  %v5932_v20 = vrot.slane %v5931_v37, 1 }
 0xc59   : > { %v10505_v25 = vpop.eup %7697  ;;  %v5995_v23 = vadd.f32 %v5994_v18, %v5993_v28  ;;  %v5936_v21 = vmax.f32 %v5934_v56, %v5935_v36  ;;  %v5442_v62 = vmul.f32 %v7696_v60, %v10466_v39  ;;  %v5441_v12 = vmul.f32 %v7696_v60, %v10460_v14 }
 0xc5a   : > { %v10509_v57 = vpop.eup %7699  ;;  %v5405_v52 = vsel %vm5230_vm11, %v10505_v25, 0.0  ;;  %v5933_v47 = vmax.f32 %v5931_v37, %v5932_v20  ;;  %v5992_v2 = vadd.f32 %v5991_v9, %v5990_v17  ;;  %v5956_v20 = vmul.f32 1.442695, %v5948_v19 }
 0xc5b   : > { %v5406_v8 = vsel %vm5230_vm11, %v10509_v57, 0.0  ;;  %v5937_v55 = vrot.slane %v5936_v21, 2  ;;  %v5480_v5 = vsel %vm5230_vm11, %v5442_v62, 0.0  ;;  %v5227_v14 = vpop.f32.mrf.mxu3  ;;  %v5477_v38 = vsel %vm5230_vm11, %v5441_v12, 0.0  ;;  %v5889_v37 = vpop.f32.mrf.mxu1 }
 0xc5c   : > { %v5407_v31 = vadd.f32 %v5406_v8, %v5405_v52  ;;  %v5953_v39 = vsub.f32 %v10485_v7, %v5933_v47  ;;  %5481 = vadd.xlane.f32.xlu2 %v5480_v5  ;;  %v5996_v16 = vrot.slane %v5995_v23, 2  ;;  %v10523_v45 = vadd.f32 %v10354_v44, %v5227_v14  ;;  %5478 = vadd.xlane.f32.xlu1 %v5477_v38 }
 0xc5d   : > { %v5938_v29 = vmax.f32 %v5936_v21, %v5937_v55  ;;  %v5294_v7 = vsel %vm5230_vm11, %v10514_v27, -inf  ;;  %7703 = vrcp.f32 %v5992_v2  ;;  %v5890_v44 = vadd.f32 %v10389_v48, %v5889_v37 }
 0xc5e   : > { %v10525_v30 = vpop.eup %7701  ;;  %v5408_v28 = vrot.slane %v5407_v31, 4  ;;  %v5966_v24 = vmul.f32 1.442695, %v5953_v39  ;;  %v5295_v10 = vsel %vm5230_vm11, %v10523_v45, -inf  ;;  %v5997_v62 = vadd.f32 %v5996_v16, %v5995_v23 }
 0xc5f   : > { %v6000_v56 = vsel %vm5230_vm11, %v10525_v30, 0.0  ;;  %v5939_v18 = vrot.slane %v5938_v29, 1  ;;  %v5296_v41 = vmax.f32 %v5294_v7, %v5295_v10  ;;  %v5941_v21 = vsel %vm5230_vm11, %v5890_v44, -inf }
 0xc60   : > { %v5409_v36 = vadd.f32 %v5408_v28, %v5407_v31  ;;  %v6001_v60 = vrot.slane %v6000_v56, 4  ;;  %7705 = vpow2.f32 %v5966_v24  ;;  %v5942_v47 = vrot.slane %v5941_v21, 4 }
 0xc61   : > { %v5940_v17 = vmax.f32 %v5938_v29, %v5939_v18  ;;  %v5297_v52 = vrot.slane %v5296_v41, 4  ;;  %v5998_v55 = vrot.slane %v5997_v62, 1  ;;  %7707 = vpow2.f32 %v5956_v20 }
 0xc62   : > { %v6002_v12 = vadd.f32 %v6001_v60, %v6000_v56  ;;  %v5410_v9 = vrot.slane %v5409_v36, 2  ;;  %v5943_v48 = vmax.f32 %v5941_v21, %v5942_v47 }
 0xc63   : > { %v5954_v8 = vsub.f32 %v10497_v3, %v5940_v17  ;;  %v7704_v5 = vpop.eup %7703  ;;  %v5298_v14 = vmax.f32 %v5296_v41, %v5297_v52  ;;  %v5999_v19 = vadd.f32 %v5998_v55, %v5997_v62 }
 0xc64   : > { %v6003_v39 = vrot.slane %v6002_v12, 2  ;;  %v5411_v31 = vadd.f32 %v5410_v9, %v5409_v36  ;;  %v6038_v2 = vmul.f32 %v7704_v5, %v10487_v46  ;;  %v5944_v16 = vrot.slane %v5943_v48, 2 }
 0xc65   : > { %v5968_v38 = vmul.f32 1.442695, %v5954_v8  ;;  %v5299_v23 = vrot.slane %v5298_v14, 2 }
 0xc66   : > { %v10537_v29 = vpop.eup %7705  ;;  %v5412_v28 = vrot.slane %v5411_v31, 1  ;;  %v6004_v24 = vadd.f32 %v6003_v39, %v6002_v12  ;;  %v6050_v7 = vsel %vm5230_vm11, %v6038_v2, 0.0  ;;  %v5945_v18 = vmax.f32 %v5943_v48, %v5944_v16 }
 0xc67   : > { %v6007_v3 = vsel %vm5230_vm11, %v10537_v29, 0.0  ;;  %7709 = vpow2.f32 %v5968_v38  ;;  %v5300_v56 = vmax.f32 %v5298_v14, %v5299_v23  ;;  %6051 = vadd.xlane.f32.xlu0 %v6050_v7  ;;  %v10542_v20 = vpop.eup %7707 }
 0xc68   : > { %v6008_v37 = vrot.slane %v6007_v3, 4  ;;  %7711 = vrcp.f32 %v5999_v19  ;;  %v5413_v10 = vadd.f32 %v5412_v28, %v5411_v31  ;;  %v6005_v46 = vrot.slane %v6004_v24, 1 }
 0xc69   : > { %v5301_v60 = vrot.slane %v5300_v56, 1  ;;  %v5946_v41 = vrot.slane %v5945_v18, 1  ;;  %v5972_v5 = vsel %vm5230_vm11, %v10542_v20, 0.0 }
 0xc6a   : > { %v6009_v36 = vadd.f32 %v6008_v37, %v6007_v3  ;;  %7713 = vrcp.f32 %v5413_v10  ;;  %v6006_v17 = vadd.f32 %v6005_v46, %v6004_v24  ;;  %v5973_v28 = vrot.slane %v5972_v5, 4 }
 0xc6b   : > { %v5302_v62 = vmax.f32 %v5300_v56, %v5301_v60  ;;  %v5947_v12 = vmax.f32 %v5945_v18, %v5946_v41 }
 0xc6c   : > { %v6010_v21 = vrot.slane %v6009_v36, 2  ;;  %7715 = vrcp.f32 %v6006_v17 }
 0xc6d   : > { %v10544_v52 = vpop.eup %7709  ;;  %v5317_v9 = vsub.f32 %v10514_v27, %v5302_v62  ;;  %v5318_v8 = vsub.f32 %v10523_v45, %v5302_v62  ;;  %v5955_v55 = vsub.f32 %v5890_v44, %v5947_v12 }
 0xc6e   : > { %v7712_v47 = vpop.eup %7711  ;;  %v6011_v38 = vadd.f32 %v6010_v21, %v6009_v36  ;;  %v6014_v19 = vsel %vm5230_vm11, %v10544_v52, 0.0 }
 0xc6f   : > { %v6039_v39 = vmul.f32 %v7712_v47, %v10499_v32  ;;  %v5347_v14 = vmul.f32 1.442695, %v5317_v9  ;;  %v5349_v48 = vmul.f32 1.442695, %v5318_v8  ;;  %v5970_v31 = vmul.f32 1.442695, %v5955_v55 }
 0xc70   : > { %v7714_v2 = vpop.eup %7713  ;;  %v6012_v44 = vrot.slane %v6011_v38, 1  ;;  %v6015_v7 = vrot.slane %v6014_v19, 4 }
 0xc71   : > { %v6053_v23 = vsel %vm5230_vm11, %v6039_v39, 0.0  ;;  %7717 = vpow2.f32 %v5347_v14  ;;  %v5444_v27 = vmul.f32 %v7714_v2, %v10509_v57  ;;  %v5443_v45 = vmul.f32 %v7714_v2, %v10505_v25 }
 0xc72   : > { %6054 = vadd.xlane.f32.xlu0 %v6053_v23  ;;  %v7716_v16 = vpop.eup %7715  ;;  %7719 = vpow2.f32 %v5349_v48  ;;  %v6013_v37 = vadd.f32 %v6012_v44, %v6011_v38  ;;  %v5974_v25 = vadd.f32 %v5973_v28, %v5972_v5  ;;  %v6016_v10 = vadd.f32 %v6015_v7, %v6014_v19 }
 0xc73   : > { %7721 = vpow2.f32 %v5970_v31  ;;  %v5486_v32 = vsel %vm5230_vm11, %v5444_v27, 0.0  ;;  %v5483_v24 = vsel %vm5230_vm11, %v5443_v45, 0.0  ;;  %v6040_v3 = vmul.f32 %v7716_v16, %v10525_v30 }
 0xc74   : > { %5487 = vadd.xlane.f32.xlu2 %v5486_v32  ;;  %5484 = vadd.xlane.f32.xlu1 %v5483_v24  ;;  %7723 = vrcp.f32 %v6013_v37  ;;  %v5975_v17 = vrot.slane %v5974_v25, 2  ;;  %v6017_v62 = vrot.slane %v6016_v10, 2 }
 0xc75   : > { %v6056_v56 = vsel %vm5230_vm11, %v6040_v3, 0.0 }
 0xc76   : > { %v5976_v5 = vadd.f32 %v5975_v17, %v5974_v25  ;;  %v6018_v48 = vadd.f32 %v6017_v62, %v6016_v10 }
 0xc77   : > { %v7718_v57 = vpop.eup %7717 }
 0xc78   : > { %v7720_v18 = vpop.eup %7719  ;;  %v5414_v46 = vsel %vm5230_vm11, %v7718_v57, 0.0  ;;  %v5977_v38 = vrot.slane %v5976_v5, 1  ;;  %v6019_v23 = vrot.slane %v6018_v48, 1 }
 0xc79   : > { %v7722_v36 = vpop.eup %7721  ;;  %v5415_v60 = vsel %vm5230_vm11, %v7720_v18, 0.0 }
 0xc7a   : > { %6057 = vadd.xlane.f32.xlu0 %v6056_v56  ;;  %v5416_v41 = vadd.f32 %v5415_v60, %v5414_v46  ;;  %v6021_v30 = vsel %vm5230_vm11, %v7722_v36, 0.0  ;;  %v7724_v21 = vpop.eup %7723  ;;  %v5978_v45 = vadd.f32 %v5977_v38, %v5976_v5  ;;  %v6020_v44 = vadd.f32 %v6019_v23, %v6018_v48 }
 0xc7b   : > { %v6022_v47 = vrot.slane %v6021_v30, 4  ;;  %v6041_v9 = vmul.f32 %v7724_v21, %v10537_v29  ;;  %v8188_v21 = vmov 4.0  }
 0xc7c   : > { %v5417_v12 = vrot.slane %v5416_v41, 4 }
 0xc7d   : > { %v6059_v55 = vsel %vm5230_vm11, %v6041_v9, 0.0  ;;  %v6023_v39 = vadd.f32 %v6022_v47, %v6021_v30 }
 0xc7e   : > { %v5418_v8 = vadd.f32 %v5417_v12, %v5416_v41 }
 0xc7f   : > { %v6024_v2 = vrot.slane %v6023_v39, 2  ;;  %v5452_v62 = vpop.xlane.xlu1 %5451 }
 0xc80   : > { %v5419_v14 = vrot.slane %v5418_v8, 2  ;;  %v5449_v17 = vpop.xlane.xlu0 %5448 }
 0xc81   : > { %v6025_v16 = vadd.f32 %v6024_v2, %v6023_v39 }
 0xc82   : > { %6060 = vadd.xlane.f32.xlu0 %v6059_v55  ;;  %v5420_v31 = vadd.f32 %v5419_v14, %v5418_v8 }
 0xc83   : > { %v6026_v29 = vrot.slane %v6025_v16, 1 }
 0xc84   : > { %v5421_v19 = vrot.slane %v5420_v31, 1 }
 0xc85   : > { %v6027_v3 = vadd.f32 %v6026_v29, %v6025_v16 }
 0xc86   : > { %v5422_v27 = vadd.f32 %v5421_v19, %v5420_v31 }
 0xc88   : > { %7725 = vrcp.f32 %v5422_v27 }
 0xc89   : > { %7727 = vrcp.f32 %v5978_v45 }
 0xc8a   : > { %7729 = vrcp.f32 %v6020_v44 }
 0xc8b   : > { %7731 = vrcp.f32 %v6027_v3 }
 0xc8c   : > { %7733 = vrcp.f32 %v8188_v21 }
 0xc8e   : > { %v7726_v28 = vpop.eup %7725 }
 0xc8f   : > { %v5446_v32 = vmul.f32 %v7726_v28, %v7720_v18  ;;  %v5445_v24 = vmul.f32 %v7726_v28, %v7718_v57  ;;  %v7728_v7 = vpop.eup %7727  ;;  %v5458_v12 = vpop.xlane.xlu0 %5457 }
 0xc90   : > { %v7730_v25 = vpop.eup %7729  ;;  %v6036_v10 = vmul.f32 %v7728_v7, %v10542_v20  ;;  %v5455_v9 = vpop.xlane.xlu2 %5454 }
 0xc91   : > { %v5492_v37 = vsel %vm5230_vm11, %v5446_v32, 0.0  ;;  %v5489_v56 = vsel %vm5230_vm11, %v5445_v24, 0.0  ;;  %v6042_v46 = vmul.f32 %v7730_v25, %v10544_v52  ;;  %v7732_v18 = vpop.eup %7731 }
 0xc92   : > { %5493 = vadd.xlane.f32.xlu2 %v5492_v37  ;;  %5490 = vadd.xlane.f32.xlu1 %v5489_v56  ;;  %v6044_v60 = vsel %vm5230_vm11, %v6036_v10, 0.0  ;;  %v6043_v57 = vmul.f32 %v7732_v18, %v7722_v36  ;;  %v7734_v47 = vpop.eup %7733 }
 0xc93   : > { %v6062_v41 = vsel %vm5230_vm11, %v6042_v46, 0.0  ;;  %v5496_v20 = vmul.f32 4.0, %v7734_v47  ;;  %vm5500_vm12 = vweird.f32 %v7734_v47 }
 0xc94   : > { %v6065_v30 = vsel %vm5230_vm11, %v6043_v57, 0.0 }
 0xc95   : > { %v5497_v55 = vsub.f32 1.0, %v5496_v20 }
 0xc97   : > { %v5498_v5 = vmul.f32 %v7734_v47, %v5497_v55 }
 0xc99   : > { %v5499_v31 = vadd.f32 %v7734_v47, %v5498_v5 }
 0xc9a   : > { %6045 = vadd.xlane.f32.xlu2 %v6044_v60  ;;  %6063 = vadd.xlane.f32.xlu1 %v6062_v41 }
 0xc9b   : > { %v10572_v36 = vsel %vm5500_vm12, %v7734_v47, %v5499_v31 }
 0xc9c   : > { %v5503_v19 = vmul.f32 %v10572_v36, %v5452_v62  ;;  %v5502_v23 = vmul.f32 %v10572_v36, %v5449_v17  ;;  %v5504_v45 = vmul.f32 %v10572_v36, %v5455_v9  ;;  %v5505_v44 = vmul.f32 %v10572_v36, %v5458_v12 }
 0xc9e   : > { %v5519_v28 = vmul.f32 %v5503_v19, %v9795_v43  ;;  %v5518_v32 = vmul.f32 %v5502_v23, %v9799_v1  ;;  %v5520_v24 = vmul.f32 %v5504_v45, %v9854_v61  ;;  %v5521_v3 = vmul.f32 %v5505_v44, %v9839_v33 }
 0xca0   : > { %v5461_v52 = vpop.xlane.xlu1 %5460  ;;  %v5534_v10 = vadd.f32 %v5519_v28, %v5518_v32  ;;  %v5541_v41 = vadd.f32 %v5521_v3, %v5520_v24 }
 0xca1   : > { %v5464_v39 = vpop.xlane.xlu2 %5463  ;;  %v5506_v16 = vmul.f32 %v10572_v36, %v5461_v52 }
 0xca2   : > { %6066 = vadd.xlane.f32.xlu2 %v6065_v30  ;;  %v5507_v29 = vmul.f32 %v10572_v36, %v5464_v39  ;;  %v5535_v57 = vrot.slane %v5534_v10, 4 }
 0xca3   : > { %v5522_v7 = vmul.f32 %v5506_v16, %v9914_v40 }
 0xca4   : > { %v5523_v37 = vmul.f32 %v5507_v29, %v9897_v58  ;;  %v5542_v58 = vrot.slane %v5541_v41, 4  ;;  %v5536_v9 = vadd.f32 %v5535_v57, %v5534_v10 }
 0xca6   : > { %v5548_v18 = vadd.f32 %v5523_v37, %v5522_v7  ;;  %v5543_v55 = vadd.f32 %v5542_v58, %v5541_v41 }
 0xca8   : > { %v5549_v30 = vrot.slane %v5548_v18, 4  ;;  %v5544_v19 = vrot.slane %v5543_v55, 2 }
 0xcaa   : > { %v5545_v32 = vadd.f32 %v5544_v19, %v5543_v55 }
 0xcaf   : > { %v5470_v14 = vpop.xlane.xlu1 %5469 }
 0xcb0   : > { %v5467_v8 = vpop.xlane.xlu0 %5466  ;;  %v5509_v46 = vmul.f32 %v10572_v36, %v5470_v14 }
 0xcb1   : > { %v5508_v60 = vmul.f32 %v10572_v36, %v5467_v8 }
 0xcb2   : > { %v5525_v33 = vmul.f32 %v5509_v46, %v9975_v35 }
 0xcb3   : > { %v5524_v40 = vmul.f32 %v5508_v60, %v9954_v54  ;;  %v5550_v54 = vadd.f32 %v5549_v30, %v5548_v18 }
 0xcb5   : > { %v5555_v52 = vadd.f32 %v5525_v33, %v5524_v40  ;;  %v5551_v23 = vrot.slane %v5550_v54, 2 }
 0xcb7   : > { %v5556_v31 = vrot.slane %v5555_v52, 4 }
 0xcb9   : > { %v5557_v29 = vadd.f32 %v5556_v31, %v5555_v52 }
 0xcba   : > { %v6049_v48 = vpop.xlane.xlu0 %6048 }
 0xcbb   : > { %v6069_v24 = vmul.f32 %v6049_v48, %v10572_v36  ;;  %v5558_v37 = vrot.slane %v5557_v29, 2 }
 0xcbf   : > { %v5476_v38 = vpop.xlane.xlu2 %5475  ;;  %v5473_v2 = vpop.xlane.xlu1 %5472 }
 0xcc0   : > { %v5511_v1 = vmul.f32 %v10572_v36, %v5476_v38  ;;  %v5510_v61 = vmul.f32 %v10572_v36, %v5473_v2 }
 0xcc2   : > { %v5527_v62 = vmul.f32 %v5511_v1, %v10024_v59  ;;  %v5526_v12 = vmul.f32 %v5510_v61, %v10041_v4  ;;  %v5537_v59 = vrot.slane %v5536_v9, 2  ;;  %v5559_v1 = vadd.f32 %v5558_v37, %v5557_v29 }
 0xcc4   : > { %v5562_v5 = vadd.f32 %v5527_v62, %v5526_v12  ;;  %v5538_v16 = vadd.f32 %v5537_v59, %v5536_v9  ;;  %v5560_v62 = vrot.slane %v5559_v1, 1 }
 0xcc6   : > { %v5563_v45 = vrot.slane %v5562_v5, 4  ;;  %v5539_v7 = vrot.slane %v5538_v16, 1 }
 0xcc8   : > { %v5564_v3 = vadd.f32 %v5563_v45, %v5562_v5  ;;  %v10608_v18 = vadd.f32 %v5539_v7, %v5538_v16 }
 0xcca   : > { %v5565_v46 = vrot.slane %v5564_v3, 2 }
 0xccc   : > { %v5566_v30 = vadd.f32 %v5565_v46, %v5564_v3 }
 0xccf   : > { %v5482_v56 = vpop.xlane.xlu2 %5481  ;;  %v5479_v25 = vpop.xlane.xlu1 %5478 }
 0xcd0   : > { %v5513_v47 = vmul.f32 %v10572_v36, %v5482_v56  ;;  %v5512_v20 = vmul.f32 %v10572_v36, %v5479_v25  ;;  %v5546_v25 = vrot.slane %v5545_v32, 1 }
 0xcd2   : > { %v5529_v39 = vmul.f32 %v5513_v47, %v10074_v34  ;;  %v5528_v14 = vmul.f32 %v5512_v20, %v10077_v63  ;;  %v5552_v34 = vadd.f32 %v5551_v23, %v5550_v54  ;;  %v10613_v40 = vadd.f32 %v5546_v25, %v5545_v32 }
 0xcd4   : > { %v5569_v44 = vadd.f32 %v5529_v39, %v5528_v14  ;;  %v5553_v10 = vrot.slane %v5552_v34, 1 }
 0xcd6   : > { %v5570_v63 = vrot.slane %v5569_v44, 4  ;;  %v10615_v58 = vadd.f32 %v5553_v10, %v5552_v34 }
 0xcd8   : > { %v5571_v60 = vadd.f32 %v5570_v63, %v5569_v44  ;;  %v5592_v54 = vmul.f32 %v10615_v58, %v10615_v58 }
 0xcda   : > { %v10576_v27 = vpop.xlane.xlu0 %6051 }
 0xcdb   : > { %v6070_v41 = vmul.f32 %v10576_v27, %v10572_v36  ;;  %v5590_v27 = vmul.f32 %v10608_v18, %v10608_v18 }
 0xce5   : > { %v6055_v43 = vpop.xlane.xlu0 %6054 }
 0xce6   : > { %v6071_v48 = vmul.f32 %v6055_v43, %v10572_v36 }
 0xce7   : > { %v5488_v17 = vpop.xlane.xlu2 %5487  ;;  %v5485_v21 = vpop.xlane.xlu1 %5484 }
 0xce8   : > { %v5515_v8 = vmul.f32 %v10572_v36, %v5488_v17  ;;  %v5514_v35 = vmul.f32 %v10572_v36, %v5485_v21  ;;  %v5572_v17 = vrot.slane %v5571_v60, 2  ;;  %v6078_v21 = vmul.f32 %v6070_v41, %v10175_v13 }
 0xce9   : > { %v6079_v43 = vmul.f32 %v6071_v48, %v10184_v51  ;;  %v5567_v51 = vrot.slane %v5566_v30, 1 }
 0xcea   : > { %v5531_v38 = vmul.f32 %v5515_v8, %v10145_v11  ;;  %v5530_v2 = vmul.f32 %v5514_v35, %v10136_v50  ;;  %v6077_v11 = vmul.f32 %v6069_v24, %v10063_v49  ;;  %v5591_v8 = vmul.f32 %v10613_v40, %v10613_v40 }
 0xceb   : > { %v5573_v5 = vadd.f32 %v5572_v17, %v5571_v60  ;;  %v6096_v39 = vrot.slane %v6078_v21, 4  ;;  %v10633_v23 = vadd.f32 %v5567_v51, %v5566_v30 }
 0xcec   : > { %v5576_v28 = vadd.f32 %v5531_v38, %v5530_v2  ;;  %v6090_v49 = vrot.slane %v6077_v11, 4  ;;  %v5607_v16 = vsel %vm5606_vm13, %v5591_v8, %v5590_v27 }
 0xced   : > { %v6058_v4 = vpop.xlane.xlu0 %6057  ;;  %v5574_v45 = vrot.slane %v5573_v5, 1  ;;  %v6097_v44 = vadd.f32 %v6096_v39, %v6078_v21 }
 0xcee   : > { %v5577_v56 = vrot.slane %v5576_v28, 4  ;;  %v6072_v57 = vmul.f32 %v6058_v4, %v10572_v36  ;;  %v6091_v35 = vadd.f32 %v6090_v49, %v6077_v11  ;;  %v5594_v11 = vmul.f32 %v10633_v23, %v10633_v23 }
 0xcef   : > { %v6098_v10 = vrot.slane %v6097_v44, 2 }
 0xcf0   : > { %v5578_v61 = vadd.f32 %v5577_v56, %v5576_v28  ;;  %v6080_v47 = vmul.f32 %v6072_v57, %v10267_v53  ;;  %v10629_v53 = vadd.f32 %v5560_v62, %v5559_v1  ;;  %v6092_v2 = vrot.slane %v6091_v35, 2 }
 0xcf1   : > { %v6099_v27 = vadd.f32 %v6098_v10, %v6097_v44 }
 0xcf2   : > { %v5579_v12 = vrot.slane %v5578_v61, 2  ;;  %v6108_v4 = vrot.slane %v6080_v47, 4  ;;  %v5593_v29 = vmul.f32 %v10629_v53, %v10629_v53  ;;  %v6093_v7 = vadd.f32 %v6092_v2, %v6091_v35 }
 0xcf3   : > { %v6100_v51 = vrot.slane %v6099_v27, 1 }
 0xcf4   : > { %v5580_v31 = vadd.f32 %v5579_v12, %v5578_v61  ;;  %v6109_v24 = vadd.f32 %v6108_v4, %v6080_v47  ;;  %v6094_v49 = vrot.slane %v6093_v7, 1 }
 0xcf5   : > { %v6061_v50 = vpop.xlane.xlu0 %6060 }
 0xcf6   : > { %v6073_v33 = vmul.f32 %v6061_v50, %v10572_v36  ;;  %v10643_v50 = vadd.f32 %v5574_v45, %v5573_v5  ;;  %v6110_v48 = vrot.slane %v6109_v24, 2 }
 0xcf8   : > { %v6081_v20 = vmul.f32 %v6073_v33, %v10260_v0  ;;  %v6102_v0 = vrot.slane %v6079_v43, 4  ;;  %v5595_v62 = vmul.f32 %v10643_v50, %v10643_v50 }
 0xcfa   : > { %v6114_v38 = vrot.slane %v6081_v20, 4  ;;  %v6103_v28 = vadd.f32 %v6102_v0, %v6079_v43 }
 0xcfc   : > { %v6115_v34 = vadd.f32 %v6114_v38, %v6081_v20  ;;  %v6104_v46 = vrot.slane %v6103_v28, 2  ;;  %v6111_v20 = vadd.f32 %v6110_v48, %v6109_v24 }
 0xcfe   : > { %v6116_v61 = vrot.slane %v6115_v34, 2  ;;  %v6112_v4 = vrot.slane %v6111_v20, 1 }
 0xd05   : > { %v5494_v9 = vpop.xlane.xlu2 %5493  ;;  %v5491_v52 = vpop.xlane.xlu1 %5490 }
 0xd06   : > { %v5517_v13 = vmul.f32 %v10572_v36, %v5494_v9  ;;  %v5516_v55 = vmul.f32 %v10572_v36, %v5491_v52  ;;  %v6117_v9 = vadd.f32 %v6116_v61, %v6115_v34 }
 0xd08   : > { %v5533_v14 = vmul.f32 %v5517_v13, %v10291_v22  ;;  %v5532_v59 = vmul.f32 %v5516_v55, %v10282_v26  ;;  %v5609_v22 = vsel %vm5608_vm14, %v5592_v54, %v5607_v16  ;;  %v5581_v26 = vrot.slane %v5580_v31, 1 }
 0xd09   : > { %v5611_v33 = vsel %vm5610_vm15, %v5593_v29, %v5609_v22  ;;  %v10666_v16 = vadd.f32 %v6100_v51, %v6099_v27 }
 0xd0a   : > { %v5583_v19 = vadd.f32 %v5533_v14, %v5532_v59  ;;  %v10647_v57 = vadd.f32 %v5581_v26, %v5580_v31  ;;  %v5613_v43 = vsel %vm5612_vm0, %v5594_v11, %v5611_v33  ;;  %v10662_v31 = vadd.f32 %v6094_v49, %v6093_v7 }
 0xd0b   : > { %v5615_v5 = vsel %vm5614_vm1, %v5595_v62, %v5613_v43 }
 0xd0c   : > { %v5584_v32 = vrot.slane %v5583_v19, 4  ;;  %v5596_v8 = vmul.f32 %v10647_v57, %v10647_v57  ;;  %v6133_v26 = vmul.f32 %v10662_v31, %v10662_v31 }
 0xd0d   : > { %v6046_v3 = vpop.xlane.xlu2 %6045  ;;  %v6064_v63 = vpop.xlane.xlu1 %6063 }
 0xd0e   : > { %v5585_v37 = vadd.f32 %v5584_v32, %v5583_v19  ;;  %v6068_v56 = vmul.f32 %v6046_v3, %v10572_v36  ;;  %v6074_v25 = vmul.f32 %v6064_v63, %v10572_v36  ;;  %v5617_v2 = vsel %vm5616_vm2, %v5596_v8, %v5615_v5 }
 0xd0f   : > { %v10672_v32 = vadd.f32 %v6112_v4, %v6111_v20  ;;  %v6134_v63 = vmul.f32 %v10666_v16, %v10666_v16 }
 0xd10   : > { %v5586_v60 = vrot.slane %v5585_v37, 2  ;;  %v6076_v41 = vmul.f32 %v6068_v56, %v10060_v15  ;;  %v6082_v1 = vmul.f32 %v6074_v25, %v10312_v6  ;;  %v6105_v15 = vadd.f32 %v6104_v46, %v6103_v28 }
 0xd11   : > { %v6136_v25 = vmul.f32 %v10672_v32, %v10672_v32 }
 0xd12   : > { %v5587_v30 = vadd.f32 %v5586_v60, %v5585_v37  ;;  %v6084_v17 = vrot.slane %v6076_v41, 4  ;;  %v6120_v21 = vrot.slane %v6082_v1, 4  ;;  %v6106_v39 = vrot.slane %v6105_v15, 1 }
 0xd14   : > { %v6085_v12 = vadd.f32 %v6084_v17, %v6076_v41  ;;  %v6121_v6 = vadd.f32 %v6120_v21, %v6082_v1  ;;  %v5588_v47 = vrot.slane %v5587_v30, 1  ;;  %v10668_v29 = vadd.f32 %v6106_v39, %v6105_v15 }
 0xd15   : > { %v6067_v52 = vpop.xlane.xlu2 %6066 }
 0xd16   : > { %v6086_v35 = vrot.slane %v6085_v12, 2  ;;  %v6122_v13 = vrot.slane %v6121_v6, 2  ;;  %v6075_v55 = vmul.f32 %v6067_v52, %v10572_v36  ;;  %v10656_v54 = vadd.f32 %v5588_v47, %v5587_v30 }
 0xd17   : > { %v6118_v36 = vrot.slane %v6117_v9, 1  ;;  %v6135_v7 = vmul.f32 %v10668_v29, %v10668_v29 }
 0xd18   : > { %v6087_v0 = vadd.f32 %v6086_v35, %v6085_v12  ;;  %v6083_v14 = vmul.f32 %v6075_v55, %v10309_v42  ;;  %v5597_v59 = vmul.f32 %v10656_v54, %v10656_v54  ;;  %v6123_v38 = vadd.f32 %v6122_v13, %v6121_v6 }
 0xd19   : > { %v10676_v24 = vadd.f32 %v6118_v36, %v6117_v9 }
 0xd1a   : > { %v6088_v19 = vrot.slane %v6087_v0, 1  ;;  %v6126_v45 = vrot.slane %v6083_v14, 4  ;;  %v5619_v44 = vsel %vm5618_vm3, %v5597_v59, %v5617_v2  ;;  %v6124_v22 = vrot.slane %v6123_v38, 1 }
 0xd1b   : > { %5621 = vadd.xlane.f32.xlu0 %v5619_v44  ;;  %v6137_v46 = vmul.f32 %v10676_v24, %v10676_v24 }
 0xd1c   : > { %v10670_v42 = vadd.f32 %v6088_v19, %v6087_v0  ;;  %v6127_v28 = vadd.f32 %v6126_v45, %v6083_v14  ;;  %v10687_v11 = vadd.f32 %v6124_v22, %v6123_v38 }
 0xd1e   : > { %v6132_v34 = vmul.f32 %v10670_v42, %v10670_v42  ;;  %v6128_v3 = vrot.slane %v6127_v28, 2  ;;  %v6138_v33 = vmul.f32 %v10687_v11, %v10687_v11 }
 0xd20   : > { %v6148_v37 = vsel %vm5606_vm13, %v6133_v26, %v6132_v34  ;;  %v6129_v56 = vadd.f32 %v6128_v3, %v6127_v28 }
 0xd21   : > { %v6149_v10 = vsel %vm5608_vm14, %v6134_v63, %v6148_v37 }
 0xd22   : > { %v6130_v60 = vrot.slane %v6129_v56, 1  ;;  %v6150_v41 = vsel %vm5610_vm15, %v6135_v7, %v6149_v10 }
 0xd23   : > { %v6151_v1 = vsel %vm5612_vm0, %v6136_v25, %v6150_v41 }
 0xd24   : > { %v10694_v48 = vadd.f32 %v6130_v60, %v6129_v56  ;;  %v6152_v61 = vsel %vm5614_vm1, %v6137_v46, %v6151_v1 }
 0xd25   : > { %v6153_v30 = vsel %vm5616_vm2, %v6138_v33, %v6152_v61 }
 0xd26   : > { %v6139_v49 = vmul.f32 %v10694_v48, %v10694_v48 }
 0xd28   : > { %v6154_v17 = vsel %vm5618_vm3, %v6139_v49, %v6153_v30 }
 0xd29   : > { %6156 = vadd.xlane.f32.xlu1 %v6154_v17 }
 0xd8e   : > { %v5622_v21 = vpop.xlane.xlu0 %5621 }
 0xd8f   : > { %v5623_v27 = vadd.f32 1e-12, %v5622_v21 }
 0xd91   : > { %7735 = vrsqrt.f32 %v5623_v27  ;;  %vm5630_vm5 = vweird.f32 %v5623_v27 }
 0xd97   : > { %v7736_v62 = vpop.eup %7735 }
 0xd98   : > { %v5625_v43 = vmul.f32 %v7736_v62, %v5623_v27  ;;  %vm5631_vm4 = vweird.f32 %v7736_v62 }
 0xd99   : > { %vm5632_vm6 = vmor %vm5630_vm5, %vm5631_vm4 }
 0xd9a   : > { %v5626_v15 = vmul.f32 %v7736_v62, %v5625_v43 }
 0xd9c   : > { %v5627_v12 = vmul.f32 0.5, %v5626_v15  ;;  %v6157_v6 = vpop.xlane.xlu1 %6156 }
 0xd9d   : > { %v6158_v47 = vadd.f32 1e-12, %v6157_v6 }
 0xd9e   : > { %v5628_v20 = vsub.f32 1.5, %v5627_v12 }
 0xd9f   : > { %7737 = vrsqrt.f32 %v6158_v47  ;;  %vm6165_vm8 = vweird.f32 %v6158_v47 }
 0xda0   : > { %v5629_v9 = vmul.f32 %v7736_v62, %v5628_v20 }
 0xda2   : > { %v5633_v52 = vsel %vm5632_vm6, %v7736_v62, %v5629_v9 }
 0xda3   : > { %v5635_v8 = vrot.slane %v5633_v52, 1  ;;  %v5636_v35 = vrot.slane %v5633_v52, 2  ;;  %v5637_v13 = vrot.slane %v5633_v52, 3  ;;  %v5638_v55 = vrot.slane %v5633_v52, 4 }
 0xda4   : > { %v5639_v51 = vrot.slane %v5633_v52, 5  ;;  %v5640_v5 = vrot.slane %v5633_v52, 6  ;;  %v5641_v14 = vrot.slane %v5633_v52, 7  ;;  %v5650_v36 = vmul.f32 %v5633_v52, %v10608_v18 }
 0xda5   : > { %v7738_v39 = vpop.eup %7737  ;;  %v5651_v0 = vmul.f32 %v5635_v8, %v10613_v40  ;;  %v5652_v59 = vmul.f32 %v5636_v35, %v10615_v58  ;;  %v5653_v4 = vmul.f32 %v5637_v13, %v10629_v53  ;;  %v5654_v2 = vmul.f32 %v5638_v55, %v10633_v23 }
 0xda6   : > { %v6160_v38 = vmul.f32 %v7738_v39, %v6158_v47  ;;  %v5655_v19 = vmul.f32 %v5639_v51, %v10643_v50  ;;  %v5656_v22 = vmul.f32 %v5640_v5, %v10647_v57  ;;  %v5657_v40 = vmul.f32 %v5641_v14, %v10656_v54 }
 0xda7   : > { %v5666_v45 = vrot.slane %v5651_v0, 7  ;;  %v5668_v44 = vrot.slane %v5652_v59, 6  ;;  %v5670_v53 = vrot.slane %v5653_v4, 5  ;;  %v5672_v26 = vrot.slane %v5654_v2, 4 }
 0xda8   : > { %v6161_v28 = vmul.f32 %v7738_v39, %v6160_v38  ;;  %v5674_v34 = vrot.slane %v5655_v19, 3  ;;  %vm6166_vm7 = vweird.f32 %v7738_v39  ;;  %v5676_v3 = vrot.slane %v5656_v22, 2 }
 0xda9   : > { %v5667_v58 = vsel %vm5606_vm13, %v5666_v45, %v5650_v36  ;;  %v5678_v7 = vrot.slane %v5657_v40, 1  ;;  %vm6167_vm9 = vmor %vm6165_vm8, %vm6166_vm7 }
 0xdaa   : > { %v6162_v23 = vmul.f32 0.5, %v6161_v28  ;;  %v5669_v18 = vsel %vm5608_vm14, %v5668_v44, %v5667_v58 }
 0xdab   : > { %v5671_v50 = vsel %vm5610_vm15, %v5670_v53, %v5669_v18 }
 0xdac   : > { %v6163_v57 = vsub.f32 1.5, %v6162_v23  ;;  %v5673_v54 = vsel %vm5612_vm0, %v5672_v26, %v5671_v50 }
 0xdad   : > { %v5675_v63 = vsel %vm5614_vm1, %v5674_v34, %v5673_v54 }
 0xdae   : > { %v6164_v37 = vmul.f32 %v7738_v39, %v6163_v57  ;;  %v5677_v56 = vsel %vm5616_vm2, %v5676_v3, %v5675_v63 }
 0xdaf   : > { %v5679_v25 = vsel %vm5618_vm3, %v5678_v7, %v5677_v56 }
 0xdb0   : > { %v6168_v10 = vsel %vm6167_vm9, %v7738_v39, %v6164_v37  ;;  %5681 = vst [vmem:[%s721_s6] sm:$0xff] %v5679_v25 }
 0xdb1   : > { %v6170_v46 = vrot.slane %v6168_v10, 1  ;;  %v6171_v60 = vrot.slane %v6168_v10, 2  ;;  %v6172_v41 = vrot.slane %v6168_v10, 3 }
 0xdb2   : > { %8087 = shalt.err (!%p8084_p10)
}
 0xdb3   : > { %7210 = dma.vmem_to_hbm [thread:$0]  (%p8410_p4), %s6236_s11, 128, %s6238_s7, %s6218_s19   ;;  %v6173_v1 = vrot.slane %v6168_v10, 4  ;;  %v6174_v61 = vrot.slane %v6168_v10, 5  ;;  %v6175_v33 = vrot.slane %v6168_v10, 6  ;;  %v6186_v49 = vmul.f32 %v6170_v46, %v10662_v31 }
 0xdb4   : > { %v6176_v30 = vrot.slane %v6168_v10, 7  ;;  %v6187_v17 = vmul.f32 %v6171_v60, %v10666_v16  ;;  %v6188_v21 = vmul.f32 %v6172_v41, %v10668_v29  ;;  %v6185_v62 = vmul.f32 %v6168_v10, %v10670_v42  ;;  %s10894_s6 = sld [smem:[#allocation41_spill]]  ;;  %s728_s7 = scalar_lea.vmem [#allocation18], %s6468_s4 }
 0xdb5   : > { %v6189_v27 = vmul.f32 %v6173_v1, %v10672_v32  ;;  %v6190_v43 = vmul.f32 %v6174_v61, %v10676_v24  ;;  %v6201_v15 = vrot.slane %v6186_v49, 7  ;;  %v6191_v6 = vmul.f32 %v6175_v33, %v10687_v11  ;;  %s6249_s19 = sshll.u32 %s728_s7, 4  ;;  %s6250_s19 = int_to_ptr.vmem [resolvable:$true] %s6249_s19 }
 0xdb6   : > { %v6203_v12 = vrot.slane %v6187_v17, 6  ;;  %v6192_v31 = vmul.f32 %v6176_v30, %v10694_v48  ;;  %v6205_v47 = vrot.slane %v6188_v21, 5 }
 0xdb7   : > { %v6202_v16 = vsel %vm5606_vm13, %v6201_v15, %v6185_v62  ;;  %v6207_v32 = vrot.slane %v6189_v27, 4  ;;  %v6209_v24 = vrot.slane %v6190_v43, 3  ;;  %v6211_v20 = vrot.slane %v6191_v6, 2 }
 0xdb8   : > { %v6204_v29 = vsel %vm5608_vm14, %v6203_v12, %v6202_v16  ;;  %v6213_v9 = vrot.slane %v6192_v31, 1 }
 0xdb9   : > { %v6206_v42 = vsel %vm5610_vm15, %v6205_v47, %v6204_v29 }
 0xdba   : > { %s6247_s11 = scalar_lea.hbm %s10894_s6, %s8471_s3  ;;  %v6208_v11 = vsel %vm5612_vm0, %v6207_v32, %v6206_v42  ;;  %s6223_s3 = scalar_lea.sflag [#allocation19], %s8444_s20 }
 0xdbb   : > { %s6251_s8 = sshll.u32 %s6247_s11, 4  ;;  %v6210_v48 = vsel %vm5614_vm1, %v6209_v24, %v6208_v11  ;;  %s8108_s30 = scalar_lea.hbm %s10894_s6, 16  ;;  %s6252_s8 = int_to_ptr.hbm [resolvable:$true] %s6251_s8 }
 0xdbc   : > { %v6212_v52 = vsel %vm5616_vm2, %v6211_v20, %v6210_v48  ;;  %s8102_s5 = sshra.s32 %s6252_s8, 4  ;;  %s8103_s5 = int_to_ptr.hbm [resolvable:$true] %s8102_s5 }
 0xdbd   : > { %v6214_v8 = vsel %vm5618_vm3, %v6213_v9, %v6212_v52  ;;  %s8104_s4 = scalar_lea.hbm %s8103_s5, 8  ;;  %p8109_p2 = scmp.lt.s32.totalorder %s8103_s5, %s10894_s6 }
 0xdbe   : > { %6216 = vst [vmem:[%s728_s7] sm:$0xff] %v6214_v8  ;;  %p8105_p13 = scmp.ne.s32.totalorder %s8103_s5, %s8104_s4  ;;  %p8110_p1 = scmp.lt.s32.totalorder %s8108_s30, %s8104_s4 }
 0xdc0   : > { %p8106_p11 = pnand %p8105_p13, %p8410_p4  ;;  %p8111_p3 = por %p8110_p1, %p8109_p2 }
 0xdc2   : > { %p8107_p0 = pneg %p8106_p11 }
 0xdc4   : > { %p8112_p5 = pnand %p8111_p3, %p8107_p0 }
 0xdc6   : > { %8115 = shalt.err (!%p8112_p5)
}
 0xdc7   : > { %7211 = dma.vmem_to_hbm [thread:$0]  (%p8410_p4), %s6250_s19, 128, %s6252_s8, %s6223_s3  }
 0xdc8 PF: > { %s6263_s20 = sand.u32 1, %s8162_s24   ;;  %p10895_p12 = scmp.ge.s32.totalorder %s8174_s27, 2 }
 0xdc9   : > { %s6264_s21 = scalar_lea.sflag [#allocation4], %s6263_s20 }
 0xdca   : > { %p7244_p7 = pnand %p10895_p12, %p8414_p6 }
 0xdcc   : > { %p7245_p8 = pneg %p7244_p7 }
 0xdce   : > { %8153 = dma.done.wait (%p7245_p8), %s6264_s21, 128  }
 0xdcf   : > { %8155 = vsyncadd (%p7245_p8), %s6264_s21, 4294967168  ;;  %s6274_s23 = scalar_lea.sflag [#allocation19], %s6263_s20 }
 0xdd0   : > { %8157 = dma.done.wait (%p7245_p8), %s6274_s23, 128  }
 0xdd1   : > { %8159 = vsyncadd (%p7245_p8), %s6274_s23, 4294967168  ;;  %p38_p4 = scmp.ge.s32.totalorder %s8384_s17, 4   ;;  %s10896_s24 = smov %s8166_s25 }
 0xdd2   : > { %s10897_s25 = smov %s8170_s26  ;;  %s10898_s26 = smov %s8395_s1 }
 0xdd3   : > { %s10899_s27 = smov %s8384_s17  ;;  %40 = sbr.rel (!%p38_p4) target bundleno = 25 (0x19), region = 181 }
 0xdd8   :  { %6280 = vsyncpa [#allocation3], 1 }
 0xdd9   :  { %6282 = vsyncpa [#allocation3 + $0x1], 1 }
 0xdda   :  { %6283 = vsyncpa [#allocation6], 1 }
 0xddb   :  { %6284 = vsyncpa [#allocation9], 1 }
 0xddc   :  { %6285 = vsyncpa [#allocation12], 1 }
 0xddd   :  { %6286 = vsyncpa [#allocation15], 1 }
 0xdde   :  { %6287 = vsyncpa [#allocation4], 1 }
 0xddf   :  { %6289 = vsyncpa [#allocation4 + $0x1], 1 }
 0xde0   :  { %6290 = vsyncpa [#allocation19], 1 }
 0xde1   :  { %6292 = vsyncpa [#allocation19 + $0x1], 1 }

</bundles_post_ra>
